<compile_context>
chip_gen: v6e
topology: v6e:2x2x1
jax: 0.10.0
libtpu: 0.0.40
codegen_flags: <defaults>
</compile_context>

<pallas_src>
import functools

import jax
import jax.numpy as jnp
from jax.experimental import pallas as pl
from jax.experimental.pallas import tpu as pltpu


# ---------------------------------------------------------------------------
# Pallas kernels
# ---------------------------------------------------------------------------

def _matmul_kernel(x_ref, w_ref, b_ref, o_ref, acc_ref, *, activation,
                   compute_dtype):
    """o = act(x @ w + b); grid = (M tiles, N tiles, K tiles), K innermost."""
    k = pl.program_id(2)

    @pl.when(k == 0)
    def _():
        acc_ref[...] = jnp.zeros_like(acc_ref)

    # Cast x to the weight dtype so a bf16 weight gets a native bf16 MXU pass
    # (f32 accumulation via preferred_element_type).  No-op for f32 weights.
    acc_ref[...] += jnp.dot(x_ref[...].astype(compute_dtype), w_ref[...],
                            preferred_element_type=jnp.float32)

    @pl.when(k == pl.num_programs(2) - 1)
    def _():
        # Bias block index is constant across k, so the pipeline does not
        # re-fetch it; it is only consumed here in the epilogue.
        y = acc_ref[...] + b_ref[...]
        if activation == "relu":
            y = jnp.maximum(y, 0.0)
        elif activation == "sigmoid":
            y = jax.nn.sigmoid(y)
        o_ref[...] = y.astype(o_ref.dtype)


def pallas_linear(x, w, b, activation="none", *, tm=None, tn=None, tk=None,
                  vmem_limit_bytes=None):
    """y = act(x @ w + b).  x: (M, K) f32, w: (K, N) f32/bf16, b: (N,) f32."""
    M, K = x.shape
    Kw, N = w.shape
    assert K == Kw, (K, Kw)

    if tm is None or tm >= M or M % tm != 0:
        tm = M
    if tn is None or tn >= N or N % tn != 0:
        tn = N
    if tk is None or tk >= K:
        tk = K
    elif K % tk != 0:
        # Explicit failure instead of a silent tk=K fallback that could blow
        # the scoped VMEM limit with a huge resident weight tile.
        raise ValueError(f"tk={tk} must divide K={K}")

    grid = (M // tm, N // tn, K // tk)
    flops = 2 * M * K * N
    bytes_accessed = (x.size * x.dtype.itemsize + w.size * w.dtype.itemsize
                      + b.size * 4 + M * N * 4)
    kernel = functools.partial(_matmul_kernel, activation=activation,
                               compute_dtype=w.dtype)
    return pl.pallas_call(
        kernel,
        out_shape=jax.ShapeDtypeStruct((M, N), jnp.float32),
        grid=grid,
        in_specs=[
            pl.BlockSpec((tm, tk), lambda i, j, k: (i, k)),
            pl.BlockSpec((tk, tn), lambda i, j, k: (k, j)),
            pl.BlockSpec((1, tn), lambda i, j, k: (0, j)),
        ],
        out_specs=pl.BlockSpec((tm, tn), lambda i, j, k: (i, j)),
        scratch_shapes=[pltpu.VMEM((tm, tn), jnp.float32)],
        compiler_params=pltpu.CompilerParams(
            dimension_semantics=("parallel", "parallel", "arbitrary"),
            vmem_limit_bytes=vmem_limit_bytes),
        cost_estimate=pl.CostEstimate(flops=flops, transcendentals=0,
                                      bytes_accessed=bytes_accessed),
    )(x, w, b.reshape(1, N))


def _vae_head_kernel(h_ref, eps_ref, w_mv_ref, b_mv_ref, w_dec_ref, b_dec_ref,
                     w_fc3_ref, b_fc3_ref, w_nf2_ref, b_nf2_ref,
                     mu_ref, logvar_ref, adj_ref, nf_ref):
    """Fused: fc_mu + fc_logvar + reparameterize + fc2/nf1 + fc3/nf2."""
    latent = mu_ref.shape[1]
    h = h_ref[...]                                            # (B, 256)

    # fc_mu / fc_logvar fused into one (256 -> 2*latent) matmul.
    mv = jnp.dot(h, w_mv_ref[...], preferred_element_type=jnp.float32)
    mv = mv + b_mv_ref[...]
    mu = mv[:, :latent]
    logvar = mv[:, latent:]
    mu_ref[...] = mu
    logvar_ref[...] = logvar

    # reparameterize: z = mu + eps * exp(0.5 * logvar)
    z = mu + eps_ref[...] * jnp.exp(0.5 * logvar)

    # fc2 / nf1 fused into one (latent -> 256 + 64) matmul + ReLU.
    dh = jnp.dot(z, w_dec_ref[...], preferred_element_type=jnp.float32)
    dh = jnp.maximum(dh + b_dec_ref[...], 0.0)
    d_width = w_fc3_ref.shape[0]
    d = dh[:, :d_width]                                        # (B, 256)
    g = dh[:, d_width:]                                        # (B, 64)

    # fc3 + sigmoid (adjacency) and nf2 (node features).
    adj = jnp.dot(d, w_fc3_ref[...], preferred_element_type=jnp.float32)
    adj_ref[...] = jax.nn.sigmoid(adj + b_fc3_ref[...])
    nf = jnp.dot(g, w_nf2_ref[...], preferred_element_type=jnp.float32)
    nf_ref[...] = nf + b_nf2_ref[...]


def pallas_vae_head(h, eps, p):
    """Single launch for everything after fc1."""
    B = h.shape[0]
    latent = eps.shape[1]
    adj_dim = p["w_fc3"].shape[1]
    nf_dim = p["w_nf2"].shape[1]
    return pl.pallas_call(
        _vae_head_kernel,
        out_shape=(jax.ShapeDtypeStruct((B, latent), jnp.float32),
                   jax.ShapeDtypeStruct((B, latent), jnp.float32),
                   jax.ShapeDtypeStruct((B, adj_dim), jnp.float32),
                   jax.ShapeDtypeStruct((B, nf_dim), jnp.float32)),
    )(h, eps, p["w_mulv"], p["b_mulv"], p["w_dec"], p["b_dec"],
      p["w_fc3"], p["b_fc3"], p["w_nf2"], p["b_nf2"])


# ---------------------------------------------------------------------------
# Glue: im2col patch extraction (pure slicing/reshape, no FLOPs)
# ---------------------------------------------------------------------------

def _im2col_3x3(x_nhwc):
    """(B, H, W, C) -> (B*H*W, 9*C), patch order (kh, kw)-major, cin-minor.

    Matches conv weight laid out as w.transpose(2, 3, 1, 0).reshape(9*Cin, Cout)
    from PyTorch's (Cout, Cin, kh, kw), i.e. a same-padded 3x3 conv.
    """
    B, H, W, C = x_nhwc.shape
    xp = jnp.pad(x_nhwc, ((0, 0), (1, 1), (1, 1), (0, 0)))
    cols = [xp[:, dy:dy + H, dx:dx + W, :]
            for dy in range(3) for dx in range(3)]
    patches = jnp.stack(cols, axis=3)                  # (B, H, W, 9, C)
    return patches.reshape(B * H * W, 9 * C)


def _conv_tm(M):
    """M tile for the conv matmuls (enables 2-TC sharding on v7x)."""
    return 256 if (M % 256 == 0 and M > 256) else None


# ---------------------------------------------------------------------------
# Parameters: PyTorch-layout init + one-time kernel-ready preparation
# ---------------------------------------------------------------------------

def init_params(key, max_num_nodes=16, node_feature_dim=7, latent_dim=16):
    """Deterministic synthetic init in native PyTorch layouts."""
    N = max_num_nodes

    def dense(k, shape, scale=0.02):
        return scale * jax.random.normal(k, shape, dtype=jnp.float32)

    ks = jax.random.split(key, 18)
    return {
        # conv weights: (Cout, Cin, kh, kw); linear weights: (out, in)
        "conv1_w": dense(ks[0], (32, 1, 3, 3)),
        "conv1_b": dense(ks[1], (32,)),
        "conv2_w": dense(ks[2], (64, 32, 3, 3)),
        "conv2_b": dense(ks[3], (64,)),
        "fc1_w": dense(ks[4], (256, 64 * N * N)),
        "fc1_b": dense(ks[5], (256,)),
        "fc_mu_w": dense(ks[6], (latent_dim, 256)),
        "fc_mu_b": dense(ks[7], (latent_dim,)),
        "fc_logvar_w": dense(ks[8], (latent_dim, 256)),
        "fc_logvar_b": dense(ks[9], (latent_dim,)),
        "fc2_w": dense(ks[10], (256, latent_dim)),
        "fc2_b": dense(ks[11], (256,)),
        "fc3_w": dense(ks[12], (N * N, 256)),
        "fc3_b": dense(ks[13], (N * N,)),
        "nf1_w": dense(ks[14], (64, latent_dim)),
        "nf1_b": dense(ks[15], (64,)),
        "nf2_w": dense(ks[16], (N * node_feature_dim, 64)),
        "nf2_b": dense(ks[17], (N * node_feature_dim,)),
    }


def prepare_params(params, max_num_nodes):
    """One-time host-side conversion of PyTorch-layout params into the
    kernel-ready (K, N) / fused / bf16 layouts used by the forward pass."""
    N = max_num_nodes
    p = {}
    # 3x3 convs: (Cout, Cin, kh, kw) -> (kh*kw*Cin, Cout) matching im2col.
    p["conv1_w"] = params["conv1_w"].transpose(2, 3, 1, 0).reshape(9 * 1, 32)
    p["conv1_b"] = params["conv1_b"]
    p["conv2_w"] = params["conv2_w"].transpose(2, 3, 1, 0).reshape(9 * 32, 64)
    p["conv2_b"] = params["conv2_b"]
    # fc1: torch columns are in NCHW (C,H,W) flatten order; permute rows to
    # NHWC (H,W,C) so the conv2 output feeds it directly, and store bf16.
    w = params["fc1_w"].reshape(256, 64, N, N).transpose(2, 3, 1, 0)
    p["fc1_w"] = w.reshape(N * N * 64, 256).astype(jnp.bfloat16)
    p["fc1_b"] = params["fc1_b"]
    # fc_mu + fc_logvar fused along N.
    p["w_mulv"] = jnp.concatenate(
        [params["fc_mu_w"].T, params["fc_logvar_w"].T], axis=1)
    p["b_mulv"] = jnp.concatenate(
        [params["fc_mu_b"], params["fc_logvar_b"]]).reshape(1, -1)
    # fc2 + nf1 fused along N.
    p["w_dec"] = jnp.concatenate(
        [params["fc2_w"].T, params["nf1_w"].T], axis=1)
    p["b_dec"] = jnp.concatenate(
        [params["fc2_b"], params["nf1_b"]]).reshape(1, -1)
    p["w_fc3"] = params["fc3_w"].T
    p["b_fc3"] = params["fc3_b"].reshape(1, -1)
    p["w_nf2"] = params["nf2_w"].T
    p["b_nf2"] = params["nf2_b"].reshape(1, -1)
    return p


# ---------------------------------------------------------------------------
# Forward pass (mirrors GraphVAE.forward)
# ---------------------------------------------------------------------------

def graph_vae_forward(params, adj, eps, *, max_num_nodes, node_feature_dim,
                      latent_dim):
    B, N, _ = adj.shape
    assert N == max_num_nodes
    assert eps.shape == (B, latent_dim)

    # encode -----------------------------------------------------------------
    x = adj.astype(jnp.float32)[..., None]                   # (B, N, N, 1)

    h = pallas_linear(_im2col_3x3(x), params["conv1_w"], params["conv1_b"],
                      "relu", tm=_conv_tm(B * N * N))
    h = h.reshape(B, N, N, 32)

    h = pallas_linear(_im2col_3x3(h), params["conv2_w"], params["conv2_b"],
                      "relu", tm=_conv_tm(B * N * N))

    # NHWC flatten; fc1_w rows were pre-permuted to this order at prepare
    # time, so no activation transpose is needed here.
    h = h.reshape(B, N * N * 64)
    h = pallas_linear(h, params["fc1_w"], params["fc1_b"], "relu",
                      tk=8192, vmem_limit_bytes=48 * 1024 * 1024)

    # fused fc_mu / fc_logvar / reparameterize / decoder ----------------------
    # TODO(synk): torch.randn_like is stochastic; eps is a deterministic
    # jax.random.normal sample supplied by the caller.
    mu, logvar, adj_flat, nf_flat = pallas_vae_head(h, eps, params)

    adj_recon = adj_flat.reshape(B, N, N)
    node_features = nf_flat.reshape(B, N, node_feature_dim)
    return adj_recon, node_features, mu, logvar


# TODO(synk): GraphVAE.sample() (dense_to_sparse / Data / to_networkx) is
# host-side graph construction with no Pallas/tensor equivalent; not implemented.


if __name__ == "__main__":
    max_num_nodes, node_feature_dim, latent_dim = 16, 7, 16
    B = 2

    key = jax.random.PRNGKey(0)
    k_param, k_adj, k_eps = jax.random.split(key, 3)

    torch_layout_params = init_params(k_param, max_num_nodes,
                                      node_feature_dim, latent_dim)
    params = prepare_params(torch_layout_params, max_num_nodes)

    # symmetric binary adjacency matrices
    a = jax.random.uniform(k_adj, (B, max_num_nodes, max_num_nodes))
    adj = ((a + jnp.swapaxes(a, 1, 2)) * 0.5 > 0.5).astype(jnp.float32)
    eps = jax.random.normal(k_eps, (B, latent_dim), dtype=jnp.float32)

    fwd = jax.jit(functools.partial(
        graph_vae_forward, max_num_nodes=max_num_nodes,
        node_feature_dim=node_feature_dim, latent_dim=latent_dim))

    adj_recon, node_features, mu, logvar = fwd(params, adj, eps)
    jax.block_until_ready((adj_recon, node_features, mu, logvar))

    assert adj_recon.shape == (B, max_num_nodes, max_num_nodes)
    assert node_features.shape == (B, max_num_nodes, node_feature_dim)
    assert mu.shape == (B, latent_dim) and logvar.shape == (B, latent_dim)
    assert adj_recon.dtype == jnp.float32
    assert bool(jnp.all(jnp.isfinite(adj_recon)))
    assert bool(jnp.all((adj_recon >= 0.0) & (adj_recon <= 1.0)))

    print("KERNEL_OK")
</pallas_src>

<mosaic_0001>
module attributes {stable_mosaic.version = 11 : i64} {
  func.func @_matmul_kernel(%arg0: i32, %arg1: i32, %arg2: i32, %arg3: memref<256x9xf32, #tpu.memory_space<vmem>>, %arg4: memref<9x32xf32, #tpu.memory_space<vmem>>, %arg5: memref<1x32xf32, #tpu.memory_space<vmem>>, %arg6: memref<256x32xf32, #tpu.memory_space<vmem>>, %arg7: memref<256x32xf32, #tpu.memory_space<vmem>>) attributes {dimension_semantics = [#tpu.dimension_semantics<parallel>, #tpu.dimension_semantics<parallel>, #tpu.dimension_semantics<arbitrary>], iteration_bounds = array<i64: 2, 1, 1>, scalar_prefetch = 0 : i64, scratch_operands = 1 : i64, tpu.core_type = #tpu.core_type<tc>, window_params = [{transform_indices = @transform_0, window_bounds = array<i64: 256, 9>}, {transform_indices = @transform_1, window_bounds = array<i64: 9, 32>}, {transform_indices = @transform_2, window_bounds = array<i64: 1, 32>}, {transform_indices = @transform_3, window_bounds = array<i64: 256, 32>}]} {
    %c0_i32 = arith.constant 0 : i32
    %0 = arith.cmpi eq, %arg2, %c0_i32 : i32
    %1 = arith.extui %0 : i1 to i32
    %c0_i32_0 = arith.constant 0 : i32
    %2 = arith.cmpi ne, %1, %c0_i32_0 : i32
    scf.if %2 {
      %cst_10 = arith.constant 0.000000e+00 : f32
      %12 = vector.broadcast %cst_10 : f32 to vector<256x32xf32>
      %c0_11 = arith.constant 0 : index
      %c0_12 = arith.constant 0 : index
      %13 = vector.load %arg7[%c0_11, %c0_12] : memref<256x32xf32, #tpu.memory_space<vmem>>, vector<256x32xf32>
      tpu.vector_store %arg7[%c0_11, %c0_12], %12 {strides = array<i32>} : memref<256x32xf32, #tpu.memory_space<vmem>>, vector<256x32xf32>,
    } else {
    }
    %c0 = arith.constant 0 : index
    %c0_1 = arith.constant 0 : index
    %3 = vector.load %arg7[%c0, %c0_1] : memref<256x32xf32, #tpu.memory_space<vmem>>, vector<256x32xf32>
    %c0_2 = arith.constant 0 : index
    %c0_3 = arith.constant 0 : index
    %4 = vector.load %arg3[%c0_2, %c0_3] : memref<256x9xf32, #tpu.memory_space<vmem>>, vector<256x9xf32>
    %c0_4 = arith.constant 0 : index
    %c0_5 = arith.constant 0 : index
    %5 = vector.load %arg4[%c0_4, %c0_5] : memref<9x32xf32, #tpu.memory_space<vmem>>, vector<9x32xf32>
    %cst = arith.constant dense<0.000000e+00> : vector<256x32xf32>
    %6 = tpu.matmul %4, %5, %cst {dimension_numbers = #tpu.dot_dimension_numbers<[1], [0], [0], [1], [0, 0, 1, 1], [], []>} : vector<256x9xf32>, vector<9x32xf32>, vector<256x32xf32> -> vector<256x32xf32>
    %7 = arith.addf %3, %6 : vector<256x32xf32>
    %c0_6 = arith.constant 0 : index
    %c0_7 = arith.constant 0 : index
    %8 = vector.load %arg7[%c0_6, %c0_7] : memref<256x32xf32, #tpu.memory_space<vmem>>, vector<256x32xf32>
    tpu.vector_store %arg7[%c0_6, %c0_7], %7 {strides = array<i32>} : memref<256x32xf32, #tpu.memory_space<vmem>>, vector<256x32xf32>,
    %c0_i32_8 = arith.constant 0 : i32
    %9 = arith.cmpi eq, %arg2, %c0_i32_8 : i32
    %10 = arith.extui %9 : i1 to i32
    %c0_i32_9 = arith.constant 0 : i32
    %11 = arith.cmpi ne, %10, %c0_i32_9 : i32
    scf.if %11 {
      %c0_10 = arith.constant 0 : index
      %c0_11 = arith.constant 0 : index
      %12 = vector.load %arg7[%c0_10, %c0_11] : memref<256x32xf32, #tpu.memory_space<vmem>>, vector<256x32xf32>
      %c0_12 = arith.constant 0 : index
      %c0_13 = arith.constant 0 : index
      %13 = vector.load %arg5[%c0_12, %c0_13] : memref<1x32xf32, #tpu.memory_space<vmem>>, vector<1x32xf32>
      %14 = vector.broadcast %13 : vector<1x32xf32> to vector<256x32xf32>
      %15 = arith.addf %12, %14 : vector<256x32xf32>
      %cst_14 = arith.constant 0.000000e+00 : f32
      %16 = vector.broadcast %cst_14 : f32 to vector<256x32xf32>
      %17 = arith.maximumf %15, %16 : vector<256x32xf32>
      %c0_15 = arith.constant 0 : index
      %c0_16 = arith.constant 0 : index
      %18 = vector.load %arg6[%c0_15, %c0_16] : memref<256x32xf32, #tpu.memory_space<vmem>>, vector<256x32xf32>
      tpu.vector_store %arg6[%c0_15, %c0_16], %17 {strides = array<i32>} : memref<256x32xf32, #tpu.memory_space<vmem>>, vector<256x32xf32>,
    } else {
    }
    return
  }
  func.func @transform_0(%arg0: i32, %arg1: i32, %arg2: i32) -> (i32, i32) {
    %c0_i32 = arith.constant 0 : i32
    return %arg0, %arg2 : i32, i32
  }
  func.func @transform_1(%arg0: i32, %arg1: i32, %arg2: i32) -> (i32, i32) {
    %c0_i32 = arith.constant 0 : i32
    return %arg2, %arg1 : i32, i32
  }
  func.func @transform_2(%arg0: i32, %arg1: i32, %arg2: i32) -> (i32, i32) {
    %c0_i32 = arith.constant 0 : i32
    %c0_i32_0 = arith.constant 0 : i32
    return %c0_i32, %arg1 : i32, i32
  }
  func.func @transform_3(%arg0: i32, %arg1: i32, %arg2: i32) -> (i32, i32) {
    %c0_i32 = arith.constant 0 : i32
    return %arg0, %arg1 : i32, i32
  }
}

module attributes {stable_mosaic.version = 11 : i64} {
  func.func @_matmul_kernel(%arg0: i32, %arg1: i32, %arg2: i32, %arg3: memref<256x288xf32, #tpu.memory_space<vmem>>, %arg4: memref<288x64xf32, #tpu.memory_space<vmem>>, %arg5: memref<1x64xf32, #tpu.memory_space<vmem>>, %arg6: memref<256x64xf32, #tpu.memory_space<vmem>>, %arg7: memref<256x64xf32, #tpu.memory_space<vmem>>) attributes {dimension_semantics = [#tpu.dimension_semantics<parallel>, #tpu.dimension_semantics<parallel>, #tpu.dimension_semantics<arbitrary>], iteration_bounds = array<i64: 2, 1, 1>, scalar_prefetch = 0 : i64, scratch_operands = 1 : i64, tpu.core_type = #tpu.core_type<tc>, window_params = [{transform_indices = @transform_0, window_bounds = array<i64: 256, 288>}, {transform_indices = @transform_1, window_bounds = array<i64: 288, 64>}, {transform_indices = @transform_2, window_bounds = array<i64: 1, 64>}, {transform_indices = @transform_3, window_bounds = array<i64: 256, 64>}]} {
    %c0_i32 = arith.constant 0 : i32
    %0 = arith.cmpi eq, %arg2, %c0_i32 : i32
    %1 = arith.extui %0 : i1 to i32
    %c0_i32_0 = arith.constant 0 : i32
    %2 = arith.cmpi ne, %1, %c0_i32_0 : i32
    scf.if %2 {
      %cst_10 = arith.constant 0.000000e+00 : f32
      %12 = vector.broadcast %cst_10 : f32 to vector<256x64xf32>
      %c0_11 = arith.constant 0 : index
      %c0_12 = arith.constant 0 : index
      %13 = vector.load %arg7[%c0_11, %c0_12] : memref<256x64xf32, #tpu.memory_space<vmem>>, vector<256x64xf32>
      tpu.vector_store %arg7[%c0_11, %c0_12], %12 {strides = array<i32>} : memref<256x64xf32, #tpu.memory_space<vmem>>, vector<256x64xf32>,
    } else {
    }
    %c0 = arith.constant 0 : index
    %c0_1 = arith.constant 0 : index
    %3 = vector.load %arg7[%c0, %c0_1] : memref<256x64xf32, #tpu.memory_space<vmem>>, vector<256x64xf32>
    %c0_2 = arith.constant 0 : index
    %c0_3 = arith.constant 0 : index
    %4 = vector.load %arg3[%c0_2, %c0_3] : memref<256x288xf32, #tpu.memory_space<vmem>>, vector<256x288xf32>
    %c0_4 = arith.constant 0 : index
    %c0_5 = arith.constant 0 : index
    %5 = vector.load %arg4[%c0_4, %c0_5] : memref<288x64xf32, #tpu.memory_space<vmem>>, vector<288x64xf32>
    %cst = arith.constant dense<0.000000e+00> : vector<256x64xf32>
    %6 = tpu.matmul %4, %5, %cst {dimension_numbers = #tpu.dot_dimension_numbers<[1], [0], [0], [1], [0, 0, 1, 1], [], []>} : vector<256x288xf32>, vector<288x64xf32>, vector<256x64xf32> -> vector<256x64xf32>
    %7 = arith.addf %3, %6 : vector<256x64xf32>
    %c0_6 = arith.constant 0 : index
    %c0_7 = arith.constant 0 : index
    %8 = vector.load %arg7[%c0_6, %c0_7] : memref<256x64xf32, #tpu.memory_space<vmem>>, vector<256x64xf32>
    tpu.vector_store %arg7[%c0_6, %c0_7], %7 {strides = array<i32>} : memref<256x64xf32, #tpu.memory_space<vmem>>, vector<256x64xf32>,
    %c0_i32_8 = arith.constant 0 : i32
    %9 = arith.cmpi eq, %arg2, %c0_i32_8 : i32
    %10 = arith.extui %9 : i1 to i32
    %c0_i32_9 = arith.constant 0 : i32
    %11 = arith.cmpi ne, %10, %c0_i32_9 : i32
    scf.if %11 {
      %c0_10 = arith.constant 0 : index
      %c0_11 = arith.constant 0 : index
      %12 = vector.load %arg7[%c0_10, %c0_11] : memref<256x64xf32, #tpu.memory_space<vmem>>, vector<256x64xf32>
      %c0_12 = arith.constant 0 : index
      %c0_13 = arith.constant 0 : index
      %13 = vector.load %arg5[%c0_12, %c0_13] : memref<1x64xf32, #tpu.memory_space<vmem>>, vector<1x64xf32>
      %14 = vector.broadcast %13 : vector<1x64xf32> to vector<256x64xf32>
      %15 = arith.addf %12, %14 : vector<256x64xf32>
      %cst_14 = arith.constant 0.000000e+00 : f32
      %16 = vector.broadcast %cst_14 : f32 to vector<256x64xf32>
      %17 = arith.maximumf %15, %16 : vector<256x64xf32>
      %c0_15 = arith.constant 0 : index
      %c0_16 = arith.constant 0 : index
      %18 = vector.load %arg6[%c0_15, %c0_16] : memref<256x64xf32, #tpu.memory_space<vmem>>, vector<256x64xf32>
      tpu.vector_store %arg6[%c0_15, %c0_16], %17 {strides = array<i32>} : memref<256x64xf32, #tpu.memory_space<vmem>>, vector<256x64xf32>,
    } else {
    }
    return
  }
  func.func @transform_0(%arg0: i32, %arg1: i32, %arg2: i32) -> (i32, i32) {
    %c0_i32 = arith.constant 0 : i32
    return %arg0, %arg2 : i32, i32
  }
  func.func @transform_1(%arg0: i32, %arg1: i32, %arg2: i32) -> (i32, i32) {
    %c0_i32 = arith.constant 0 : i32
    return %arg2, %arg1 : i32, i32
  }
  func.func @transform_2(%arg0: i32, %arg1: i32, %arg2: i32) -> (i32, i32) {
    %c0_i32 = arith.constant 0 : i32
    %c0_i32_0 = arith.constant 0 : i32
    return %c0_i32, %arg1 : i32, i32
  }
  func.func @transform_3(%arg0: i32, %arg1: i32, %arg2: i32) -> (i32, i32) {
    %c0_i32 = arith.constant 0 : i32
    return %arg0, %arg1 : i32, i32
  }
}

module attributes {stable_mosaic.version = 11 : i64} {
  func.func @_matmul_kernel(%arg0: i32, %arg1: i32, %arg2: i32, %arg3: memref<2x8192xf32, #tpu.memory_space<vmem>>, %arg4: memref<8192x256xbf16, #tpu.memory_space<vmem>>, %arg5: memref<1x256xf32, #tpu.memory_space<vmem>>, %arg6: memref<2x256xf32, #tpu.memory_space<vmem>>, %arg7: memref<2x256xf32, #tpu.memory_space<vmem>>) attributes {dimension_semantics = [#tpu.dimension_semantics<parallel>, #tpu.dimension_semantics<parallel>, #tpu.dimension_semantics<arbitrary>], iteration_bounds = array<i64: 1, 1, 2>, scalar_prefetch = 0 : i64, scratch_operands = 1 : i64, tpu.core_type = #tpu.core_type<tc>, window_params = [{transform_indices = @transform_0, window_bounds = array<i64: 2, 8192>}, {transform_indices = @transform_1, window_bounds = array<i64: 8192, 256>}, {transform_indices = @transform_2, window_bounds = array<i64: 1, 256>}, {transform_indices = @transform_3, window_bounds = array<i64: 2, 256>}]} {
    %c0_i32 = arith.constant 0 : i32
    %0 = arith.cmpi eq, %arg2, %c0_i32 : i32
    %1 = arith.extui %0 : i1 to i32
    %c0_i32_0 = arith.constant 0 : i32
    %2 = arith.cmpi ne, %1, %c0_i32_0 : i32
    scf.if %2 {
      %cst_9 = arith.constant 0.000000e+00 : f32
      %13 = vector.broadcast %cst_9 : f32 to vector<2x256xf32>
      %c0_10 = arith.constant 0 : index
      %c0_11 = arith.constant 0 : index
      %14 = vector.load %arg7[%c0_10, %c0_11] : memref<2x256xf32, #tpu.memory_space<vmem>>, vector<2x256xf32>
      tpu.vector_store %arg7[%c0_10, %c0_11], %13 {strides = array<i32>} : memref<2x256xf32, #tpu.memory_space<vmem>>, vector<2x256xf32>,
    } else {
    }
    %c0 = arith.constant 0 : index
    %c0_1 = arith.constant 0 : index
    %3 = vector.load %arg7[%c0, %c0_1] : memref<2x256xf32, #tpu.memory_space<vmem>>, vector<2x256xf32>
    %c0_2 = arith.constant 0 : index
    %c0_3 = arith.constant 0 : index
    %4 = vector.load %arg3[%c0_2, %c0_3] : memref<2x8192xf32, #tpu.memory_space<vmem>>, vector<2x8192xf32>
    %5 = arith.truncf %4 : vector<2x8192xf32> to vector<2x8192xbf16>
    %c0_4 = arith.constant 0 : index
    %c0_5 = arith.constant 0 : index
    %6 = vector.load %arg4[%c0_4, %c0_5] : memref<8192x256xbf16, #tpu.memory_space<vmem>>, vector<8192x256xbf16>
    %cst = arith.constant dense<0.000000e+00> : vector<2x256xf32>
    %7 = tpu.matmul %5, %6, %cst {dimension_numbers = #tpu.dot_dimension_numbers<[1], [0], [0], [1], [0, 0, 1, 1], [], []>} : vector<2x8192xbf16>, vector<8192x256xbf16>, vector<2x256xf32> -> vector<2x256xf32>
    %8 = arith.addf %3, %7 : vector<2x256xf32>
    %c0_6 = arith.constant 0 : index
    %c0_7 = arith.constant 0 : index
    %9 = vector.load %arg7[%c0_6, %c0_7] : memref<2x256xf32, #tpu.memory_space<vmem>>, vector<2x256xf32>
    tpu.vector_store %arg7[%c0_6, %c0_7], %8 {strides = array<i32>} : memref<2x256xf32, #tpu.memory_space<vmem>>, vector<2x256xf32>,
    %c1_i32 = arith.constant 1 : i32
    %10 = arith.cmpi eq, %arg2, %c1_i32 : i32
    %11 = arith.extui %10 : i1 to i32
    %c0_i32_8 = arith.constant 0 : i32
    %12 = arith.cmpi ne, %11, %c0_i32_8 : i32
    scf.if %12 {
      %c0_9 = arith.constant 0 : index
      %c0_10 = arith.constant 0 : index
      %13 = vector.load %arg7[%c0_9, %c0_10] : memref<2x256xf32, #tpu.memory_space<vmem>>, vector<2x256xf32>
      %c0_11 = arith.constant 0 : index
      %c0_12 = arith.constant 0 : index
      %14 = vector.load %arg5[%c0_11, %c0_12] : memref<1x256xf32, #tpu.memory_space<vmem>>, vector<1x256xf32>
      %15 = vector.broadcast %14 : vector<1x256xf32> to vector<2x256xf32>
      %16 = arith.addf %13, %15 : vector<2x256xf32>
      %cst_13 = arith.constant 0.000000e+00 : f32
      %17 = vector.broadcast %cst_13 : f32 to vector<2x256xf32>
      %18 = arith.maximumf %16, %17 : vector<2x256xf32>
      %c0_14 = arith.constant 0 : index
      %c0_15 = arith.constant 0 : index
      %19 = vector.load %arg6[%c0_14, %c0_15] : memref<2x256xf32, #tpu.memory_space<vmem>>, vector<2x256xf32>
      tpu.vector_store %arg6[%c0_14, %c0_15], %18 {strides = array<i32>} : memref<2x256xf32, #tpu.memory_space<vmem>>, vector<2x256xf32>,
    } else {
    }
    return
  }
  func.func @transform_0(%arg0: i32, %arg1: i32, %arg2: i32) -> (i32, i32) {
    %c0_i32 = arith.constant 0 : i32
    return %arg0, %arg2 : i32, i32
  }
  func.func @transform_1(%arg0: i32, %arg1: i32, %arg2: i32) -> (i32, i32) {
    %c0_i32 = arith.constant 0 : i32
    return %arg2, %arg1 : i32, i32
  }
  func.func @transform_2(%arg0: i32, %arg1: i32, %arg2: i32) -> (i32, i32) {
    %c0_i32 = arith.constant 0 : i32
    %c0_i32_0 = arith.constant 0 : i32
    return %c0_i32, %arg1 : i32, i32
  }
  func.func @transform_3(%arg0: i32, %arg1: i32, %arg2: i32) -> (i32, i32) {
    %c0_i32 = arith.constant 0 : i32
    return %arg0, %arg1 : i32, i32
  }
}

module attributes {stable_mosaic.version = 11 : i64} {
  func.func @_vae_head_kernel(%arg0: memref<2x256xf32, #tpu.memory_space<vmem>>, %arg1: memref<2x16xf32, #tpu.memory_space<vmem>>, %arg2: memref<256x32xf32, #tpu.memory_space<vmem>>, %arg3: memref<1x32xf32, #tpu.memory_space<vmem>>, %arg4: memref<16x320xf32, #tpu.memory_space<vmem>>, %arg5: memref<1x320xf32, #tpu.memory_space<vmem>>, %arg6: memref<256x256xf32, #tpu.memory_space<vmem>>, %arg7: memref<1x256xf32, #tpu.memory_space<vmem>>, %arg8: memref<64x112xf32, #tpu.memory_space<vmem>>, %arg9: memref<1x112xf32, #tpu.memory_space<vmem>>, %arg10: memref<2x16xf32, #tpu.memory_space<vmem>>, %arg11: memref<2x16xf32, #tpu.memory_space<vmem>>, %arg12: memref<2x256xf32, #tpu.memory_space<vmem>>, %arg13: memref<2x112xf32, #tpu.memory_space<vmem>>) attributes {dimension_semantics = [], scalar_prefetch = 0 : i64, scratch_operands = 0 : i64, tpu.core_type = #tpu.core_type<tc>} {
    %c0 = arith.constant 0 : index
    %c0_0 = arith.constant 0 : index
    %0 = vector.load %arg0[%c0, %c0_0] : memref<2x256xf32, #tpu.memory_space<vmem>>, vector<2x256xf32>
    %c0_1 = arith.constant 0 : index
    %c0_2 = arith.constant 0 : index
    %1 = vector.load %arg2[%c0_1, %c0_2] : memref<256x32xf32, #tpu.memory_space<vmem>>, vector<256x32xf32>
    %cst = arith.constant dense<0.000000e+00> : vector<2x32xf32>
    %2 = tpu.matmul %0, %1, %cst {dimension_numbers = #tpu.dot_dimension_numbers<[1], [0], [0], [1], [0, 0, 1, 1], [], []>} : vector<2x256xf32>, vector<256x32xf32>, vector<2x32xf32> -> vector<2x32xf32>
    %c0_3 = arith.constant 0 : index
    %c0_4 = arith.constant 0 : index
    %3 = vector.load %arg3[%c0_3, %c0_4] : memref<1x32xf32, #tpu.memory_space<vmem>>, vector<1x32xf32>
    %4 = vector.broadcast %3 : vector<1x32xf32> to vector<2x32xf32>
    %5 = arith.addf %2, %4 : vector<2x32xf32>
    %6 = vector.extract_strided_slice %5 {offsets = [0, 0], sizes = [2, 16], strides = [1, 1]} : vector<2x32xf32> to vector<2x16xf32>
    %7 = vector.extract_strided_slice %5 {offsets = [0, 16], sizes = [2, 16], strides = [1, 1]} : vector<2x32xf32> to vector<2x16xf32>
    %c0_5 = arith.constant 0 : index
    %c0_6 = arith.constant 0 : index
    %8 = vector.load %arg10[%c0_5, %c0_6] : memref<2x16xf32, #tpu.memory_space<vmem>>, vector<2x16xf32>
    tpu.vector_store %arg10[%c0_5, %c0_6], %6 {strides = array<i32>} : memref<2x16xf32, #tpu.memory_space<vmem>>, vector<2x16xf32>,
    %c0_7 = arith.constant 0 : index
    %c0_8 = arith.constant 0 : index
    %9 = vector.load %arg11[%c0_7, %c0_8] : memref<2x16xf32, #tpu.memory_space<vmem>>, vector<2x16xf32>
    tpu.vector_store %arg11[%c0_7, %c0_8], %7 {strides = array<i32>} : memref<2x16xf32, #tpu.memory_space<vmem>>, vector<2x16xf32>,
    %c0_9 = arith.constant 0 : index
    %c0_10 = arith.constant 0 : index
    %10 = vector.load %arg1[%c0_9, %c0_10] : memref<2x16xf32, #tpu.memory_space<vmem>>, vector<2x16xf32>
    %cst_11 = arith.constant 5.000000e-01 : f32
    %11 = vector.broadcast %cst_11 : f32 to vector<2x16xf32>
    %12 = arith.mulf %11, %7 : vector<2x16xf32>
    %13 = math.exp %12 : vector<2x16xf32>
    %14 = arith.mulf %10, %13 : vector<2x16xf32>
    %15 = arith.addf %6, %14 : vector<2x16xf32>
    %c0_12 = arith.constant 0 : index
    %c0_13 = arith.constant 0 : index
    %16 = vector.load %arg4[%c0_12, %c0_13] : memref<16x320xf32, #tpu.memory_space<vmem>>, vector<16x320xf32>
    %cst_14 = arith.constant dense<0.000000e+00> : vector<2x320xf32>
    %17 = tpu.matmul %15, %16, %cst_14 {dimension_numbers = #tpu.dot_dimension_numbers<[1], [0], [0], [1], [0, 0, 1, 1], [], []>} : vector<2x16xf32>, vector<16x320xf32>, vector<2x320xf32> -> vector<2x320xf32>
    %c0_15 = arith.constant 0 : index
    %c0_16 = arith.constant 0 : index
    %18 = vector.load %arg5[%c0_15, %c0_16] : memref<1x320xf32, #tpu.memory_space<vmem>>, vector<1x320xf32>
    %19 = vector.broadcast %18 : vector<1x320xf32> to vector<2x320xf32>
    %20 = arith.addf %17, %19 : vector<2x320xf32>
    %cst_17 = arith.constant 0.000000e+00 : f32
    %21 = vector.broadcast %cst_17 : f32 to vector<2x320xf32>
    %22 = arith.maximumf %20, %21 : vector<2x320xf32>
    %23 = vector.extract_strided_slice %22 {offsets = [0, 0], sizes = [2, 256], strides = [1, 1]} : vector<2x320xf32> to vector<2x256xf32>
    %24 = vector.extract_strided_slice %22 {offsets = [0, 256], sizes = [2, 64], strides = [1, 1]} : vector<2x320xf32> to vector<2x64xf32>
    %c0_18 = arith.constant 0 : index
    %c0_19 = arith.constant 0 : index
    %25 = vector.load %arg6[%c0_18, %c0_19] : memref<256x256xf32, #tpu.memory_space<vmem>>, vector<256x256xf32>
    %cst_20 = arith.constant dense<0.000000e+00> : vector<2x256xf32>
    %26 = tpu.matmul %23, %25, %cst_20 {dimension_numbers = #tpu.dot_dimension_numbers<[1], [0], [0], [1], [0, 0, 1, 1], [], []>} : vector<2x256xf32>, vector<256x256xf32>, vector<2x256xf32> -> vector<2x256xf32>
    %c0_21 = arith.constant 0 : index
    %c0_22 = arith.constant 0 : index
    %27 = vector.load %arg7[%c0_21, %c0_22] : memref<1x256xf32, #tpu.memory_space<vmem>>, vector<1x256xf32>
    %28 = vector.broadcast %27 : vector<1x256xf32> to vector<2x256xf32>
    %29 = arith.addf %26, %28 : vector<2x256xf32>
    %30 = arith.negf %29 : vector<2x256xf32>
    %31 = math.exp %30 : vector<2x256xf32>
    %cst_23 = arith.constant 1.000000e+00 : f32
    %32 = vector.broadcast %cst_23 : f32 to vector<2x256xf32>
    %33 = arith.addf %32, %31 : vector<2x256xf32>
    %34 = arith.divf %32, %33 : vector<2x256xf32>
    %c0_24 = arith.constant 0 : index
    %c0_25 = arith.constant 0 : index
    %35 = vector.load %arg12[%c0_24, %c0_25] : memref<2x256xf32, #tpu.memory_space<vmem>>, vector<2x256xf32>
    tpu.vector_store %arg12[%c0_24, %c0_25], %34 {strides = array<i32>} : memref<2x256xf32, #tpu.memory_space<vmem>>, vector<2x256xf32>,
    %c0_26 = arith.constant 0 : index
    %c0_27 = arith.constant 0 : index
    %36 = vector.load %arg8[%c0_26, %c0_27] : memref<64x112xf32, #tpu.memory_space<vmem>>, vector<64x112xf32>
    %cst_28 = arith.constant dense<0.000000e+00> : vector<2x112xf32>
    %37 = tpu.matmul %24, %36, %cst_28 {dimension_numbers = #tpu.dot_dimension_numbers<[1], [0], [0], [1], [0, 0, 1, 1], [], []>} : vector<2x64xf32>, vector<64x112xf32>, vector<2x112xf32> -> vector<2x112xf32>
    %c0_29 = arith.constant 0 : index
    %c0_30 = arith.constant 0 : index
    %38 = vector.load %arg9[%c0_29, %c0_30] : memref<1x112xf32, #tpu.memory_space<vmem>>, vector<1x112xf32>
    %39 = vector.broadcast %38 : vector<1x112xf32> to vector<2x112xf32>
    %40 = arith.addf %37, %39 : vector<2x112xf32>
    %c0_31 = arith.constant 0 : index
    %c0_32 = arith.constant 0 : index
    %41 = vector.load %arg13[%c0_31, %c0_32] : memref<2x112xf32, #tpu.memory_space<vmem>>, vector<2x112xf32>
    tpu.vector_store %arg13[%c0_31, %c0_32], %40 {strides = array<i32>} : memref<2x112xf32, #tpu.memory_space<vmem>>, vector<2x112xf32>,
    return
  }
}

</mosaic_0001>

<bundles_post_ra>
// kernel: graph_vae_forward.4
= control target key start
LH: loop header
LB: loop body
LE: loop exit
PB: predicated region body
PF: predicated region fallthrough
CT: control target
= control target key end

     0   :  { %8 = vsyncpa [#allocation4], 0  ;;  %s1624_s0 = inlined_call_operand.vmem [shape: f32[512,9], index: 0, kind: input, shape index: {}]   ;;  %s1625_s1 = inlined_call_operand.hbm [shape: f32[9,32], index: 1, kind: input, shape index: {}]   ;;  %s1626_s2 = inlined_call_operand.hbm [shape: f32[1,32], index: 2, kind: input, shape index: {}]   ;;  %s1627_s3 = inlined_call_operand.vmem [shape: f32[512,32], index: 3, kind: output, shape index: {}]  }
   0x1   :  { %9 = vsyncpa [#allocation6], 0  ;;  %s1296_s12 = smov 0   ;;  %s1298_s13 = smov 0  }
   0x2   :  { %s1300_s14 = smov 0  }
   0x3 LB: > { %s1000_s15 = sadd.s32 4294967295, %s1269_s14   ;;  %s34_s16 = sadd.s32 1, %s1265_s13  ;;  %s1269_s14 = sphi %s1300_s14, %s15_s14   ;;  %s1265_s13 = sphi %s1298_s13, %s1633_s13   ;;  %s1261_s12 = sphi %s1296_s12, %s1632_s12  }
   0x4   : > { %p36_p0 = scmp.ge.s32.totalorder %s34_s16, 2  ;;  %p1002_p1 = scmp.ge.s32.totalorder %s1269_s14, 1 }
   0x5   : > { %p149_p2 = scmp.lt.s32.totalorder %s1269_s14, 3  ;;  %p1321_p4 = scmp.eq.s32.totalorder %s1000_s15, 0 }
   0x6   : > { %s1635_s16 = smov (%p36_p0, %s34_s16), 0  ;;  %s1271_s19 = smov [#allocation3]  }
   0x7   : > { %p1317_p3 = pnand %p1002_p1, %p149_p2  ;;  %s165_s20 = sshll.u32 %s1271_s19, 4  ;;  %s166_s20 = int_to_ptr.vmem [resolvable:$true] %s165_s20 }
   0x8   : > { %s1272_s22 = smov [#allocation5]   ;;  %s1198_s24 = scalar_lea.vmem %s166_s20, 256 }
   0x9   : > { %p1147_p5 = pneg %p1317_p3  ;;  %s181_s23 = sshll.u32 %s1272_s22, 4  ;;  %s182_s23 = int_to_ptr.vmem [resolvable:$true] %s181_s23 }
   0xa   : > { %p1199_p8 = scmp.ne.s32.totalorder %s166_s20, %s1198_s24  ;;  %p1206_p11 = scmp.lt.s32.totalorder %s166_s20, %s166_s20 }
   0xb   : > { %p1329_p6 = pnand %p1321_p4, %p1147_p5  ;;  %p1207_p12 = scmp.lt.s32.totalorder %s1198_s24, %s1198_s24 }
   0xd   : > { %p1189_p7 = pneg %p1329_p6  ;;  %p1208_p13 = por %p1207_p12, %p1206_p11 }
   0xf   : > { %p1201_p9 = pnand %p1199_p8, %p1189_p7 }
  0x11   : > { %p1202_p10 = pneg %p1201_p9 }
  0x13   : > { %p1209_p0 = pnand %p1208_p13, %p1202_p10 }
  0x15   : > { %1212 = shalt.err (!%p1209_p0)
}
  0x16   : > { %s1273_s25 = smov 128   ;;  %s1274_s26 = smov 8  }
  0x17   : > { %1150 = dma.hbm_to_vmem [thread:$0]  (!%p1329_p6), %s1625_s1, 256, %s166_s20, [#allocation4], %s1273_s25, %s1273_s25, %s1274_s26  }
  0x18   : > { %s1224_s29 = scalar_lea.vmem %s182_s23, 16  ;;  %s1231_s30 = scalar_lea.vmem %s182_s23, 32 }
  0x19   : > { %p1225_p1 = scmp.ne.s32.totalorder %s182_s23, %s1224_s29  ;;  %p1232_p8 = scmp.lt.s32.totalorder %s182_s23, %s182_s23 }
  0x1a   : > { %p1233_p9 = scmp.lt.s32.totalorder %s1231_s30, %s1224_s29 }
  0x1b   : > { %p1227_p2 = pnand %p1225_p1, %p1189_p7 }
  0x1c   : > { %p1234_p10 = por %p1233_p9, %p1232_p8 }
  0x1d   : > { %p1228_p5 = pneg %p1227_p2 }
  0x1f   : > { %p1235_p11 = pnand %p1234_p10, %p1228_p5 }
  0x21   : > { %1238 = shalt.err (!%p1235_p11)
}
  0x22   : > { %1153 = dma.hbm_to_vmem [thread:$0]  (!%p1329_p6), %s1626_s2, 16, %s182_s23, [#allocation6]  }
  0x23   : > { %206 = sbr.rel (%p1317_p3) target bundleno = 290 (0x122), region = 32 }
  0x28   : > { %1252 = dma.done.wait (%p1321_p4), [#allocation4], 256  }
  0x29   : > { %1254 = vsyncadd (%p1321_p4), [#allocation4], 4294967040 }
  0x2a   : > { %1256 = dma.done.wait (%p1321_p4), [#allocation6], 16  }
  0x2b   : > { %1258 = vsyncadd (%p1321_p4), [#allocation6], 4294967280  ;;  %s1009_s6 = sshll.u32 %s1261_s12, 5  ;;  %vm263_vm0 = vcmask 261120   ;;  %v1275_v0 = vmov 0.0   ;;  %vm459_vm1 = vcmask 1040384  }
  0x2c   : > { %p1364_p6 = scmp.lt.s32.totalorder %s1009_s6, 63  ;;  %265 = vst.msk [vmem:[#allocation2 + $0x8] sm:$0xff] %vm263_vm0, %v1275_v0  ;;  %264 = vst.msk [vmem:[#allocation2] sm:$0xff] %vm263_vm0, %v1275_v0  ;;  %v361_v1 = vld [vmem:[#allocation3 + $0x8] sm:$0x1]  ;;  %v360_v2 = vld [vmem:[#allocation3] sm:$0xff] }
  0x2d   : > { %266 = vst.msk [vmem:[#allocation2 + $0x10] sm:$0xff] %vm263_vm0, %v1275_v0  ;;  %267 = vst.msk [vmem:[#allocation2 + $0x18] sm:$0xff] %vm263_vm0, %v1275_v0  ;;  %1083 = vmatprep.subr.msk.mxu0 %vm459_vm1, %v361_v1  ;;  %1135 = vmatprep.subr.msk.mxu1 %vm459_vm1, %v361_v1  ;;  %vm362_vm2 = vcmask 72704   ;;  %v1484_v61 = vld [vmem:[#allocation5] ss:$0 sm:$0xff] }
  0x2e   : > { %268 = vst.msk [vmem:[#allocation2 + $0x20] sm:$0xff] %vm263_vm0, %v1275_v0  ;;  %269 = vst.msk [vmem:[#allocation2 + $0x28] sm:$0xff] %vm263_vm0, %v1275_v0  ;;  %s1637_s6 = smov (!%p1364_p6, %s1009_s6), 63  ;;  %1084 = vmatpush3.msk.msra.mxu0 %vm459_vm1, %v361_v1  ;;  %1137 = vmatpush3.msk.msra.mxu1 %vm459_vm1, %v361_v1 }
  0x2f   : > { %270 = vst.msk [vmem:[#allocation2 + $0x30] sm:$0xff] %vm263_vm0, %v1275_v0  ;;  %271 = vst.msk [vmem:[#allocation2 + $0x38] sm:$0xff] %vm263_vm0, %v1275_v0  ;;  %s1010_s8 = sshll.u32 %s1637_s6, 3  ;;  %1085 = vmatprep.subr.mxu0 %v360_v2  ;;  %1136 = vmatprep.subr.mxu1 %v360_v2 }
  0x30   : > { %272 = vst.msk [vmem:[#allocation2 + $0x40] sm:$0xff] %vm263_vm0, %v1275_v0  ;;  %273 = vst.msk [vmem:[#allocation2 + $0x48] sm:$0xff] %vm263_vm0, %v1275_v0  ;;  %s1412_s11 = scalar_lea.vmem %s1624_s0, %s1010_s8  ;;  %1086 = vmatpush3.msra.mxu0 %v360_v2  ;;  %1138 = vmatpush3.msra.mxu1 %v360_v2  ;;  %s1497_s17 = scalar_lea.vmem %s1627_s3, %s1010_s8 }
  0x31   : > { %274 = vst.msk [vmem:[#allocation2 + $0x50] sm:$0xff] %vm263_vm0, %v1275_v0  ;;  %275 = vst.msk [vmem:[#allocation2 + $0x58] sm:$0xff] %vm263_vm0, %v1275_v0  ;;  %v328_v3 = vld [vmem:[%s1412_s11] sm:$0xff]  ;;  %v329_v5 = vld [vmem:[%s1412_s11 + $0x8] sm:$0xff] }
  0x32   : > { %276 = vst.msk [vmem:[#allocation2 + $0x60] sm:$0xff] %vm263_vm0, %v1275_v0  ;;  %277 = vst.msk [vmem:[#allocation2 + $0x68] sm:$0xff] %vm263_vm0, %v1275_v0  ;;  %v344_v4 = vld [vmem:[%s1412_s11 + $0x80] sm:$0xff]  ;;  %v345_v6 = vld [vmem:[%s1412_s11 + $0x88] sm:$0xff]  ;;  %1087 = vmatprep.mubr.msk.f32.mxu0 %vm362_vm2, %v328_v3 }
  0x33   : > { %278 = vst.msk [vmem:[#allocation2 + $0x70] sm:$0xff] %vm263_vm0, %v1275_v0  ;;  %279 = vst.msk [vmem:[#allocation2 + $0x78] sm:$0xff] %vm263_vm0, %v1275_v0  ;;  %v330_v7 = vld [vmem:[%s1412_s11 + $0x10] sm:$0xff]  ;;  %1111 = vmatprep.mubr.msk.f32.mxu1 %vm362_vm2, %v344_v4  ;;  %1088 = vmatmul.mubr.msk.f32.vlgmr.msra.gmra.mxu0 %vm362_vm2, %v329_v5  ;;  %v331_v9 = vld [vmem:[%s1412_s11 + $0x18] sm:$0xff] }
  0x34   : > { %280 = vst.msk [vmem:[#allocation2 + $0x80] sm:$0xff] %vm263_vm0, %v1275_v0  ;;  %281 = vst.msk [vmem:[#allocation2 + $0x88] sm:$0xff] %vm263_vm0, %v1275_v0  ;;  %v346_v8 = vld [vmem:[%s1412_s11 + $0x90] sm:$0xff]  ;;  %1112 = vmatmul.mubr.msk.f32.vlgmr.msra.gmra.mxu1 %vm362_vm2, %v345_v6  ;;  %1090 = vmatprep.mubr.msk.f32.mxu0 %vm362_vm2, %v330_v7  ;;  %v347_v10 = vld [vmem:[%s1412_s11 + $0x98] sm:$0xff] }
  0x35   : > { %282 = vst.msk [vmem:[#allocation2 + $0x90] sm:$0xff] %vm263_vm0, %v1275_v0  ;;  %283 = vst.msk [vmem:[#allocation2 + $0x98] sm:$0xff] %vm263_vm0, %v1275_v0  ;;  %1114 = vmatprep.mubr.msk.f32.mxu1 %vm362_vm2, %v346_v8  ;;  %v332_v11 = vld [vmem:[%s1412_s11 + $0x20] sm:$0xff]  ;;  %v333_v13 = vld [vmem:[%s1412_s11 + $0x28] sm:$0xff] }
  0x36   : > { %284 = vst.msk [vmem:[#allocation2 + $0xa0] sm:$0xff] %vm263_vm0, %v1275_v0  ;;  %285 = vst.msk [vmem:[#allocation2 + $0xa8] sm:$0xff] %vm263_vm0, %v1275_v0  ;;  %v348_v12 = vld [vmem:[%s1412_s11 + $0xa0] sm:$0xff]  ;;  %v349_v14 = vld [vmem:[%s1412_s11 + $0xa8] sm:$0xff] }
  0x37   : > { %286 = vst.msk [vmem:[#allocation2 + $0xb0] sm:$0xff] %vm263_vm0, %v1275_v0  ;;  %287 = vst.msk [vmem:[#allocation2 + $0xb8] sm:$0xff] %vm263_vm0, %v1275_v0  ;;  %1091 = vmatmul.mubr.msk.f32.gmra.mxu0 %vm362_vm2, %v331_v9  ;;  %v334_v15 = vld [vmem:[%s1412_s11 + $0x30] sm:$0xff]  ;;  %v335_v17 = vld [vmem:[%s1412_s11 + $0x38] sm:$0xff] }
  0x38   : > { %288 = vst.msk [vmem:[#allocation2 + $0xc0] sm:$0xff] %vm263_vm0, %v1275_v0  ;;  %289 = vst.msk [vmem:[#allocation2 + $0xc8] sm:$0xff] %vm263_vm0, %v1275_v0  ;;  %1115 = vmatmul.mubr.msk.f32.gmra.mxu1 %vm362_vm2, %v347_v10  ;;  %1093 = vmatprep.mubr.msk.f32.mxu0 %vm362_vm2, %v332_v11  ;;  %v350_v16 = vld [vmem:[%s1412_s11 + $0xb0] sm:$0xff]  ;;  %v351_v18 = vld [vmem:[%s1412_s11 + $0xb8] sm:$0xff] }
  0x39   : > { %290 = vst.msk [vmem:[#allocation2 + $0xd0] sm:$0xff] %vm263_vm0, %v1275_v0  ;;  %291 = vst.msk [vmem:[#allocation2 + $0xd8] sm:$0xff] %vm263_vm0, %v1275_v0  ;;  %1117 = vmatprep.mubr.msk.f32.mxu1 %vm362_vm2, %v348_v12  ;;  %v336_v19 = vld [vmem:[%s1412_s11 + $0x40] sm:$0xff]  ;;  %v337_v21 = vld [vmem:[%s1412_s11 + $0x48] sm:$0xff] }
  0x3a   : > { %292 = vst.msk [vmem:[#allocation2 + $0xe0] sm:$0xff] %vm263_vm0, %v1275_v0  ;;  %293 = vst.msk [vmem:[#allocation2 + $0xe8] sm:$0xff] %vm263_vm0, %v1275_v0  ;;  %v352_v20 = vld [vmem:[%s1412_s11 + $0xc0] sm:$0xff]  ;;  %v353_v22 = vld [vmem:[%s1412_s11 + $0xc8] sm:$0xff] }
  0x3b   : > { %294 = vst.msk [vmem:[#allocation2 + $0xf0] sm:$0xff] %vm263_vm0, %v1275_v0  ;;  %295 = vst.msk [vmem:[#allocation2 + $0xf8] sm:$0xff] %vm263_vm0, %v1275_v0  ;;  %1094 = vmatmul.mubr.msk.f32.gmra.mxu0 %vm362_vm2, %v333_v13  ;;  %v338_v23 = vld [vmem:[%s1412_s11 + $0x50] sm:$0xff]  ;;  %v339_v25 = vld [vmem:[%s1412_s11 + $0x58] sm:$0xff] }
  0x3c   : > { %1118 = vmatmul.mubr.msk.f32.gmra.mxu1 %vm362_vm2, %v349_v14  ;;  %1096 = vmatprep.mubr.msk.f32.mxu0 %vm362_vm2, %v334_v15  ;;  %v354_v24 = vld [vmem:[%s1412_s11 + $0xd0] sm:$0xff]  ;;  %v355_v26 = vld [vmem:[%s1412_s11 + $0xd8] sm:$0xff]  ;;  %v340_v27 = vld [vmem:[%s1412_s11 + $0x60] sm:$0xff] }
  0x3d   : > { %1120 = vmatprep.mubr.msk.f32.mxu1 %vm362_vm2, %v350_v16  ;;  %v356_v28 = vld [vmem:[%s1412_s11 + $0xe0] sm:$0xff]  ;;  %v341_v29 = vld [vmem:[%s1412_s11 + $0x68] sm:$0xff]  ;;  %v342_v31 = vld [vmem:[%s1412_s11 + $0x70] sm:$0xff] }
  0x3e   : > { %v357_v30 = vld [vmem:[%s1412_s11 + $0xe8] sm:$0xff]  ;;  %v358_v32 = vld [vmem:[%s1412_s11 + $0xf0] sm:$0xff]  ;;  %v343_v33 = vld [vmem:[%s1412_s11 + $0x78] sm:$0xff] }
  0x3f   : > { %1097 = vmatmul.mubr.msk.f32.gmra.mxu0 %vm362_vm2, %v335_v17  ;;  %v359_v34 = vld [vmem:[%s1412_s11 + $0xf8] sm:$0xff]  ;;  %v297_v35 = vld [vmem:[#allocation2 + $0x8] sm:$0xff]  ;;  %v296_v39 = vld [vmem:[#allocation2] sm:$0xff] }
  0x40   : > { %1121 = vmatmul.mubr.msk.f32.gmra.mxu1 %vm362_vm2, %v351_v18  ;;  %1099 = vmatprep.mubr.msk.f32.mxu0 %vm362_vm2, %v336_v19  ;;  %v313_v36 = vld [vmem:[#allocation2 + $0x88] sm:$0xff]  ;;  %v312_v40 = vld [vmem:[#allocation2 + $0x80] sm:$0xff]  ;;  %v299_v45 = vld [vmem:[#allocation2 + $0x18] sm:$0xff] }
  0x41   : > { %1123 = vmatprep.mubr.msk.f32.mxu1 %vm362_vm2, %v352_v20  ;;  %v315_v46 = vld [vmem:[#allocation2 + $0x98] sm:$0xff]  ;;  %v298_v51 = vld [vmem:[#allocation2 + $0x10] sm:$0xff]  ;;  %v301_v57 = vld [vmem:[#allocation2 + $0x28] sm:$0xff] }
  0x42   : > { %v314_v52 = vld [vmem:[#allocation2 + $0x90] sm:$0xff]  ;;  %v317_v58 = vld [vmem:[#allocation2 + $0xa8] sm:$0xff]  ;;  %v300_v0 = vld [vmem:[#allocation2 + $0x20] sm:$0xff] }
  0x43   : > { %1100 = vmatmul.mubr.msk.f32.gmra.mxu0 %vm362_vm2, %v337_v21  ;;  %v316_v1 = vld [vmem:[#allocation2 + $0xa0] sm:$0xff]  ;;  %v303_v12 = vld [vmem:[#allocation2 + $0x38] sm:$0xff] }
  0x44   : > { %1124 = vmatmul.mubr.msk.f32.gmra.mxu1 %vm362_vm2, %v353_v22  ;;  %1102 = vmatprep.mubr.msk.f32.mxu0 %vm362_vm2, %v338_v23  ;;  %v319_v13 = vld [vmem:[#allocation2 + $0xb8] sm:$0xff]  ;;  %v302_v22 = vld [vmem:[#allocation2 + $0x30] sm:$0xff] }
  0x45   : > { %1126 = vmatprep.mubr.msk.f32.mxu1 %vm362_vm2, %v354_v24  ;;  %v318_v23 = vld [vmem:[#allocation2 + $0xb0] sm:$0xff] }
  0x47   : > { %1103 = vmatmul.mubr.msk.f32.gmra.mxu0 %vm362_vm2, %v339_v25 }
  0x48   : > { %1127 = vmatmul.mubr.msk.f32.gmra.mxu1 %vm362_vm2, %v355_v26  ;;  %1105 = vmatprep.mubr.msk.f32.mxu0 %vm362_vm2, %v340_v27 }
  0x49   : > { %1129 = vmatprep.mubr.msk.f32.mxu1 %vm362_vm2, %v356_v28 }
  0x4b   : > { %1106 = vmatmul.mubr.msk.f32.gmra.mxu0 %vm362_vm2, %v341_v29 }
  0x4c   : > { %1130 = vmatmul.mubr.msk.f32.gmra.mxu1 %vm362_vm2, %v357_v30  ;;  %1108 = vmatprep.mubr.msk.f32.mxu0 %vm362_vm2, %v342_v31 }
  0x4d   : > { %1132 = vmatprep.mubr.msk.f32.mxu1 %vm362_vm2, %v358_v32 }
  0x4f   : > { %1109 = vmatmul.mubr.msk.f32.gmra.mxu0 %vm362_vm2, %v343_v33 }
  0x50   : > { %1133 = vmatmul.mubr.msk.f32.gmra.mxu1 %vm362_vm2, %v359_v34  ;;  %v305_v34 = vld [vmem:[#allocation2 + $0x48] sm:$0xff] }
  0xf3   : > { %v1089_v37 = vpop.f32.mrf.mxu0 }
  0xf4   : > { %v1113_v38 = vpop.f32.mrf.mxu1  ;;  %v689_v41 = vadd.f32 %v1089_v37, %v297_v35  ;;  %v321_v35 = vld [vmem:[#allocation2 + $0xc8] sm:$0xff] }
  0xf5   : > { %v705_v42 = vadd.f32 %v1113_v38, %v313_v36  ;;  %v529_v43 = vpop.f32.mrf.mxu0 }
  0xf6   : > { %v609_v44 = vpop.f32.mrf.mxu1  ;;  %722 = vst.msk [vmem:[#allocation2 + $0x8] sm:$0xff] %vm263_vm0, %v689_v41  ;;  %v688_v47 = vadd.f32 %v529_v43, %v296_v39 }
  0xf7   : > { %738 = vst.msk [vmem:[#allocation2 + $0x88] sm:$0xff] %vm263_vm0, %v705_v42  ;;  %v704_v48 = vadd.f32 %v609_v44, %v312_v40  ;;  %v1092_v49 = vpop.f32.mrf.mxu0 }
  0xf8   : > { %v1116_v50 = vpop.f32.mrf.mxu1  ;;  %721 = vst.msk [vmem:[#allocation2] sm:$0xff] %vm263_vm0, %v688_v47  ;;  %v691_v53 = vadd.f32 %v1092_v49, %v299_v45  ;;  %v320_v47 = vld [vmem:[#allocation2 + $0xc0] sm:$0xff] }
  0xf9   : > { %737 = vst.msk [vmem:[#allocation2 + $0x80] sm:$0xff] %vm263_vm0, %v704_v48  ;;  %v707_v54 = vadd.f32 %v1116_v50, %v315_v46  ;;  %v539_v55 = vpop.f32.mrf.mxu0  ;;  %v304_v46 = vld [vmem:[#allocation2 + $0x40] sm:$0xff] }
  0xfa   : > { %v619_v56 = vpop.f32.mrf.mxu1  ;;  %724 = vst.msk [vmem:[#allocation2 + $0x18] sm:$0xff] %vm263_vm0, %v691_v53  ;;  %v690_v59 = vadd.f32 %v539_v55, %v298_v51 }
  0xfb   : > { %740 = vst.msk [vmem:[#allocation2 + $0x98] sm:$0xff] %vm263_vm0, %v707_v54  ;;  %v706_v60 = vadd.f32 %v619_v56, %v314_v52  ;;  %v1095_v62 = vpop.f32.mrf.mxu0 }
  0xfc   : > { %v1119_v63 = vpop.f32.mrf.mxu1  ;;  %723 = vst.msk [vmem:[#allocation2 + $0x10] sm:$0xff] %vm263_vm0, %v690_v59  ;;  %v693_v2 = vadd.f32 %v1095_v62, %v301_v57  ;;  %v323_v59 = vld [vmem:[#allocation2 + $0xd8] sm:$0xff] }
  0xfd   : > { %739 = vst.msk [vmem:[#allocation2 + $0x90] sm:$0xff] %vm263_vm0, %v706_v60  ;;  %v709_v3 = vadd.f32 %v1119_v63, %v317_v58  ;;  %v757_v4 = vld [vmem:[#allocation2 + $0x8] sm:$0xff]  ;;  %v549_v6 = vpop.f32.mrf.mxu0  ;;  %v307_v58 = vld [vmem:[#allocation2 + $0x58] sm:$0xff]  ;;  %v306_v60 = vld [vmem:[#allocation2 + $0x50] sm:$0xff] }
  0xfe   : > { %v773_v5 = vld [vmem:[#allocation2 + $0x88] sm:$0xff]  ;;  %v629_v7 = vpop.f32.mrf.mxu1  ;;  %v796_v8 = vadd.f32 %v1484_v61, %v757_v4  ;;  %726 = vst.msk [vmem:[#allocation2 + $0x28] sm:$0xff] %vm263_vm0, %v693_v2  ;;  %v692_v10 = vadd.f32 %v549_v6, %v300_v0  ;;  %v322_v4 = vld [vmem:[#allocation2 + $0xd0] sm:$0xff] }
  0xff   : > { %v812_v9 = vadd.f32 %v1484_v61, %v773_v5  ;;  %742 = vst.msk [vmem:[#allocation2 + $0xa8] sm:$0xff] %vm263_vm0, %v709_v3  ;;  %v708_v11 = vadd.f32 %v629_v7, %v316_v1  ;;  %v756_v14 = vld [vmem:[#allocation2] sm:$0xff]  ;;  %v1098_v16 = vpop.f32.mrf.mxu0 }
 0x100   : > { %v772_v15 = vld [vmem:[#allocation2 + $0x80] sm:$0xff]  ;;  %v1122_v17 = vpop.f32.mrf.mxu1  ;;  %v828_v18 = vmax.f32 %v796_v8, 0.0  ;;  %v795_v20 = vadd.f32 %v1484_v61, %v756_v14  ;;  %725 = vst.msk [vmem:[#allocation2 + $0x20] sm:$0xff] %vm263_vm0, %v692_v10  ;;  %v695_v26 = vadd.f32 %v1098_v16, %v303_v12  ;;  %v325_v14 = vld [vmem:[#allocation2 + $0xe8] sm:$0xff] }
 0x101   : > { %v844_v19 = vmax.f32 %v812_v9, 0.0  ;;  %v811_v21 = vadd.f32 %v1484_v61, %v772_v15  ;;  %741 = vst.msk [vmem:[#allocation2 + $0xa0] sm:$0xff] %vm263_vm0, %v708_v11  ;;  %v759_v24 = vld [vmem:[#allocation2 + $0x18] sm:$0xff]  ;;  %v711_v27 = vadd.f32 %v1122_v17, %v319_v13  ;;  %v559_v28 = vpop.f32.mrf.mxu0  ;;  %v309_v13 = vld [vmem:[#allocation2 + $0x68] sm:$0xff] }
 0x102   : > { %v775_v25 = vld [vmem:[#allocation2 + $0x98] sm:$0xff]  ;;  %v639_v29 = vpop.f32.mrf.mxu1  ;;  %860 = vst.msk [vmem:[%s1497_s17 + $0x8] sm:$0xff] %vm263_vm0, %v828_v18  ;;  %v827_v30 = vmax.f32 %v795_v20, 0.0  ;;  %v798_v32 = vadd.f32 %v1484_v61, %v759_v24  ;;  %728 = vst.msk [vmem:[#allocation2 + $0x38] sm:$0xff] %vm263_vm0, %v695_v26  ;;  %v694_v38 = vadd.f32 %v559_v28, %v302_v22  ;;  %v324_v26 = vld [vmem:[#allocation2 + $0xe0] sm:$0xff] }
 0x103   : > { %876 = vst.msk [vmem:[%s1497_s17 + $0x88] sm:$0xff] %vm263_vm0, %v844_v19  ;;  %v843_v31 = vmax.f32 %v811_v21, 0.0  ;;  %v814_v33 = vadd.f32 %v1484_v61, %v775_v25  ;;  %v758_v36 = vld [vmem:[#allocation2 + $0x10] sm:$0xff]  ;;  %744 = vst.msk [vmem:[#allocation2 + $0xb8] sm:$0xff] %vm263_vm0, %v711_v27  ;;  %v710_v39 = vadd.f32 %v639_v29, %v318_v23  ;;  %v1101_v40 = vpop.f32.mrf.mxu0  ;;  %v308_v25 = vld [vmem:[#allocation2 + $0x60] sm:$0xff] }
 0x104   : > { %v774_v37 = vld [vmem:[#allocation2 + $0x90] sm:$0xff]  ;;  %v1125_v41 = vpop.f32.mrf.mxu1  ;;  %859 = vst.msk [vmem:[%s1497_s17] sm:$0xff] %vm263_vm0, %v827_v30  ;;  %v830_v42 = vmax.f32 %v798_v32, 0.0  ;;  %v797_v44 = vadd.f32 %v1484_v61, %v758_v36  ;;  %727 = vst.msk [vmem:[#allocation2 + $0x30] sm:$0xff] %vm263_vm0, %v694_v38  ;;  %v697_v50 = vadd.f32 %v1101_v40, %v305_v34  ;;  %v327_v38 = vld [vmem:[#allocation2 + $0xf8] sm:$0xff] }
 0x105   : > { %875 = vst.msk [vmem:[%s1497_s17 + $0x80] sm:$0xff] %vm263_vm0, %v843_v31  ;;  %v846_v43 = vmax.f32 %v814_v33, 0.0  ;;  %v813_v45 = vadd.f32 %v1484_v61, %v774_v37  ;;  %v761_v48 = vld [vmem:[#allocation2 + $0x28] sm:$0xff]  ;;  %743 = vst.msk [vmem:[#allocation2 + $0xb0] sm:$0xff] %vm263_vm0, %v710_v39  ;;  %v713_v51 = vadd.f32 %v1125_v41, %v321_v35  ;;  %v569_v52 = vpop.f32.mrf.mxu0  ;;  %v311_v37 = vld [vmem:[#allocation2 + $0x78] sm:$0xff] }
 0x106   : > { %v777_v49 = vld [vmem:[#allocation2 + $0xa8] sm:$0xff]  ;;  %v649_v53 = vpop.f32.mrf.mxu1  ;;  %862 = vst.msk [vmem:[%s1497_s17 + $0x18] sm:$0xff] %vm263_vm0, %v830_v42  ;;  %v829_v54 = vmax.f32 %v797_v44, 0.0  ;;  %v800_v56 = vadd.f32 %v1484_v61, %v761_v48  ;;  %730 = vst.msk [vmem:[#allocation2 + $0x48] sm:$0xff] %vm263_vm0, %v697_v50  ;;  %v696_v0 = vadd.f32 %v569_v52, %v304_v46  ;;  %v326_v50 = vld [vmem:[#allocation2 + $0xf0] sm:$0xff] }
 0x107   : > { %878 = vst.msk [vmem:[%s1497_s17 + $0x98] sm:$0xff] %vm263_vm0, %v846_v43  ;;  %v845_v55 = vmax.f32 %v813_v45, 0.0  ;;  %v816_v57 = vadd.f32 %v1484_v61, %v777_v49  ;;  %v760_v62 = vld [vmem:[#allocation2 + $0x20] sm:$0xff]  ;;  %746 = vst.msk [vmem:[#allocation2 + $0xc8] sm:$0xff] %vm263_vm0, %v713_v51  ;;  %v712_v1 = vadd.f32 %v649_v53, %v320_v47  ;;  %v1104_v2 = vpop.f32.mrf.mxu0  ;;  %v310_v49 = vld [vmem:[#allocation2 + $0x70] sm:$0xff] }
 0x108   : > { %v776_v63 = vld [vmem:[#allocation2 + $0xa0] sm:$0xff]  ;;  %v1128_v3 = vpop.f32.mrf.mxu1  ;;  %861 = vst.msk [vmem:[%s1497_s17 + $0x10] sm:$0xff] %vm263_vm0, %v829_v54  ;;  %v832_v5 = vmax.f32 %v800_v56, 0.0  ;;  %v799_v7 = vadd.f32 %v1484_v61, %v760_v62  ;;  %729 = vst.msk [vmem:[#allocation2 + $0x40] sm:$0xff] %vm263_vm0, %v696_v0  ;;  %v699_v9 = vadd.f32 %v1104_v2, %v307_v58 }
 0x109   : > { %877 = vst.msk [vmem:[%s1497_s17 + $0x90] sm:$0xff] %vm263_vm0, %v845_v55  ;;  %v848_v6 = vmax.f32 %v816_v57, 0.0  ;;  %v815_v8 = vadd.f32 %v1484_v61, %v776_v63  ;;  %745 = vst.msk [vmem:[#allocation2 + $0xc0] sm:$0xff] %vm263_vm0, %v712_v1  ;;  %v715_v10 = vadd.f32 %v1128_v3, %v323_v59  ;;  %v579_v11 = vpop.f32.mrf.mxu0  ;;  %v763_v17 = vld [vmem:[#allocation2 + $0x38] sm:$0xff] }
 0x10a   : > { %v659_v12 = vpop.f32.mrf.mxu1  ;;  %864 = vst.msk [vmem:[%s1497_s17 + $0x28] sm:$0xff] %vm263_vm0, %v832_v5  ;;  %v831_v15 = vmax.f32 %v799_v7, 0.0  ;;  %v779_v18 = vld [vmem:[#allocation2 + $0xb8] sm:$0xff]  ;;  %v698_v19 = vadd.f32 %v579_v11, %v306_v60  ;;  %v802_v21 = vadd.f32 %v1484_v61, %v763_v17  ;;  %732 = vst.msk [vmem:[#allocation2 + $0x58] sm:$0xff] %vm263_vm0, %v699_v9 }
 0x10b   : > { %880 = vst.msk [vmem:[%s1497_s17 + $0xa8] sm:$0xff] %vm263_vm0, %v848_v6  ;;  %v847_v16 = vmax.f32 %v815_v8, 0.0  ;;  %v714_v20 = vadd.f32 %v659_v12, %v322_v4  ;;  %v818_v22 = vadd.f32 %v1484_v61, %v779_v18  ;;  %748 = vst.msk [vmem:[#allocation2 + $0xd8] sm:$0xff] %vm263_vm0, %v715_v10  ;;  %v1107_v23 = vpop.f32.mrf.mxu0  ;;  %v762_v27 = vld [vmem:[#allocation2 + $0x30] sm:$0xff] }
 0x10c   : > { %v1131_v24 = vpop.f32.mrf.mxu1  ;;  %863 = vst.msk [vmem:[%s1497_s17 + $0x20] sm:$0xff] %vm263_vm0, %v831_v15  ;;  %v778_v28 = vld [vmem:[#allocation2 + $0xb0] sm:$0xff]  ;;  %731 = vst.msk [vmem:[#allocation2 + $0x50] sm:$0xff] %vm263_vm0, %v698_v19  ;;  %v701_v29 = vadd.f32 %v1107_v23, %v309_v13  ;;  %v834_v31 = vmax.f32 %v802_v21, 0.0  ;;  %v801_v33 = vadd.f32 %v1484_v61, %v762_v27 }
 0x10d   : > { %879 = vst.msk [vmem:[%s1497_s17 + $0xa0] sm:$0xff] %vm263_vm0, %v847_v16  ;;  %747 = vst.msk [vmem:[#allocation2 + $0xd0] sm:$0xff] %vm263_vm0, %v714_v20  ;;  %v717_v30 = vadd.f32 %v1131_v24, %v325_v14  ;;  %v850_v32 = vmax.f32 %v818_v22, 0.0  ;;  %v817_v34 = vadd.f32 %v1484_v61, %v778_v28  ;;  %v589_v35 = vpop.f32.mrf.mxu0  ;;  %v765_v39 = vld [vmem:[#allocation2 + $0x48] sm:$0xff] }
 0x10e   : > { %v669_v36 = vpop.f32.mrf.mxu1  ;;  %v781_v40 = vld [vmem:[#allocation2 + $0xc8] sm:$0xff]  ;;  %734 = vst.msk [vmem:[#allocation2 + $0x68] sm:$0xff] %vm263_vm0, %v701_v29  ;;  %v700_v41 = vadd.f32 %v589_v35, %v308_v25  ;;  %866 = vst.msk [vmem:[%s1497_s17 + $0x38] sm:$0xff] %vm263_vm0, %v834_v31  ;;  %v833_v43 = vmax.f32 %v801_v33, 0.0  ;;  %v804_v45 = vadd.f32 %v1484_v61, %v765_v39 }
 0x10f   : > { %750 = vst.msk [vmem:[#allocation2 + $0xe8] sm:$0xff] %vm263_vm0, %v717_v30  ;;  %v716_v42 = vadd.f32 %v669_v36, %v324_v26  ;;  %882 = vst.msk [vmem:[%s1497_s17 + $0xb8] sm:$0xff] %vm263_vm0, %v850_v32  ;;  %v849_v44 = vmax.f32 %v817_v34, 0.0  ;;  %v820_v46 = vadd.f32 %v1484_v61, %v781_v40  ;;  %v1110_v47 = vpop.f32.mrf.mxu0  ;;  %v764_v51 = vld [vmem:[#allocation2 + $0x40] sm:$0xff] }
 0x110   : > { %v1134_v48 = vpop.f32.mrf.mxu1  ;;  %v780_v52 = vld [vmem:[#allocation2 + $0xc0] sm:$0xff]  ;;  %733 = vst.msk [vmem:[#allocation2 + $0x60] sm:$0xff] %vm263_vm0, %v700_v41  ;;  %v703_v53 = vadd.f32 %v1110_v47, %v311_v37  ;;  %865 = vst.msk [vmem:[%s1497_s17 + $0x30] sm:$0xff] %vm263_vm0, %v833_v43  ;;  %v836_v55 = vmax.f32 %v804_v45, 0.0  ;;  %v803_v57 = vadd.f32 %v1484_v61, %v764_v51 }
 0x111   : > { %749 = vst.msk [vmem:[#allocation2 + $0xe0] sm:$0xff] %vm263_vm0, %v716_v42  ;;  %v719_v54 = vadd.f32 %v1134_v48, %v327_v38  ;;  %881 = vst.msk [vmem:[%s1497_s17 + $0xb0] sm:$0xff] %vm263_vm0, %v849_v44  ;;  %v852_v56 = vmax.f32 %v820_v46, 0.0  ;;  %v819_v58 = vadd.f32 %v1484_v61, %v780_v52  ;;  %v599_v59 = vpop.f32.mrf.mxu0  ;;  %v767_v62 = vld [vmem:[#allocation2 + $0x58] sm:$0xff] }
 0x112   : > { %v679_v60 = vpop.f32.mrf.mxu1  ;;  %v783_v63 = vld [vmem:[#allocation2 + $0xd8] sm:$0xff]  ;;  %736 = vst.msk [vmem:[#allocation2 + $0x78] sm:$0xff] %vm263_vm0, %v703_v53  ;;  %v702_v0 = vadd.f32 %v599_v59, %v310_v49  ;;  %868 = vst.msk [vmem:[%s1497_s17 + $0x48] sm:$0xff] %vm263_vm0, %v836_v55  ;;  %v835_v2 = vmax.f32 %v803_v57, 0.0  ;;  %v806_v4 = vadd.f32 %v1484_v61, %v767_v62 }
 0x113   : > { %752 = vst.msk [vmem:[#allocation2 + $0xf8] sm:$0xff] %vm263_vm0, %v719_v54  ;;  %v718_v1 = vadd.f32 %v679_v60, %v326_v50  ;;  %884 = vst.msk [vmem:[%s1497_s17 + $0xc8] sm:$0xff] %vm263_vm0, %v852_v56  ;;  %v851_v3 = vmax.f32 %v819_v58, 0.0  ;;  %v822_v5 = vadd.f32 %v1484_v61, %v783_v63  ;;  %v766_v6 = vld [vmem:[#allocation2 + $0x50] sm:$0xff] }
 0x114   : > { %v782_v7 = vld [vmem:[#allocation2 + $0xd0] sm:$0xff]  ;;  %v805_v8 = vadd.f32 %v1484_v61, %v766_v6  ;;  %735 = vst.msk [vmem:[#allocation2 + $0x70] sm:$0xff] %vm263_vm0, %v702_v0  ;;  %867 = vst.msk [vmem:[%s1497_s17 + $0x40] sm:$0xff] %vm263_vm0, %v835_v2  ;;  %v838_v10 = vmax.f32 %v806_v4, 0.0 }
 0x115   : > { %v821_v9 = vadd.f32 %v1484_v61, %v782_v7  ;;  %751 = vst.msk [vmem:[#allocation2 + $0xf0] sm:$0xff] %vm263_vm0, %v718_v1  ;;  %883 = vst.msk [vmem:[%s1497_s17 + $0xc0] sm:$0xff] %vm263_vm0, %v851_v3  ;;  %v854_v11 = vmax.f32 %v822_v5, 0.0  ;;  %v769_v12 = vld [vmem:[#allocation2 + $0x68] sm:$0xff] }
 0x116   : > { %v785_v13 = vld [vmem:[#allocation2 + $0xe8] sm:$0xff]  ;;  %v837_v14 = vmax.f32 %v805_v8, 0.0  ;;  %v808_v16 = vadd.f32 %v1484_v61, %v769_v12  ;;  %870 = vst.msk [vmem:[%s1497_s17 + $0x58] sm:$0xff] %vm263_vm0, %v838_v10 }
 0x117   : > { %v853_v15 = vmax.f32 %v821_v9, 0.0  ;;  %v824_v17 = vadd.f32 %v1484_v61, %v785_v13  ;;  %886 = vst.msk [vmem:[%s1497_s17 + $0xd8] sm:$0xff] %vm263_vm0, %v854_v11  ;;  %v768_v18 = vld [vmem:[#allocation2 + $0x60] sm:$0xff] }
 0x118   : > { %v784_v19 = vld [vmem:[#allocation2 + $0xe0] sm:$0xff]  ;;  %869 = vst.msk [vmem:[%s1497_s17 + $0x50] sm:$0xff] %vm263_vm0, %v837_v14  ;;  %v840_v20 = vmax.f32 %v808_v16, 0.0  ;;  %v807_v22 = vadd.f32 %v1484_v61, %v768_v18 }
 0x119   : > { %885 = vst.msk [vmem:[%s1497_s17 + $0xd0] sm:$0xff] %vm263_vm0, %v853_v15  ;;  %v856_v21 = vmax.f32 %v824_v17, 0.0  ;;  %v823_v23 = vadd.f32 %v1484_v61, %v784_v19  ;;  %v771_v24 = vld [vmem:[#allocation2 + $0x78] sm:$0xff] }
 0x11a   : > { %v787_v25 = vld [vmem:[#allocation2 + $0xf8] sm:$0xff]  ;;  %872 = vst.msk [vmem:[%s1497_s17 + $0x68] sm:$0xff] %vm263_vm0, %v840_v20  ;;  %v839_v26 = vmax.f32 %v807_v22, 0.0  ;;  %v810_v28 = vadd.f32 %v1484_v61, %v771_v24 }
 0x11b   : > { %888 = vst.msk [vmem:[%s1497_s17 + $0xe8] sm:$0xff] %vm263_vm0, %v856_v21  ;;  %v855_v27 = vmax.f32 %v823_v23, 0.0  ;;  %v826_v29 = vadd.f32 %v1484_v61, %v787_v25  ;;  %v770_v30 = vld [vmem:[#allocation2 + $0x70] sm:$0xff] }
 0x11c   : > { %v786_v31 = vld [vmem:[#allocation2 + $0xf0] sm:$0xff]  ;;  %871 = vst.msk [vmem:[%s1497_s17 + $0x60] sm:$0xff] %vm263_vm0, %v839_v26  ;;  %v842_v32 = vmax.f32 %v810_v28, 0.0  ;;  %v809_v34 = vadd.f32 %v1484_v61, %v770_v30 }
 0x11d   : > { %887 = vst.msk [vmem:[%s1497_s17 + $0xe0] sm:$0xff] %vm263_vm0, %v855_v27  ;;  %v858_v33 = vmax.f32 %v826_v29, 0.0  ;;  %v825_v35 = vadd.f32 %v1484_v61, %v786_v31 }
 0x11e   : > { %874 = vst.msk [vmem:[%s1497_s17 + $0x78] sm:$0xff] %vm263_vm0, %v842_v32  ;;  %v841_v36 = vmax.f32 %v809_v34, 0.0 }
 0x11f   : > { %890 = vst.msk [vmem:[%s1497_s17 + $0xf8] sm:$0xff] %vm263_vm0, %v858_v33  ;;  %v857_v37 = vmax.f32 %v825_v35, 0.0 }
 0x120   : > { %873 = vst.msk [vmem:[%s1497_s17 + $0x70] sm:$0xff] %vm263_vm0, %v841_v36 }
 0x121   : > { %889 = vst.msk [vmem:[%s1497_s17 + $0xf0] sm:$0xff] %vm263_vm0, %v857_v37 }
 0x122 PF: > { %s15_s14 = sadd.s32 1, %s1269_s14   ;;  %s1632_s12 = smov %s1265_s13 }
 0x123   : > { %p12_p3 = scmp.ge.s32.totalorder %s15_s14, 4   ;;  %s1633_s13 = smov %s1635_s16 }
 0x125   :  { %14 = sbr.rel (!%p12_p3) target bundleno = 3 (0x3), region = 81 }
 0x12a   :  { %919 = vsyncpa [#allocation4], 1 }
 0x12b   :  { %921 = vsyncpa [#allocation4 + $0x1], 1 }
 0x12c   :  { %922 = vsyncpa [#allocation6], 1 }

// kernel: graph_vae_forward.5
= control target key start
LH: loop header
LB: loop body
LE: loop exit
PB: predicated region body
PF: predicated region fallthrough
CT: control target
= control target key end

     0   :  { %s1605_s12 = smov 0   ;;  %s1607_s13 = smov 0   ;;  %s2179_s0 = inlined_call_operand.vmem [shape: f32[512,288], index: 0, kind: input, shape index: {}]   ;;  %s2180_s1 = inlined_call_operand.vmem [shape: f32[288,64], index: 1, kind: input, shape index: {}]   ;;  %s2181_s2 = inlined_call_operand.vmem [shape: f32[1,64], index: 2, kind: input, shape index: {}]   ;;  %s2182_s3 = inlined_call_operand.vmem [shape: f32[512,64], index: 3, kind: output, shape index: {}]  }
   0x1   :  { %s1609_s14 = smov 0  }
   0x2 LB: > { %s32_s15 = sadd.s32 1, %s1578_s13  ;;  %p1338_p0 = scmp.ge.s32.totalorder %s1582_s14, 1  ;;  %s1582_s14 = sphi %s1609_s14, %s13_s14   ;;  %s1578_s13 = sphi %s1607_s13, %s2184_s13   ;;  %s1574_s12 = sphi %s1605_s12, %s2183_s12  }
   0x3   : > { %p34_p1 = scmp.ge.s32.totalorder %s32_s15, 2  ;;  %p191_p2 = scmp.lt.s32.totalorder %s1582_s14, 3 }
   0x5   : > { %s2186_s15 = smov (%p34_p1, %s32_s15), 0  ;;  %p192_p3 = pnand %p1338_p0, %p191_p2 }
   0x6   : > { %s1339_s16 = sshll.u32 (!%p192_p3), %s1574_s12, 5 }
   0x7   : > { %195 = sbr.rel (%p192_p3) target bundleno = 382 (0x17e), region = 32  ;;  %p236_p4 = scmp.lt.s32.totalorder (!%p192_p3), %s1339_s16, 63 }
   0xc   : > { %v447_v0 = vld [vmem:[%s2180_s1 + $0x78] sm:$0xff]  ;;  %v1584_v1 = vmov 0.0   ;;  %v446_v2 = vld [vmem:[%s2180_s1 + $0x70] sm:$0xff]  ;;  %v445_v3 = vld [vmem:[%s2180_s1 + $0x68] sm:$0xff]  ;;  %s2188_s16 = smov (!%p236_p4, %s1339_s16), 63  ;;  %vm468_vm0 = vcmask 261120  }
   0xd   : > { %565 = vmatprep.subr.mxu0 %v1584_v1  ;;  %1470 = vmatprep.subr.mxu1 %v1584_v1  ;;  %v444_v4 = vld [vmem:[%s2180_s1 + $0x60] sm:$0xff]  ;;  %v443_v5 = vld [vmem:[%s2180_s1 + $0x58] sm:$0xff]  ;;  %v442_v6 = vld [vmem:[%s2180_s1 + $0x50] sm:$0xff]  ;;  %s1534_s28 = smul.u32 24, %s2188_s16  ;;  %vm271_vm1 = vcmask 523264   ;;  %s1342_s25 = sshll.u32 %s2188_s16, 3 }
   0xe   : > { %566 = vmatpush1.msra.mxu0 %v447_v0  ;;  %1502 = vmatpush1.msra.mxu1 %v447_v0  ;;  %v441_v7 = vld [vmem:[%s2180_s1 + $0x48] sm:$0xff]  ;;  %v440_v8 = vld [vmem:[%s2180_s1 + $0x40] sm:$0xff]  ;;  %v439_v9 = vld [vmem:[%s2180_s1 + $0x38] sm:$0xff]  ;;  %273 = vst.msk [vmem:[#allocation2 + $0x8] sm:$0xff] %vm271_vm1, %v1584_v1 }
   0xf   : > { %567 = vmatprep.subr.mxu0 %v1584_v1  ;;  %1471 = vmatprep.subr.mxu1 %v1584_v1  ;;  %v438_v10 = vld [vmem:[%s2180_s1 + $0x30] sm:$0xff]  ;;  %v437_v11 = vld [vmem:[%s2180_s1 + $0x28] sm:$0xff]  ;;  %v436_v12 = vld [vmem:[%s2180_s1 + $0x20] sm:$0xff]  ;;  %s1785_s8 = scalar_lea.vmem %s2179_s0, %s1534_s28  ;;  %272 = vst.msk [vmem:[#allocation2] sm:$0xff] %vm271_vm1, %v1584_v1  ;;  %s2033_s28 = scalar_lea.vmem %s2182_s3, %s1342_s25 }
  0x10   : > { %568 = vmatpush1.msra.mxu0 %v446_v2  ;;  %1503 = vmatpush1.msra.mxu1 %v446_v2  ;;  %v435_v13 = vld [vmem:[%s2180_s1 + $0x18] sm:$0xff]  ;;  %v434_v14 = vld [vmem:[%s2180_s1 + $0x10] sm:$0xff]  ;;  %v433_v15 = vld [vmem:[%s2180_s1 + $0x8] sm:$0xff]  ;;  %274 = vst.msk [vmem:[#allocation2 + $0x10] sm:$0xff] %vm271_vm1, %v1584_v1 }
  0x11   : > { %569 = vmatprep.subr.mxu0 %v1584_v1  ;;  %1472 = vmatprep.subr.mxu1 %v1584_v1  ;;  %v432_v16 = vld [vmem:[%s2180_s1] sm:$0xff]  ;;  %v463_v17 = vld [vmem:[%s2180_s1 + $0xf8] sm:$0xff]  ;;  %v462_v18 = vld [vmem:[%s2180_s1 + $0xf0] sm:$0xff]  ;;  %275 = vst.msk [vmem:[#allocation2 + $0x18] sm:$0xff] %vm271_vm1, %v1584_v1 }
  0x12   : > { %570 = vmatpush1.msra.mxu0 %v445_v3  ;;  %1504 = vmatpush1.msra.mxu1 %v445_v3  ;;  %v461_v19 = vld [vmem:[%s2180_s1 + $0xe8] sm:$0xff]  ;;  %v460_v20 = vld [vmem:[%s2180_s1 + $0xe0] sm:$0xff]  ;;  %v459_v21 = vld [vmem:[%s2180_s1 + $0xd8] sm:$0xff]  ;;  %276 = vst.msk [vmem:[#allocation2 + $0x20] sm:$0xff] %vm271_vm1, %v1584_v1 }
  0x13   : > { %571 = vmatprep.subr.mxu0 %v1584_v1  ;;  %1473 = vmatprep.subr.mxu1 %v1584_v1  ;;  %v458_v22 = vld [vmem:[%s2180_s1 + $0xd0] sm:$0xff]  ;;  %v457_v23 = vld [vmem:[%s2180_s1 + $0xc8] sm:$0xff]  ;;  %v456_v24 = vld [vmem:[%s2180_s1 + $0xc0] sm:$0xff]  ;;  %277 = vst.msk [vmem:[#allocation2 + $0x28] sm:$0xff] %vm271_vm1, %v1584_v1 }
  0x14   : > { %572 = vmatpush1.msra.mxu0 %v444_v4  ;;  %1505 = vmatpush1.msra.mxu1 %v444_v4  ;;  %v455_v25 = vld [vmem:[%s2180_s1 + $0xb8] sm:$0xff]  ;;  %v454_v26 = vld [vmem:[%s2180_s1 + $0xb0] sm:$0xff]  ;;  %v453_v27 = vld [vmem:[%s2180_s1 + $0xa8] sm:$0xff]  ;;  %278 = vst.msk [vmem:[#allocation2 + $0x30] sm:$0xff] %vm271_vm1, %v1584_v1 }
  0x15   : > { %573 = vmatprep.subr.mxu0 %v1584_v1  ;;  %1474 = vmatprep.subr.mxu1 %v1584_v1  ;;  %v452_v28 = vld [vmem:[%s2180_s1 + $0xa0] sm:$0xff]  ;;  %v451_v29 = vld [vmem:[%s2180_s1 + $0x98] sm:$0xff]  ;;  %v450_v30 = vld [vmem:[%s2180_s1 + $0x90] sm:$0xff]  ;;  %279 = vst.msk [vmem:[#allocation2 + $0x38] sm:$0xff] %vm271_vm1, %v1584_v1 }
  0x16   : > { %574 = vmatpush1.msra.mxu0 %v443_v5  ;;  %1506 = vmatpush1.msra.mxu1 %v443_v5  ;;  %v449_v31 = vld [vmem:[%s2180_s1 + $0x88] sm:$0xff]  ;;  %v448_v32 = vld [vmem:[%s2180_s1 + $0x80] sm:$0xff]  ;;  %v467_v37 = vld [vmem:[%s2180_s1 + $0x118] sm:$0xff]  ;;  %280 = vst.msk [vmem:[#allocation2 + $0x40] sm:$0xff] %vm271_vm1, %v1584_v1 }
  0x17   : > { %575 = vmatprep.subr.mxu0 %v1584_v1  ;;  %1475 = vmatprep.subr.mxu1 %v1584_v1  ;;  %v337_v33 = vld [vmem:[%s1785_s8 + $0x8] sm:$0xff]  ;;  %v336_v35 = vld [vmem:[%s1785_s8] sm:$0xff]  ;;  %v466_v40 = vld [vmem:[%s2180_s1 + $0x110] sm:$0xff]  ;;  %281 = vst.msk [vmem:[#allocation2 + $0x48] sm:$0xff] %vm271_vm1, %v1584_v1 }
  0x18   : > { %576 = vmatpush1.msra.mxu0 %v442_v6  ;;  %1507 = vmatpush1.msra.mxu1 %v442_v6  ;;  %v409_v34 = vld [vmem:[%s1785_s8 + $0x248] sm:$0xff]  ;;  %v408_v36 = vld [vmem:[%s1785_s8 + $0x240] sm:$0xff]  ;;  %v339_v41 = vld [vmem:[%s1785_s8 + $0x18] sm:$0xff]  ;;  %282 = vst.msk [vmem:[#allocation2 + $0x50] sm:$0xff] %vm271_vm1, %v1584_v1 }
  0x19   : > { %577 = vmatprep.subr.mxu0 %v1584_v1  ;;  %1476 = vmatprep.subr.mxu1 %v1584_v1  ;;  %v340_v38 = vld [vmem:[%s1785_s8 + $0x20] sm:$0xff]  ;;  %v411_v42 = vld [vmem:[%s1785_s8 + $0x258] sm:$0xff]  ;;  %v465_v45 = vld [vmem:[%s2180_s1 + $0x108] sm:$0xff]  ;;  %283 = vst.msk [vmem:[#allocation2 + $0x58] sm:$0xff] %vm271_vm1, %v1584_v1 }
  0x1a   : > { %578 = vmatpush1.msra.mxu0 %v441_v7  ;;  %1508 = vmatpush1.msra.mxu1 %v441_v7  ;;  %v412_v39 = vld [vmem:[%s1785_s8 + $0x260] sm:$0xff]  ;;  %v343_v43 = vld [vmem:[%s1785_s8 + $0x38] sm:$0xff]  ;;  %v342_v46 = vld [vmem:[%s1785_s8 + $0x30] sm:$0xff]  ;;  %284 = vst.msk [vmem:[#allocation2 + $0x60] sm:$0xff] %vm271_vm1, %v1584_v1 }
  0x1b   : > { %579 = vmatprep.subr.mxu0 %v1584_v1  ;;  %1477 = vmatprep.subr.mxu1 %v1584_v1  ;;  %v415_v44 = vld [vmem:[%s1785_s8 + $0x278] sm:$0xff]  ;;  %v414_v47 = vld [vmem:[%s1785_s8 + $0x270] sm:$0xff]  ;;  %v464_v50 = vld [vmem:[%s2180_s1 + $0x100] sm:$0xff]  ;;  %285 = vst.msk [vmem:[#allocation2 + $0x68] sm:$0xff] %vm271_vm1, %v1584_v1 }
  0x1c   : > { %580 = vmatpush1.msra.mxu0 %v440_v8  ;;  %1509 = vmatpush1.msra.mxu1 %v440_v8  ;;  %v346_v48 = vld [vmem:[%s1785_s8 + $0x50] sm:$0xff]  ;;  %v345_v51 = vld [vmem:[%s1785_s8 + $0x48] sm:$0xff]  ;;  %v348_v55 = vld [vmem:[%s1785_s8 + $0x60] sm:$0xff]  ;;  %286 = vst.msk [vmem:[#allocation2 + $0x70] sm:$0xff] %vm271_vm1, %v1584_v1 }
  0x1d   : > { %581 = vmatprep.subr.mxu0 %v1584_v1  ;;  %1478 = vmatprep.subr.mxu1 %v1584_v1  ;;  %v418_v49 = vld [vmem:[%s1785_s8 + $0x290] sm:$0xff]  ;;  %v417_v52 = vld [vmem:[%s1785_s8 + $0x288] sm:$0xff]  ;;  %v420_v56 = vld [vmem:[%s1785_s8 + $0x2a0] sm:$0xff]  ;;  %287 = vst.msk [vmem:[#allocation2 + $0x78] sm:$0xff] %vm271_vm1, %v1584_v1 }
  0x1e   : > { %582 = vmatpush1.msra.mxu0 %v439_v9  ;;  %1510 = vmatpush1.msra.mxu1 %v439_v9  ;;  %v349_v53 = vld [vmem:[%s1785_s8 + $0x68] sm:$0xff]  ;;  %v352_v57 = vld [vmem:[%s1785_s8 + $0x80] sm:$0xff]  ;;  %v351_v59 = vld [vmem:[%s1785_s8 + $0x78] sm:$0xff]  ;;  %288 = vst.msk [vmem:[#allocation2 + $0x80] sm:$0xff] %vm271_vm1, %v1584_v1 }
  0x1f   : > { %583 = vmatprep.subr.mxu0 %v1584_v1  ;;  %1479 = vmatprep.subr.mxu1 %v1584_v1  ;;  %v421_v54 = vld [vmem:[%s1785_s8 + $0x2a8] sm:$0xff]  ;;  %v424_v58 = vld [vmem:[%s1785_s8 + $0x2c0] sm:$0xff]  ;;  %v423_v60 = vld [vmem:[%s1785_s8 + $0x2b8] sm:$0xff]  ;;  %289 = vst.msk [vmem:[#allocation2 + $0x88] sm:$0xff] %vm271_vm1, %v1584_v1 }
  0x20   : > { %584 = vmatpush1.msra.mxu0 %v438_v10  ;;  %1511 = vmatpush1.msra.mxu1 %v438_v10  ;;  %v355_v61 = vld [vmem:[%s1785_s8 + $0x98] sm:$0xff]  ;;  %v354_v63 = vld [vmem:[%s1785_s8 + $0x90] sm:$0xff]  ;;  %v357_v4 = vld [vmem:[%s1785_s8 + $0xa8] sm:$0xff]  ;;  %290 = vst.msk [vmem:[#allocation2 + $0x90] sm:$0xff] %vm271_vm1, %v1584_v1 }
  0x21   : > { %585 = vmatprep.subr.mxu0 %v1584_v1  ;;  %1480 = vmatprep.subr.mxu1 %v1584_v1  ;;  %v427_v62 = vld [vmem:[%s1785_s8 + $0x2d8] sm:$0xff]  ;;  %v426_v0 = vld [vmem:[%s1785_s8 + $0x2d0] sm:$0xff]  ;;  %v429_v5 = vld [vmem:[%s1785_s8 + $0x2e8] sm:$0xff]  ;;  %291 = vst.msk [vmem:[#allocation2 + $0x98] sm:$0xff] %vm271_vm1, %v1584_v1 }
  0x22   : > { %586 = vmatpush1.msra.mxu0 %v437_v11  ;;  %1512 = vmatpush1.msra.mxu1 %v437_v11  ;;  %v358_v2 = vld [vmem:[%s1785_s8 + $0xb0] sm:$0xff]  ;;  %v361_v6 = vld [vmem:[%s1785_s8 + $0xc8] sm:$0xff]  ;;  %v360_v8 = vld [vmem:[%s1785_s8 + $0xc0] sm:$0xff]  ;;  %292 = vst.msk [vmem:[#allocation2 + $0xa0] sm:$0xff] %vm271_vm1, %v1584_v1 }
  0x23   : > { %587 = vmatprep.subr.mxu0 %v1584_v1  ;;  %1481 = vmatprep.subr.mxu1 %v1584_v1  ;;  %v430_v3 = vld [vmem:[%s1785_s8 + $0x2f0] sm:$0xff]  ;;  %v341_v9 = vld [vmem:[%s1785_s8 + $0x28] sm:$0xff]  ;;  %v364_v10 = vld [vmem:[%s1785_s8 + $0xe0] sm:$0xff]  ;;  %293 = vst.msk [vmem:[#allocation2 + $0xa8] sm:$0xff] %vm271_vm1, %v1584_v1 }
  0x24   : > { %588 = vmatpush1.msra.mxu0 %v436_v12  ;;  %1513 = vmatpush1.msra.mxu1 %v436_v12  ;;  %v338_v7 = vld [vmem:[%s1785_s8 + $0x10] sm:$0xff]  ;;  %v344_v11 = vld [vmem:[%s1785_s8 + $0x40] sm:$0xff]  ;;  %v363_v12 = vld [vmem:[%s1785_s8 + $0xd8] sm:$0xff]  ;;  %294 = vst.msk [vmem:[#allocation2 + $0xb0] sm:$0xff] %vm271_vm1, %v1584_v1 }
  0x25   : > { %589 = vmatprep.subr.mxu0 %v1584_v1  ;;  %1482 = vmatprep.subr.mxu1 %v1584_v1  ;;  %295 = vst.msk [vmem:[#allocation2 + $0xb8] sm:$0xff] %vm271_vm1, %v1584_v1  ;;  %296 = vst.msk [vmem:[#allocation2 + $0xc0] sm:$0xff] %vm271_vm1, %v1584_v1 }
  0x26   : > { %590 = vmatpush1.msra.mxu0 %v435_v13  ;;  %1514 = vmatpush1.msra.mxu1 %v435_v13  ;;  %v347_v13 = vld [vmem:[%s1785_s8 + $0x58] sm:$0xff]  ;;  %297 = vst.msk [vmem:[#allocation2 + $0xc8] sm:$0xff] %vm271_vm1, %v1584_v1  ;;  %298 = vst.msk [vmem:[#allocation2 + $0xd0] sm:$0xff] %vm271_vm1, %v1584_v1 }
  0x27   : > { %591 = vmatprep.subr.mxu0 %v1584_v1  ;;  %1483 = vmatprep.subr.mxu1 %v1584_v1  ;;  %299 = vst.msk [vmem:[#allocation2 + $0xd8] sm:$0xff] %vm271_vm1, %v1584_v1  ;;  %300 = vst.msk [vmem:[#allocation2 + $0xe0] sm:$0xff] %vm271_vm1, %v1584_v1 }
  0x28   : > { %592 = vmatpush1.msra.mxu0 %v434_v14  ;;  %1515 = vmatpush1.msra.mxu1 %v434_v14  ;;  %v367_v14 = vld [vmem:[%s1785_s8 + $0xf8] sm:$0xff]  ;;  %301 = vst.msk [vmem:[#allocation2 + $0xe8] sm:$0xff] %vm271_vm1, %v1584_v1  ;;  %302 = vst.msk [vmem:[#allocation2 + $0xf0] sm:$0xff] %vm271_vm1, %v1584_v1 }
  0x29   : > { %593 = vmatprep.subr.mxu0 %v1584_v1  ;;  %1484 = vmatprep.subr.mxu1 %v1584_v1  ;;  %303 = vst.msk [vmem:[#allocation2 + $0xf8] sm:$0xff] %vm271_vm1, %v1584_v1 }
  0x2a   : > { %594 = vmatpush1.msra.mxu0 %v433_v15  ;;  %1516 = vmatpush1.msra.mxu1 %v433_v15  ;;  %v350_v15 = vld [vmem:[%s1785_s8 + $0x70] sm:$0xff] }
  0x2b   : > { %595 = vmatprep.subr.mxu0 %v1584_v1  ;;  %1485 = vmatprep.subr.mxu1 %v1584_v1 }
  0x2c   : > { %596 = vmatpush1.msra.mxu0 %v432_v16  ;;  %1517 = vmatpush1.msra.mxu1 %v432_v16  ;;  %v366_v16 = vld [vmem:[%s1785_s8 + $0xf0] sm:$0xff] }
  0x2d   : > { %597 = vmatprep.subr.mxu0 %v1584_v1  ;;  %1486 = vmatprep.subr.mxu1 %v1584_v1 }
  0x2e   : > { %598 = vmatpush2.msra.mxu0 %v463_v17  ;;  %1518 = vmatpush2.msra.mxu1 %v463_v17  ;;  %v353_v17 = vld [vmem:[%s1785_s8 + $0x88] sm:$0xff] }
  0x2f   : > { %599 = vmatprep.subr.mxu0 %v1584_v1  ;;  %1487 = vmatprep.subr.mxu1 %v1584_v1 }
  0x30   : > { %600 = vmatpush2.msra.mxu0 %v462_v18  ;;  %1519 = vmatpush2.msra.mxu1 %v462_v18  ;;  %v370_v18 = vld [vmem:[%s1785_s8 + $0x110] sm:$0xff] }
  0x31   : > { %601 = vmatprep.subr.mxu0 %v1584_v1  ;;  %1488 = vmatprep.subr.mxu1 %v1584_v1 }
  0x32   : > { %602 = vmatpush2.msra.mxu0 %v461_v19  ;;  %1520 = vmatpush2.msra.mxu1 %v461_v19  ;;  %v356_v19 = vld [vmem:[%s1785_s8 + $0xa0] sm:$0xff] }
  0x33   : > { %603 = vmatprep.subr.mxu0 %v1584_v1  ;;  %1489 = vmatprep.subr.mxu1 %v1584_v1 }
  0x34   : > { %604 = vmatpush2.msra.mxu0 %v460_v20  ;;  %1521 = vmatpush2.msra.mxu1 %v460_v20  ;;  %v369_v20 = vld [vmem:[%s1785_s8 + $0x108] sm:$0xff] }
  0x35   : > { %605 = vmatprep.subr.mxu0 %v1584_v1  ;;  %1490 = vmatprep.subr.mxu1 %v1584_v1 }
  0x36   : > { %606 = vmatpush2.msra.mxu0 %v459_v21  ;;  %1522 = vmatpush2.msra.mxu1 %v459_v21  ;;  %v359_v21 = vld [vmem:[%s1785_s8 + $0xb8] sm:$0xff] }
  0x37   : > { %607 = vmatprep.subr.mxu0 %v1584_v1  ;;  %1491 = vmatprep.subr.mxu1 %v1584_v1 }
  0x38   : > { %608 = vmatpush2.msra.mxu0 %v458_v22  ;;  %1523 = vmatpush2.msra.mxu1 %v458_v22  ;;  %v373_v22 = vld [vmem:[%s1785_s8 + $0x128] sm:$0xff] }
  0x39   : > { %609 = vmatprep.subr.mxu0 %v1584_v1  ;;  %1492 = vmatprep.subr.mxu1 %v1584_v1 }
  0x3a   : > { %610 = vmatpush2.msra.mxu0 %v457_v23  ;;  %1524 = vmatpush2.msra.mxu1 %v457_v23  ;;  %v362_v23 = vld [vmem:[%s1785_s8 + $0xd0] sm:$0xff] }
  0x3b   : > { %611 = vmatprep.subr.mxu0 %v1584_v1  ;;  %1493 = vmatprep.subr.mxu1 %v1584_v1 }
  0x3c   : > { %612 = vmatpush2.msra.mxu0 %v456_v24  ;;  %1525 = vmatpush2.msra.mxu1 %v456_v24  ;;  %v372_v24 = vld [vmem:[%s1785_s8 + $0x120] sm:$0xff] }
  0x3d   : > { %613 = vmatprep.subr.mxu0 %v1584_v1  ;;  %1494 = vmatprep.subr.mxu1 %v1584_v1 }
  0x3e   : > { %614 = vmatpush2.msra.mxu0 %v455_v25  ;;  %1526 = vmatpush2.msra.mxu1 %v455_v25  ;;  %v365_v25 = vld [vmem:[%s1785_s8 + $0xe8] sm:$0xff] }
  0x3f   : > { %615 = vmatprep.subr.mxu0 %v1584_v1  ;;  %1495 = vmatprep.subr.mxu1 %v1584_v1 }
  0x40   : > { %616 = vmatpush2.msra.mxu0 %v454_v26  ;;  %1527 = vmatpush2.msra.mxu1 %v454_v26  ;;  %v376_v26 = vld [vmem:[%s1785_s8 + $0x140] sm:$0xff] }
  0x41   : > { %617 = vmatprep.subr.mxu0 %v1584_v1  ;;  %1496 = vmatprep.subr.mxu1 %v1584_v1 }
  0x42   : > { %618 = vmatpush2.msra.mxu0 %v453_v27  ;;  %1528 = vmatpush2.msra.mxu1 %v453_v27  ;;  %v368_v27 = vld [vmem:[%s1785_s8 + $0x100] sm:$0xff] }
  0x43   : > { %619 = vmatprep.subr.mxu0 %v1584_v1  ;;  %1497 = vmatprep.subr.mxu1 %v1584_v1 }
  0x44   : > { %620 = vmatpush2.msra.mxu0 %v452_v28  ;;  %1529 = vmatpush2.msra.mxu1 %v452_v28  ;;  %v375_v28 = vld [vmem:[%s1785_s8 + $0x138] sm:$0xff] }
  0x45   : > { %621 = vmatprep.subr.mxu0 %v1584_v1  ;;  %1498 = vmatprep.subr.mxu1 %v1584_v1 }
  0x46   : > { %622 = vmatpush2.msra.mxu0 %v451_v29  ;;  %1530 = vmatpush2.msra.mxu1 %v451_v29  ;;  %v371_v29 = vld [vmem:[%s1785_s8 + $0x118] sm:$0xff] }
  0x47   : > { %623 = vmatprep.subr.mxu0 %v1584_v1  ;;  %1499 = vmatprep.subr.mxu1 %v1584_v1 }
  0x48   : > { %624 = vmatpush2.msra.mxu0 %v450_v30  ;;  %1531 = vmatpush2.msra.mxu1 %v450_v30  ;;  %v379_v30 = vld [vmem:[%s1785_s8 + $0x158] sm:$0xff] }
  0x49   : > { %625 = vmatprep.subr.mxu0 %v1584_v1  ;;  %1500 = vmatprep.subr.mxu1 %v1584_v1 }
  0x4a   : > { %626 = vmatpush2.msra.mxu0 %v449_v31  ;;  %1532 = vmatpush2.msra.mxu1 %v449_v31  ;;  %v374_v31 = vld [vmem:[%s1785_s8 + $0x130] sm:$0xff] }
  0x4b   : > { %627 = vmatprep.subr.mxu0 %v1584_v1  ;;  %1501 = vmatprep.subr.mxu1 %v1584_v1 }
  0x4c   : > { %628 = vmatpush2.msra.mxu0 %v448_v32  ;;  %1533 = vmatpush2.msra.mxu1 %v448_v32  ;;  %v378_v32 = vld [vmem:[%s1785_s8 + $0x150] sm:$0xff] }
  0x4d   : > { %629 = vmatprep.mubr.f32.mxu0 %v337_v33  ;;  %749 = vmatprep.mubr.f32.mxu1 %v409_v34  ;;  %v377_v33 = vld [vmem:[%s1785_s8 + $0x148] sm:$0xff]  ;;  %v382_v34 = vld [vmem:[%s1785_s8 + $0x170] sm:$0xff] }
  0x4e   : > { %630 = vmatmul.mubr.f32.vlgmr.msra.gmra.mxu0 %v336_v35  ;;  %750 = vmatmul.mubr.f32.vlgmr.msra.gmra.mxu1 %v408_v36  ;;  %v380_v35 = vld [vmem:[%s1785_s8 + $0x160] sm:$0xff]  ;;  %v381_v36 = vld [vmem:[%s1785_s8 + $0x168] sm:$0xff] }
  0x4f   : > { %1414 = vmatprep.subr.mxu1 %v467_v37  ;;  %634 = vmatprep.mubr.f32.mxu0 %v340_v38  ;;  %v385_v38 = vld [vmem:[%s1785_s8 + $0x188] sm:$0xff] }
  0x50   : > { %1415 = vmatpush3.msra.mxu1 %v467_v37  ;;  %754 = vmatprep.mubr.f32.mxu1 %v412_v39  ;;  %v383_v37 = vld [vmem:[%s1785_s8 + $0x178] sm:$0xff]  ;;  %v386_v39 = vld [vmem:[%s1785_s8 + $0x190] sm:$0xff] }
  0x51   : > { %1416 = vmatprep.subr.mxu1 %v466_v40 }
  0x52   : > { %635 = vmatmul.mubr.f32.gmra.mxu0 %v339_v41  ;;  %755 = vmatmul.mubr.f32.gmra.mxu1 %v411_v42  ;;  %v389_v41 = vld [vmem:[%s1785_s8 + $0x1a8] sm:$0xff]  ;;  %v388_v42 = vld [vmem:[%s1785_s8 + $0x1a0] sm:$0xff] }
  0x53   : > { %639 = vmatprep.mubr.f32.mxu0 %v343_v43  ;;  %759 = vmatprep.mubr.f32.mxu1 %v415_v44  ;;  %v392_v43 = vld [vmem:[%s1785_s8 + $0x1c0] sm:$0xff]  ;;  %v387_v44 = vld [vmem:[%s1785_s8 + $0x198] sm:$0xff] }
  0x54   : > { %1417 = vmatpush3.msra.mxu1 %v466_v40  ;;  %v384_v40 = vld [vmem:[%s1785_s8 + $0x180] sm:$0xff] }
  0x55   : > { %1418 = vmatprep.subr.mxu1 %v465_v45 }
  0x56   : > { %640 = vmatmul.mubr.f32.gmra.mxu0 %v342_v46  ;;  %760 = vmatmul.mubr.f32.gmra.mxu1 %v414_v47  ;;  %v391_v46 = vld [vmem:[%s1785_s8 + $0x1b8] sm:$0xff]  ;;  %v398_v47 = vld [vmem:[%s1785_s8 + $0x1f0] sm:$0xff] }
  0x57   : > { %644 = vmatprep.mubr.f32.mxu0 %v346_v48  ;;  %764 = vmatprep.mubr.f32.mxu1 %v418_v49  ;;  %v390_v48 = vld [vmem:[%s1785_s8 + $0x1b0] sm:$0xff]  ;;  %v401_v49 = vld [vmem:[%s1785_s8 + $0x208] sm:$0xff] }
  0x58   : > { %1419 = vmatpush3.msra.mxu1 %v465_v45  ;;  %v395_v45 = vld [vmem:[%s1785_s8 + $0x1d8] sm:$0xff] }
  0x59   : > { %1420 = vmatprep.subr.mxu1 %v464_v50 }
  0x5a   : > { %645 = vmatmul.mubr.f32.gmra.mxu0 %v345_v51  ;;  %765 = vmatmul.mubr.f32.gmra.mxu1 %v417_v52  ;;  %v404_v51 = vld [vmem:[%s1785_s8 + $0x220] sm:$0xff]  ;;  %v393_v52 = vld [vmem:[%s1785_s8 + $0x1c8] sm:$0xff] }
  0x5b   : > { %649 = vmatprep.mubr.f32.mxu0 %v349_v53  ;;  %769 = vmatprep.mubr.f32.mxu1 %v421_v54  ;;  %v407_v53 = vld [vmem:[%s1785_s8 + $0x238] sm:$0xff]  ;;  %v397_v54 = vld [vmem:[%s1785_s8 + $0x1e8] sm:$0xff] }
  0x5c   : > { %1421 = vmatpush3.msra.mxu1 %v464_v50  ;;  %v394_v50 = vld [vmem:[%s1785_s8 + $0x1d0] sm:$0xff] }
  0x5e   : > { %650 = vmatmul.mubr.f32.gmra.mxu0 %v348_v55  ;;  %770 = vmatmul.mubr.f32.gmra.mxu1 %v420_v56  ;;  %v410_v55 = vld [vmem:[%s1785_s8 + $0x250] sm:$0xff]  ;;  %v396_v56 = vld [vmem:[%s1785_s8 + $0x1e0] sm:$0xff] }
  0x5f   : > { %654 = vmatprep.mubr.f32.mxu0 %v352_v57  ;;  %774 = vmatprep.mubr.f32.mxu1 %v424_v58  ;;  %v413_v57 = vld [vmem:[%s1785_s8 + $0x268] sm:$0xff]  ;;  %v400_v58 = vld [vmem:[%s1785_s8 + $0x200] sm:$0xff] }
  0x62   : > { %655 = vmatmul.mubr.f32.gmra.mxu0 %v351_v59  ;;  %775 = vmatmul.mubr.f32.gmra.mxu1 %v423_v60  ;;  %v416_v59 = vld [vmem:[%s1785_s8 + $0x280] sm:$0xff]  ;;  %v399_v60 = vld [vmem:[%s1785_s8 + $0x1f8] sm:$0xff] }
  0x63   : > { %659 = vmatprep.mubr.f32.mxu0 %v355_v61  ;;  %779 = vmatprep.mubr.f32.mxu1 %v427_v62  ;;  %v419_v61 = vld [vmem:[%s1785_s8 + $0x298] sm:$0xff] }
  0x64   : > { %v403_v62 = vld [vmem:[%s1785_s8 + $0x218] sm:$0xff] }
  0x66   : > { %660 = vmatmul.mubr.f32.gmra.mxu0 %v354_v63  ;;  %780 = vmatmul.mubr.f32.gmra.mxu1 %v426_v0  ;;  %v422_v63 = vld [vmem:[%s1785_s8 + $0x2b0] sm:$0xff] }
  0x67   : > { %664 = vmatprep.mubr.f32.mxu0 %v358_v2  ;;  %784 = vmatprep.mubr.f32.mxu1 %v430_v3  ;;  %v402_v0 = vld [vmem:[%s1785_s8 + $0x210] sm:$0xff]  ;;  %v425_v2 = vld [vmem:[%s1785_s8 + $0x2c8] sm:$0xff] }
  0x68   : > { %v406_v3 = vld [vmem:[%s1785_s8 + $0x230] sm:$0xff] }
  0x6a   : > { %665 = vmatmul.mubr.f32.gmra.mxu0 %v357_v4  ;;  %785 = vmatmul.mubr.f32.gmra.mxu1 %v429_v5  ;;  %v428_v4 = vld [vmem:[%s1785_s8 + $0x2e0] sm:$0xff]  ;;  %v405_v5 = vld [vmem:[%s1785_s8 + $0x228] sm:$0xff] }
  0x6b   : > { %669 = vmatprep.mubr.f32.mxu0 %v361_v6  ;;  %1422 = vmatprep.mubr.msk.f32.mxu1 %vm468_vm0, %v338_v7  ;;  %v431_v6 = vld [vmem:[%s1785_s8 + $0x2f8] sm:$0xff] }
  0x6e   : > { %670 = vmatmul.mubr.f32.gmra.mxu0 %v360_v8  ;;  %1423 = vmatmul.mubr.msk.f32.vlgmr.msra.gmra.mxu1 %vm468_vm0, %v341_v9 }
  0x6f   : > { %674 = vmatprep.mubr.f32.mxu0 %v364_v10  ;;  %1425 = vmatprep.mubr.msk.f32.mxu1 %vm468_vm0, %v344_v11 }
  0x72   : > { %675 = vmatmul.mubr.f32.gmra.mxu0 %v363_v12  ;;  %1426 = vmatmul.mubr.msk.f32.gmra.mxu1 %vm468_vm0, %v347_v13 }
  0x73   : > { %679 = vmatprep.mubr.f32.mxu0 %v367_v14  ;;  %1428 = vmatprep.mubr.msk.f32.mxu1 %vm468_vm0, %v350_v15 }
  0x76   : > { %680 = vmatmul.mubr.f32.gmra.mxu0 %v366_v16  ;;  %1429 = vmatmul.mubr.msk.f32.gmra.mxu1 %vm468_vm0, %v353_v17 }
  0x77   : > { %684 = vmatprep.mubr.f32.mxu0 %v370_v18  ;;  %1431 = vmatprep.mubr.msk.f32.mxu1 %vm468_vm0, %v356_v19 }
  0x7a   : > { %685 = vmatmul.mubr.f32.gmra.mxu0 %v369_v20  ;;  %1432 = vmatmul.mubr.msk.f32.gmra.mxu1 %vm468_vm0, %v359_v21 }
  0x7b   : > { %689 = vmatprep.mubr.f32.mxu0 %v373_v22  ;;  %1434 = vmatprep.mubr.msk.f32.mxu1 %vm468_vm0, %v362_v23 }
  0x7e   : > { %690 = vmatmul.mubr.f32.gmra.mxu0 %v372_v24  ;;  %1435 = vmatmul.mubr.msk.f32.gmra.mxu1 %vm468_vm0, %v365_v25 }
  0x7f   : > { %694 = vmatprep.mubr.f32.mxu0 %v376_v26  ;;  %1437 = vmatprep.mubr.msk.f32.mxu1 %vm468_vm0, %v368_v27 }
  0x82   : > { %695 = vmatmul.mubr.f32.gmra.mxu0 %v375_v28  ;;  %1438 = vmatmul.mubr.msk.f32.gmra.mxu1 %vm468_vm0, %v371_v29 }
  0x83   : > { %699 = vmatprep.mubr.f32.mxu0 %v379_v30  ;;  %1440 = vmatprep.mubr.msk.f32.mxu1 %vm468_vm0, %v374_v31 }
  0x86   : > { %700 = vmatmul.mubr.f32.gmra.mxu0 %v378_v32  ;;  %1441 = vmatmul.mubr.msk.f32.gmra.mxu1 %vm468_vm0, %v377_v33 }
  0x87   : > { %704 = vmatprep.mubr.f32.mxu0 %v382_v34  ;;  %1443 = vmatprep.mubr.msk.f32.mxu1 %vm468_vm0, %v380_v35 }
  0x8a   : > { %705 = vmatmul.mubr.f32.gmra.mxu0 %v381_v36  ;;  %1444 = vmatmul.mubr.msk.f32.gmra.mxu1 %vm468_vm0, %v383_v37 }
  0x8b   : > { %709 = vmatprep.mubr.f32.mxu0 %v385_v38  ;;  %1446 = vmatprep.mubr.msk.f32.mxu1 %vm468_vm0, %v386_v39  ;;  %v305_v39 = vld [vmem:[#allocation2 + $0x8] sm:$0xff] }
  0x8e   : > { %710 = vmatmul.mubr.f32.gmra.mxu0 %v384_v40  ;;  %1447 = vmatmul.mubr.msk.f32.gmra.mxu1 %vm468_vm0, %v389_v41 }
  0x8f   : > { %714 = vmatprep.mubr.f32.mxu0 %v388_v42  ;;  %1449 = vmatprep.mubr.msk.f32.mxu1 %vm468_vm0, %v392_v43  ;;  %v304_v43 = vld [vmem:[#allocation2] sm:$0xff] }
  0x92   : > { %715 = vmatmul.mubr.f32.gmra.mxu0 %v387_v44  ;;  %1450 = vmatmul.mubr.msk.f32.gmra.mxu1 %vm468_vm0, %v395_v45 }
  0x93   : > { %719 = vmatprep.mubr.f32.mxu0 %v391_v46  ;;  %1452 = vmatprep.mubr.msk.f32.mxu1 %vm468_vm0, %v398_v47 }
  0x96   : > { %720 = vmatmul.mubr.f32.gmra.mxu0 %v390_v48  ;;  %1453 = vmatmul.mubr.msk.f32.gmra.mxu1 %vm468_vm0, %v401_v49  ;;  %v307_v48 = vld [vmem:[#allocation2 + $0x18] sm:$0xff] }
  0x97   : > { %724 = vmatprep.mubr.f32.mxu0 %v394_v50  ;;  %1455 = vmatprep.mubr.msk.f32.mxu1 %vm468_vm0, %v404_v51 }
  0x9a   : > { %725 = vmatmul.mubr.f32.gmra.mxu0 %v393_v52  ;;  %1456 = vmatmul.mubr.msk.f32.gmra.mxu1 %vm468_vm0, %v407_v53  ;;  %v306_v53 = vld [vmem:[#allocation2 + $0x10] sm:$0xff] }
  0x9b   : > { %729 = vmatprep.mubr.f32.mxu0 %v397_v54  ;;  %1458 = vmatprep.mubr.msk.f32.mxu1 %vm468_vm0, %v410_v55 }
  0x9e   : > { %730 = vmatmul.mubr.f32.gmra.mxu0 %v396_v56  ;;  %1459 = vmatmul.mubr.msk.f32.gmra.mxu1 %vm468_vm0, %v413_v57 }
  0x9f   : > { %734 = vmatprep.mubr.f32.mxu0 %v400_v58  ;;  %1461 = vmatprep.mubr.msk.f32.mxu1 %vm468_vm0, %v416_v59  ;;  %v309_v58 = vld [vmem:[#allocation2 + $0x28] sm:$0xff] }
  0xa2   : > { %735 = vmatmul.mubr.f32.gmra.mxu0 %v399_v60  ;;  %1462 = vmatmul.mubr.msk.f32.gmra.mxu1 %vm468_vm0, %v419_v61 }
  0xa3   : > { %739 = vmatprep.mubr.f32.mxu0 %v403_v62  ;;  %1464 = vmatprep.mubr.msk.f32.mxu1 %vm468_vm0, %v422_v63  ;;  %v2024_v62 = vld [vmem:[%s2181_s2] ss:$0 sm:$0xff] }
  0xa6   : > { %740 = vmatmul.mubr.f32.gmra.mxu0 %v402_v0  ;;  %1465 = vmatmul.mubr.msk.f32.gmra.mxu1 %vm468_vm0, %v425_v2  ;;  %v308_v0 = vld [vmem:[#allocation2 + $0x20] sm:$0xff] }
  0xa7   : > { %744 = vmatprep.mubr.f32.mxu0 %v406_v3  ;;  %1467 = vmatprep.mubr.msk.f32.mxu1 %vm468_vm0, %v428_v4 }
  0xaa   : > { %745 = vmatmul.mubr.f32.gmra.mxu0 %v405_v5  ;;  %1468 = vmatmul.mubr.msk.f32.gmra.mxu1 %vm468_vm0, %v431_v6 }
 0x10e   : > { %v631_v7 = vpop.f32.mrf.mxu0  ;;  %v1998_v8 = vpop.f32.mrf.mxu1 }
 0x110   : > { %v633_v9 = vpop.f32.mrf.mxu0  ;;  %v753_v10 = vpop.f32.mrf.mxu1 }
 0x112   : > { %v636_v11 = vpop.f32.mrf.mxu0  ;;  %v2000_v12 = vpop.f32.mrf.mxu1 }
 0x114   : > { %v638_v13 = vpop.f32.mrf.mxu0  ;;  %v758_v14 = vpop.f32.mrf.mxu1 }
 0x116   : > { %v641_v15 = vpop.f32.mrf.mxu0  ;;  %v2002_v16 = vpop.f32.mrf.mxu1 }
 0x118   : > { %v643_v17 = vpop.f32.mrf.mxu0  ;;  %v763_v18 = vpop.f32.mrf.mxu1 }
 0x119   : > { %v310_v17 = vld [vmem:[#allocation2 + $0x30] sm:$0xff] }
 0x11a   : > { %v646_v19 = vpop.f32.mrf.mxu0  ;;  %v2004_v1 = vpop.f32.mrf.mxu1 }
 0x11c   : > { %v648_v20 = vpop.f32.mrf.mxu0  ;;  %v768_v21 = vpop.f32.mrf.mxu1 }
 0x11e   : > { %v651_v22 = vpop.f32.mrf.mxu0  ;;  %v2006_v23 = vpop.f32.mrf.mxu1 }
 0x120   : > { %v653_v24 = vpop.f32.mrf.mxu0  ;;  %v773_v25 = vpop.f32.mrf.mxu1 }
 0x122   : > { %v656_v26 = vpop.f32.mrf.mxu0  ;;  %v2008_v27 = vpop.f32.mrf.mxu1 }
 0x124   : > { %v658_v28 = vpop.f32.mrf.mxu0  ;;  %v778_v29 = vpop.f32.mrf.mxu1 }
 0x126   : > { %v661_v30 = vpop.f32.mrf.mxu0  ;;  %v2010_v31 = vpop.f32.mrf.mxu1 }
 0x128   : > { %v663_v32 = vpop.f32.mrf.mxu0  ;;  %v783_v33 = vpop.f32.mrf.mxu1 }
 0x12a   : > { %v666_v34 = vpop.f32.mrf.mxu0  ;;  %v2012_v35 = vpop.f32.mrf.mxu1 }
 0x12c   : > { %v668_v36 = vpop.f32.mrf.mxu0  ;;  %v788_v37 = vpop.f32.mrf.mxu1 }
 0x12e   : > { %v2014_v38 = vpop.f32.mrf.mxu0  ;;  %v1424_v40 = vpop.f32.mrf.mxu1 }
 0x12f   : > { %v862_v41 = vadd.f32 %v1424_v40, %v636_v11 }
 0x130   : > { %v673_v42 = vpop.f32.mrf.mxu0  ;;  %v856_v44 = vpop.f32.mrf.mxu1 }
 0x131   : > { %v1016_v45 = vadd.f32 %v862_v41, %v305_v39  ;;  %v857_v46 = vadd.f32 %v856_v44, %v631_v7  ;;  %v311_v7 = vld [vmem:[#allocation2 + $0x38] sm:$0xff]  ;;  %v312_v39 = vld [vmem:[#allocation2 + $0x40] sm:$0xff] }
 0x132   : > { %v676_v47 = vpop.f32.mrf.mxu0  ;;  %v1427_v49 = vpop.f32.mrf.mxu1 }
 0x133   : > { %1049 = vst.msk [vmem:[#allocation2 + $0x8] sm:$0xff] %vm271_vm1, %v1016_v45  ;;  %v1015_v50 = vadd.f32 %v857_v46, %v304_v43  ;;  %v872_v51 = vadd.f32 %v1427_v49, %v646_v19  ;;  %v315_v46 = vld [vmem:[#allocation2 + $0x58] sm:$0xff] }
 0x134   : > { %v678_v52 = vpop.f32.mrf.mxu0  ;;  %v866_v54 = vpop.f32.mrf.mxu1 }
 0x135   : > { %1048 = vst.msk [vmem:[#allocation2] sm:$0xff] %vm271_vm1, %v1015_v50  ;;  %v1018_v55 = vadd.f32 %v872_v51, %v307_v48  ;;  %v867_v56 = vadd.f32 %v866_v54, %v641_v15  ;;  %v314_v54 = vld [vmem:[#allocation2 + $0x50] sm:$0xff] }
 0x136   : > { %v2018_v57 = vpop.f32.mrf.mxu0  ;;  %v1430_v59 = vpop.f32.mrf.mxu1 }
 0x137   : > { %1051 = vst.msk [vmem:[#allocation2 + $0x18] sm:$0xff] %vm271_vm1, %v1018_v55  ;;  %v1017_v60 = vadd.f32 %v867_v56, %v306_v53  ;;  %v882_v61 = vadd.f32 %v1430_v59, %v656_v26  ;;  %v313_v26 = vld [vmem:[#allocation2 + $0x48] sm:$0xff] }
 0x138   : > { %v683_v63 = vpop.f32.mrf.mxu0  ;;  %v876_v2 = vpop.f32.mrf.mxu1 }
 0x139   : > { %1050 = vst.msk [vmem:[#allocation2 + $0x10] sm:$0xff] %vm271_vm1, %v1017_v60  ;;  %v1020_v3 = vadd.f32 %v882_v61, %v309_v58  ;;  %v877_v4 = vadd.f32 %v876_v2, %v651_v22  ;;  %v317_v63 = vld [vmem:[#allocation2 + $0x68] sm:$0xff] }
 0x13a   : > { %v1084_v5 = vld [vmem:[#allocation2 + $0x8] sm:$0xff]  ;;  %v686_v6 = vpop.f32.mrf.mxu0  ;;  %v1433_v9 = vpop.f32.mrf.mxu1 }
 0x13b   : > { %v1123_v10 = vadd.f32 %v2024_v62, %v1084_v5  ;;  %1053 = vst.msk [vmem:[#allocation2 + $0x28] sm:$0xff] %vm271_vm1, %v1020_v3  ;;  %v1019_v11 = vadd.f32 %v877_v4, %v308_v0  ;;  %v892_v13 = vadd.f32 %v1433_v9, %v666_v34  ;;  %v316_v9 = vld [vmem:[#allocation2 + $0x60] sm:$0xff] }
 0x13c   : > { %v1083_v14 = vld [vmem:[#allocation2] sm:$0xff]  ;;  %v688_v15 = vpop.f32.mrf.mxu0  ;;  %v886_v18 = vpop.f32.mrf.mxu1 }
 0x13d   : > { %v1155_v19 = vmax.f32 %v1123_v10, 0.0  ;;  %v1122_v20 = vadd.f32 %v2024_v62, %v1083_v14  ;;  %1052 = vst.msk [vmem:[#allocation2 + $0x20] sm:$0xff] %vm271_vm1, %v1019_v11  ;;  %v1022_v21 = vadd.f32 %v892_v13, %v311_v7  ;;  %v887_v22 = vadd.f32 %v886_v18, %v661_v30  ;;  %v319_v18 = vld [vmem:[#allocation2 + $0x78] sm:$0xff] }
 0x13e   : > { %v1086_v24 = vld [vmem:[#allocation2 + $0x18] sm:$0xff]  ;;  %v691_v25 = vpop.f32.mrf.mxu0  ;;  %v1436_v28 = vpop.f32.mrf.mxu1 }
 0x13f   : > { %1187 = vst.msk [vmem:[%s2033_s28 + $0x8] sm:$0xff] %vm271_vm1, %v1155_v19  ;;  %v1154_v29 = vmax.f32 %v1122_v20, 0.0  ;;  %v1125_v32 = vadd.f32 %v2024_v62, %v1086_v24  ;;  %1055 = vst.msk [vmem:[#allocation2 + $0x38] sm:$0xff] %vm271_vm1, %v1022_v21  ;;  %v1021_v33 = vadd.f32 %v887_v22, %v310_v17  ;;  %v902_v34 = vadd.f32 %v1436_v28, %v676_v47 }
 0x140   : > { %v1085_v36 = vld [vmem:[#allocation2 + $0x10] sm:$0xff]  ;;  %v693_v37 = vpop.f32.mrf.mxu0  ;;  %v896_v40 = vpop.f32.mrf.mxu1 }
 0x141   : > { %1186 = vst.msk [vmem:[%s2033_s28] sm:$0xff] %vm271_vm1, %v1154_v29  ;;  %v1157_v30 = vmax.f32 %v1125_v32, 0.0  ;;  %v1124_v41 = vadd.f32 %v2024_v62, %v1085_v36  ;;  %1054 = vst.msk [vmem:[#allocation2 + $0x30] sm:$0xff] %vm271_vm1, %v1021_v33  ;;  %v1024_v42 = vadd.f32 %v902_v34, %v313_v26  ;;  %v897_v43 = vadd.f32 %v896_v40, %v2014_v38  ;;  %v318_v29 = vld [vmem:[#allocation2 + $0x70] sm:$0xff] }
 0x142   : > { %v1088_v44 = vld [vmem:[#allocation2 + $0x28] sm:$0xff]  ;;  %v696_v45 = vpop.f32.mrf.mxu0  ;;  %v1439_v48 = vpop.f32.mrf.mxu1 }
 0x143   : > { %1189 = vst.msk [vmem:[%s2033_s28 + $0x18] sm:$0xff] %vm271_vm1, %v1157_v30  ;;  %v1156_v47 = vmax.f32 %v1124_v41, 0.0  ;;  %v1127_v49 = vadd.f32 %v2024_v62, %v1088_v44  ;;  %1057 = vst.msk [vmem:[#allocation2 + $0x48] sm:$0xff] %vm271_vm1, %v1024_v42  ;;  %v1023_v50 = vadd.f32 %v897_v43, %v312_v39  ;;  %v912_v51 = vadd.f32 %v1439_v48, %v686_v6 }
 0x144   : > { %v1087_v52 = vld [vmem:[#allocation2 + $0x20] sm:$0xff]  ;;  %v698_v53 = vpop.f32.mrf.mxu0  ;;  %v906_v55 = vpop.f32.mrf.mxu1 }
 0x145   : > { %1188 = vst.msk [vmem:[%s2033_s28 + $0x10] sm:$0xff] %vm271_vm1, %v1156_v47  ;;  %v1159_v38 = vmax.f32 %v1127_v49, 0.0  ;;  %v1126_v56 = vadd.f32 %v2024_v62, %v1087_v52  ;;  %1056 = vst.msk [vmem:[#allocation2 + $0x40] sm:$0xff] %vm271_vm1, %v1023_v50  ;;  %v1026_v58 = vadd.f32 %v912_v51, %v315_v46  ;;  %v907_v59 = vadd.f32 %v906_v55, %v2018_v57  ;;  %v321_v51 = vld [vmem:[#allocation2 + $0x88] sm:$0xff] }
 0x146   : > { %v1090_v60 = vld [vmem:[#allocation2 + $0x38] sm:$0xff]  ;;  %v701_v61 = vpop.f32.mrf.mxu0  ;;  %v1442_v0 = vpop.f32.mrf.mxu1 }
 0x147   : > { %1191 = vst.msk [vmem:[%s2033_s28 + $0x28] sm:$0xff] %vm271_vm1, %v1159_v38  ;;  %v1158_v2 = vmax.f32 %v1126_v56, 0.0  ;;  %v1129_v3 = vadd.f32 %v2024_v62, %v1090_v60  ;;  %1059 = vst.msk [vmem:[#allocation2 + $0x58] sm:$0xff] %vm271_vm1, %v1026_v58  ;;  %v1025_v4 = vadd.f32 %v907_v59, %v314_v54  ;;  %v922_v5 = vadd.f32 %v1442_v0, %v696_v45  ;;  %v320_v45 = vld [vmem:[#allocation2 + $0x80] sm:$0xff] }
 0x148   : > { %v1089_v6 = vld [vmem:[#allocation2 + $0x30] sm:$0xff]  ;;  %v703_v7 = vpop.f32.mrf.mxu0  ;;  %v916_v10 = vpop.f32.mrf.mxu1 }
 0x149   : > { %1190 = vst.msk [vmem:[%s2033_s28 + $0x20] sm:$0xff] %vm271_vm1, %v1158_v2  ;;  %v1161_v57 = vmax.f32 %v1129_v3, 0.0  ;;  %v1128_v11 = vadd.f32 %v2024_v62, %v1089_v6  ;;  %1058 = vst.msk [vmem:[#allocation2 + $0x50] sm:$0xff] %vm271_vm1, %v1025_v4  ;;  %v1028_v13 = vadd.f32 %v922_v5, %v317_v63  ;;  %v917_v14 = vadd.f32 %v916_v10, %v691_v25  ;;  %v322_v3 = vld [vmem:[#allocation2 + $0x90] sm:$0xff] }
 0x14a   : > { %v1092_v15 = vld [vmem:[#allocation2 + $0x48] sm:$0xff]  ;;  %v706_v17 = vpop.f32.mrf.mxu0  ;;  %v1445_v19 = vpop.f32.mrf.mxu1 }
 0x14b   : > { %1193 = vst.msk [vmem:[%s2033_s28 + $0x38] sm:$0xff] %vm271_vm1, %v1161_v57  ;;  %v1160_v20 = vmax.f32 %v1128_v11, 0.0  ;;  %v1131_v21 = vadd.f32 %v2024_v62, %v1092_v15  ;;  %1061 = vst.msk [vmem:[#allocation2 + $0x68] sm:$0xff] %vm271_vm1, %v1028_v13  ;;  %v1027_v22 = vadd.f32 %v917_v14, %v316_v9  ;;  %v932_v24 = vadd.f32 %v1445_v19, %v706_v17  ;;  %v323_v17 = vld [vmem:[#allocation2 + $0x98] sm:$0xff] }
 0x14c   : > { %v1091_v26 = vld [vmem:[#allocation2 + $0x40] sm:$0xff]  ;;  %v708_v28 = vpop.f32.mrf.mxu0  ;;  %v926_v32 = vpop.f32.mrf.mxu1 }
 0x14d   : > { %1192 = vst.msk [vmem:[%s2033_s28 + $0x30] sm:$0xff] %vm271_vm1, %v1160_v20  ;;  %v1163_v25 = vmax.f32 %v1131_v21, 0.0  ;;  %v1130_v33 = vadd.f32 %v2024_v62, %v1091_v26  ;;  %1060 = vst.msk [vmem:[#allocation2 + $0x60] sm:$0xff] %vm271_vm1, %v1027_v22  ;;  %v1030_v34 = vadd.f32 %v932_v24, %v319_v18  ;;  %v927_v36 = vadd.f32 %v926_v32, %v701_v61 }
 0x14e   : > { %v1094_v37 = vld [vmem:[#allocation2 + $0x58] sm:$0xff]  ;;  %v711_v39 = vpop.f32.mrf.mxu0  ;;  %v1448_v40 = vpop.f32.mrf.mxu1 }
 0x14f   : > { %1195 = vst.msk [vmem:[%s2033_s28 + $0x48] sm:$0xff] %vm271_vm1, %v1163_v25  ;;  %v1162_v30 = vmax.f32 %v1130_v33, 0.0  ;;  %v1133_v41 = vadd.f32 %v2024_v62, %v1094_v37  ;;  %1063 = vst.msk [vmem:[#allocation2 + $0x78] sm:$0xff] %vm271_vm1, %v1030_v34  ;;  %v1029_v42 = vadd.f32 %v927_v36, %v318_v29  ;;  %v324_v25 = vld [vmem:[#allocation2 + $0xa0] sm:$0xff]  ;;  %v329_v34 = vld [vmem:[#allocation2 + $0xc8] sm:$0xff] }
 0x150   : > { %v1093_v43 = vld [vmem:[#allocation2 + $0x50] sm:$0xff]  ;;  %v713_v44 = vpop.f32.mrf.mxu0  ;;  %v936_v46 = vpop.f32.mrf.mxu1 }
 0x151   : > { %1194 = vst.msk [vmem:[%s2033_s28 + $0x40] sm:$0xff] %vm271_vm1, %v1162_v30  ;;  %v1165_v48 = vmax.f32 %v1133_v41, 0.0  ;;  %v1132_v47 = vadd.f32 %v2024_v62, %v1093_v43  ;;  %1062 = vst.msk [vmem:[#allocation2 + $0x70] sm:$0xff] %vm271_vm1, %v1029_v42  ;;  %v937_v49 = vadd.f32 %v936_v46, %v711_v39  ;;  %v328_v42 = vld [vmem:[#allocation2 + $0xc0] sm:$0xff] }
 0x152   : > { %v1096_v50 = vld [vmem:[#allocation2 + $0x68] sm:$0xff]  ;;  %v716_v52 = vpop.f32.mrf.mxu0  ;;  %v1451_v53 = vpop.f32.mrf.mxu1 }
 0x153   : > { %1197 = vst.msk [vmem:[%s2033_s28 + $0x58] sm:$0xff] %vm271_vm1, %v1165_v48  ;;  %v1164_v54 = vmax.f32 %v1132_v47, 0.0  ;;  %v1135_v55 = vadd.f32 %v2024_v62, %v1096_v50  ;;  %v1031_v38 = vadd.f32 %v937_v49, %v320_v45  ;;  %v942_v56 = vadd.f32 %v1448_v40, %v716_v52  ;;  %v325_v49 = vld [vmem:[#allocation2 + $0xa8] sm:$0xff] }
 0x154   : > { %v1095_v58 = vld [vmem:[#allocation2 + $0x60] sm:$0xff]  ;;  %v718_v59 = vpop.f32.mrf.mxu0  ;;  %v946_v60 = vpop.f32.mrf.mxu1 }
 0x155   : > { %1196 = vst.msk [vmem:[%s2033_s28 + $0x50] sm:$0xff] %vm271_vm1, %v1164_v54  ;;  %v1167_v61 = vmax.f32 %v1135_v55, 0.0  ;;  %v1134_v63 = vadd.f32 %v2024_v62, %v1095_v58  ;;  %1064 = vst.msk [vmem:[#allocation2 + $0x80] sm:$0xff] %vm271_vm1, %v1031_v38  ;;  %v1032_v0 = vadd.f32 %v942_v56, %v321_v51  ;;  %v331_v51 = vld [vmem:[#allocation2 + $0xd8] sm:$0xff] }
 0x156   : > { %v1098_v2 = vld [vmem:[#allocation2 + $0x78] sm:$0xff]  ;;  %v721_v4 = vpop.f32.mrf.mxu0  ;;  %v1454_v5 = vpop.f32.mrf.mxu1 }
 0x157   : > { %1199 = vst.msk [vmem:[%s2033_s28 + $0x68] sm:$0xff] %vm271_vm1, %v1167_v61  ;;  %v1166_v6 = vmax.f32 %v1134_v63, 0.0  ;;  %v1137_v7 = vadd.f32 %v2024_v62, %v1098_v2  ;;  %1065 = vst.msk [vmem:[#allocation2 + $0x88] sm:$0xff] %vm271_vm1, %v1032_v0  ;;  %v947_v9 = vadd.f32 %v946_v60, %v721_v4  ;;  %v326_v0 = vld [vmem:[#allocation2 + $0xb0] sm:$0xff] }
 0x158   : > { %v1097_v10 = vld [vmem:[#allocation2 + $0x70] sm:$0xff]  ;;  %v723_v57 = vpop.f32.mrf.mxu0  ;;  %v956_v11 = vpop.f32.mrf.mxu1 }
 0x159   : > { %1198 = vst.msk [vmem:[%s2033_s28 + $0x60] sm:$0xff] %vm271_vm1, %v1166_v6  ;;  %v1169_v13 = vmax.f32 %v1137_v7, 0.0  ;;  %v1136_v14 = vadd.f32 %v2024_v62, %v1097_v10  ;;  %v1033_v15 = vadd.f32 %v947_v9, %v322_v3  ;;  %v333_v3 = vld [vmem:[#allocation2 + $0xe8] sm:$0xff] }
 0x15a   : > { %v726_v18 = vpop.f32.mrf.mxu0  ;;  %v2093_v19 = vpop.f32.mrf.mxu1 }
 0x15b   : > { %1201 = vst.msk [vmem:[%s2033_s28 + $0x78] sm:$0xff] %vm271_vm1, %v1169_v13  ;;  %v1168_v20 = vmax.f32 %v1136_v14, 0.0  ;;  %1066 = vst.msk [vmem:[#allocation2 + $0x90] sm:$0xff] %vm271_vm1, %v1033_v15  ;;  %v952_v21 = vadd.f32 %v1451_v53, %v726_v18  ;;  %v327_v18 = vld [vmem:[#allocation2 + $0xb8] sm:$0xff] }
 0x15c   : > { %v1099_v22 = vld [vmem:[#allocation2 + $0x80] sm:$0xff]  ;;  %v728_v24 = vpop.f32.mrf.mxu0  ;;  %v966_v26 = vpop.f32.mrf.mxu1 }
 0x15d   : > { %1200 = vst.msk [vmem:[%s2033_s28 + $0x70] sm:$0xff] %vm271_vm1, %v1168_v20  ;;  %v1138_v28 = vadd.f32 %v2024_v62, %v1099_v22  ;;  %v1034_v29 = vadd.f32 %v952_v21, %v323_v17 }
 0x15e   : > { %v1100_v32 = vld [vmem:[#allocation2 + $0x88] sm:$0xff]  ;;  %v731_v33 = vpop.f32.mrf.mxu0  ;;  %v1460_v36 = vpop.f32.mrf.mxu1 }
 0x15f   : > { %v1170_v37 = vmax.f32 %v1138_v28, 0.0  ;;  %v1139_v39 = vadd.f32 %v2024_v62, %v1100_v32  ;;  %1067 = vst.msk [vmem:[#allocation2 + $0x98] sm:$0xff] %vm271_vm1, %v1034_v29  ;;  %v957_v40 = vadd.f32 %v956_v11, %v731_v33  ;;  %v982_v30 = vadd.f32 %v1460_v36, %v2000_v12 }
 0x160   : > { %v733_v41 = vpop.f32.mrf.mxu0  ;;  %v976_v43 = vpop.f32.mrf.mxu1 }
 0x161   : > { %1202 = vst.msk [vmem:[%s2033_s28 + $0x80] sm:$0xff] %vm271_vm1, %v1170_v37  ;;  %v1171_v44 = vmax.f32 %v1139_v39, 0.0  ;;  %v1035_v45 = vadd.f32 %v957_v40, %v324_v25  ;;  %v1040_v46 = vadd.f32 %v982_v30, %v329_v34  ;;  %v977_v48 = vadd.f32 %v976_v43, %v1998_v8  ;;  %v330_v8 = vld [vmem:[#allocation2 + $0xd0] sm:$0xff] }
 0x162   : > { %v1101_v47 = vld [vmem:[#allocation2 + $0x90] sm:$0xff]  ;;  %v736_v50 = vpop.f32.mrf.mxu0  ;;  %v1463_v52 = vpop.f32.mrf.mxu1 }
 0x163   : > { %1203 = vst.msk [vmem:[%s2033_s28 + $0x88] sm:$0xff] %vm271_vm1, %v1171_v44  ;;  %v1140_v53 = vadd.f32 %v2024_v62, %v1101_v47  ;;  %1068 = vst.msk [vmem:[#allocation2 + $0xa0] sm:$0xff] %vm271_vm1, %v1035_v45  ;;  %v1039_v12 = vadd.f32 %v977_v48, %v328_v42  ;;  %v962_v54 = vadd.f32 %v1454_v5, %v736_v50  ;;  %v334_v39 = vld [vmem:[#allocation2 + $0xf0] sm:$0xff] }
 0x164   : > { %1073 = vst.msk [vmem:[#allocation2 + $0xc8] sm:$0xff] %vm271_vm1, %v1040_v46  ;;  %v992_v55 = vadd.f32 %v1463_v52, %v2004_v1  ;;  %v738_v38 = vpop.f32.mrf.mxu0  ;;  %v986_v56 = vpop.f32.mrf.mxu1 }
 0x165   : > { %v1172_v58 = vmax.f32 %v1140_v53, 0.0  ;;  %1072 = vst.msk [vmem:[#allocation2 + $0xc0] sm:$0xff] %vm271_vm1, %v1039_v12  ;;  %v1036_v59 = vadd.f32 %v962_v54, %v325_v49  ;;  %v987_v61 = vadd.f32 %v986_v56, %v2002_v16  ;;  %v332_v16 = vld [vmem:[#allocation2 + $0xe0] sm:$0xff] }
 0x166   : > { %v1042_v60 = vadd.f32 %v992_v55, %v331_v51  ;;  %v1102_v63 = vld [vmem:[#allocation2 + $0x98] sm:$0xff]  ;;  %v741_v2 = vpop.f32.mrf.mxu0  ;;  %v1466_v4 = vpop.f32.mrf.mxu1 }
 0x167   : > { %1204 = vst.msk [vmem:[%s2033_s28 + $0x90] sm:$0xff] %vm271_vm1, %v1172_v58  ;;  %v1141_v5 = vadd.f32 %v2024_v62, %v1102_v63  ;;  %1069 = vst.msk [vmem:[#allocation2 + $0xa8] sm:$0xff] %vm271_vm1, %v1036_v59  ;;  %v1041_v1 = vadd.f32 %v987_v61, %v330_v8  ;;  %v967_v6 = vadd.f32 %v966_v26, %v741_v2 }
 0x168   : > { %1075 = vst.msk [vmem:[#allocation2 + $0xd8] sm:$0xff] %vm271_vm1, %v1042_v60  ;;  %v1002_v7 = vadd.f32 %v1466_v4, %v2008_v27  ;;  %v743_v9 = vpop.f32.mrf.mxu0  ;;  %v996_v10 = vpop.f32.mrf.mxu1 }
 0x169   : > { %v1173_v57 = vmax.f32 %v1141_v5, 0.0  ;;  %1074 = vst.msk [vmem:[#allocation2 + $0xd0] sm:$0xff] %vm271_vm1, %v1041_v1  ;;  %v1037_v11 = vadd.f32 %v967_v6, %v326_v0  ;;  %v997_v14 = vadd.f32 %v996_v10, %v2006_v23  ;;  %v335_v23 = vld [vmem:[#allocation2 + $0xf8] sm:$0xff] }
 0x16a   : > { %v1044_v13 = vadd.f32 %v1002_v7, %v333_v3  ;;  %v1103_v15 = vld [vmem:[#allocation2 + $0xa0] sm:$0xff]  ;;  %v746_v20 = vpop.f32.mrf.mxu0  ;;  %v1469_v21 = vpop.f32.mrf.mxu1 }
 0x16b   : > { %v1108_v17 = vld [vmem:[#allocation2 + $0xc8] sm:$0xff]  ;;  %1205 = vst.msk [vmem:[%s2033_s28 + $0x98] sm:$0xff] %vm271_vm1, %v1173_v57  ;;  %v1142_v22 = vadd.f32 %v2024_v62, %v1103_v15  ;;  %1070 = vst.msk [vmem:[#allocation2 + $0xb0] sm:$0xff] %vm271_vm1, %v1037_v11  ;;  %v1043_v24 = vadd.f32 %v997_v14, %v332_v16  ;;  %v972_v26 = vadd.f32 %v2093_v19, %v746_v20 }
 0x16c   : > { %v1147_v27 = vadd.f32 %v2024_v62, %v1108_v17  ;;  %1077 = vst.msk [vmem:[#allocation2 + $0xe8] sm:$0xff] %vm271_vm1, %v1044_v13  ;;  %v1107_v28 = vld [vmem:[#allocation2 + $0xc0] sm:$0xff]  ;;  %v1012_v29 = vadd.f32 %v1469_v21, %v2012_v35  ;;  %v1006_v32 = vpop.f32.mrf.mxu1  ;;  %v748_v25 = vpop.f32.mrf.mxu0 }
 0x16d   : > { %v1174_v33 = vmax.f32 %v1142_v22, 0.0  ;;  %v1146_v36 = vadd.f32 %v2024_v62, %v1107_v28  ;;  %1076 = vst.msk [vmem:[#allocation2 + $0xe0] sm:$0xff] %vm271_vm1, %v1043_v24  ;;  %v1038_v37 = vadd.f32 %v972_v26, %v327_v18  ;;  %v1007_v41 = vadd.f32 %v1006_v32, %v2010_v31 }
 0x16e   : > { %v1179_v34 = vmax.f32 %v1147_v27, 0.0  ;;  %v1104_v40 = vld [vmem:[#allocation2 + $0xa8] sm:$0xff]  ;;  %v1046_v19 = vadd.f32 %v1012_v29, %v335_v23 }
 0x16f   : > { %v1110_v30 = vld [vmem:[#allocation2 + $0xd8] sm:$0xff]  ;;  %1206 = vst.msk [vmem:[%s2033_s28 + $0xa0] sm:$0xff] %vm271_vm1, %v1174_v33  ;;  %v1178_v35 = vmax.f32 %v1146_v36, 0.0  ;;  %v1143_v42 = vadd.f32 %v2024_v62, %v1104_v40  ;;  %1071 = vst.msk [vmem:[#allocation2 + $0xb8] sm:$0xff] %vm271_vm1, %v1038_v37  ;;  %v1045_v45 = vadd.f32 %v1007_v41, %v334_v39 }
 0x170   : > { %1211 = vst.msk [vmem:[%s2033_s28 + $0xc8] sm:$0xff] %vm271_vm1, %v1179_v34  ;;  %v1149_v43 = vadd.f32 %v2024_v62, %v1110_v30  ;;  %v1109_v44 = vld [vmem:[#allocation2 + $0xd0] sm:$0xff]  ;;  %1079 = vst.msk [vmem:[#allocation2 + $0xf8] sm:$0xff] %vm271_vm1, %v1046_v19 }
 0x171   : > { %1210 = vst.msk [vmem:[%s2033_s28 + $0xc0] sm:$0xff] %vm271_vm1, %v1178_v35  ;;  %v1175_v31 = vmax.f32 %v1143_v42, 0.0  ;;  %v1148_v48 = vadd.f32 %v2024_v62, %v1109_v44  ;;  %1078 = vst.msk [vmem:[#allocation2 + $0xf0] sm:$0xff] %vm271_vm1, %v1045_v45 }
 0x172   : > { %v1181_v46 = vmax.f32 %v1149_v43, 0.0  ;;  %v1105_v47 = vld [vmem:[#allocation2 + $0xb0] sm:$0xff] }
 0x173   : > { %v1112_v49 = vld [vmem:[#allocation2 + $0xe8] sm:$0xff]  ;;  %1207 = vst.msk [vmem:[%s2033_s28 + $0xa8] sm:$0xff] %vm271_vm1, %v1175_v31  ;;  %v1180_v50 = vmax.f32 %v1148_v48, 0.0  ;;  %v1144_v51 = vadd.f32 %v2024_v62, %v1105_v47 }
 0x174   : > { %1213 = vst.msk [vmem:[%s2033_s28 + $0xd8] sm:$0xff] %vm271_vm1, %v1181_v46  ;;  %v1151_v52 = vadd.f32 %v2024_v62, %v1112_v49  ;;  %v1111_v53 = vld [vmem:[#allocation2 + $0xe0] sm:$0xff] }
 0x175   : > { %1212 = vst.msk [vmem:[%s2033_s28 + $0xd0] sm:$0xff] %vm271_vm1, %v1180_v50  ;;  %v1176_v12 = vmax.f32 %v1144_v51, 0.0  ;;  %v1150_v55 = vadd.f32 %v2024_v62, %v1111_v53 }
 0x176   : > { %v1183_v54 = vmax.f32 %v1151_v52, 0.0  ;;  %v1106_v38 = vld [vmem:[#allocation2 + $0xb8] sm:$0xff] }
 0x177   : > { %1208 = vst.msk [vmem:[%s2033_s28 + $0xb0] sm:$0xff] %vm271_vm1, %v1176_v12  ;;  %v1182_v8 = vmax.f32 %v1150_v55, 0.0  ;;  %v1145_v56 = vadd.f32 %v2024_v62, %v1106_v38  ;;  %v1114_v58 = vld [vmem:[#allocation2 + $0xf8] sm:$0xff] }
 0x178   : > { %1215 = vst.msk [vmem:[%s2033_s28 + $0xe8] sm:$0xff] %vm271_vm1, %v1183_v54  ;;  %v1153_v59 = vadd.f32 %v2024_v62, %v1114_v58  ;;  %v1113_v61 = vld [vmem:[#allocation2 + $0xf0] sm:$0xff] }
 0x179   : > { %1214 = vst.msk [vmem:[%s2033_s28 + $0xe0] sm:$0xff] %vm271_vm1, %v1182_v8  ;;  %v1177_v60 = vmax.f32 %v1145_v56, 0.0  ;;  %v1152_v0 = vadd.f32 %v2024_v62, %v1113_v61 }
 0x17a   : > { %v1185_v63 = vmax.f32 %v1153_v59, 0.0 }
 0x17b   : > { %1209 = vst.msk [vmem:[%s2033_s28 + $0xb8] sm:$0xff] %vm271_vm1, %v1177_v60  ;;  %v1184_v2 = vmax.f32 %v1152_v0, 0.0 }
 0x17c   : > { %1217 = vst.msk [vmem:[%s2033_s28 + $0xf8] sm:$0xff] %vm271_vm1, %v1185_v63 }
 0x17d   : > { %1216 = vst.msk [vmem:[%s2033_s28 + $0xf0] sm:$0xff] %vm271_vm1, %v1184_v2 }
 0x17e PF: > { %s13_s14 = sadd.s32 1, %s1582_s14   ;;  %s2183_s12 = smov %s1578_s13 }
 0x17f   : > { %p10_p5 = scmp.ge.s32.totalorder %s13_s14, 4   ;;  %s2184_s13 = smov %s2186_s15 }
 0x181   :  { %12 = sbr.rel (!%p10_p5) target bundleno = 2 (0x2), region = 76 }

// kernel: graph_vae_forward.7
= control target key start
LH: loop header
LB: loop body
LE: loop exit
PB: predicated region body
PF: predicated region fallthrough
CT: control target
= control target key end

     0   :  { %19 = vsyncpa [#allocation3], 0  ;;  %s1245_s0 = inlined_call_operand.vmem [shape: f32[2,256], index: 0, kind: input, shape index: {}]   ;;  %s1246_s1 = inlined_call_operand.vmem [shape: f32[2,16], index: 1, kind: input, shape index: {}]   ;;  %s1247_s2 = inlined_call_operand.vmem [shape: f32[256,32], index: 2, kind: input, shape index: {}]   ;;  %s1248_s3 = inlined_call_operand.vmem [shape: f32[1,32], index: 3, kind: input, shape index: {}]   ;;  %s1249_s4 = inlined_call_operand.vmem [shape: f32[16,320], index: 4, kind: input, shape index: {}]   ;;  %s1250_s5 = inlined_call_operand.vmem [shape: f32[1,320], index: 5, kind: input, shape index: {}]   ;;  %s1251_s6 = inlined_call_operand.vmem [shape: f32[256,256], index: 6, kind: input, shape index: {}]   ;;  %s1252_s7 = inlined_call_operand.vmem [shape: f32[1,256], index: 7, kind: input, shape index: {}]   ;;  %s1253_s8 = inlined_call_operand.vmem [shape: f32[64,112], index: 8, kind: input, shape index: {}]   ;;  %s1254_s9 = inlined_call_operand.vmem [shape: f32[1,112], index: 9, kind: input, shape index: {}]   ;;  %s1255_s10 = inlined_call_operand.hbm [shape: f32[2,16], index: 10, kind: output, shape index: {0}]   ;;  %s1256_s11 = inlined_call_operand.hbm [shape: f32[2,16], index: 11, kind: output, shape index: {1}]   ;;  %s1257_s12 = inlined_call_operand.vmem [shape: f32[2,256], index: 12, kind: output, shape index: {2}]   ;;  %s1258_s13 = inlined_call_operand.vmem [shape: f32[2,112], index: 13, kind: output, shape index: {3}]  }
   0x1   :  { %v73_v0 = vld [vmem:[%s1247_s2 + $0xf8] sm:$0xff]  ;;  %v72_v2 = vld [vmem:[%s1247_s2 + $0xf0] sm:$0xff]  ;;  %v71_v4 = vld [vmem:[%s1247_s2 + $0xe8] sm:$0xff] }
   0x2   :  { %v57_v1 = vld [vmem:[%s1247_s2 + $0x78] sm:$0xff]  ;;  %657 = vmatprep.subr.mxu0 %v73_v0  ;;  %v56_v3 = vld [vmem:[%s1247_s2 + $0x70] sm:$0xff]  ;;  %v55_v5 = vld [vmem:[%s1247_s2 + $0x68] sm:$0xff] }
   0x3   :  { %658 = vmatpush3.msra.mxu0 %v57_v1  ;;  %v70_v6 = vld [vmem:[%s1247_s2 + $0xe0] sm:$0xff]  ;;  %v69_v8 = vld [vmem:[%s1247_s2 + $0xd8] sm:$0xff]  ;;  %v68_v10 = vld [vmem:[%s1247_s2 + $0xd0] sm:$0xff] }
   0x4   :  { %659 = vmatprep.subr.mxu0 %v72_v2  ;;  %v54_v7 = vld [vmem:[%s1247_s2 + $0x60] sm:$0xff]  ;;  %v53_v9 = vld [vmem:[%s1247_s2 + $0x58] sm:$0xff]  ;;  %v52_v11 = vld [vmem:[%s1247_s2 + $0x50] sm:$0xff] }
   0x5   :  { %660 = vmatpush3.msra.mxu0 %v56_v3  ;;  %v67_v12 = vld [vmem:[%s1247_s2 + $0xc8] sm:$0xff]  ;;  %v649_v13 = vld.sshfl [vmem:[%s1245_s0] sm:$0x33 pattern:$0x76325410] }
   0x6   :  { %661 = vmatprep.subr.mxu0 %v71_v4  ;;  %v51_v14 = vld [vmem:[%s1247_s2 + $0x48] sm:$0xff]  ;;  %v89_v15 = vcombine.high %v649_v13, %v649_v13 }
   0x7   :  { %662 = vmatpush3.msra.mxu0 %v55_v5 }
   0x8   :  { %663 = vmatprep.subr.mxu0 %v70_v6 }
   0x9   :  { %664 = vmatpush3.msra.mxu0 %v54_v7 }
   0xa   :  { %665 = vmatprep.subr.mxu0 %v69_v8 }
   0xb   :  { %666 = vmatpush3.msra.mxu0 %v53_v9 }
   0xc   :  { %667 = vmatprep.subr.mxu0 %v68_v10 }
   0xd   :  { %20 = vsyncpa [#allocation5], 0  ;;  %668 = vmatpush3.msra.mxu0 %v52_v11  ;;  %v66_v16 = vld [vmem:[%s1247_s2 + $0xc0] sm:$0xff]  ;;  %156 = vmatprep.mubr.f32.mxu0 %v89_v15  ;;  %v65_v18 = vld [vmem:[%s1247_s2 + $0xb8] sm:$0xff]  ;;  %vm162_vm0 = vcmask 123904   ;;  %v789_v45 = vmov 0.0  }
   0xe   :  { %669 = vmatprep.subr.mxu0 %v67_v12  ;;  %v50_v17 = vld [vmem:[%s1247_s2 + $0x40] sm:$0xff]  ;;  %v49_v19 = vld [vmem:[%s1247_s2 + $0x38] sm:$0xff]  ;;  %v64_v20 = vld [vmem:[%s1247_s2 + $0xb0] sm:$0xff]  ;;  %vm202_vm1 = vcmask 130048   ;;  %vm791_vm2 = vmmov 0   ;;  %vm536_vm3 = vcmask 523264  }
   0xf   :  { %670 = vmatpush3.msra.mxu0 %v51_v14  ;;  %v48_v21 = vld [vmem:[%s1247_s2 + $0x30] sm:$0xff]  ;;  %v63_v22 = vld [vmem:[%s1247_s2 + $0xa8] sm:$0xff]  ;;  %v62_v24 = vld [vmem:[%s1247_s2 + $0xa0] sm:$0xff] }
  0x10   :  { %671 = vmatprep.subr.mxu0 %v66_v16  ;;  %v47_v23 = vld [vmem:[%s1247_s2 + $0x28] sm:$0xff]  ;;  %v46_v25 = vld [vmem:[%s1247_s2 + $0x20] sm:$0xff]  ;;  %v61_v26 = vld [vmem:[%s1247_s2 + $0x98] sm:$0xff] }
  0x11   :  { %672 = vmatpush3.msra.mxu0 %v50_v17  ;;  %v45_v27 = vld [vmem:[%s1247_s2 + $0x18] sm:$0xff]  ;;  %v60_v28 = vld [vmem:[%s1247_s2 + $0x90] sm:$0xff]  ;;  %v59_v30 = vld [vmem:[%s1247_s2 + $0x88] sm:$0xff] }
  0x12   :  { %673 = vmatprep.subr.mxu0 %v65_v18  ;;  %v44_v29 = vld [vmem:[%s1247_s2 + $0x10] sm:$0xff]  ;;  %v43_v31 = vld [vmem:[%s1247_s2 + $0x8] sm:$0xff]  ;;  %v58_v32 = vld [vmem:[%s1247_s2 + $0x80] sm:$0xff] }
  0x13   :  { %674 = vmatpush3.msra.mxu0 %v49_v19  ;;  %v42_v33 = vld [vmem:[%s1247_s2] sm:$0xff]  ;;  %v182_v42 = vld [vmem:[%s1249_s4 + $0x18] sm:$0xff]  ;;  %v180_v43 = vld [vmem:[%s1249_s4 + $0x8] sm:$0xff]  ;;  %s790_s2 = smov 112  }
  0x14   :  { %675 = vmatprep.subr.mxu0 %v64_v20  ;;  %v183_v34 = vld [vmem:[%s1249_s4 + $0x20] sm:$0xff]  ;;  %v381_v46 = vld [vmem:[%s1251_s6 + $0xf8] sm:$0xff]  ;;  %v380_v47 = vld [vmem:[%s1251_s6 + $0xf0] sm:$0xff] }
  0x15   :  { %676 = vmatpush3.msra.mxu0 %v48_v21  ;;  %v648_v36 = vld [vmem:[%s1248_s3] ss:$0 sm:$0xff]  ;;  %v379_v48 = vld [vmem:[%s1251_s6 + $0xe8] sm:$0xff]  ;;  %426 = vmatprep.subr.mxu1 %v381_v46  ;;  %v377_v50 = vld [vmem:[%s1251_s6 + $0xd8] sm:$0xff] }
  0x16   :  { %677 = vmatprep.subr.mxu0 %v63_v22  ;;  %v179_v44 = vld [vmem:[%s1249_s4] sm:$0xff]  ;;  %427 = vmatpush1.msra.mxu1 %v380_v47  ;;  %v376_v51 = vld [vmem:[%s1251_s6 + $0xd0] sm:$0xff]  ;;  %v375_v53 = vld [vmem:[%s1251_s6 + $0xc8] sm:$0xff] }
  0x17   :  { %678 = vmatpush3.msra.mxu0 %v47_v23  ;;  %v378_v49 = vld [vmem:[%s1251_s6 + $0xe0] sm:$0xff]  ;;  %428 = vmatprep.subr.mxu1 %v379_v48  ;;  %v373_v55 = vld [vmem:[%s1251_s6 + $0xb8] sm:$0xff]  ;;  %v372_v56 = vld [vmem:[%s1251_s6 + $0xb0] sm:$0xff] }
  0x18   :  { %679 = vmatprep.subr.mxu0 %v62_v24  ;;  %429 = vmatpush1.msra.mxu1 %v378_v49  ;;  %v374_v54 = vld [vmem:[%s1251_s6 + $0xc0] sm:$0xff]  ;;  %v371_v57 = vld [vmem:[%s1251_s6 + $0xa8] sm:$0xff]  ;;  %v369_v59 = vld [vmem:[%s1251_s6 + $0x98] sm:$0xff] }
  0x19   :  { %680 = vmatpush3.msra.mxu0 %v46_v25  ;;  %430 = vmatprep.subr.mxu1 %v377_v50  ;;  %v370_v58 = vld [vmem:[%s1251_s6 + $0xa0] sm:$0xff]  ;;  %v368_v60 = vld [vmem:[%s1251_s6 + $0x90] sm:$0xff]  ;;  %v367_v61 = vld [vmem:[%s1251_s6 + $0x88] sm:$0xff] }
  0x1a   :  { %681 = vmatprep.subr.mxu0 %v61_v26  ;;  %431 = vmatpush1.msra.mxu1 %v376_v51  ;;  %v366_v62 = vld [vmem:[%s1251_s6 + $0x80] sm:$0xff]  ;;  %v365_v63 = vld [vmem:[%s1251_s6 + $0x78] sm:$0xff]  ;;  %v364_v0 = vld [vmem:[%s1251_s6 + $0x70] sm:$0xff] }
  0x1b   :  { %682 = vmatpush3.msra.mxu0 %v45_v27  ;;  %432 = vmatprep.subr.mxu1 %v375_v53  ;;  %v363_v1 = vld [vmem:[%s1251_s6 + $0x68] sm:$0xff]  ;;  %v362_v2 = vld [vmem:[%s1251_s6 + $0x60] sm:$0xff]  ;;  %v361_v3 = vld [vmem:[%s1251_s6 + $0x58] sm:$0xff] }
  0x1c   :  { %683 = vmatprep.subr.mxu0 %v60_v28  ;;  %433 = vmatpush1.msra.mxu1 %v374_v54  ;;  %v360_v4 = vld [vmem:[%s1251_s6 + $0x50] sm:$0xff]  ;;  %v359_v5 = vld [vmem:[%s1251_s6 + $0x48] sm:$0xff]  ;;  %v358_v6 = vld [vmem:[%s1251_s6 + $0x40] sm:$0xff] }
  0x1d   :  { %684 = vmatpush3.msra.mxu0 %v44_v29  ;;  %434 = vmatprep.subr.mxu1 %v373_v55  ;;  %v357_v7 = vld [vmem:[%s1251_s6 + $0x38] sm:$0xff]  ;;  %v356_v8 = vld [vmem:[%s1251_s6 + $0x30] sm:$0xff]  ;;  %v355_v9 = vld [vmem:[%s1251_s6 + $0x28] sm:$0xff] }
  0x1e   :  { %685 = vmatprep.subr.mxu0 %v59_v30  ;;  %435 = vmatpush1.msra.mxu1 %v372_v56  ;;  %v354_v10 = vld [vmem:[%s1251_s6 + $0x20] sm:$0xff]  ;;  %v353_v11 = vld [vmem:[%s1251_s6 + $0x18] sm:$0xff]  ;;  %v352_v12 = vld [vmem:[%s1251_s6 + $0x10] sm:$0xff] }
  0x1f   :  { %686 = vmatpush3.msra.mxu0 %v43_v31  ;;  %436 = vmatprep.subr.mxu1 %v371_v57  ;;  %v350_v14 = vld [vmem:[%s1251_s6] sm:$0xff]  ;;  %v413_v15 = vld [vmem:[%s1251_s6 + $0x1f8] sm:$0xff]  ;;  %v412_v16 = vld [vmem:[%s1251_s6 + $0x1f0] sm:$0xff] }
  0x20   :  { %687 = vmatprep.subr.mxu0 %v58_v32  ;;  %437 = vmatpush1.msra.mxu1 %v370_v58  ;;  %v411_v17 = vld [vmem:[%s1251_s6 + $0x1e8] sm:$0xff]  ;;  %v410_v18 = vld [vmem:[%s1251_s6 + $0x1e0] sm:$0xff]  ;;  %v409_v19 = vld [vmem:[%s1251_s6 + $0x1d8] sm:$0xff] }
  0x21   :  { %688 = vmatpush3.msra.mxu0 %v42_v33  ;;  %438 = vmatprep.subr.mxu1 %v369_v59  ;;  %v408_v20 = vld [vmem:[%s1251_s6 + $0x1d0] sm:$0xff]  ;;  %v407_v21 = vld [vmem:[%s1251_s6 + $0x1c8] sm:$0xff]  ;;  %v406_v22 = vld [vmem:[%s1251_s6 + $0x1c0] sm:$0xff] }
  0x22   :  { %157 = vmatmul.mubr.f32.vlgmr.msra.gmra.mxu0 %v649_v13  ;;  %234 = vmatprep.subr.mxu0 %v183_v34  ;;  %v351_v13 = vld [vmem:[%s1251_s6 + $0x8] sm:$0xff]  ;;  %v405_v23 = vld [vmem:[%s1251_s6 + $0x1b8] sm:$0xff]  ;;  %v404_v24 = vld [vmem:[%s1251_s6 + $0x1b0] sm:$0xff] }
  0x23   :  { %235 = vmatpush1.msra.mxu0 %v182_v42  ;;  %270 = vmatprep.mubr.f32.mxu0 %v789_v45  ;;  %v403_v25 = vld [vmem:[%s1251_s6 + $0x1a8] sm:$0xff]  ;;  %v402_v26 = vld [vmem:[%s1251_s6 + $0x1a0] sm:$0xff]  ;;  %v401_v27 = vld [vmem:[%s1251_s6 + $0x198] sm:$0xff] }
  0x24   :  { %236 = vmatprep.subr.mxu0 %v180_v43  ;;  %439 = vmatpush1.msra.mxu1 %v368_v60  ;;  %v400_v28 = vld [vmem:[%s1251_s6 + $0x190] sm:$0xff]  ;;  %v399_v29 = vld [vmem:[%s1251_s6 + $0x188] sm:$0xff]  ;;  %v398_v30 = vld [vmem:[%s1251_s6 + $0x180] sm:$0xff] }
  0x25   :  { %237 = vmatpush1.msra.mxu0 %v179_v44  ;;  %440 = vmatprep.subr.mxu1 %v367_v61  ;;  %v397_v31 = vld [vmem:[%s1251_s6 + $0x178] sm:$0xff]  ;;  %v396_v32 = vld [vmem:[%s1251_s6 + $0x170] sm:$0xff]  ;;  %v395_v33 = vld [vmem:[%s1251_s6 + $0x168] sm:$0xff] }
  0x26   :  { %704 = vmatprep.subr.mxu0 %v789_v45  ;;  %441 = vmatpush1.msra.mxu1 %v366_v62  ;;  %v394_v34 = vld [vmem:[%s1251_s6 + $0x160] sm:$0xff]  ;;  %v184_v44 = vld [vmem:[%s1249_s4 + $0x28] sm:$0xff]  ;;  %v181_v47 = vld [vmem:[%s1249_s4 + $0x10] sm:$0xff] }
  0x27   :  { %442 = vmatprep.subr.mxu1 %v365_v63  ;;  %v527_v48 = vld [vmem:[%s1253_s8 + $0x30] sm:$0xff]  ;;  %v526_v49 = vld [vmem:[%s1253_s8 + $0x28] sm:$0xff]  ;;  %v389_v50 = vld [vmem:[%s1251_s6 + $0x138] sm:$0xff]  ;;  %v187_v63 = vlaneseq }
  0x28   :  { %443 = vmatpush1.msra.mxu1 %v364_v0  ;;  %v525_v51 = vld [vmem:[%s1253_s8 + $0x20] sm:$0xff]  ;;  %v387_v53 = vld [vmem:[%s1251_s6 + $0x128] sm:$0xff]  ;;  %v524_v54 = vld [vmem:[%s1253_s8 + $0x18] sm:$0xff] }
  0x29   :  { %444 = vmatprep.subr.mxu1 %v363_v1  ;;  %v386_v55 = vld [vmem:[%s1251_s6 + $0x120] sm:$0xff]  ;;  %v385_v56 = vld [vmem:[%s1251_s6 + $0x118] sm:$0xff]  ;;  %v523_v57 = vld [vmem:[%s1253_s8 + $0x10] sm:$0xff]  ;;  %v188_v0 = vshrl.u32 %v187_v63, 7 }
  0x2a   :  { %445 = vmatpush1.msra.mxu1 %v362_v2  ;;  %v384_v58 = vld [vmem:[%s1251_s6 + $0x110] sm:$0xff]  ;;  %v383_v59 = vld [vmem:[%s1251_s6 + $0x108] sm:$0xff]  ;;  %v382_v61 = vld [vmem:[%s1251_s6 + $0x100] sm:$0xff] }
  0x2b   :  { %446 = vmatprep.subr.mxu1 %v361_v3  ;;  %v522_v60 = vld [vmem:[%s1253_s8 + $0x8] sm:$0xff]  ;;  %v521_v62 = vld [vmem:[%s1253_s8] sm:$0xff]  ;;  %v189_v1 = vsub.s32 0, %v188_v0  ;;  %v193_v3 = vsub.s32 1, %v188_v0 }
  0x2c   :  { %447 = vmatpush1.msra.mxu1 %v360_v4  ;;  %v185_v2 = vld [vmem:[%s1250_s5] sm:$0x7]  ;;  %v197_v4 = vsub.s32 2, %v188_v0  ;;  %s792_s5 = smov [#allocation2]  }
  0x2d   :  { %448 = vmatprep.subr.mxu1 %v359_v5  ;;  %v190_v5 = vrot.slane %v185_v2, %v189_v1 }
  0x2e   :  { %449 = vmatpush1.msra.mxu1 %v358_v6  ;;  %v194_v6 = vrot.slane %v185_v2, %v193_v3 }
  0x2f   :  { %450 = vmatprep.subr.mxu1 %v357_v7 }
  0x30   :  { %451 = vmatpush1.msra.mxu1 %v356_v8  ;;  %v198_v8 = vrot.slane %v185_v2, %v197_v4 }
  0x31   :  { %452 = vmatprep.subr.mxu1 %v355_v9 }
  0x32   :  { %453 = vmatpush1.msra.mxu1 %v354_v10 }
  0x33   :  { %454 = vmatprep.subr.mxu1 %v353_v11 }
  0x34   :  { %455 = vmatpush1.msra.mxu1 %v352_v12 }
  0x35   :  { %456 = vmatprep.subr.mxu1 %v351_v13 }
  0x36   :  { %457 = vmatpush1.msra.mxu1 %v350_v14 }
  0x37   :  { %458 = vmatprep.subr.mxu1 %v413_v15 }
  0x38   :  { %459 = vmatpush2.msra.mxu1 %v412_v16 }
  0x39   :  { %460 = vmatprep.subr.mxu1 %v411_v17 }
  0x3a   :  { %461 = vmatpush2.msra.mxu1 %v410_v18 }
  0x3b   :  { %462 = vmatprep.subr.mxu1 %v409_v19 }
  0x3c   :  { %463 = vmatpush2.msra.mxu1 %v408_v20 }
  0x3d   :  { %464 = vmatprep.subr.mxu1 %v407_v21 }
  0x3e   :  { %465 = vmatpush2.msra.mxu1 %v406_v22 }
  0x3f   :  { %466 = vmatprep.subr.mxu1 %v405_v23 }
  0x40   :  { %467 = vmatpush2.msra.mxu1 %v404_v24 }
  0x41   :  { %468 = vmatprep.subr.mxu1 %v403_v25 }
  0x42   :  { %469 = vmatpush2.msra.mxu1 %v402_v26 }
  0x43   :  { %470 = vmatprep.subr.mxu1 %v401_v27 }
  0x44   :  { %471 = vmatpush2.msra.mxu1 %v400_v28 }
  0x45   :  { %472 = vmatprep.subr.mxu1 %v399_v29 }
  0x46   :  { %473 = vmatpush2.msra.mxu1 %v398_v30 }
  0x47   :  { %474 = vmatprep.subr.mxu1 %v397_v31 }
  0x48   :  { %475 = vmatpush2.msra.mxu1 %v396_v32 }
  0x49   :  { %476 = vmatprep.subr.mxu1 %v395_v33 }
  0x4a   :  { %477 = vmatpush2.msra.mxu1 %v394_v34 }
  0xe2   :  { %v689_v35 = vpop.f32.mrf.mxu0 }
  0xe4   :  { %v690_v37 = vpop.f32.mrf.mxu0 }
  0xe5   :  { %v691_v38 = vadd.f32 %v690_v37, %v689_v35  ;;  %v393_v35 = vld [vmem:[%s1251_s6 + $0x158] sm:$0xff]  ;;  %v391_v37 = vld [vmem:[%s1251_s6 + $0x148] sm:$0xff] }
  0xe6   :  { %478 = vmatprep.subr.mxu1 %v393_v35 }
  0xe7   :  { %v969_v39 = vadd.f32 %v691_v38, %v648_v36  ;;  %v392_v36 = vld [vmem:[%s1251_s6 + $0x150] sm:$0xff]  ;;  %v390_v38 = vld [vmem:[%s1251_s6 + $0x140] sm:$0xff] }
  0xe8   :  { %479 = vmatpush2.msra.mxu1 %v392_v36 }
  0xe9   :  { %v170_v40 = vmul.f32 0.5, %v969_v39  ;;  %163 = vst.msk [vmem:[#allocation2] sm:$0x3] %vm162_vm0, %v969_v39  ;;  %480 = vmatprep.subr.mxu1 %v391_v37 }
  0xea   :  { %481 = vmatpush2.msra.mxu1 %v390_v38 }
  0xeb   :  { %v171_v41 = vmul.f32 1.442695, %v170_v40  ;;  %v169_v40 = vld [vmem:[%s1246_s1] sm:$0x3]  ;;  %482 = vmatprep.subr.mxu1 %v389_v50 }
  0xed   :  { %735 = vpow2.f32 %v171_v41 }
  0xfa   :  { %v736_v52 = vpop.eup %735 }
  0xfb   :  { %174 = vrot.lane.b32.xlu0 %v736_v52, %s790_s2  ;;  %v388_v52 = vld [vmem:[%s1251_s6 + $0x130] sm:$0xff]  ;;  %s618_s6 = sshll.u32 %s792_s5, 4  ;;  %s619_s6 = int_to_ptr.vmem [resolvable:$true] %s618_s6 }
  0xfc   :  { %483 = vmatpush2.msra.mxu1 %v388_v52  ;;  %s745_s21 = scalar_lea.vmem %s619_s6, 32  ;;  %p750_p1 = scmp.lt.s32.totalorder %s619_s6, %s619_s6 }
  0xfd   :  { %484 = vmatprep.subr.mxu1 %v387_v53  ;;  %p746_p0 = scmp.ne.s32.totalorder %s619_s6, %s745_s21  ;;  %p751_p2 = scmp.lt.s32.totalorder %s745_s21, %s745_s21 }
  0xfe   :  { %485 = vmatpush2.msra.mxu1 %v386_v55 }
  0xff   :  { %165 = vrot.lane.b32.xlu0 %v969_v39, %s790_s2  ;;  %486 = vmatprep.subr.mxu1 %v385_v56  ;;  %p752_p3 = por %p751_p2, %p750_p1 }
 0x100   :  { %487 = vmatpush2.msra.mxu1 %v384_v58 }
 0x101   :  { %488 = vmatprep.subr.mxu1 %v383_v59  ;;  %p753_p4 = pnand %p752_p3, %p746_p0 }
 0x102   :  { %489 = vmatpush2.msra.mxu1 %v382_v61 }
 0x16d   :  { %v175_v41 = vpop.permute.xlu0 %174 }
 0x16e   :  { %v177_v42 = vmul.f32 %v175_v41, %v169_v40 }
 0x170   :  { %v178_v43 = vadd.f32 %v177_v42, %v969_v39  ;;  %v528_v39 = vld [vmem:[%s1253_s8 + $0x38] sm:$0xff]  ;;  %s793_s8 = smov [#allocation4]  }
 0x171   :  { %v166_v46 = vpop.permute.xlu0 %165  ;;  %s628_s20 = sshll.u32 %s793_s8, 4  ;;  %s629_s20 = int_to_ptr.vmem [resolvable:$true] %s628_s20 }
 0x172   :  { %168 = vst.msk [vmem:[#allocation4] sm:$0x3] %vm162_vm0, %v166_v46  ;;  %650 = vmatmul.mubr.msk.f32.vlgmr.msra.gmra.mxu0 %vm202_vm1, %v178_v43 }
 0x173   :  { %705 = vmatpush3.msra.mxu0 %v184_v44  ;;  %708 = vmatprep.mubr.msk.f32.mxu0 %vm791_vm2, %v789_v45 }
 0x174   :  { %706 = vmatprep.subr.mxu0 %v789_v45 }
 0x175   :  { %707 = vmatpush3.msra.mxu0 %v181_v47 }
 0x176   :  { %709 = vmatmul.mubr.msk.f32.vlgmr.msra.gmra.mxu0 %vm202_vm1, %v178_v43  ;;  %711 = vmatprep.subr.mxu0 %v789_v45 }
 0x177   :  { %712 = vmatpush3.msra.mxu0 %v528_v39  ;;  %727 = vmatprep.mubr.msk.f32.mxu0 %vm791_vm2, %v789_v45 }
 0x178   :  { %713 = vmatprep.subr.mxu0 %v789_v45 }
 0x179   :  { %714 = vmatpush3.msra.mxu0 %v527_v48 }
 0x17a   :  { %715 = vmatprep.subr.mxu0 %v789_v45 }
 0x17b   :  { %716 = vmatpush3.msra.mxu0 %v526_v49 }
 0x17c   :  { %717 = vmatprep.subr.mxu0 %v789_v45 }
 0x17d   :  { %718 = vmatpush3.msra.mxu0 %v525_v51 }
 0x17e   :  { %719 = vmatprep.subr.mxu0 %v789_v45 }
 0x17f   :  { %720 = vmatpush3.msra.mxu0 %v524_v54 }
 0x180   :  { %721 = vmatprep.subr.mxu0 %v789_v45 }
 0x181   :  { %722 = vmatpush3.msra.mxu0 %v523_v57 }
 0x182   :  { %723 = vmatprep.subr.mxu0 %v789_v45 }
 0x183   :  { %724 = vmatpush3.msra.mxu0 %v522_v60 }
 0x184   :  { %725 = vmatprep.subr.mxu0 %v789_v45 }
 0x185   :  { %726 = vmatpush3.msra.mxu0 %v521_v62 }
 0x232   :  { %v272_v7 = vpop.f32.mrf.mxu0 }
 0x233   :  { %v273_v9 = vadd.f32 %v272_v7, %v190_v5 }
 0x234   :  { %v274_v45 = vpop.f32.mrf.mxu0 }
 0x235   :  { %v275_v10 = vadd.f32 %v274_v45, %v194_v6  ;;  %v347_v14 = vmax.f32 %v273_v9, 0.0 }
 0x236   :  { %v343_v11 = vpop.f32.mrf.mxu0 }
 0x237   :  { %v344_v12 = vadd.f32 %v343_v11, %v198_v8  ;;  %v348_v13 = vmax.f32 %v275_v10, 0.0 }
 0x238   :  { %v710_v15 = vpop.f32.mrf.mxu0 }
 0x239   :  { %v349_v16 = vmax.f32 %v344_v12, 0.0  ;;  %490 = vmatprep.mubr.f32.mxu1 %v348_v13 }
 0x23a   :  { %491 = vmatmul.mubr.f32.vlgmr.msra.gmra.mxu1 %v347_v14 }
 0x23b   :  { %728 = vmatmul.mubr.msk.f32.vlgmr.msra.gmra.mxu0 %vm536_vm3, %v349_v16 }
 0x23c   :  { %756 = shalt.err (!%p753_p4)
}
 0x23d   :  { %621 = dma.vmem_to_hbm [thread:$0]  %s619_s6, 32, %s1255_s10, [#allocation3]  }
 0x23e   :  { %s765_s24 = scalar_lea.vmem %s629_s20, 32  ;;  %p770_p6 = scmp.lt.s32.totalorder %s629_s20, %s629_s20 }
 0x23f   :  { %p766_p5 = scmp.ne.s32.totalorder %s629_s20, %s765_s24  ;;  %p771_p7 = scmp.lt.s32.totalorder %s765_s24, %s765_s24 }
 0x241   :  { %p772_p8 = por %p771_p7, %p770_p6 }
 0x243   :  { %p773_p9 = pnand %p772_p8, %p766_p5 }
 0x245   :  { %776 = shalt.err (!%p773_p9)
}
 0x246   :  { %631 = dma.vmem_to_hbm [thread:$0]  %s629_s20, 32, %s1256_s11, [#allocation5]   ;;  %v414_v17 = vld [vmem:[%s1252_s7] sm:$0x3]  ;;  %vm610_vm4 = vcmask 910336  }
 0x247   :  { %v419_v18 = vrot.slane %v414_v17, %v189_v1  ;;  %v655_v19 = vld [vmem:[%s1254_s9] ss:$0 sm:$0xff]  ;;  %v423_v20 = vrot.slane %v414_v17, %v193_v3 }
 0x2fa   :  { %v492_v21 = vpop.f32.mrf.mxu1 }
 0x2fb   :  { %v493_v22 = vadd.f32 %v492_v21, %v419_v18  ;;  %v606_v23 = vpop.f32.mrf.mxu0 }
 0x2fc   :  { %v607_v24 = vadd.f32 %v655_v19, %v606_v23  ;;  %v494_v25 = vpop.f32.mrf.mxu1 }
 0x2fd   :  { %v652_v26 = vmul.f32 -1.442695, %v493_v22  ;;  %v495_v27 = vadd.f32 %v494_v25, %v423_v20  ;;  %v729_v28 = vpop.f32.mrf.mxu0 }
 0x2fe   :  { %611 = vst.msk [vmem:[%s1258_s13] sm:$0x3] %vm610_vm4, %v607_v24 }
 0x2ff   :  { %737 = vpow2.f32 %v652_v26  ;;  %v653_v29 = vmul.f32 -1.442695, %v495_v27 }
 0x301   :  { %739 = vpow2.f32 %v653_v29 }
 0x30c   :  { %v738_v30 = vpop.eup %737 }
 0x30d   :  { %v503_v31 = vadd.f32 1.0, %v738_v30 }
 0x30e   :  { %v740_v32 = vpop.eup %739 }
 0x30f   :  { %v504_v33 = vadd.f32 1.0, %v740_v32  ;;  %741 = vrcp.f32 %v503_v31 }
 0x311   :  { %743 = vrcp.f32 %v504_v33 }
 0x31c   :  { %v742_v34 = vpop.eup %741 }
 0x31e   :  { %v744_v35 = vpop.eup %743 }
 0x31f   :  { %v511_v36 = vcombine.low %v742_v34, %v744_v35 }
 0x321   :  { %654 = vst.sshfl [vmem:[%s1257_s12] sm:$0x33 pattern:$0x76325410] %v511_v36 }
 0x322   :  { %785 = dma.done.wait [#allocation3], 32  }
 0x323   :  { %786 = vsyncadd [#allocation3], 4294967264 }
 0x324   :  { %787 = dma.done.wait [#allocation5], 32  }
 0x325   :  { %788 = vsyncadd [#allocation5], 4294967264 }
 0x326   :  { %646 = vsyncpa [#allocation3], 1 }
 0x327   :  { %647 = vsyncpa [#allocation5], 1 }

// kernel: graph_vae_forward.6
= control target key start
LH: loop header
LB: loop body
LE: loop exit
PB: predicated region body
PF: predicated region fallthrough
CT: control target
= control target key end

     0   :  { %s10993_s12 = smov 0   ;;  %s10995_s13 = smov 0   ;;  %s12375_s0 = inlined_call_operand.vmem [shape: f32[2,16384], index: 0, kind: input, shape index: {}]   ;;  %s12376_s1 = inlined_call_operand.vmem [shape: bf16[16384,256], index: 1, kind: input, shape index: {}]   ;;  %s12377_s2 = inlined_call_operand.vmem [shape: f32[1,256], index: 2, kind: input, shape index: {}]   ;;  %s12378_s3 = inlined_call_operand.vmem [shape: f32[2,256], index: 3, kind: output, shape index: {}]  }
   0x1   :  { %s10997_s14 = smov 0  }
   0x2 LB: > { %s25_s15 = sadd.s32 1, %s10965_s13  ;;  %p8332_p0 = scmp.ge.s32.totalorder %s10969_s14, 1  ;;  %s10969_s14 = sphi %s10997_s14, %s13_s14   ;;  %s10965_s13 = sphi %s10995_s13, %s12380_s13   ;;  %s10961_s12 = sphi %s10993_s12, %s12379_s12  }
   0x3   : > { %p26_p1 = scmp.ge.s32.totalorder %s25_s15, 2  ;;  %p194_p2 = scmp.lt.s32.totalorder %s10969_s14, 3 }
   0x5   : > { %s12382_s15 = smov (%p26_p1, %s25_s15), 0  ;;  %p195_p3 = pnand %p8332_p0, %p194_p2 }
   0x6   : > { %s8333_s16 = sshll.u32 (!%p195_p3), %s10961_s12, 6  ;;  %s8335_s17 = sshll.u32 (!%p195_p3), %s10961_s12, 10 }
   0x7   : > { %198 = sbr.rel (%p195_p3) target bundleno = 1266 (0x4f2), region = 32  ;;  %p243_p4 = scmp.lt.s32.totalorder (!%p195_p3), %s8333_s16, 127 }
   0x8   : > { %p252_p5 = scmp.lt.s32.totalorder (!%p195_p3), %s8335_s17, 2047  ;;  %p8338_p6 = scmp.ne.s32.totalorder (!%p195_p3), %s10961_s12, 0 }
   0xc   : > { %s12384_s16 = smov (!%p243_p4, %s8333_s16), 127  ;;  %s12386_s17 = smov (!%p252_p5, %s8335_s17), 2047 }
   0xd   : > { %s8334_s18 = sshll.u32 %s12384_s16, 1  ;;  %s9368_s22 = sshll.u32 %s12386_s17, 3 }
   0xe   : > { %s11018_s21 = scalar_lea.vmem %s12375_s0, %s8334_s18  ;;  %s11023_s25 = scalar_lea.vmem %s12376_s1, %s9368_s22 }
   0xf   : > { %280 = sbr.rel (%p8338_p6) target bundleno = 22 (0x16), region = 36 }
  0x14   : > { %v10971_v0 = vmov 0.0  }
  0x15   : > { %281 = vst [vmem:[#allocation2] sm:$0xf] %v10971_v0 }
  0x16 PF: > { %v9395_v1 = vld [vmem:[%s11023_s25 + $0x74] ss:$8 sps:$4 sm:$0xff]   ;;  %v9399_v3 = vld [vmem:[%s11023_s25 + $0x70] ss:$8 sps:$4 sm:$0xff]   ;;  %v9401_v5 = vld [vmem:[%s11023_s25 + $0x64] ss:$8 sps:$4 sm:$0xff]   ;;  %v319_v39 = vlaneseq }
  0x17   : > { %v9397_v2 = vld [vmem:[%s11023_s25 + $0x174] ss:$8 sps:$4 sm:$0xff]   ;;  %6859 = vmatprep.subr.bf16.mxu0 %v9395_v1  ;;  %v9400_v4 = vld [vmem:[%s11023_s25 + $0x170] ss:$8 sps:$4 sm:$0xff]   ;;  %v9403_v6 = vld [vmem:[%s11023_s25 + $0x164] ss:$8 sps:$4 sm:$0xff]  }
  0x18   : > { %6900 = vmatprep.subr.bf16.mxu1 %v9397_v2  ;;  %6860 = vmatpush1.bf16.msra.mxu0 %v9399_v3  ;;  %v9405_v7 = vld [vmem:[%s11023_s25 + $0x60] ss:$8 sps:$4 sm:$0xff]   ;;  %v9407_v9 = vld [vmem:[%s11023_s25 + $0x54] ss:$8 sps:$4 sm:$0xff]   ;;  %v9411_v11 = vld [vmem:[%s11023_s25 + $0x50] ss:$8 sps:$4 sm:$0xff]  }
  0x19   : > { %6901 = vmatpush1.bf16.msra.mxu1 %v9400_v4  ;;  %6861 = vmatprep.subr.bf16.mxu0 %v9401_v5  ;;  %v9406_v8 = vld [vmem:[%s11023_s25 + $0x160] ss:$8 sps:$4 sm:$0xff]   ;;  %v9409_v10 = vld [vmem:[%s11023_s25 + $0x154] ss:$8 sps:$4 sm:$0xff]   ;;  %v9412_v12 = vld [vmem:[%s11023_s25 + $0x150] ss:$8 sps:$4 sm:$0xff]  }
  0x1a   : > { %6902 = vmatprep.subr.bf16.mxu1 %v9403_v6  ;;  %v9413_v13 = vld [vmem:[%s11023_s25 + $0x44] ss:$8 sps:$4 sm:$0xff]   ;;  %v9417_v15 = vld [vmem:[%s11023_s25 + $0x40] ss:$8 sps:$4 sm:$0xff]   ;;  %v9419_v17 = vld [vmem:[%s11023_s25 + $0x34] ss:$8 sps:$4 sm:$0xff]  }
  0x1b   : > { %v9415_v14 = vld [vmem:[%s11023_s25 + $0x144] ss:$8 sps:$4 sm:$0xff]   ;;  %v9418_v16 = vld [vmem:[%s11023_s25 + $0x140] ss:$8 sps:$4 sm:$0xff]   ;;  %v9421_v18 = vld [vmem:[%s11023_s25 + $0x134] ss:$8 sps:$4 sm:$0xff]  }
  0x1c   : > { %6862 = vmatpush1.bf16.msra.mxu0 %v9405_v7  ;;  %v9423_v19 = vld [vmem:[%s11023_s25 + $0x30] ss:$8 sps:$4 sm:$0xff]   ;;  %v9425_v21 = vld [vmem:[%s11023_s25 + $0x24] ss:$8 sps:$4 sm:$0xff]   ;;  %v9429_v23 = vld [vmem:[%s11023_s25 + $0x20] ss:$8 sps:$4 sm:$0xff]  }
  0x1d   : > { %6903 = vmatpush1.bf16.msra.mxu1 %v9406_v8  ;;  %6863 = vmatprep.subr.bf16.mxu0 %v9407_v9  ;;  %v9424_v20 = vld [vmem:[%s11023_s25 + $0x130] ss:$8 sps:$4 sm:$0xff]   ;;  %v9427_v22 = vld [vmem:[%s11023_s25 + $0x124] ss:$8 sps:$4 sm:$0xff]   ;;  %v9430_v24 = vld [vmem:[%s11023_s25 + $0x120] ss:$8 sps:$4 sm:$0xff]  }
  0x1e   : > { %6904 = vmatprep.subr.bf16.mxu1 %v9409_v10  ;;  %v9431_v25 = vld [vmem:[%s11023_s25 + $0x14] ss:$8 sps:$4 sm:$0xff]   ;;  %v9435_v27 = vld [vmem:[%s11023_s25 + $0x10] ss:$8 sps:$4 sm:$0xff]   ;;  %v9437_v29 = vld [vmem:[%s11023_s25 + $0x4] ss:$8 sps:$4 sm:$0xff]  }
  0x1f   : > { %v9433_v26 = vld [vmem:[%s11023_s25 + $0x114] ss:$8 sps:$4 sm:$0xff]   ;;  %v9436_v28 = vld [vmem:[%s11023_s25 + $0x110] ss:$8 sps:$4 sm:$0xff]   ;;  %v9439_v30 = vld [vmem:[%s11023_s25 + $0x104] ss:$8 sps:$4 sm:$0xff]  }
  0x20   : > { %6864 = vmatpush1.bf16.msra.mxu0 %v9411_v11  ;;  %v9441_v31 = vld [vmem:[%s11023_s25] ss:$8 sps:$4 sm:$0xff]   ;;  %v9443_v33 = vld [vmem:[%s11023_s25 + $0xf4] ss:$8 sps:$4 sm:$0xff]   ;;  %v9447_v35 = vld [vmem:[%s11023_s25 + $0xf0] ss:$8 sps:$4 sm:$0xff]  }
  0x21   : > { %6905 = vmatpush1.bf16.msra.mxu1 %v9412_v12  ;;  %6865 = vmatprep.subr.bf16.mxu0 %v9413_v13  ;;  %v9442_v32 = vld [vmem:[%s11023_s25 + $0x100] ss:$8 sps:$4 sm:$0xff]   ;;  %v9445_v34 = vld [vmem:[%s11023_s25 + $0x1f4] ss:$8 sps:$4 sm:$0xff]   ;;  %v9448_v36 = vld [vmem:[%s11023_s25 + $0x1f0] ss:$8 sps:$4 sm:$0xff]  }
  0x22   : > { %6906 = vmatprep.subr.bf16.mxu1 %v9415_v14  ;;  %v10972_v37 = vmov 1983009808   ;;  %v9449_v40 = vld [vmem:[%s11023_s25 + $0xe4] ss:$8 sps:$4 sm:$0xff]   ;;  %v9453_v42 = vld [vmem:[%s11023_s25 + $0xe0] ss:$8 sps:$4 sm:$0xff]  }
  0x23   : > { %v317_v38 = vunpack.c.l.s4 %v10972_v37  ;;  %v9451_v41 = vld [vmem:[%s11023_s25 + $0x1e4] ss:$8 sps:$4 sm:$0xff]   ;;  %v11065_v44 = vshrl.u32 %v319_v39, 7  ;;  %v9454_v45 = vld [vmem:[%s11023_s25 + $0x1e0] ss:$8 sps:$4 sm:$0xff]   ;;  %p9363_p7 = scmp.ne.s32.totalorder %s10961_s12, 1 }
  0x24   : > { %6866 = vmatpush1.bf16.msra.mxu0 %v9417_v15  ;;  %v9455_v46 = vld [vmem:[%s11023_s25 + $0xd4] ss:$8 sps:$4 sm:$0xff]   ;;  %v9459_v48 = vld [vmem:[%s11023_s25 + $0xd0] ss:$8 sps:$4 sm:$0xff]   ;;  %v9461_v51 = vld [vmem:[%s11023_s25 + $0xc4] ss:$8 sps:$4 sm:$0xff]  }
  0x25   : > { %6907 = vmatpush1.bf16.msra.mxu1 %v9418_v16  ;;  %6867 = vmatprep.subr.bf16.mxu0 %v9419_v17  ;;  %v318_v43 = vunpack.c.0.s8 %v317_v38  ;;  %v9457_v47 = vld [vmem:[%s11023_s25 + $0x1d4] ss:$8 sps:$4 sm:$0xff]   ;;  %v9460_v49 = vld [vmem:[%s11023_s25 + $0x1d0] ss:$8 sps:$4 sm:$0xff]   ;;  %v9463_v52 = vld [vmem:[%s11023_s25 + $0x1c4] ss:$8 sps:$4 sm:$0xff]  }
  0x26   : > { %6908 = vmatprep.subr.bf16.mxu1 %v9421_v18  ;;  %v283_v53 = vld [vmem:[%s11018_s21] sm:$0xff]  ;;  %v9467_v58 = vld [vmem:[%s11023_s25 + $0xb4] ss:$8 sps:$4 sm:$0xff]   ;;  %v9471_v62 = vld [vmem:[%s11023_s25 + $0xb0] ss:$8 sps:$4 sm:$0xff]  }
  0x27   : > { %v11073_v50 = vsub.s32 %v318_v43, %v11065_v44  ;;  %v9465_v54 = vld [vmem:[%s11023_s25 + $0xc0] ss:$8 sps:$4 sm:$0xff]   ;;  %v315_v56 = vcombine.high %v283_v53, %v283_v53  ;;  %v9469_v59 = vld [vmem:[%s11023_s25 + $0x1b4] ss:$8 sps:$4 sm:$0xff]   ;;  %v9472_v1 = vld [vmem:[%s11023_s25 + $0x1b0] ss:$8 sps:$4 sm:$0xff]  }
  0x28   : > { %6868 = vmatpush1.bf16.msra.mxu0 %v9423_v19  ;;  %v9466_v57 = vld [vmem:[%s11023_s25 + $0x1c0] ss:$8 sps:$4 sm:$0xff]   ;;  %v9473_v2 = vld [vmem:[%s11023_s25 + $0xa4] ss:$8 sps:$4 sm:$0xff]   ;;  %v9479_v7 = vld [vmem:[%s11023_s25 + $0x94] ss:$8 sps:$4 sm:$0xff]  }
  0x29   : > { %6909 = vmatpush1.bf16.msra.mxu1 %v9424_v20  ;;  %6869 = vmatprep.subr.bf16.mxu0 %v9425_v21  ;;  %v322_v55 = vrot.slane %v283_v53, %v11073_v50  ;;  %v329_v61 = vrot.slane %v315_v56, %v11073_v50  ;;  %v9475_v3 = vld [vmem:[%s11023_s25 + $0x1a4] ss:$8 sps:$4 sm:$0xff]   ;;  %v9477_v5 = vld [vmem:[%s11023_s25 + $0xa0] ss:$8 sps:$4 sm:$0xff]   ;;  %v9481_v8 = vld [vmem:[%s11023_s25 + $0x194] ss:$8 sps:$4 sm:$0xff]  }
  0x2a   : > { %6910 = vmatprep.subr.bf16.mxu1 %v9427_v22  ;;  %v9478_v6 = vld [vmem:[%s11023_s25 + $0x1a0] ss:$8 sps:$4 sm:$0xff]   ;;  %v9483_v9 = vld [vmem:[%s11023_s25 + $0x90] ss:$8 sps:$4 sm:$0xff]   ;;  %v9485_v11 = vld [vmem:[%s11023_s25 + $0x84] ss:$8 sps:$4 sm:$0xff]  }
  0x2b   : > { %v330_v60 = vcombine.high %v322_v55, %v322_v55  ;;  %v331_v0 = vcombine.high %v329_v61, %v329_v61  ;;  %v9484_v10 = vld [vmem:[%s11023_s25 + $0x190] ss:$8 sps:$4 sm:$0xff]   ;;  %v9487_v12 = vld [vmem:[%s11023_s25 + $0x184] ss:$8 sps:$4 sm:$0xff]   ;;  %v9489_v13 = vld [vmem:[%s11023_s25 + $0x80] ss:$8 sps:$4 sm:$0xff]   ;;  %v651_v17 = vpack.c.bf16 %v322_v55, %v322_v55  ;;  %v653_v18 = vpack.c.bf16 %v329_v61, %v329_v61 }
  0x2c   : > { %6870 = vmatpush1.bf16.msra.mxu0 %v9429_v23  ;;  %v9490_v14 = vld [vmem:[%s11023_s25 + $0x180] ss:$8 sps:$4 sm:$0xff]   ;;  %v9494_v15 = vld [vmem:[%s11023_s25 + $0x274] ss:$8 sps:$4 sm:$0xff]   ;;  %v9492_v19 = vld [vmem:[%s11023_s25 + $0x270] ss:$8 sps:$4 sm:$0xff]  }
  0x2d   : > { %6911 = vmatpush1.bf16.msra.mxu1 %v9430_v24  ;;  %6871 = vmatprep.subr.bf16.mxu0 %v9431_v25  ;;  %v652_v63 = vpack.c.bf16 %v330_v60, %v330_v60  ;;  %v654_v4 = vpack.c.bf16 %v331_v0, %v331_v0  ;;  %v9497_v16 = vld [vmem:[%s11023_s25 + $0x374] ss:$8 sps:$4 sm:$0xff]   ;;  %v9495_v20 = vld [vmem:[%s11023_s25 + $0x370] ss:$8 sps:$4 sm:$0xff]   ;;  %v9500_v21 = vld [vmem:[%s11023_s25 + $0x264] ss:$8 sps:$4 sm:$0xff]  }
  0x2e   : > { %6912 = vmatprep.subr.bf16.mxu1 %v9433_v26  ;;  %v9503_v22 = vld [vmem:[%s11023_s25 + $0x364] ss:$8 sps:$4 sm:$0xff]   ;;  %v9498_v23 = vld [vmem:[%s11023_s25 + $0x260] ss:$8 sps:$4 sm:$0xff]   ;;  %v9506_v25 = vld [vmem:[%s11023_s25 + $0x254] ss:$8 sps:$4 sm:$0xff]  }
  0x2f   : > { %6891 = vmatprep.mubr.bf16.mxu0 %v652_v63  ;;  %6932 = vmatprep.mubr.bf16.mxu1 %v654_v4  ;;  %v9501_v24 = vld [vmem:[%s11023_s25 + $0x360] ss:$8 sps:$4 sm:$0xff]   ;;  %v9509_v26 = vld [vmem:[%s11023_s25 + $0x354] ss:$8 sps:$4 sm:$0xff]   ;;  %v9524_v37 = vld [vmem:[%s11023_s25 + $0x224] ss:$8 sps:$4 sm:$0xff]  }
  0x30   : > { %6872 = vmatpush1.bf16.msra.mxu0 %v9435_v27  ;;  %v9504_v27 = vld [vmem:[%s11023_s25 + $0x250] ss:$8 sps:$4 sm:$0xff]   ;;  %v9527_v38 = vld [vmem:[%s11023_s25 + $0x324] ss:$8 sps:$4 sm:$0xff]   ;;  %v9522_v39 = vld [vmem:[%s11023_s25 + $0x220] ss:$8 sps:$4 sm:$0xff]  }
  0x31   : > { %6913 = vmatpush1.bf16.msra.mxu1 %v9436_v28  ;;  %6873 = vmatprep.subr.bf16.mxu0 %v9437_v29  ;;  %v9507_v28 = vld [vmem:[%s11023_s25 + $0x350] ss:$8 sps:$4 sm:$0xff]   ;;  %v9512_v29 = vld [vmem:[%s11023_s25 + $0x244] ss:$8 sps:$4 sm:$0xff]   ;;  %v9534_v56 = vld [vmem:[%s11023_s25 + $0x200] ss:$8 sps:$4 sm:$0xff]  }
  0x32   : > { %6914 = vmatprep.subr.bf16.mxu1 %v9439_v30  ;;  %v9515_v30 = vld [vmem:[%s11023_s25 + $0x344] ss:$8 sps:$4 sm:$0xff]   ;;  %v9545_v60 = vld [vmem:[%s11023_s25 + $0x3f4] ss:$8 sps:$4 sm:$0xff]   ;;  %v9540_v61 = vld [vmem:[%s11023_s25 + $0x2f0] ss:$8 sps:$4 sm:$0xff]  }
  0x33   : > { %v284_v43 = vld [vmem:[%s11018_s21 + $0x8] sm:$0xff]  ;;  %v9557_v4 = vld [vmem:[%s11023_s25 + $0x3d4] ss:$8 sps:$4 sm:$0xff]  }
  0x34   : > { %6874 = vmatpush1.bf16.msra.mxu0 %v9441_v31  ;;  %v9510_v31 = vld [vmem:[%s11023_s25 + $0x240] ss:$8 sps:$4 sm:$0xff]   ;;  %v9539_v53 = vld [vmem:[%s11023_s25 + $0x304] ss:$8 sps:$4 sm:$0xff]  }
  0x35   : > { %6915 = vmatpush1.bf16.msra.mxu1 %v9442_v32  ;;  %6875 = vmatprep.subr.bf16.mxu0 %v9443_v33  ;;  %v9513_v32 = vld [vmem:[%s11023_s25 + $0x340] ss:$8 sps:$4 sm:$0xff]   ;;  %v9518_v33 = vld [vmem:[%s11023_s25 + $0x234] ss:$8 sps:$4 sm:$0xff]   ;;  %v9548_v63 = vld [vmem:[%s11023_s25 + $0x2e4] ss:$8 sps:$4 sm:$0xff]  }
  0x36   : > { %6916 = vmatprep.subr.bf16.mxu1 %v9445_v34  ;;  %v9521_v34 = vld [vmem:[%s11023_s25 + $0x334] ss:$8 sps:$4 sm:$0xff]   ;;  %v9551_v0 = vld [vmem:[%s11023_s25 + $0x3e4] ss:$8 sps:$4 sm:$0xff]  }
  0x38   : > { %6876 = vmatpush2.bf16.msra.mxu0 %v9447_v35  ;;  %v9516_v35 = vld [vmem:[%s11023_s25 + $0x230] ss:$8 sps:$4 sm:$0xff]  }
  0x39   : > { %6917 = vmatpush2.bf16.msra.mxu1 %v9448_v36  ;;  %6877 = vmatprep.subr.bf16.mxu0 %v9449_v40  ;;  %v9519_v36 = vld [vmem:[%s11023_s25 + $0x330] ss:$8 sps:$4 sm:$0xff]   ;;  %v9525_v40 = vld [vmem:[%s11023_s25 + $0x320] ss:$8 sps:$4 sm:$0xff]  }
  0x3a   : > { %6918 = vmatprep.subr.bf16.mxu1 %v9451_v41  ;;  %v9530_v41 = vld [vmem:[%s11023_s25 + $0x214] ss:$8 sps:$4 sm:$0xff]  }
  0x3c   : > { %6878 = vmatpush2.bf16.msra.mxu0 %v9453_v42  ;;  %v9533_v42 = vld [vmem:[%s11023_s25 + $0x314] ss:$8 sps:$4 sm:$0xff]  }
  0x3d   : > { %6919 = vmatpush2.bf16.msra.mxu1 %v9454_v45  ;;  %6879 = vmatprep.subr.bf16.mxu0 %v9455_v46  ;;  %v11126_v45 = vrot.slane %v284_v43, %v11073_v50  ;;  %v332_v46 = vcombine.high %v284_v43, %v284_v43  ;;  %v9606_v43 = vld [vmem:[%s11023_s25 + $0x554] ss:$8 sps:$4 sm:$0xff]  }
  0x3e   : > { %6920 = vmatprep.subr.bf16.mxu1 %v9457_v47  ;;  %v9528_v47 = vld [vmem:[%s11023_s25 + $0x210] ss:$8 sps:$4 sm:$0xff]  }
  0x40   : > { %6880 = vmatpush2.bf16.msra.mxu0 %v9459_v48  ;;  %v9531_v48 = vld [vmem:[%s11023_s25 + $0x310] ss:$8 sps:$4 sm:$0xff]  }
  0x41   : > { %6921 = vmatpush2.bf16.msra.mxu1 %v9460_v49  ;;  %6881 = vmatprep.subr.bf16.mxu0 %v9461_v51  ;;  %v347_v49 = vcombine.high %v11126_v45, %v11126_v45  ;;  %v11133_v51 = vrot.slane %v332_v46, %v11073_v50 }
  0x42   : > { %6922 = vmatprep.subr.bf16.mxu1 %v9463_v52  ;;  %v9536_v52 = vld [vmem:[%s11023_s25 + $0x204] ss:$8 sps:$4 sm:$0xff]  }
  0x43   : > { %v348_v55 = vcombine.high %v11133_v51, %v11133_v51 }
  0x44   : > { %6882 = vmatpush2.bf16.msra.mxu0 %v9465_v54  ;;  %v656_v54 = vpack.c.bf16 %v347_v49, %v347_v49  ;;  %v9604_v49 = vld [vmem:[%s11023_s25 + $0x550] ss:$8 sps:$4 sm:$0xff]  }
  0x45   : > { %6923 = vmatpush2.bf16.msra.mxu1 %v9466_v57  ;;  %6883 = vmatprep.subr.bf16.mxu0 %v9467_v58  ;;  %v9537_v57 = vld [vmem:[%s11023_s25 + $0x300] ss:$8 sps:$4 sm:$0xff]   ;;  %v658_v58 = vpack.c.bf16 %v348_v55, %v348_v55  ;;  %v9615_v55 = vld [vmem:[%s11023_s25 + $0x434] ss:$8 sps:$4 sm:$0xff]  }
  0x46   : > { %6924 = vmatprep.subr.bf16.mxu1 %v9469_v59  ;;  %v9542_v59 = vld [vmem:[%s11023_s25 + $0x2f4] ss:$8 sps:$4 sm:$0xff]  }
  0x48   : > { %6884 = vmatpush2.bf16.msra.mxu0 %v9471_v62  ;;  %v9543_v62 = vld [vmem:[%s11023_s25 + $0x3f0] ss:$8 sps:$4 sm:$0xff]  }
  0x49   : > { %6925 = vmatpush2.bf16.msra.mxu1 %v9472_v1  ;;  %6885 = vmatprep.subr.bf16.mxu0 %v9473_v2  ;;  %v9546_v1 = vld [vmem:[%s11023_s25 + $0x2e0] ss:$8 sps:$4 sm:$0xff]  }
  0x4a   : > { %6926 = vmatprep.subr.bf16.mxu1 %v9475_v3  ;;  %v9549_v2 = vld [vmem:[%s11023_s25 + $0x3e0] ss:$8 sps:$4 sm:$0xff]   ;;  %v9554_v3 = vld [vmem:[%s11023_s25 + $0x2d4] ss:$8 sps:$4 sm:$0xff]  }
  0x4c   : > { %6886 = vmatpush2.bf16.msra.mxu0 %v9477_v5  ;;  %v9552_v5 = vld [vmem:[%s11023_s25 + $0x2d0] ss:$8 sps:$4 sm:$0xff]  }
  0x4d   : > { %6927 = vmatpush2.bf16.msra.mxu1 %v9478_v6  ;;  %6887 = vmatprep.subr.bf16.mxu0 %v9479_v7  ;;  %v9555_v6 = vld [vmem:[%s11023_s25 + $0x3d0] ss:$8 sps:$4 sm:$0xff]   ;;  %v9560_v7 = vld [vmem:[%s11023_s25 + $0x2c4] ss:$8 sps:$4 sm:$0xff]  }
  0x4e   : > { %6928 = vmatprep.subr.bf16.mxu1 %v9481_v8  ;;  %v9563_v8 = vld [vmem:[%s11023_s25 + $0x3c4] ss:$8 sps:$4 sm:$0xff]  }
  0x50   : > { %6888 = vmatpush2.bf16.msra.mxu0 %v9483_v9  ;;  %v9558_v9 = vld [vmem:[%s11023_s25 + $0x2c0] ss:$8 sps:$4 sm:$0xff]  }
  0x51   : > { %6929 = vmatpush2.bf16.msra.mxu1 %v9484_v10  ;;  %6889 = vmatprep.subr.bf16.mxu0 %v9485_v11  ;;  %v9561_v10 = vld [vmem:[%s11023_s25 + $0x3c0] ss:$8 sps:$4 sm:$0xff]   ;;  %v9566_v11 = vld [vmem:[%s11023_s25 + $0x2b4] ss:$8 sps:$4 sm:$0xff]  }
  0x52   : > { %6930 = vmatprep.subr.bf16.mxu1 %v9487_v12  ;;  %v9569_v12 = vld [vmem:[%s11023_s25 + $0x3b4] ss:$8 sps:$4 sm:$0xff]  }
  0x54   : > { %6890 = vmatpush2.bf16.msra.mxu0 %v9489_v13  ;;  %v9564_v13 = vld [vmem:[%s11023_s25 + $0x2b0] ss:$8 sps:$4 sm:$0xff]  }
  0x55   : > { %6931 = vmatpush2.bf16.msra.mxu1 %v9490_v14  ;;  %6941 = vmatprep.subr.bf16.mxu0 %v9494_v15  ;;  %v9567_v14 = vld [vmem:[%s11023_s25 + $0x3b0] ss:$8 sps:$4 sm:$0xff]   ;;  %v9572_v15 = vld [vmem:[%s11023_s25 + $0x2a4] ss:$8 sps:$4 sm:$0xff]  }
  0x56   : > { %6982 = vmatprep.subr.bf16.mxu1 %v9497_v16  ;;  %v9575_v16 = vld [vmem:[%s11023_s25 + $0x3a4] ss:$8 sps:$4 sm:$0xff]  }
  0x57   : > { %6892 = vmatmul.mubr.bf16.vlgmr.msra.gmra.mxu0 %v651_v17  ;;  %v9570_v17 = vld [vmem:[%s11023_s25 + $0x2a0] ss:$8 sps:$4 sm:$0xff]  }
  0x58   : > { %6933 = vmatmul.mubr.bf16.vlgmr.msra.gmra.mxu1 %v653_v18  ;;  %6942 = vmatpush1.bf16.msra.mxu0 %v9492_v19  ;;  %v9573_v18 = vld [vmem:[%s11023_s25 + $0x3a0] ss:$8 sps:$4 sm:$0xff]   ;;  %v9578_v19 = vld [vmem:[%s11023_s25 + $0x294] ss:$8 sps:$4 sm:$0xff]  }
  0x59   : > { %6983 = vmatpush1.bf16.msra.mxu1 %v9495_v20  ;;  %6943 = vmatprep.subr.bf16.mxu0 %v9500_v21  ;;  %v9581_v20 = vld [vmem:[%s11023_s25 + $0x394] ss:$8 sps:$4 sm:$0xff]   ;;  %v9576_v21 = vld [vmem:[%s11023_s25 + $0x290] ss:$8 sps:$4 sm:$0xff]  }
  0x5a   : > { %6984 = vmatprep.subr.bf16.mxu1 %v9503_v22  ;;  %6973 = vmatprep.mubr.bf16.mxu0 %v656_v54  ;;  %v9579_v22 = vld [vmem:[%s11023_s25 + $0x390] ss:$8 sps:$4 sm:$0xff]   ;;  %v9610_v54 = vld [vmem:[%s11023_s25 + $0x540] ss:$8 sps:$4 sm:$0xff]  }
  0x5b   : > { %7014 = vmatprep.mubr.bf16.mxu1 %v658_v58  ;;  %v9616_v58 = vld [vmem:[%s11023_s25 + $0x530] ss:$8 sps:$4 sm:$0xff]  }
  0x5c   : > { %6944 = vmatpush1.bf16.msra.mxu0 %v9498_v23  ;;  %v9584_v23 = vld [vmem:[%s11023_s25 + $0x284] ss:$8 sps:$4 sm:$0xff]  }
  0x5d   : > { %6985 = vmatpush1.bf16.msra.mxu1 %v9501_v24  ;;  %6945 = vmatprep.subr.bf16.mxu0 %v9506_v25  ;;  %v9587_v24 = vld [vmem:[%s11023_s25 + $0x384] ss:$8 sps:$4 sm:$0xff]   ;;  %v9582_v25 = vld [vmem:[%s11023_s25 + $0x280] ss:$8 sps:$4 sm:$0xff]  }
  0x5e   : > { %6986 = vmatprep.subr.bf16.mxu1 %v9509_v26  ;;  %v9585_v26 = vld [vmem:[%s11023_s25 + $0x380] ss:$8 sps:$4 sm:$0xff]  }
  0x60   : > { %6946 = vmatpush1.bf16.msra.mxu0 %v9504_v27  ;;  %v9591_v27 = vld [vmem:[%s11023_s25 + $0x474] ss:$8 sps:$4 sm:$0xff]  }
  0x61   : > { %6987 = vmatpush1.bf16.msra.mxu1 %v9507_v28  ;;  %6947 = vmatprep.subr.bf16.mxu0 %v9512_v29  ;;  %v9594_v28 = vld [vmem:[%s11023_s25 + $0x574] ss:$8 sps:$4 sm:$0xff]   ;;  %v655_v29 = vpack.c.bf16 %v11126_v45, %v11126_v45 }
  0x62   : > { %6988 = vmatprep.subr.bf16.mxu1 %v9515_v30  ;;  %v657_v30 = vpack.c.bf16 %v11133_v51, %v11133_v51  ;;  %v9609_v51 = vld [vmem:[%s11023_s25 + $0x444] ss:$8 sps:$4 sm:$0xff]  }
  0x64   : > { %6948 = vmatpush1.bf16.msra.mxu0 %v9510_v31  ;;  %v9589_v31 = vld [vmem:[%s11023_s25 + $0x470] ss:$8 sps:$4 sm:$0xff]  }
  0x65   : > { %6989 = vmatpush1.bf16.msra.mxu1 %v9513_v32  ;;  %6949 = vmatprep.subr.bf16.mxu0 %v9518_v33  ;;  %v9592_v32 = vld [vmem:[%s11023_s25 + $0x570] ss:$8 sps:$4 sm:$0xff]   ;;  %v9597_v33 = vld [vmem:[%s11023_s25 + $0x464] ss:$8 sps:$4 sm:$0xff]  }
  0x66   : > { %6990 = vmatprep.subr.bf16.mxu1 %v9521_v34  ;;  %v285_v34 = vld [vmem:[%s11018_s21 + $0x10] sm:$0xff] }
  0x68   : > { %6950 = vmatpush1.bf16.msra.mxu0 %v9516_v35  ;;  %v9600_v35 = vld [vmem:[%s11023_s25 + $0x564] ss:$8 sps:$4 sm:$0xff]  }
  0x69   : > { %6991 = vmatpush1.bf16.msra.mxu1 %v9519_v36  ;;  %6951 = vmatprep.subr.bf16.mxu0 %v9524_v37  ;;  %v11185_v36 = vrot.slane %v285_v34, %v11073_v50  ;;  %v349_v37 = vcombine.high %v285_v34, %v285_v34 }
  0x6a   : > { %6992 = vmatprep.subr.bf16.mxu1 %v9527_v38  ;;  %v9595_v38 = vld [vmem:[%s11023_s25 + $0x460] ss:$8 sps:$4 sm:$0xff]  }
  0x6c   : > { %6952 = vmatpush1.bf16.msra.mxu0 %v9522_v39  ;;  %v364_v39 = vcombine.high %v11185_v36, %v11185_v36 }
  0x6d   : > { %6993 = vmatpush1.bf16.msra.mxu1 %v9525_v40  ;;  %6953 = vmatprep.subr.bf16.mxu0 %v9530_v41  ;;  %v11191_v40 = vrot.slane %v349_v37, %v11073_v50  ;;  %v9598_v41 = vld [vmem:[%s11023_s25 + $0x560] ss:$8 sps:$4 sm:$0xff]   ;;  %v9676_v37 = vld [vmem:[%s11023_s25 + $0x590] ss:$8 sps:$4 sm:$0xff]  }
  0x6e   : > { %6994 = vmatprep.subr.bf16.mxu1 %v9533_v42  ;;  %v9603_v42 = vld [vmem:[%s11023_s25 + $0x454] ss:$8 sps:$4 sm:$0xff]   ;;  %v660_v45 = vpack.c.bf16 %v364_v39, %v364_v39  ;;  %v9684_v39 = vld [vmem:[%s11023_s25 + $0x584] ss:$8 sps:$4 sm:$0xff]  }
  0x6f   : > { %v365_v46 = vcombine.high %v11191_v40, %v11191_v40 }
  0x70   : > { %6954 = vmatpush1.bf16.msra.mxu0 %v9528_v47  ;;  %v9601_v47 = vld [vmem:[%s11023_s25 + $0x450] ss:$8 sps:$4 sm:$0xff]  }
  0x71   : > { %6995 = vmatpush1.bf16.msra.mxu1 %v9531_v48  ;;  %6955 = vmatprep.subr.bf16.mxu0 %v9536_v52  ;;  %v662_v48 = vpack.c.bf16 %v365_v46, %v365_v46  ;;  %v9612_v52 = vld [vmem:[%s11023_s25 + $0x544] ss:$8 sps:$4 sm:$0xff]   ;;  %v9688_v46 = vld [vmem:[%s11023_s25 + $0x674] ss:$8 sps:$4 sm:$0xff]  }
  0x72   : > { %6996 = vmatprep.subr.bf16.mxu1 %v9539_v53  ;;  %v9607_v53 = vld [vmem:[%s11023_s25 + $0x440] ss:$8 sps:$4 sm:$0xff]  }
  0x74   : > { %6956 = vmatpush1.bf16.msra.mxu0 %v9534_v56  ;;  %v9618_v56 = vld [vmem:[%s11023_s25 + $0x534] ss:$8 sps:$4 sm:$0xff]  }
  0x75   : > { %6997 = vmatpush1.bf16.msra.mxu1 %v9537_v57  ;;  %6957 = vmatprep.subr.bf16.mxu0 %v9542_v59  ;;  %v9613_v57 = vld [vmem:[%s11023_s25 + $0x430] ss:$8 sps:$4 sm:$0xff]   ;;  %v9621_v59 = vld [vmem:[%s11023_s25 + $0x424] ss:$8 sps:$4 sm:$0xff]  }
  0x76   : > { %6998 = vmatprep.subr.bf16.mxu1 %v9545_v60  ;;  %v9624_v60 = vld [vmem:[%s11023_s25 + $0x524] ss:$8 sps:$4 sm:$0xff]  }
  0x78   : > { %6958 = vmatpush2.bf16.msra.mxu0 %v9540_v61  ;;  %v9619_v61 = vld [vmem:[%s11023_s25 + $0x420] ss:$8 sps:$4 sm:$0xff]  }
  0x79   : > { %6999 = vmatpush2.bf16.msra.mxu1 %v9543_v62  ;;  %6959 = vmatprep.subr.bf16.mxu0 %v9548_v63  ;;  %v9622_v62 = vld [vmem:[%s11023_s25 + $0x520] ss:$8 sps:$4 sm:$0xff]   ;;  %v9627_v63 = vld [vmem:[%s11023_s25 + $0x414] ss:$8 sps:$4 sm:$0xff]  }
  0x7a   : > { %7000 = vmatprep.subr.bf16.mxu1 %v9551_v0  ;;  %v9630_v0 = vld [vmem:[%s11023_s25 + $0x514] ss:$8 sps:$4 sm:$0xff]  }
  0x7c   : > { %6960 = vmatpush2.bf16.msra.mxu0 %v9546_v1  ;;  %v9625_v1 = vld [vmem:[%s11023_s25 + $0x410] ss:$8 sps:$4 sm:$0xff]  }
  0x7d   : > { %7001 = vmatpush2.bf16.msra.mxu1 %v9549_v2  ;;  %6961 = vmatprep.subr.bf16.mxu0 %v9554_v3  ;;  %v9628_v2 = vld [vmem:[%s11023_s25 + $0x510] ss:$8 sps:$4 sm:$0xff]   ;;  %v9633_v3 = vld [vmem:[%s11023_s25 + $0x404] ss:$8 sps:$4 sm:$0xff]  }
  0x7e   : > { %7002 = vmatprep.subr.bf16.mxu1 %v9557_v4  ;;  %v9636_v4 = vld [vmem:[%s11023_s25 + $0x504] ss:$8 sps:$4 sm:$0xff]  }
  0x80   : > { %6962 = vmatpush2.bf16.msra.mxu0 %v9552_v5  ;;  %v9631_v5 = vld [vmem:[%s11023_s25 + $0x400] ss:$8 sps:$4 sm:$0xff]  }
  0x81   : > { %7003 = vmatpush2.bf16.msra.mxu1 %v9555_v6  ;;  %6963 = vmatprep.subr.bf16.mxu0 %v9560_v7  ;;  %v9634_v6 = vld [vmem:[%s11023_s25 + $0x500] ss:$8 sps:$4 sm:$0xff]   ;;  %v9639_v7 = vld [vmem:[%s11023_s25 + $0x4f4] ss:$8 sps:$4 sm:$0xff]  }
  0x82   : > { %7004 = vmatprep.subr.bf16.mxu1 %v9563_v8  ;;  %v9642_v8 = vld [vmem:[%s11023_s25 + $0x5f4] ss:$8 sps:$4 sm:$0xff]  }
  0x84   : > { %6964 = vmatpush2.bf16.msra.mxu0 %v9558_v9  ;;  %v9637_v9 = vld [vmem:[%s11023_s25 + $0x4f0] ss:$8 sps:$4 sm:$0xff]  }
  0x85   : > { %7005 = vmatpush2.bf16.msra.mxu1 %v9561_v10  ;;  %6965 = vmatprep.subr.bf16.mxu0 %v9566_v11  ;;  %v9640_v10 = vld [vmem:[%s11023_s25 + $0x5f0] ss:$8 sps:$4 sm:$0xff]   ;;  %v9645_v11 = vld [vmem:[%s11023_s25 + $0x4e4] ss:$8 sps:$4 sm:$0xff]  }
  0x86   : > { %7006 = vmatprep.subr.bf16.mxu1 %v9569_v12  ;;  %v9648_v12 = vld [vmem:[%s11023_s25 + $0x5e4] ss:$8 sps:$4 sm:$0xff]  }
  0x88   : > { %6966 = vmatpush2.bf16.msra.mxu0 %v9564_v13  ;;  %v9643_v13 = vld [vmem:[%s11023_s25 + $0x4e0] ss:$8 sps:$4 sm:$0xff]  }
  0x89   : > { %7007 = vmatpush2.bf16.msra.mxu1 %v9567_v14  ;;  %6967 = vmatprep.subr.bf16.mxu0 %v9572_v15  ;;  %v9646_v14 = vld [vmem:[%s11023_s25 + $0x5e0] ss:$8 sps:$4 sm:$0xff]   ;;  %v9651_v15 = vld [vmem:[%s11023_s25 + $0x4d4] ss:$8 sps:$4 sm:$0xff]  }
  0x8a   : > { %7008 = vmatprep.subr.bf16.mxu1 %v9575_v16  ;;  %v9654_v16 = vld [vmem:[%s11023_s25 + $0x5d4] ss:$8 sps:$4 sm:$0xff]  }
  0x8c   : > { %6968 = vmatpush2.bf16.msra.mxu0 %v9570_v17  ;;  %v9649_v17 = vld [vmem:[%s11023_s25 + $0x4d0] ss:$8 sps:$4 sm:$0xff]  }
  0x8d   : > { %7009 = vmatpush2.bf16.msra.mxu1 %v9573_v18  ;;  %6969 = vmatprep.subr.bf16.mxu0 %v9578_v19  ;;  %v9652_v18 = vld [vmem:[%s11023_s25 + $0x5d0] ss:$8 sps:$4 sm:$0xff]   ;;  %v9657_v19 = vld [vmem:[%s11023_s25 + $0x4c4] ss:$8 sps:$4 sm:$0xff]  }
  0x8e   : > { %7010 = vmatprep.subr.bf16.mxu1 %v9581_v20  ;;  %v9660_v20 = vld [vmem:[%s11023_s25 + $0x5c4] ss:$8 sps:$4 sm:$0xff]  }
  0x90   : > { %6970 = vmatpush2.bf16.msra.mxu0 %v9576_v21  ;;  %v9655_v21 = vld [vmem:[%s11023_s25 + $0x4c0] ss:$8 sps:$4 sm:$0xff]  }
  0x91   : > { %7011 = vmatpush2.bf16.msra.mxu1 %v9579_v22  ;;  %6971 = vmatprep.subr.bf16.mxu0 %v9584_v23  ;;  %v9658_v22 = vld [vmem:[%s11023_s25 + $0x5c0] ss:$8 sps:$4 sm:$0xff]   ;;  %v9663_v23 = vld [vmem:[%s11023_s25 + $0x4b4] ss:$8 sps:$4 sm:$0xff]  }
  0x92   : > { %7012 = vmatprep.subr.bf16.mxu1 %v9587_v24  ;;  %v9666_v24 = vld [vmem:[%s11023_s25 + $0x5b4] ss:$8 sps:$4 sm:$0xff]  }
  0x94   : > { %6972 = vmatpush2.bf16.msra.mxu0 %v9582_v25  ;;  %v9661_v25 = vld [vmem:[%s11023_s25 + $0x4b0] ss:$8 sps:$4 sm:$0xff]  }
  0x95   : > { %7013 = vmatpush2.bf16.msra.mxu1 %v9585_v26  ;;  %7023 = vmatprep.subr.bf16.mxu0 %v9591_v27  ;;  %v9664_v26 = vld [vmem:[%s11023_s25 + $0x5b0] ss:$8 sps:$4 sm:$0xff]   ;;  %v9669_v27 = vld [vmem:[%s11023_s25 + $0x4a4] ss:$8 sps:$4 sm:$0xff]  }
  0x96   : > { %7064 = vmatprep.subr.bf16.mxu1 %v9594_v28  ;;  %v9672_v28 = vld [vmem:[%s11023_s25 + $0x5a4] ss:$8 sps:$4 sm:$0xff]  }
  0x97   : > { %6974 = vmatmul.mubr.bf16.vlgmr.msra.gmra.mxu0 %v655_v29  ;;  %v9667_v29 = vld [vmem:[%s11023_s25 + $0x4a0] ss:$8 sps:$4 sm:$0xff]  }
  0x98   : > { %7015 = vmatmul.mubr.bf16.vlgmr.msra.gmra.mxu1 %v657_v30  ;;  %7024 = vmatpush1.bf16.msra.mxu0 %v9589_v31  ;;  %v9670_v30 = vld [vmem:[%s11023_s25 + $0x5a0] ss:$8 sps:$4 sm:$0xff]   ;;  %v286_v31 = vld [vmem:[%s11018_s21 + $0x18] sm:$0xff] }
  0x99   : > { %7065 = vmatpush1.bf16.msra.mxu1 %v9592_v32  ;;  %7025 = vmatprep.subr.bf16.mxu0 %v9597_v33  ;;  %v9675_v32 = vld [vmem:[%s11023_s25 + $0x494] ss:$8 sps:$4 sm:$0xff]   ;;  %v366_v34 = vcombine.high %v286_v31, %v286_v31 }
  0x9a   : > { %7066 = vmatprep.subr.bf16.mxu1 %v9600_v35  ;;  %7055 = vmatprep.mubr.bf16.mxu0 %v660_v45  ;;  %v9678_v33 = vld [vmem:[%s11023_s25 + $0x594] ss:$8 sps:$4 sm:$0xff]   ;;  %v9673_v35 = vld [vmem:[%s11023_s25 + $0x490] ss:$8 sps:$4 sm:$0xff]   ;;  %v9682_v45 = vld [vmem:[%s11023_s25 + $0x580] ss:$8 sps:$4 sm:$0xff]  }
  0x9b   : > { %7096 = vmatprep.mubr.bf16.mxu1 %v662_v48 }
  0x9c   : > { %7026 = vmatpush1.bf16.msra.mxu0 %v9595_v38  ;;  %v9681_v38 = vld [vmem:[%s11023_s25 + $0x484] ss:$8 sps:$4 sm:$0xff]  }
  0x9d   : > { %7067 = vmatpush1.bf16.msra.mxu1 %v9598_v41  ;;  %7027 = vmatprep.subr.bf16.mxu0 %v9603_v42  ;;  %v11252_v41 = vrot.slane %v286_v31, %v11073_v50  ;;  %v11255_v42 = vrot.slane %v366_v34, %v11073_v50  ;;  %v9754_v31 = vld [vmem:[%s11023_s25 + $0x6c4] ss:$8 sps:$4 sm:$0xff]   ;;  %v9755_v34 = vld [vmem:[%s11023_s25 + $0x7c0] ss:$8 sps:$4 sm:$0xff]  }
  0x9e   : > { %7068 = vmatprep.subr.bf16.mxu1 %v9606_v43  ;;  %v9679_v43 = vld [vmem:[%s11023_s25 + $0x480] ss:$8 sps:$4 sm:$0xff]  }
  0x9f   : > { %v381_v48 = vcombine.high %v11252_v41, %v11252_v41 }
  0xa0   : > { %7028 = vmatpush1.bf16.msra.mxu0 %v9601_v47  ;;  %v9691_v47 = vld [vmem:[%s11023_s25 + $0x774] ss:$8 sps:$4 sm:$0xff]  }
  0xa1   : > { %7069 = vmatpush1.bf16.msra.mxu1 %v9604_v49  ;;  %7029 = vmatprep.subr.bf16.mxu0 %v9609_v51  ;;  %v382_v49 = vcombine.high %v11255_v42, %v11255_v42  ;;  %v659_v51 = vpack.c.bf16 %v11185_v36, %v11185_v36  ;;  %v9692_v36 = vld [vmem:[%s11023_s25 + $0x660] ss:$8 sps:$4 sm:$0xff]  }
  0xa2   : > { %7070 = vmatprep.subr.bf16.mxu1 %v9612_v52  ;;  %v661_v52 = vpack.c.bf16 %v11191_v40, %v11191_v40  ;;  %v9700_v40 = vld [vmem:[%s11023_s25 + $0x654] ss:$8 sps:$4 sm:$0xff]  }
  0xa4   : > { %7030 = vmatpush1.bf16.msra.mxu0 %v9607_v53  ;;  %v9686_v53 = vld [vmem:[%s11023_s25 + $0x670] ss:$8 sps:$4 sm:$0xff]  }
  0xa5   : > { %7071 = vmatpush1.bf16.msra.mxu1 %v9610_v54  ;;  %7031 = vmatprep.subr.bf16.mxu0 %v9615_v55  ;;  %v9689_v54 = vld [vmem:[%s11023_s25 + $0x770] ss:$8 sps:$4 sm:$0xff]   ;;  %v9694_v55 = vld [vmem:[%s11023_s25 + $0x664] ss:$8 sps:$4 sm:$0xff]  }
  0xa6   : > { %7072 = vmatprep.subr.bf16.mxu1 %v9618_v56  ;;  %v9697_v56 = vld [vmem:[%s11023_s25 + $0x764] ss:$8 sps:$4 sm:$0xff]  }
  0xa8   : > { %7032 = vmatpush1.bf16.msra.mxu0 %v9613_v57  ;;  %v664_v57 = vpack.c.bf16 %v381_v48, %v381_v48  ;;  %v9767_v48 = vld [vmem:[%s11023_s25 + $0x7a0] ss:$8 sps:$4 sm:$0xff]  }
  0xa9   : > { %7073 = vmatpush1.bf16.msra.mxu1 %v9616_v58  ;;  %7033 = vmatprep.subr.bf16.mxu0 %v9621_v59  ;;  %v666_v58 = vpack.c.bf16 %v382_v49, %v382_v49  ;;  %v9695_v59 = vld [vmem:[%s11023_s25 + $0x760] ss:$8 sps:$4 sm:$0xff]   ;;  %v9772_v49 = vld [vmem:[%s11023_s25 + $0x694] ss:$8 sps:$4 sm:$0xff]  }
  0xaa   : > { %7074 = vmatprep.subr.bf16.mxu1 %v9624_v60  ;;  %v9703_v60 = vld [vmem:[%s11023_s25 + $0x754] ss:$8 sps:$4 sm:$0xff]  }
  0xac   : > { %7034 = vmatpush1.bf16.msra.mxu0 %v9619_v61  ;;  %v9698_v61 = vld [vmem:[%s11023_s25 + $0x650] ss:$8 sps:$4 sm:$0xff]  }
  0xad   : > { %7075 = vmatpush1.bf16.msra.mxu1 %v9622_v62  ;;  %7035 = vmatprep.subr.bf16.mxu0 %v9627_v63  ;;  %v9701_v62 = vld [vmem:[%s11023_s25 + $0x750] ss:$8 sps:$4 sm:$0xff]   ;;  %v9706_v63 = vld [vmem:[%s11023_s25 + $0x644] ss:$8 sps:$4 sm:$0xff]  }
  0xae   : > { %7076 = vmatprep.subr.bf16.mxu1 %v9630_v0  ;;  %v9709_v0 = vld [vmem:[%s11023_s25 + $0x744] ss:$8 sps:$4 sm:$0xff]  }
  0xb0   : > { %7036 = vmatpush1.bf16.msra.mxu0 %v9625_v1  ;;  %v9704_v1 = vld [vmem:[%s11023_s25 + $0x640] ss:$8 sps:$4 sm:$0xff]  }
  0xb1   : > { %7077 = vmatpush1.bf16.msra.mxu1 %v9628_v2  ;;  %7037 = vmatprep.subr.bf16.mxu0 %v9633_v3  ;;  %v9707_v2 = vld [vmem:[%s11023_s25 + $0x740] ss:$8 sps:$4 sm:$0xff]   ;;  %v9712_v3 = vld [vmem:[%s11023_s25 + $0x634] ss:$8 sps:$4 sm:$0xff]  }
  0xb2   : > { %7078 = vmatprep.subr.bf16.mxu1 %v9636_v4  ;;  %v9715_v4 = vld [vmem:[%s11023_s25 + $0x734] ss:$8 sps:$4 sm:$0xff]  }
  0xb4   : > { %7038 = vmatpush1.bf16.msra.mxu0 %v9631_v5  ;;  %v9710_v5 = vld [vmem:[%s11023_s25 + $0x630] ss:$8 sps:$4 sm:$0xff]  }
  0xb5   : > { %7079 = vmatpush1.bf16.msra.mxu1 %v9634_v6  ;;  %7039 = vmatprep.subr.bf16.mxu0 %v9639_v7  ;;  %v9713_v6 = vld [vmem:[%s11023_s25 + $0x730] ss:$8 sps:$4 sm:$0xff]   ;;  %v9718_v7 = vld [vmem:[%s11023_s25 + $0x624] ss:$8 sps:$4 sm:$0xff]  }
  0xb6   : > { %7080 = vmatprep.subr.bf16.mxu1 %v9642_v8  ;;  %v9721_v8 = vld [vmem:[%s11023_s25 + $0x724] ss:$8 sps:$4 sm:$0xff]  }
  0xb8   : > { %7040 = vmatpush2.bf16.msra.mxu0 %v9637_v9  ;;  %v9716_v9 = vld [vmem:[%s11023_s25 + $0x620] ss:$8 sps:$4 sm:$0xff]  }
  0xb9   : > { %7081 = vmatpush2.bf16.msra.mxu1 %v9640_v10  ;;  %7041 = vmatprep.subr.bf16.mxu0 %v9645_v11  ;;  %v9719_v10 = vld [vmem:[%s11023_s25 + $0x720] ss:$8 sps:$4 sm:$0xff]   ;;  %v9724_v11 = vld [vmem:[%s11023_s25 + $0x614] ss:$8 sps:$4 sm:$0xff]  }
  0xba   : > { %7082 = vmatprep.subr.bf16.mxu1 %v9648_v12  ;;  %v9727_v12 = vld [vmem:[%s11023_s25 + $0x714] ss:$8 sps:$4 sm:$0xff]  }
  0xbc   : > { %7042 = vmatpush2.bf16.msra.mxu0 %v9643_v13  ;;  %v9722_v13 = vld [vmem:[%s11023_s25 + $0x610] ss:$8 sps:$4 sm:$0xff]  }
  0xbd   : > { %7083 = vmatpush2.bf16.msra.mxu1 %v9646_v14  ;;  %7043 = vmatprep.subr.bf16.mxu0 %v9651_v15  ;;  %v9725_v14 = vld [vmem:[%s11023_s25 + $0x710] ss:$8 sps:$4 sm:$0xff]   ;;  %v9730_v15 = vld [vmem:[%s11023_s25 + $0x604] ss:$8 sps:$4 sm:$0xff]  }
  0xbe   : > { %7084 = vmatprep.subr.bf16.mxu1 %v9654_v16  ;;  %v9733_v16 = vld [vmem:[%s11023_s25 + $0x704] ss:$8 sps:$4 sm:$0xff]  }
  0xc0   : > { %7044 = vmatpush2.bf16.msra.mxu0 %v9649_v17  ;;  %v9728_v17 = vld [vmem:[%s11023_s25 + $0x600] ss:$8 sps:$4 sm:$0xff]  }
  0xc1   : > { %7085 = vmatpush2.bf16.msra.mxu1 %v9652_v18  ;;  %7045 = vmatprep.subr.bf16.mxu0 %v9657_v19  ;;  %v9731_v18 = vld [vmem:[%s11023_s25 + $0x700] ss:$8 sps:$4 sm:$0xff]   ;;  %v9736_v19 = vld [vmem:[%s11023_s25 + $0x6f4] ss:$8 sps:$4 sm:$0xff]  }
  0xc2   : > { %7086 = vmatprep.subr.bf16.mxu1 %v9660_v20  ;;  %v9739_v20 = vld [vmem:[%s11023_s25 + $0x7f4] ss:$8 sps:$4 sm:$0xff]  }
  0xc4   : > { %7046 = vmatpush2.bf16.msra.mxu0 %v9655_v21  ;;  %v9734_v21 = vld [vmem:[%s11023_s25 + $0x6f0] ss:$8 sps:$4 sm:$0xff]  }
  0xc5   : > { %7087 = vmatpush2.bf16.msra.mxu1 %v9658_v22  ;;  %7047 = vmatprep.subr.bf16.mxu0 %v9663_v23  ;;  %v9737_v22 = vld [vmem:[%s11023_s25 + $0x7f0] ss:$8 sps:$4 sm:$0xff]   ;;  %v9742_v23 = vld [vmem:[%s11023_s25 + $0x6e4] ss:$8 sps:$4 sm:$0xff]  }
  0xc6   : > { %7088 = vmatprep.subr.bf16.mxu1 %v9666_v24  ;;  %v9745_v24 = vld [vmem:[%s11023_s25 + $0x7e4] ss:$8 sps:$4 sm:$0xff]  }
  0xc8   : > { %7048 = vmatpush2.bf16.msra.mxu0 %v9661_v25  ;;  %v9740_v25 = vld [vmem:[%s11023_s25 + $0x6e0] ss:$8 sps:$4 sm:$0xff]  }
  0xc9   : > { %7089 = vmatpush2.bf16.msra.mxu1 %v9664_v26  ;;  %7049 = vmatprep.subr.bf16.mxu0 %v9669_v27  ;;  %v9743_v26 = vld [vmem:[%s11023_s25 + $0x7e0] ss:$8 sps:$4 sm:$0xff]   ;;  %v9748_v27 = vld [vmem:[%s11023_s25 + $0x6d4] ss:$8 sps:$4 sm:$0xff]  }
  0xca   : > { %7090 = vmatprep.subr.bf16.mxu1 %v9672_v28  ;;  %v9751_v28 = vld [vmem:[%s11023_s25 + $0x7d4] ss:$8 sps:$4 sm:$0xff]  }
  0xcc   : > { %7050 = vmatpush2.bf16.msra.mxu0 %v9667_v29  ;;  %v9746_v29 = vld [vmem:[%s11023_s25 + $0x6d0] ss:$8 sps:$4 sm:$0xff]  }
  0xcd   : > { %7091 = vmatpush2.bf16.msra.mxu1 %v9670_v30  ;;  %7051 = vmatprep.subr.bf16.mxu0 %v9675_v32  ;;  %v9749_v30 = vld [vmem:[%s11023_s25 + $0x7d0] ss:$8 sps:$4 sm:$0xff]   ;;  %v9757_v32 = vld [vmem:[%s11023_s25 + $0x7c4] ss:$8 sps:$4 sm:$0xff]  }
  0xce   : > { %7092 = vmatprep.subr.bf16.mxu1 %v9678_v33  ;;  %v9752_v33 = vld [vmem:[%s11023_s25 + $0x6c0] ss:$8 sps:$4 sm:$0xff]  }
  0xd0   : > { %7052 = vmatpush2.bf16.msra.mxu0 %v9673_v35  ;;  %v9760_v35 = vld [vmem:[%s11023_s25 + $0x6b4] ss:$8 sps:$4 sm:$0xff]  }
  0xd1   : > { %7093 = vmatpush2.bf16.msra.mxu1 %v9676_v37  ;;  %7053 = vmatprep.subr.bf16.mxu0 %v9681_v38  ;;  %v9763_v37 = vld [vmem:[%s11023_s25 + $0x7b4] ss:$8 sps:$4 sm:$0xff]   ;;  %v9758_v38 = vld [vmem:[%s11023_s25 + $0x6b0] ss:$8 sps:$4 sm:$0xff]  }
  0xd2   : > { %7094 = vmatprep.subr.bf16.mxu1 %v9684_v39  ;;  %v9761_v39 = vld [vmem:[%s11023_s25 + $0x7b0] ss:$8 sps:$4 sm:$0xff]  }
  0xd4   : > { %7054 = vmatpush2.bf16.msra.mxu0 %v9679_v43  ;;  %v9766_v43 = vld [vmem:[%s11023_s25 + $0x6a4] ss:$8 sps:$4 sm:$0xff]  }
  0xd5   : > { %7095 = vmatpush2.bf16.msra.mxu1 %v9682_v45  ;;  %7105 = vmatprep.subr.bf16.mxu0 %v9688_v46  ;;  %v9769_v45 = vld [vmem:[%s11023_s25 + $0x7a4] ss:$8 sps:$4 sm:$0xff]   ;;  %v9764_v46 = vld [vmem:[%s11023_s25 + $0x6a0] ss:$8 sps:$4 sm:$0xff]  }
  0xd6   : > { %7146 = vmatprep.subr.bf16.mxu1 %v9691_v47  ;;  %v287_v47 = vld [vmem:[%s11018_s21 + $0x20] sm:$0xff] }
  0xd7   : > { %7056 = vmatmul.mubr.bf16.vlgmr.msra.gmra.mxu0 %v659_v51  ;;  %v9775_v51 = vld [vmem:[%s11023_s25 + $0x794] ss:$8 sps:$4 sm:$0xff]  }
  0xd8   : > { %7097 = vmatmul.mubr.bf16.vlgmr.msra.gmra.mxu1 %v661_v52  ;;  %7106 = vmatpush1.bf16.msra.mxu0 %v9686_v53  ;;  %v383_v52 = vcombine.high %v287_v47, %v287_v47  ;;  %v9770_v53 = vld [vmem:[%s11023_s25 + $0x690] ss:$8 sps:$4 sm:$0xff]  }
  0xd9   : > { %7147 = vmatpush1.bf16.msra.mxu1 %v9689_v54  ;;  %7107 = vmatprep.subr.bf16.mxu0 %v9694_v55  ;;  %v9773_v54 = vld [vmem:[%s11023_s25 + $0x790] ss:$8 sps:$4 sm:$0xff]   ;;  %v9778_v55 = vld [vmem:[%s11023_s25 + $0x684] ss:$8 sps:$4 sm:$0xff]  }
  0xda   : > { %7148 = vmatprep.subr.bf16.mxu1 %v9697_v56  ;;  %7137 = vmatprep.mubr.bf16.mxu0 %v664_v57  ;;  %v9781_v56 = vld [vmem:[%s11023_s25 + $0x784] ss:$8 sps:$4 sm:$0xff]   ;;  %v11331_v57 = vrot.slane %v287_v47, %v11073_v50  ;;  %v9836_v47 = vld [vmem:[%s11023_s25 + $0x9f4] ss:$8 sps:$4 sm:$0xff]  }
  0xdb   : > { %7178 = vmatprep.mubr.bf16.mxu1 %v666_v58  ;;  %v11334_v58 = vrot.slane %v383_v52, %v11073_v50  ;;  %v9842_v52 = vld [vmem:[%s11023_s25 + $0x9e4] ss:$8 sps:$4 sm:$0xff]  }
  0xdc   : > { %7108 = vmatpush1.bf16.msra.mxu0 %v9692_v36  ;;  %v9776_v36 = vld [vmem:[%s11023_s25 + $0x680] ss:$8 sps:$4 sm:$0xff]  }
  0xdd   : > { %7149 = vmatpush1.bf16.msra.mxu1 %v9695_v59  ;;  %7109 = vmatprep.subr.bf16.mxu0 %v9700_v40  ;;  %v9779_v59 = vld [vmem:[%s11023_s25 + $0x780] ss:$8 sps:$4 sm:$0xff]   ;;  %v9785_v40 = vld [vmem:[%s11023_s25 + $0x874] ss:$8 sps:$4 sm:$0xff]  }
  0xde   : > { %7150 = vmatprep.subr.bf16.mxu1 %v9703_v60  ;;  %v9788_v60 = vld [vmem:[%s11023_s25 + $0x974] ss:$8 sps:$4 sm:$0xff]  }
  0xe0   : > { %7110 = vmatpush1.bf16.msra.mxu0 %v9698_v61  ;;  %v398_v61 = vcombine.high %v11331_v57, %v11331_v57 }
  0xe1   : > { %7151 = vmatpush1.bf16.msra.mxu1 %v9701_v62  ;;  %7111 = vmatprep.subr.bf16.mxu0 %v9706_v63  ;;  %v399_v62 = vcombine.high %v11334_v58, %v11334_v58  ;;  %v663_v63 = vpack.c.bf16 %v11252_v41, %v11252_v41 }
  0xe2   : > { %7152 = vmatprep.subr.bf16.mxu1 %v9709_v0  ;;  %v665_v0 = vpack.c.bf16 %v11255_v42, %v11255_v42 }
  0xe4   : > { %7112 = vmatpush1.bf16.msra.mxu0 %v9704_v1  ;;  %v9783_v1 = vld [vmem:[%s11023_s25 + $0x870] ss:$8 sps:$4 sm:$0xff]  }
  0xe5   : > { %7153 = vmatpush1.bf16.msra.mxu1 %v9707_v2  ;;  %7113 = vmatprep.subr.bf16.mxu0 %v9712_v3  ;;  %v9786_v2 = vld [vmem:[%s11023_s25 + $0x970] ss:$8 sps:$4 sm:$0xff]   ;;  %v9791_v3 = vld [vmem:[%s11023_s25 + $0x864] ss:$8 sps:$4 sm:$0xff]  }
  0xe6   : > { %7154 = vmatprep.subr.bf16.mxu1 %v9715_v4  ;;  %v9794_v4 = vld [vmem:[%s11023_s25 + $0x964] ss:$8 sps:$4 sm:$0xff]  }
  0xe8   : > { %7114 = vmatpush1.bf16.msra.mxu0 %v9710_v5  ;;  %v668_v5 = vpack.c.bf16 %v398_v61, %v398_v61  ;;  %v9849_v61 = vld [vmem:[%s11023_s25 + $0x8c0] ss:$8 sps:$4 sm:$0xff]  }
  0xe9   : > { %7155 = vmatpush1.bf16.msra.mxu1 %v9713_v6  ;;  %7115 = vmatprep.subr.bf16.mxu0 %v9718_v7  ;;  %v670_v6 = vpack.c.bf16 %v399_v62, %v399_v62  ;;  %v9852_v62 = vld [vmem:[%s11023_s25 + $0x9c0] ss:$8 sps:$4 sm:$0xff]  }
  0xea   : > { %7156 = vmatprep.subr.bf16.mxu1 %v9721_v8  ;;  %v9789_v8 = vld [vmem:[%s11023_s25 + $0x860] ss:$8 sps:$4 sm:$0xff]  }
  0xec   : > { %7116 = vmatpush1.bf16.msra.mxu0 %v9716_v9  ;;  %v9792_v9 = vld [vmem:[%s11023_s25 + $0x960] ss:$8 sps:$4 sm:$0xff]  }
  0xed   : > { %7157 = vmatpush1.bf16.msra.mxu1 %v9719_v10  ;;  %7117 = vmatprep.subr.bf16.mxu0 %v9724_v11  ;;  %v9797_v10 = vld [vmem:[%s11023_s25 + $0x854] ss:$8 sps:$4 sm:$0xff]  }
  0xee   : > { %7158 = vmatprep.subr.bf16.mxu1 %v9727_v12 }
  0xf0   : > { %7118 = vmatpush1.bf16.msra.mxu0 %v9722_v13  ;;  %v9800_v13 = vld [vmem:[%s11023_s25 + $0x954] ss:$8 sps:$4 sm:$0xff]  }
  0xf1   : > { %7159 = vmatpush1.bf16.msra.mxu1 %v9725_v14  ;;  %7119 = vmatprep.subr.bf16.mxu0 %v9730_v15  ;;  %v9795_v15 = vld [vmem:[%s11023_s25 + $0x850] ss:$8 sps:$4 sm:$0xff]  }
  0xf2   : > { %7160 = vmatprep.subr.bf16.mxu1 %v9733_v16 }
  0xf4   : > { %7120 = vmatpush1.bf16.msra.mxu0 %v9728_v17 }
  0xf5   : > { %7161 = vmatpush1.bf16.msra.mxu1 %v9731_v18  ;;  %7121 = vmatprep.subr.bf16.mxu0 %v9736_v19  ;;  %v9798_v18 = vld [vmem:[%s11023_s25 + $0x950] ss:$8 sps:$4 sm:$0xff]  }
  0xf6   : > { %7162 = vmatprep.subr.bf16.mxu1 %v9739_v20 }
  0xf8   : > { %7122 = vmatpush2.bf16.msra.mxu0 %v9734_v21  ;;  %v9803_v21 = vld [vmem:[%s11023_s25 + $0x844] ss:$8 sps:$4 sm:$0xff]  }
  0xf9   : > { %7163 = vmatpush2.bf16.msra.mxu1 %v9737_v22  ;;  %7123 = vmatprep.subr.bf16.mxu0 %v9742_v23  ;;  %v9806_v22 = vld [vmem:[%s11023_s25 + $0x944] ss:$8 sps:$4 sm:$0xff]   ;;  %v9801_v23 = vld [vmem:[%s11023_s25 + $0x840] ss:$8 sps:$4 sm:$0xff]  }
  0xfa   : > { %7164 = vmatprep.subr.bf16.mxu1 %v9745_v24  ;;  %v9804_v24 = vld [vmem:[%s11023_s25 + $0x940] ss:$8 sps:$4 sm:$0xff]  }
  0xfc   : > { %7124 = vmatpush2.bf16.msra.mxu0 %v9740_v25  ;;  %v9809_v25 = vld [vmem:[%s11023_s25 + $0x834] ss:$8 sps:$4 sm:$0xff]  }
  0xfd   : > { %7165 = vmatpush2.bf16.msra.mxu1 %v9743_v26  ;;  %7125 = vmatprep.subr.bf16.mxu0 %v9748_v27  ;;  %v9812_v26 = vld [vmem:[%s11023_s25 + $0x934] ss:$8 sps:$4 sm:$0xff]   ;;  %v9807_v27 = vld [vmem:[%s11023_s25 + $0x830] ss:$8 sps:$4 sm:$0xff]  }
  0xfe   : > { %7166 = vmatprep.subr.bf16.mxu1 %v9751_v28  ;;  %v9810_v28 = vld [vmem:[%s11023_s25 + $0x930] ss:$8 sps:$4 sm:$0xff]  }
 0x100   : > { %7126 = vmatpush2.bf16.msra.mxu0 %v9746_v29  ;;  %v9815_v29 = vld [vmem:[%s11023_s25 + $0x824] ss:$8 sps:$4 sm:$0xff]  }
 0x101   : > { %7167 = vmatpush2.bf16.msra.mxu1 %v9749_v30  ;;  %7127 = vmatprep.subr.bf16.mxu0 %v9754_v31  ;;  %v9818_v30 = vld [vmem:[%s11023_s25 + $0x924] ss:$8 sps:$4 sm:$0xff]   ;;  %v9813_v31 = vld [vmem:[%s11023_s25 + $0x820] ss:$8 sps:$4 sm:$0xff]  }
 0x102   : > { %7168 = vmatprep.subr.bf16.mxu1 %v9757_v32  ;;  %v9816_v32 = vld [vmem:[%s11023_s25 + $0x920] ss:$8 sps:$4 sm:$0xff]  }
 0x104   : > { %7128 = vmatpush2.bf16.msra.mxu0 %v9752_v33  ;;  %v9821_v33 = vld [vmem:[%s11023_s25 + $0x814] ss:$8 sps:$4 sm:$0xff]  }
 0x105   : > { %7169 = vmatpush2.bf16.msra.mxu1 %v9755_v34  ;;  %7129 = vmatprep.subr.bf16.mxu0 %v9760_v35  ;;  %v9824_v34 = vld [vmem:[%s11023_s25 + $0x914] ss:$8 sps:$4 sm:$0xff]   ;;  %v9819_v35 = vld [vmem:[%s11023_s25 + $0x810] ss:$8 sps:$4 sm:$0xff]  }
 0x106   : > { %7170 = vmatprep.subr.bf16.mxu1 %v9763_v37  ;;  %v9822_v37 = vld [vmem:[%s11023_s25 + $0x910] ss:$8 sps:$4 sm:$0xff]  }
 0x108   : > { %7130 = vmatpush2.bf16.msra.mxu0 %v9758_v38  ;;  %v9827_v38 = vld [vmem:[%s11023_s25 + $0x804] ss:$8 sps:$4 sm:$0xff]  }
 0x109   : > { %7171 = vmatpush2.bf16.msra.mxu1 %v9761_v39  ;;  %7131 = vmatprep.subr.bf16.mxu0 %v9766_v43  ;;  %v9830_v39 = vld [vmem:[%s11023_s25 + $0x904] ss:$8 sps:$4 sm:$0xff]   ;;  %v9825_v43 = vld [vmem:[%s11023_s25 + $0x800] ss:$8 sps:$4 sm:$0xff]  }
 0x10a   : > { %7172 = vmatprep.subr.bf16.mxu1 %v9769_v45  ;;  %v9828_v45 = vld [vmem:[%s11023_s25 + $0x900] ss:$8 sps:$4 sm:$0xff]  }
 0x10c   : > { %7132 = vmatpush2.bf16.msra.mxu0 %v9764_v46  ;;  %v9833_v46 = vld [vmem:[%s11023_s25 + $0x8f4] ss:$8 sps:$4 sm:$0xff]  }
 0x10d   : > { %7173 = vmatpush2.bf16.msra.mxu1 %v9767_v48  ;;  %7133 = vmatprep.subr.bf16.mxu0 %v9772_v49  ;;  %v9831_v48 = vld [vmem:[%s11023_s25 + $0x8f0] ss:$8 sps:$4 sm:$0xff]  }
 0x10e   : > { %7174 = vmatprep.subr.bf16.mxu1 %v9775_v51  ;;  %v9834_v49 = vld [vmem:[%s11023_s25 + $0x9f0] ss:$8 sps:$4 sm:$0xff]   ;;  %v9839_v51 = vld [vmem:[%s11023_s25 + $0x8e4] ss:$8 sps:$4 sm:$0xff]  }
 0x110   : > { %7134 = vmatpush2.bf16.msra.mxu0 %v9770_v53  ;;  %v9837_v53 = vld [vmem:[%s11023_s25 + $0x8e0] ss:$8 sps:$4 sm:$0xff]  }
 0x111   : > { %7175 = vmatpush2.bf16.msra.mxu1 %v9773_v54  ;;  %7135 = vmatprep.subr.bf16.mxu0 %v9778_v55  ;;  %v9840_v54 = vld [vmem:[%s11023_s25 + $0x9e0] ss:$8 sps:$4 sm:$0xff]   ;;  %v9845_v55 = vld [vmem:[%s11023_s25 + $0x8d4] ss:$8 sps:$4 sm:$0xff]  }
 0x112   : > { %7176 = vmatprep.subr.bf16.mxu1 %v9781_v56  ;;  %v9848_v56 = vld [vmem:[%s11023_s25 + $0x9d4] ss:$8 sps:$4 sm:$0xff]  }
 0x114   : > { %7136 = vmatpush2.bf16.msra.mxu0 %v9776_v36  ;;  %v9843_v36 = vld [vmem:[%s11023_s25 + $0x8d0] ss:$8 sps:$4 sm:$0xff]  }
 0x115   : > { %7177 = vmatpush2.bf16.msra.mxu1 %v9779_v59  ;;  %7187 = vmatprep.subr.bf16.mxu0 %v9785_v40  ;;  %v9846_v59 = vld [vmem:[%s11023_s25 + $0x9d0] ss:$8 sps:$4 sm:$0xff]   ;;  %v9851_v40 = vld [vmem:[%s11023_s25 + $0x8c4] ss:$8 sps:$4 sm:$0xff]  }
 0x116   : > { %7228 = vmatprep.subr.bf16.mxu1 %v9788_v60  ;;  %v9854_v60 = vld [vmem:[%s11023_s25 + $0x9c4] ss:$8 sps:$4 sm:$0xff]  }
 0x117   : > { %v6893_v7 = vpop.f32.mrf.mxu0  ;;  %7138 = vmatmul.mubr.bf16.vlgmr.msra.gmra.mxu0 %v663_v63  ;;  %v9857_v63 = vld [vmem:[%s11023_s25 + $0x8b4] ss:$8 sps:$4 sm:$0xff]  }
 0x118   : > { %v6934_v41 = vpop.f32.mrf.mxu1  ;;  %7179 = vmatmul.mubr.bf16.vlgmr.msra.gmra.mxu1 %v665_v0  ;;  %7188 = vmatpush1.bf16.msra.mxu0 %v9783_v1  ;;  %v9860_v0 = vld [vmem:[%s11023_s25 + $0x9b4] ss:$8 sps:$4 sm:$0xff]   ;;  %v9855_v1 = vld [vmem:[%s11023_s25 + $0x8b0] ss:$8 sps:$4 sm:$0xff]  }
 0x119   : > { %v11353_v42 = vadd.f32 %v6934_v41, %v6893_v7  ;;  %7229 = vmatpush1.bf16.msra.mxu1 %v9786_v2  ;;  %v6895_v11 = vpop.f32.mrf.mxu0  ;;  %7189 = vmatprep.subr.bf16.mxu0 %v9791_v3  ;;  %v9858_v2 = vld [vmem:[%s11023_s25 + $0x9b0] ss:$8 sps:$4 sm:$0xff]   ;;  %v9863_v3 = vld [vmem:[%s11023_s25 + $0x8a4] ss:$8 sps:$4 sm:$0xff]   ;;  %v9864_v7 = vld [vmem:[%s11023_s25 + $0x9a0] ss:$8 sps:$4 sm:$0xff]  }
 0x11a   : > { %v6936_v12 = vpop.f32.mrf.mxu1  ;;  %7230 = vmatprep.subr.bf16.mxu1 %v9794_v4  ;;  %7219 = vmatprep.mubr.bf16.mxu0 %v668_v5  ;;  %v9866_v4 = vld [vmem:[%s11023_s25 + $0x9a4] ss:$8 sps:$4 sm:$0xff]   ;;  %v9869_v41 = vld [vmem:[%s11023_s25 + $0x894] ss:$8 sps:$4 sm:$0xff]  }
 0x11b   : > { %v11358_v14 = vadd.f32 %v6936_v12, %v6895_v11  ;;  %7260 = vmatprep.mubr.bf16.mxu1 %v670_v6  ;;  %v6897_v16 = vpop.f32.mrf.mxu0  ;;  %v288_v5 = vld [vmem:[%s11018_s21 + $0x28] sm:$0xff]  ;;  %v9870_v11 = vld [vmem:[%s11023_s25 + $0x990] ss:$8 sps:$4 sm:$0xff]  }
 0x11c   : > { %v6938_v17 = vpop.f32.mrf.mxu1  ;;  %7190 = vmatpush1.bf16.msra.mxu0 %v9789_v8  ;;  %v9861_v6 = vld [vmem:[%s11023_s25 + $0x8a0] ss:$8 sps:$4 sm:$0xff]   ;;  %v9872_v8 = vld [vmem:[%s11023_s25 + $0x994] ss:$8 sps:$4 sm:$0xff]   ;;  %v9875_v12 = vld [vmem:[%s11023_s25 + $0x884] ss:$8 sps:$4 sm:$0xff]  }
 0x11d   : > { %7231 = vmatpush1.bf16.msra.mxu1 %v9792_v9  ;;  %v6898_v19 = vpop.f32.mrf.mxu0  ;;  %7191 = vmatprep.subr.bf16.mxu0 %v9797_v10  ;;  %v400_v9 = vcombine.high %v288_v5, %v288_v5  ;;  %v9867_v10 = vld [vmem:[%s11023_s25 + $0x890] ss:$8 sps:$4 sm:$0xff]   ;;  %v9873_v17 = vld [vmem:[%s11023_s25 + $0x880] ss:$8 sps:$4 sm:$0xff]  }
 0x11e   : > { %v6939_v20 = vpop.f32.mrf.mxu1  ;;  %7232 = vmatprep.subr.bf16.mxu1 %v9800_v13  ;;  %v9878_v13 = vld [vmem:[%s11023_s25 + $0x984] ss:$8 sps:$4 sm:$0xff]   ;;  %v9882_v19 = vld [vmem:[%s11023_s25 + $0xa74] ss:$8 sps:$4 sm:$0xff]  }
 0x11f   : > { %v11417_v16 = vrot.slane %v400_v9, %v11073_v50  ;;  %v9885_v20 = vld [vmem:[%s11023_s25 + $0xb74] ss:$8 sps:$4 sm:$0xff]   ;;  %v9931_v9 = vld [vmem:[%s11023_s25 + $0xbf0] ss:$8 sps:$4 sm:$0xff]  }
 0x120   : > { %7192 = vmatpush1.bf16.msra.mxu0 %v9795_v15  ;;  %v11414_v15 = vrot.slane %v288_v5, %v11073_v50  ;;  %v9922_v5 = vld [vmem:[%s11023_s25 + $0xa00] ss:$8 sps:$4 sm:$0xff]  }
 0x121   : > { %7233 = vmatpush1.bf16.msra.mxu1 %v9798_v18  ;;  %7193 = vmatprep.subr.bf16.mxu0 %v9803_v21  ;;  %v9876_v18 = vld [vmem:[%s11023_s25 + $0x980] ss:$8 sps:$4 sm:$0xff]   ;;  %v9880_v21 = vld [vmem:[%s11023_s25 + $0xa70] ss:$8 sps:$4 sm:$0xff]  }
 0x122   : > { %7234 = vmatprep.subr.bf16.mxu1 %v9806_v22  ;;  %v9883_v22 = vld [vmem:[%s11023_s25 + $0xb70] ss:$8 sps:$4 sm:$0xff]  }
 0x124   : > { %7194 = vmatpush1.bf16.msra.mxu0 %v9801_v23  ;;  %v415_v23 = vcombine.high %v11414_v15, %v11414_v15 }
 0x125   : > { %7235 = vmatpush1.bf16.msra.mxu1 %v9804_v24  ;;  %7195 = vmatprep.subr.bf16.mxu0 %v9809_v25  ;;  %v416_v24 = vcombine.high %v11417_v16, %v11417_v16  ;;  %v667_v25 = vpack.c.bf16 %v11331_v57, %v11331_v57 }
 0x126   : > { %7236 = vmatprep.subr.bf16.mxu1 %v9812_v26  ;;  %v669_v26 = vpack.c.bf16 %v11334_v58, %v11334_v58 }
 0x128   : > { %7196 = vmatpush1.bf16.msra.mxu0 %v9807_v27  ;;  %v9888_v27 = vld [vmem:[%s11023_s25 + $0xa64] ss:$8 sps:$4 sm:$0xff]  }
 0x129   : > { %7237 = vmatpush1.bf16.msra.mxu1 %v9810_v28  ;;  %7197 = vmatprep.subr.bf16.mxu0 %v9815_v29  ;;  %v9891_v28 = vld [vmem:[%s11023_s25 + $0xb64] ss:$8 sps:$4 sm:$0xff]   ;;  %v9886_v29 = vld [vmem:[%s11023_s25 + $0xa60] ss:$8 sps:$4 sm:$0xff]  }
 0x12a   : > { %7238 = vmatprep.subr.bf16.mxu1 %v9818_v30  ;;  %v9889_v30 = vld [vmem:[%s11023_s25 + $0xb60] ss:$8 sps:$4 sm:$0xff]  }
 0x12c   : > { %7198 = vmatpush1.bf16.msra.mxu0 %v9813_v31  ;;  %v672_v31 = vpack.c.bf16 %v415_v23, %v415_v23  ;;  %v9946_v23 = vld [vmem:[%s11023_s25 + $0xac0] ss:$8 sps:$4 sm:$0xff]  }
 0x12d   : > { %7239 = vmatpush1.bf16.msra.mxu1 %v9816_v32  ;;  %7199 = vmatprep.subr.bf16.mxu0 %v9821_v33  ;;  %v674_v32 = vpack.c.bf16 %v416_v24, %v416_v24  ;;  %v9949_v24 = vld [vmem:[%s11023_s25 + $0xbc0] ss:$8 sps:$4 sm:$0xff]  }
 0x12e   : > { %7240 = vmatprep.subr.bf16.mxu1 %v9824_v34 }
 0x130   : > { %7200 = vmatpush1.bf16.msra.mxu0 %v9819_v35 }
 0x131   : > { %7241 = vmatpush1.bf16.msra.mxu1 %v9822_v37  ;;  %7201 = vmatprep.subr.bf16.mxu0 %v9827_v38  ;;  %v9894_v37 = vld [vmem:[%s11023_s25 + $0xa54] ss:$8 sps:$4 sm:$0xff]  }
 0x132   : > { %7242 = vmatprep.subr.bf16.mxu1 %v9830_v39  ;;  %v9897_v38 = vld [vmem:[%s11023_s25 + $0xb54] ss:$8 sps:$4 sm:$0xff]  }
 0x134   : > { %7202 = vmatpush1.bf16.msra.mxu0 %v9825_v43 }
 0x135   : > { %7243 = vmatpush1.bf16.msra.mxu1 %v9828_v45  ;;  %7203 = vmatprep.subr.bf16.mxu0 %v9833_v46  ;;  %v9892_v45 = vld [vmem:[%s11023_s25 + $0xa50] ss:$8 sps:$4 sm:$0xff]  }
 0x136   : > { %7244 = vmatprep.subr.bf16.mxu1 %v9836_v47  ;;  %v9895_v46 = vld [vmem:[%s11023_s25 + $0xb50] ss:$8 sps:$4 sm:$0xff]  }
 0x138   : > { %7204 = vmatpush2.bf16.msra.mxu0 %v9831_v48 }
 0x139   : > { %7245 = vmatpush2.bf16.msra.mxu1 %v9834_v49  ;;  %7205 = vmatprep.subr.bf16.mxu0 %v9839_v51 }
 0x13a   : > { %7246 = vmatprep.subr.bf16.mxu1 %v9842_v52  ;;  %v9903_v52 = vld [vmem:[%s11023_s25 + $0xb44] ss:$8 sps:$4 sm:$0xff]  }
 0x13c   : > { %7206 = vmatpush2.bf16.msra.mxu0 %v9837_v53  ;;  %v9898_v53 = vld [vmem:[%s11023_s25 + $0xa40] ss:$8 sps:$4 sm:$0xff]  }
 0x13d   : > { %7247 = vmatpush2.bf16.msra.mxu1 %v9840_v54  ;;  %7207 = vmatprep.subr.bf16.mxu0 %v9845_v55  ;;  %v9901_v54 = vld [vmem:[%s11023_s25 + $0xb40] ss:$8 sps:$4 sm:$0xff]   ;;  %v9906_v55 = vld [vmem:[%s11023_s25 + $0xa34] ss:$8 sps:$4 sm:$0xff]  }
 0x13e   : > { %7248 = vmatprep.subr.bf16.mxu1 %v9848_v56  ;;  %v9909_v56 = vld [vmem:[%s11023_s25 + $0xb34] ss:$8 sps:$4 sm:$0xff]  }
 0x140   : > { %7208 = vmatpush2.bf16.msra.mxu0 %v9843_v36  ;;  %v9904_v36 = vld [vmem:[%s11023_s25 + $0xa30] ss:$8 sps:$4 sm:$0xff]  }
 0x141   : > { %7249 = vmatpush2.bf16.msra.mxu1 %v9846_v59  ;;  %7209 = vmatprep.subr.bf16.mxu0 %v9851_v40  ;;  %v9907_v59 = vld [vmem:[%s11023_s25 + $0xb30] ss:$8 sps:$4 sm:$0xff]   ;;  %v9912_v40 = vld [vmem:[%s11023_s25 + $0xa24] ss:$8 sps:$4 sm:$0xff]  }
 0x142   : > { %7250 = vmatprep.subr.bf16.mxu1 %v9854_v60  ;;  %v9915_v60 = vld [vmem:[%s11023_s25 + $0xb24] ss:$8 sps:$4 sm:$0xff]  }
 0x144   : > { %7210 = vmatpush2.bf16.msra.mxu0 %v9849_v61  ;;  %v9910_v61 = vld [vmem:[%s11023_s25 + $0xa20] ss:$8 sps:$4 sm:$0xff]  }
 0x145   : > { %7251 = vmatpush2.bf16.msra.mxu1 %v9852_v62  ;;  %7211 = vmatprep.subr.bf16.mxu0 %v9857_v63  ;;  %v9913_v62 = vld [vmem:[%s11023_s25 + $0xb20] ss:$8 sps:$4 sm:$0xff]   ;;  %v9918_v63 = vld [vmem:[%s11023_s25 + $0xa14] ss:$8 sps:$4 sm:$0xff]  }
 0x146   : > { %7252 = vmatprep.subr.bf16.mxu1 %v9860_v0  ;;  %v9921_v0 = vld [vmem:[%s11023_s25 + $0xb14] ss:$8 sps:$4 sm:$0xff]  }
 0x148   : > { %7212 = vmatpush2.bf16.msra.mxu0 %v9855_v1  ;;  %v9916_v1 = vld [vmem:[%s11023_s25 + $0xa10] ss:$8 sps:$4 sm:$0xff]  }
 0x149   : > { %7253 = vmatpush2.bf16.msra.mxu1 %v9858_v2  ;;  %7213 = vmatprep.subr.bf16.mxu0 %v9863_v3  ;;  %v9919_v2 = vld [vmem:[%s11023_s25 + $0xb10] ss:$8 sps:$4 sm:$0xff]   ;;  %v9924_v3 = vld [vmem:[%s11023_s25 + $0xa04] ss:$8 sps:$4 sm:$0xff]  }
 0x14a   : > { %7254 = vmatprep.subr.bf16.mxu1 %v9866_v4  ;;  %v9927_v4 = vld [vmem:[%s11023_s25 + $0xb04] ss:$8 sps:$4 sm:$0xff]  }
 0x14c   : > { %7214 = vmatpush2.bf16.msra.mxu0 %v9861_v6  ;;  %v9925_v6 = vld [vmem:[%s11023_s25 + $0xb00] ss:$8 sps:$4 sm:$0xff]  }
 0x14d   : > { %7255 = vmatpush2.bf16.msra.mxu1 %v9864_v7  ;;  %7215 = vmatprep.subr.bf16.mxu0 %v9869_v41  ;;  %v9930_v7 = vld [vmem:[%s11023_s25 + $0xaf4] ss:$8 sps:$4 sm:$0xff]  }
 0x14e   : > { %7256 = vmatprep.subr.bf16.mxu1 %v9872_v8  ;;  %v9933_v41 = vld [vmem:[%s11023_s25 + $0xbf4] ss:$8 sps:$4 sm:$0xff]   ;;  %v9928_v8 = vld [vmem:[%s11023_s25 + $0xaf0] ss:$8 sps:$4 sm:$0xff]  }
 0x150   : > { %7216 = vmatpush2.bf16.msra.mxu0 %v9867_v10  ;;  %v9936_v10 = vld [vmem:[%s11023_s25 + $0xae4] ss:$8 sps:$4 sm:$0xff]  }
 0x151   : > { %7257 = vmatpush2.bf16.msra.mxu1 %v9870_v11  ;;  %7217 = vmatprep.subr.bf16.mxu0 %v9875_v12  ;;  %v9939_v11 = vld [vmem:[%s11023_s25 + $0xbe4] ss:$8 sps:$4 sm:$0xff]   ;;  %v9934_v12 = vld [vmem:[%s11023_s25 + $0xae0] ss:$8 sps:$4 sm:$0xff]  }
 0x152   : > { %7258 = vmatprep.subr.bf16.mxu1 %v9878_v13  ;;  %v9937_v13 = vld [vmem:[%s11023_s25 + $0xbe0] ss:$8 sps:$4 sm:$0xff]  }
 0x154   : > { %7218 = vmatpush2.bf16.msra.mxu0 %v9873_v17  ;;  %v9942_v17 = vld [vmem:[%s11023_s25 + $0xad4] ss:$8 sps:$4 sm:$0xff]  }
 0x155   : > { %7259 = vmatpush2.bf16.msra.mxu1 %v9876_v18  ;;  %7269 = vmatprep.subr.bf16.mxu0 %v9882_v19  ;;  %v9945_v18 = vld [vmem:[%s11023_s25 + $0xbd4] ss:$8 sps:$4 sm:$0xff]   ;;  %v9940_v19 = vld [vmem:[%s11023_s25 + $0xad0] ss:$8 sps:$4 sm:$0xff]  }
 0x156   : > { %7310 = vmatprep.subr.bf16.mxu1 %v9885_v20  ;;  %v9943_v20 = vld [vmem:[%s11023_s25 + $0xbd0] ss:$8 sps:$4 sm:$0xff]  }
 0x157   : > { %v6975_v33 = vpop.f32.mrf.mxu0  ;;  %7220 = vmatmul.mubr.bf16.vlgmr.msra.gmra.mxu0 %v667_v25  ;;  %v9954_v25 = vld [vmem:[%s11023_s25 + $0xab4] ss:$8 sps:$4 sm:$0xff]  }
 0x158   : > { %v7016_v34 = vpop.f32.mrf.mxu1  ;;  %7261 = vmatmul.mubr.bf16.vlgmr.msra.gmra.mxu1 %v669_v26  ;;  %v6976_v57 = vadd.f32 %v6975_v33, %v11353_v42  ;;  %7270 = vmatpush1.bf16.msra.mxu0 %v9880_v21  ;;  %v9948_v21 = vld [vmem:[%s11023_s25 + $0xac4] ss:$8 sps:$4 sm:$0xff]   ;;  %v9957_v26 = vld [vmem:[%s11023_s25 + $0xbb4] ss:$8 sps:$4 sm:$0xff]   ;;  %v9961_v33 = vld [vmem:[%s11023_s25 + $0xba0] ss:$8 sps:$4 sm:$0xff]  }
 0x159   : > { %7311 = vmatpush1.bf16.msra.mxu1 %v9883_v22  ;;  %v6977_v58 = vpop.f32.mrf.mxu0  ;;  %7271 = vmatprep.subr.bf16.mxu0 %v9888_v27  ;;  %v9951_v22 = vld [vmem:[%s11023_s25 + $0xbc4] ss:$8 sps:$4 sm:$0xff]   ;;  %v9952_v27 = vld [vmem:[%s11023_s25 + $0xab0] ss:$8 sps:$4 sm:$0xff]  }
 0x15a   : > { %v7018_v35 = vpop.f32.mrf.mxu1  ;;  %7312 = vmatprep.subr.bf16.mxu1 %v9891_v28  ;;  %v11440_v39 = vadd.f32 %v7016_v34, %v6976_v57  ;;  %v6978_v43 = vadd.f32 %v6977_v58, %v11358_v14  ;;  %7301 = vmatprep.mubr.bf16.mxu0 %v672_v31  ;;  %v9900_v14 = vld [vmem:[%s11023_s25 + $0xa44] ss:$8 sps:$4 sm:$0xff]   ;;  %v9955_v28 = vld [vmem:[%s11023_s25 + $0xbb0] ss:$8 sps:$4 sm:$0xff]   ;;  %v9966_v34 = vld [vmem:[%s11023_s25 + $0xa94] ss:$8 sps:$4 sm:$0xff]  }
 0x15b   : > { %7342 = vmatprep.mubr.bf16.mxu1 %v674_v32  ;;  %v6979_v42 = vpop.f32.mrf.mxu0  ;;  %v289_v31 = vld [vmem:[%s11018_s21 + $0x30] sm:$0xff]  ;;  %v9958_v32 = vld [vmem:[%s11023_s25 + $0xaa0] ss:$8 sps:$4 sm:$0xff]  }
 0x15c   : > { %v7020_v47 = vpop.f32.mrf.mxu1  ;;  %v11445_v48 = vadd.f32 %v7018_v35, %v6978_v43  ;;  %7272 = vmatpush1.bf16.msra.mxu0 %v9886_v29  ;;  %v9960_v29 = vld [vmem:[%s11023_s25 + $0xaa4] ss:$8 sps:$4 sm:$0xff]   ;;  %v9969_v57 = vld [vmem:[%s11023_s25 + $0xb94] ss:$8 sps:$4 sm:$0xff]   ;;  %v417_v58 = vcombine.high %v289_v31, %v289_v31  ;;  %v9964_v35 = vld [vmem:[%s11023_s25 + $0xa90] ss:$8 sps:$4 sm:$0xff]  }
 0x15d   : > { %7313 = vmatpush1.bf16.msra.mxu1 %v9889_v30  ;;  %v6980_v49 = vpop.f32.mrf.mxu0  ;;  %7273 = vmatprep.subr.bf16.mxu0 %v9894_v37  ;;  %v9963_v30 = vld [vmem:[%s11023_s25 + $0xba4] ss:$8 sps:$4 sm:$0xff]   ;;  %v9967_v37 = vld [vmem:[%s11023_s25 + $0xb90] ss:$8 sps:$4 sm:$0xff]   ;;  %v9970_v42 = vld [vmem:[%s11023_s25 + $0xa80] ss:$8 sps:$4 sm:$0xff]  }
 0x15e   : > { %v7021_v51 = vpop.f32.mrf.mxu1  ;;  %7314 = vmatprep.subr.bf16.mxu1 %v9897_v38  ;;  %v9972_v38 = vld [vmem:[%s11023_s25 + $0xa84] ss:$8 sps:$4 sm:$0xff]   ;;  %v9973_v47 = vld [vmem:[%s11023_s25 + $0xb80] ss:$8 sps:$4 sm:$0xff]   ;;  %v9979_v49 = vld [vmem:[%s11023_s25 + $0xc74] ss:$8 sps:$4 sm:$0xff]  }
 0x15f   : > { %v9975_v43 = vld [vmem:[%s11023_s25 + $0xb84] ss:$8 sps:$4 sm:$0xff]   ;;  %v9982_v51 = vld [vmem:[%s11023_s25 + $0xd74] ss:$8 sps:$4 sm:$0xff]  }
 0x160   : > { %7274 = vmatpush1.bf16.msra.mxu0 %v9892_v45  ;;  %v11499_v45 = vrot.slane %v289_v31, %v11073_v50  ;;  %v10019_v31 = vld [vmem:[%s11023_s25 + $0xc00] ss:$8 sps:$4 sm:$0xff]  }
 0x161   : > { %7315 = vmatpush1.bf16.msra.mxu1 %v9895_v46  ;;  %7275 = vmatprep.subr.bf16.mxu0 %v9900_v14  ;;  %v11502_v46 = vrot.slane %v417_v58, %v11073_v50  ;;  %v9977_v14 = vld [vmem:[%s11023_s25 + $0xc70] ss:$8 sps:$4 sm:$0xff]  }
 0x162   : > { %7316 = vmatprep.subr.bf16.mxu1 %v9903_v52  ;;  %v9980_v52 = vld [vmem:[%s11023_s25 + $0xd70] ss:$8 sps:$4 sm:$0xff]  }
 0x163   : > { %v10028_v58 = vld [vmem:[%s11023_s25 + $0xdf0] ss:$8 sps:$4 sm:$0xff]  }
 0x164   : > { %7276 = vmatpush1.bf16.msra.mxu0 %v9898_v53  ;;  %v432_v53 = vcombine.high %v11499_v45, %v11499_v45 }
 0x165   : > { %7317 = vmatpush1.bf16.msra.mxu1 %v9901_v54  ;;  %7277 = vmatprep.subr.bf16.mxu0 %v9906_v55  ;;  %v433_v54 = vcombine.high %v11502_v46, %v11502_v46  ;;  %v671_v55 = vpack.c.bf16 %v11414_v15, %v11414_v15 }
 0x166   : > { %7318 = vmatprep.subr.bf16.mxu1 %v9909_v56  ;;  %v673_v56 = vpack.c.bf16 %v11417_v16, %v11417_v16 }
 0x168   : > { %7278 = vmatpush1.bf16.msra.mxu0 %v9904_v36  ;;  %v9985_v36 = vld [vmem:[%s11023_s25 + $0xc64] ss:$8 sps:$4 sm:$0xff]  }
 0x169   : > { %7319 = vmatpush1.bf16.msra.mxu1 %v9907_v59  ;;  %7279 = vmatprep.subr.bf16.mxu0 %v9912_v40  ;;  %v9988_v59 = vld [vmem:[%s11023_s25 + $0xd64] ss:$8 sps:$4 sm:$0xff]   ;;  %v9983_v40 = vld [vmem:[%s11023_s25 + $0xc60] ss:$8 sps:$4 sm:$0xff]  }
 0x16a   : > { %7320 = vmatprep.subr.bf16.mxu1 %v9915_v60  ;;  %v9986_v60 = vld [vmem:[%s11023_s25 + $0xd60] ss:$8 sps:$4 sm:$0xff]  }
 0x16c   : > { %7280 = vmatpush1.bf16.msra.mxu0 %v9910_v61  ;;  %v676_v61 = vpack.c.bf16 %v432_v53, %v432_v53  ;;  %v10043_v53 = vld [vmem:[%s11023_s25 + $0xcc0] ss:$8 sps:$4 sm:$0xff]  }
 0x16d   : > { %7321 = vmatpush1.bf16.msra.mxu1 %v9913_v62  ;;  %7281 = vmatprep.subr.bf16.mxu0 %v9918_v63  ;;  %v678_v62 = vpack.c.bf16 %v433_v54, %v433_v54  ;;  %v10046_v54 = vld [vmem:[%s11023_s25 + $0xdc0] ss:$8 sps:$4 sm:$0xff]  }
 0x16e   : > { %7322 = vmatprep.subr.bf16.mxu1 %v9921_v0 }
 0x170   : > { %7282 = vmatpush1.bf16.msra.mxu0 %v9916_v1 }
 0x171   : > { %7323 = vmatpush1.bf16.msra.mxu1 %v9919_v2  ;;  %7283 = vmatprep.subr.bf16.mxu0 %v9924_v3  ;;  %v9991_v2 = vld [vmem:[%s11023_s25 + $0xc54] ss:$8 sps:$4 sm:$0xff]  }
 0x172   : > { %7324 = vmatprep.subr.bf16.mxu1 %v9927_v4  ;;  %v9994_v3 = vld [vmem:[%s11023_s25 + $0xd54] ss:$8 sps:$4 sm:$0xff]  }
 0x174   : > { %7284 = vmatpush1.bf16.msra.mxu0 %v9922_v5 }
 0x175   : > { %7325 = vmatpush1.bf16.msra.mxu1 %v9925_v6  ;;  %7285 = vmatprep.subr.bf16.mxu0 %v9930_v7  ;;  %v9989_v6 = vld [vmem:[%s11023_s25 + $0xc50] ss:$8 sps:$4 sm:$0xff]  }
 0x176   : > { %7326 = vmatprep.subr.bf16.mxu1 %v9933_v41  ;;  %v9992_v7 = vld [vmem:[%s11023_s25 + $0xd50] ss:$8 sps:$4 sm:$0xff]  }
 0x178   : > { %7286 = vmatpush2.bf16.msra.mxu0 %v9928_v8 }
 0x179   : > { %7327 = vmatpush2.bf16.msra.mxu1 %v9931_v9  ;;  %7287 = vmatprep.subr.bf16.mxu0 %v9936_v10 }
 0x17a   : > { %7328 = vmatprep.subr.bf16.mxu1 %v9939_v11  ;;  %v10000_v11 = vld [vmem:[%s11023_s25 + $0xd44] ss:$8 sps:$4 sm:$0xff]  }
 0x17c   : > { %7288 = vmatpush2.bf16.msra.mxu0 %v9934_v12  ;;  %v9995_v12 = vld [vmem:[%s11023_s25 + $0xc40] ss:$8 sps:$4 sm:$0xff]  }
 0x17d   : > { %7329 = vmatpush2.bf16.msra.mxu1 %v9937_v13  ;;  %7289 = vmatprep.subr.bf16.mxu0 %v9942_v17  ;;  %v9998_v13 = vld [vmem:[%s11023_s25 + $0xd40] ss:$8 sps:$4 sm:$0xff]   ;;  %v10003_v17 = vld [vmem:[%s11023_s25 + $0xc34] ss:$8 sps:$4 sm:$0xff]  }
 0x17e   : > { %7330 = vmatprep.subr.bf16.mxu1 %v9945_v18  ;;  %v10006_v18 = vld [vmem:[%s11023_s25 + $0xd34] ss:$8 sps:$4 sm:$0xff]  }
 0x180   : > { %7290 = vmatpush2.bf16.msra.mxu0 %v9940_v19  ;;  %v10001_v19 = vld [vmem:[%s11023_s25 + $0xc30] ss:$8 sps:$4 sm:$0xff]  }
 0x181   : > { %7331 = vmatpush2.bf16.msra.mxu1 %v9943_v20  ;;  %7291 = vmatprep.subr.bf16.mxu0 %v9948_v21  ;;  %v10004_v20 = vld [vmem:[%s11023_s25 + $0xd30] ss:$8 sps:$4 sm:$0xff]   ;;  %v10009_v21 = vld [vmem:[%s11023_s25 + $0xc24] ss:$8 sps:$4 sm:$0xff]  }
 0x182   : > { %7332 = vmatprep.subr.bf16.mxu1 %v9951_v22  ;;  %v10012_v22 = vld [vmem:[%s11023_s25 + $0xd24] ss:$8 sps:$4 sm:$0xff]  }
 0x184   : > { %7292 = vmatpush2.bf16.msra.mxu0 %v9946_v23  ;;  %v10007_v23 = vld [vmem:[%s11023_s25 + $0xc20] ss:$8 sps:$4 sm:$0xff]  }
 0x185   : > { %7333 = vmatpush2.bf16.msra.mxu1 %v9949_v24  ;;  %7293 = vmatprep.subr.bf16.mxu0 %v9954_v25  ;;  %v10010_v24 = vld [vmem:[%s11023_s25 + $0xd20] ss:$8 sps:$4 sm:$0xff]   ;;  %v10015_v25 = vld [vmem:[%s11023_s25 + $0xc14] ss:$8 sps:$4 sm:$0xff]  }
 0x186   : > { %7334 = vmatprep.subr.bf16.mxu1 %v9957_v26  ;;  %v10018_v26 = vld [vmem:[%s11023_s25 + $0xd14] ss:$8 sps:$4 sm:$0xff]  }
 0x188   : > { %7294 = vmatpush2.bf16.msra.mxu0 %v9952_v27  ;;  %v10013_v27 = vld [vmem:[%s11023_s25 + $0xc10] ss:$8 sps:$4 sm:$0xff]  }
 0x189   : > { %7335 = vmatpush2.bf16.msra.mxu1 %v9955_v28  ;;  %7295 = vmatprep.subr.bf16.mxu0 %v9960_v29  ;;  %v10016_v28 = vld [vmem:[%s11023_s25 + $0xd10] ss:$8 sps:$4 sm:$0xff]   ;;  %v10021_v29 = vld [vmem:[%s11023_s25 + $0xc04] ss:$8 sps:$4 sm:$0xff]  }
 0x18a   : > { %7336 = vmatprep.subr.bf16.mxu1 %v9963_v30  ;;  %v10024_v30 = vld [vmem:[%s11023_s25 + $0xd04] ss:$8 sps:$4 sm:$0xff]  }
 0x18c   : > { %7296 = vmatpush2.bf16.msra.mxu0 %v9958_v32  ;;  %v10022_v32 = vld [vmem:[%s11023_s25 + $0xd00] ss:$8 sps:$4 sm:$0xff]  }
 0x18d   : > { %7337 = vmatpush2.bf16.msra.mxu1 %v9961_v33  ;;  %7297 = vmatprep.subr.bf16.mxu0 %v9966_v34  ;;  %v10027_v33 = vld [vmem:[%s11023_s25 + $0xcf4] ss:$8 sps:$4 sm:$0xff]  }
 0x18e   : > { %7338 = vmatprep.subr.bf16.mxu1 %v9969_v57  ;;  %v10030_v34 = vld [vmem:[%s11023_s25 + $0xdf4] ss:$8 sps:$4 sm:$0xff]   ;;  %v10025_v57 = vld [vmem:[%s11023_s25 + $0xcf0] ss:$8 sps:$4 sm:$0xff]  }
 0x190   : > { %7298 = vmatpush2.bf16.msra.mxu0 %v9964_v35  ;;  %v10033_v35 = vld [vmem:[%s11023_s25 + $0xce4] ss:$8 sps:$4 sm:$0xff]  }
 0x191   : > { %7339 = vmatpush2.bf16.msra.mxu1 %v9967_v37  ;;  %7299 = vmatprep.subr.bf16.mxu0 %v9972_v38  ;;  %v10036_v37 = vld [vmem:[%s11023_s25 + $0xde4] ss:$8 sps:$4 sm:$0xff]   ;;  %v10031_v38 = vld [vmem:[%s11023_s25 + $0xce0] ss:$8 sps:$4 sm:$0xff]  }
 0x192   : > { %7340 = vmatprep.subr.bf16.mxu1 %v9975_v43  ;;  %v10034_v43 = vld [vmem:[%s11023_s25 + $0xde0] ss:$8 sps:$4 sm:$0xff]  }
 0x194   : > { %7300 = vmatpush2.bf16.msra.mxu0 %v9970_v42  ;;  %v10039_v42 = vld [vmem:[%s11023_s25 + $0xcd4] ss:$8 sps:$4 sm:$0xff]  }
 0x195   : > { %7341 = vmatpush2.bf16.msra.mxu1 %v9973_v47  ;;  %7351 = vmatprep.subr.bf16.mxu0 %v9979_v49  ;;  %v10042_v47 = vld [vmem:[%s11023_s25 + $0xdd4] ss:$8 sps:$4 sm:$0xff]   ;;  %v10037_v49 = vld [vmem:[%s11023_s25 + $0xcd0] ss:$8 sps:$4 sm:$0xff]  }
 0x196   : > { %7392 = vmatprep.subr.bf16.mxu1 %v9982_v51  ;;  %v10040_v51 = vld [vmem:[%s11023_s25 + $0xdd0] ss:$8 sps:$4 sm:$0xff]  }
 0x197   : > { %v7057_v63 = vpop.f32.mrf.mxu0  ;;  %7302 = vmatmul.mubr.bf16.vlgmr.msra.gmra.mxu0 %v671_v55  ;;  %v10051_v55 = vld [vmem:[%s11023_s25 + $0xcb4] ss:$8 sps:$4 sm:$0xff]  }
 0x198   : > { %v7098_v0 = vpop.f32.mrf.mxu1  ;;  %7343 = vmatmul.mubr.bf16.vlgmr.msra.gmra.mxu1 %v673_v56  ;;  %v7058_v15 = vadd.f32 %v7057_v63, %v11440_v39  ;;  %7352 = vmatpush1.bf16.msra.mxu0 %v9977_v14  ;;  %v10045_v14 = vld [vmem:[%s11023_s25 + $0xcc4] ss:$8 sps:$4 sm:$0xff]   ;;  %v10054_v56 = vld [vmem:[%s11023_s25 + $0xdb4] ss:$8 sps:$4 sm:$0xff]   ;;  %v10058_v63 = vld [vmem:[%s11023_s25 + $0xda0] ss:$8 sps:$4 sm:$0xff]  }
 0x199   : > { %7393 = vmatpush1.bf16.msra.mxu1 %v9980_v52  ;;  %v7059_v16 = vpop.f32.mrf.mxu0  ;;  %7353 = vmatprep.subr.bf16.mxu0 %v9985_v36  ;;  %v10048_v52 = vld [vmem:[%s11023_s25 + $0xdc4] ss:$8 sps:$4 sm:$0xff]   ;;  %v10049_v36 = vld [vmem:[%s11023_s25 + $0xcb0] ss:$8 sps:$4 sm:$0xff]  }
 0x19a   : > { %v7100_v1 = vpop.f32.mrf.mxu1  ;;  %7394 = vmatprep.subr.bf16.mxu1 %v9988_v59  ;;  %v11525_v4 = vadd.f32 %v7098_v0, %v7058_v15  ;;  %v7060_v5 = vadd.f32 %v7059_v16, %v11445_v48  ;;  %7383 = vmatprep.mubr.bf16.mxu0 %v676_v61  ;;  %v9997_v48 = vld [vmem:[%s11023_s25 + $0xc44] ss:$8 sps:$4 sm:$0xff]   ;;  %v10052_v59 = vld [vmem:[%s11023_s25 + $0xdb0] ss:$8 sps:$4 sm:$0xff]   ;;  %v10063_v0 = vld [vmem:[%s11023_s25 + $0xc94] ss:$8 sps:$4 sm:$0xff]  }
 0x19b   : > { %7424 = vmatprep.mubr.bf16.mxu1 %v678_v62  ;;  %v7061_v39 = vpop.f32.mrf.mxu0  ;;  %v290_v61 = vld [vmem:[%s11018_s21 + $0x38] sm:$0xff]  ;;  %v10055_v62 = vld [vmem:[%s11023_s25 + $0xca0] ss:$8 sps:$4 sm:$0xff]  }
 0x19c   : > { %v7102_v41 = vpop.f32.mrf.mxu1  ;;  %v11530_v8 = vadd.f32 %v7100_v1, %v7060_v5  ;;  %7354 = vmatpush1.bf16.msra.mxu0 %v9983_v40  ;;  %v10057_v40 = vld [vmem:[%s11023_s25 + $0xca4] ss:$8 sps:$4 sm:$0xff]   ;;  %v10066_v15 = vld [vmem:[%s11023_s25 + $0xd94] ss:$8 sps:$4 sm:$0xff]   ;;  %v434_v16 = vcombine.high %v290_v61, %v290_v61  ;;  %v10061_v1 = vld [vmem:[%s11023_s25 + $0xc90] ss:$8 sps:$4 sm:$0xff]  }
 0x19d   : > { %7395 = vmatpush1.bf16.msra.mxu1 %v9986_v60  ;;  %v7062_v9 = vpop.f32.mrf.mxu0  ;;  %7355 = vmatprep.subr.bf16.mxu0 %v9991_v2  ;;  %v10060_v60 = vld [vmem:[%s11023_s25 + $0xda4] ss:$8 sps:$4 sm:$0xff]   ;;  %v10064_v2 = vld [vmem:[%s11023_s25 + $0xd90] ss:$8 sps:$4 sm:$0xff]   ;;  %v10067_v39 = vld [vmem:[%s11023_s25 + $0xc80] ss:$8 sps:$4 sm:$0xff]  }
 0x19e   : > { %v7103_v10 = vpop.f32.mrf.mxu1  ;;  %7396 = vmatprep.subr.bf16.mxu1 %v9994_v3  ;;  %v10069_v3 = vld [vmem:[%s11023_s25 + $0xc84] ss:$8 sps:$4 sm:$0xff]   ;;  %v10070_v41 = vld [vmem:[%s11023_s25 + $0xd80] ss:$8 sps:$4 sm:$0xff]   ;;  %v10076_v9 = vld [vmem:[%s11023_s25 + $0xe74] ss:$8 sps:$4 sm:$0xff]  }
 0x19f   : > { %v10072_v5 = vld [vmem:[%s11023_s25 + $0xd84] ss:$8 sps:$4 sm:$0xff]   ;;  %v10079_v10 = vld [vmem:[%s11023_s25 + $0xf74] ss:$8 sps:$4 sm:$0xff]  }
 0x1a0   : > { %7356 = vmatpush1.bf16.msra.mxu0 %v9989_v6  ;;  %v11584_v6 = vrot.slane %v290_v61, %v11073_v50  ;;  %v10116_v61 = vld [vmem:[%s11023_s25 + $0xe00] ss:$8 sps:$4 sm:$0xff]  }
 0x1a1   : > { %7397 = vmatpush1.bf16.msra.mxu1 %v9992_v7  ;;  %7357 = vmatprep.subr.bf16.mxu0 %v9997_v48  ;;  %v11587_v7 = vrot.slane %v434_v16, %v11073_v50  ;;  %v10074_v48 = vld [vmem:[%s11023_s25 + $0xe70] ss:$8 sps:$4 sm:$0xff]  }
 0x1a2   : > { %7398 = vmatprep.subr.bf16.mxu1 %v10000_v11  ;;  %v10077_v11 = vld [vmem:[%s11023_s25 + $0xf70] ss:$8 sps:$4 sm:$0xff]  }
 0x1a3   : > { %v10125_v16 = vld [vmem:[%s11023_s25 + $0xff0] ss:$8 sps:$4 sm:$0xff]  }
 0x1a4   : > { %7358 = vmatpush1.bf16.msra.mxu0 %v9995_v12  ;;  %v449_v12 = vcombine.high %v11584_v6, %v11584_v6 }
 0x1a5   : > { %7399 = vmatpush1.bf16.msra.mxu1 %v9998_v13  ;;  %7359 = vmatprep.subr.bf16.mxu0 %v10003_v17  ;;  %v450_v13 = vcombine.high %v11587_v7, %v11587_v7  ;;  %v675_v17 = vpack.c.bf16 %v11499_v45, %v11499_v45 }
 0x1a6   : > { %7400 = vmatprep.subr.bf16.mxu1 %v10006_v18  ;;  %v677_v18 = vpack.c.bf16 %v11502_v46, %v11502_v46 }
 0x1a8   : > { %7360 = vmatpush1.bf16.msra.mxu0 %v10001_v19  ;;  %v10082_v19 = vld [vmem:[%s11023_s25 + $0xe64] ss:$8 sps:$4 sm:$0xff]  }
 0x1a9   : > { %7401 = vmatpush1.bf16.msra.mxu1 %v10004_v20  ;;  %7361 = vmatprep.subr.bf16.mxu0 %v10009_v21  ;;  %v10085_v20 = vld [vmem:[%s11023_s25 + $0xf64] ss:$8 sps:$4 sm:$0xff]   ;;  %v10080_v21 = vld [vmem:[%s11023_s25 + $0xe60] ss:$8 sps:$4 sm:$0xff]  }
 0x1aa   : > { %7402 = vmatprep.subr.bf16.mxu1 %v10012_v22  ;;  %v10083_v22 = vld [vmem:[%s11023_s25 + $0xf60] ss:$8 sps:$4 sm:$0xff]  }
 0x1ac   : > { %7362 = vmatpush1.bf16.msra.mxu0 %v10007_v23  ;;  %v680_v23 = vpack.c.bf16 %v449_v12, %v449_v12  ;;  %v10140_v12 = vld [vmem:[%s11023_s25 + $0xec0] ss:$8 sps:$4 sm:$0xff]  }
 0x1ad   : > { %7403 = vmatpush1.bf16.msra.mxu1 %v10010_v24  ;;  %7363 = vmatprep.subr.bf16.mxu0 %v10015_v25  ;;  %v682_v24 = vpack.c.bf16 %v450_v13, %v450_v13  ;;  %v10143_v13 = vld [vmem:[%s11023_s25 + $0xfc0] ss:$8 sps:$4 sm:$0xff]  }
 0x1ae   : > { %7404 = vmatprep.subr.bf16.mxu1 %v10018_v26 }
 0x1b0   : > { %7364 = vmatpush1.bf16.msra.mxu0 %v10013_v27 }
 0x1b1   : > { %7405 = vmatpush1.bf16.msra.mxu1 %v10016_v28  ;;  %7365 = vmatprep.subr.bf16.mxu0 %v10021_v29  ;;  %v10088_v28 = vld [vmem:[%s11023_s25 + $0xe54] ss:$8 sps:$4 sm:$0xff]  }
 0x1b2   : > { %7406 = vmatprep.subr.bf16.mxu1 %v10024_v30  ;;  %v10091_v29 = vld [vmem:[%s11023_s25 + $0xf54] ss:$8 sps:$4 sm:$0xff]  }
 0x1b4   : > { %7366 = vmatpush1.bf16.msra.mxu0 %v10019_v31 }
 0x1b5   : > { %7407 = vmatpush1.bf16.msra.mxu1 %v10022_v32  ;;  %7367 = vmatprep.subr.bf16.mxu0 %v10027_v33  ;;  %v10086_v32 = vld [vmem:[%s11023_s25 + $0xe50] ss:$8 sps:$4 sm:$0xff]  }
 0x1b6   : > { %7408 = vmatprep.subr.bf16.mxu1 %v10030_v34  ;;  %v10089_v33 = vld [vmem:[%s11023_s25 + $0xf50] ss:$8 sps:$4 sm:$0xff]  }
 0x1b8   : > { %7368 = vmatpush2.bf16.msra.mxu0 %v10025_v57 }
 0x1b9   : > { %7409 = vmatpush2.bf16.msra.mxu1 %v10028_v58  ;;  %7369 = vmatprep.subr.bf16.mxu0 %v10033_v35 }
 0x1ba   : > { %7410 = vmatprep.subr.bf16.mxu1 %v10036_v37  ;;  %v10097_v37 = vld [vmem:[%s11023_s25 + $0xf44] ss:$8 sps:$4 sm:$0xff]  }
 0x1bc   : > { %7370 = vmatpush2.bf16.msra.mxu0 %v10031_v38  ;;  %v10092_v38 = vld [vmem:[%s11023_s25 + $0xe40] ss:$8 sps:$4 sm:$0xff]  }
 0x1bd   : > { %7411 = vmatpush2.bf16.msra.mxu1 %v10034_v43  ;;  %7371 = vmatprep.subr.bf16.mxu0 %v10039_v42  ;;  %v10095_v43 = vld [vmem:[%s11023_s25 + $0xf40] ss:$8 sps:$4 sm:$0xff]   ;;  %v10100_v42 = vld [vmem:[%s11023_s25 + $0xe34] ss:$8 sps:$4 sm:$0xff]  }
 0x1be   : > { %7412 = vmatprep.subr.bf16.mxu1 %v10042_v47  ;;  %v10103_v47 = vld [vmem:[%s11023_s25 + $0xf34] ss:$8 sps:$4 sm:$0xff]  }
 0x1c0   : > { %7372 = vmatpush2.bf16.msra.mxu0 %v10037_v49  ;;  %v10098_v49 = vld [vmem:[%s11023_s25 + $0xe30] ss:$8 sps:$4 sm:$0xff]  }
 0x1c1   : > { %7413 = vmatpush2.bf16.msra.mxu1 %v10040_v51  ;;  %7373 = vmatprep.subr.bf16.mxu0 %v10045_v14  ;;  %v10101_v51 = vld [vmem:[%s11023_s25 + $0xf30] ss:$8 sps:$4 sm:$0xff]   ;;  %v10106_v14 = vld [vmem:[%s11023_s25 + $0xe24] ss:$8 sps:$4 sm:$0xff]  }
 0x1c2   : > { %7414 = vmatprep.subr.bf16.mxu1 %v10048_v52  ;;  %v10109_v52 = vld [vmem:[%s11023_s25 + $0xf24] ss:$8 sps:$4 sm:$0xff]  }
 0x1c4   : > { %7374 = vmatpush2.bf16.msra.mxu0 %v10043_v53  ;;  %v10104_v53 = vld [vmem:[%s11023_s25 + $0xe20] ss:$8 sps:$4 sm:$0xff]  }
 0x1c5   : > { %7415 = vmatpush2.bf16.msra.mxu1 %v10046_v54  ;;  %7375 = vmatprep.subr.bf16.mxu0 %v10051_v55  ;;  %v10107_v54 = vld [vmem:[%s11023_s25 + $0xf20] ss:$8 sps:$4 sm:$0xff]   ;;  %v10112_v55 = vld [vmem:[%s11023_s25 + $0xe14] ss:$8 sps:$4 sm:$0xff]  }
 0x1c6   : > { %7416 = vmatprep.subr.bf16.mxu1 %v10054_v56  ;;  %v10115_v56 = vld [vmem:[%s11023_s25 + $0xf14] ss:$8 sps:$4 sm:$0xff]  }
 0x1c8   : > { %7376 = vmatpush2.bf16.msra.mxu0 %v10049_v36  ;;  %v10110_v36 = vld [vmem:[%s11023_s25 + $0xe10] ss:$8 sps:$4 sm:$0xff]  }
 0x1c9   : > { %7417 = vmatpush2.bf16.msra.mxu1 %v10052_v59  ;;  %7377 = vmatprep.subr.bf16.mxu0 %v10057_v40  ;;  %v10113_v59 = vld [vmem:[%s11023_s25 + $0xf10] ss:$8 sps:$4 sm:$0xff]   ;;  %v10118_v40 = vld [vmem:[%s11023_s25 + $0xe04] ss:$8 sps:$4 sm:$0xff]  }
 0x1ca   : > { %7418 = vmatprep.subr.bf16.mxu1 %v10060_v60  ;;  %v10121_v60 = vld [vmem:[%s11023_s25 + $0xf04] ss:$8 sps:$4 sm:$0xff]  }
 0x1cc   : > { %7378 = vmatpush2.bf16.msra.mxu0 %v10055_v62  ;;  %v10119_v62 = vld [vmem:[%s11023_s25 + $0xf00] ss:$8 sps:$4 sm:$0xff]  }
 0x1cd   : > { %7419 = vmatpush2.bf16.msra.mxu1 %v10058_v63  ;;  %7379 = vmatprep.subr.bf16.mxu0 %v10063_v0  ;;  %v10124_v63 = vld [vmem:[%s11023_s25 + $0xef4] ss:$8 sps:$4 sm:$0xff]  }
 0x1ce   : > { %7420 = vmatprep.subr.bf16.mxu1 %v10066_v15  ;;  %v10127_v0 = vld [vmem:[%s11023_s25 + $0xff4] ss:$8 sps:$4 sm:$0xff]   ;;  %v10122_v15 = vld [vmem:[%s11023_s25 + $0xef0] ss:$8 sps:$4 sm:$0xff]  }
 0x1d0   : > { %7380 = vmatpush2.bf16.msra.mxu0 %v10061_v1  ;;  %v10130_v1 = vld [vmem:[%s11023_s25 + $0xee4] ss:$8 sps:$4 sm:$0xff]  }
 0x1d1   : > { %7421 = vmatpush2.bf16.msra.mxu1 %v10064_v2  ;;  %7381 = vmatprep.subr.bf16.mxu0 %v10069_v3  ;;  %v10133_v2 = vld [vmem:[%s11023_s25 + $0xfe4] ss:$8 sps:$4 sm:$0xff]   ;;  %v10128_v3 = vld [vmem:[%s11023_s25 + $0xee0] ss:$8 sps:$4 sm:$0xff]  }
 0x1d2   : > { %7422 = vmatprep.subr.bf16.mxu1 %v10072_v5  ;;  %v10131_v5 = vld [vmem:[%s11023_s25 + $0xfe0] ss:$8 sps:$4 sm:$0xff]  }
 0x1d4   : > { %7382 = vmatpush2.bf16.msra.mxu0 %v10067_v39  ;;  %v10136_v39 = vld [vmem:[%s11023_s25 + $0xed4] ss:$8 sps:$4 sm:$0xff]  }
 0x1d5   : > { %7423 = vmatpush2.bf16.msra.mxu1 %v10070_v41  ;;  %7433 = vmatprep.subr.bf16.mxu0 %v10076_v9  ;;  %v10139_v41 = vld [vmem:[%s11023_s25 + $0xfd4] ss:$8 sps:$4 sm:$0xff]   ;;  %v10134_v9 = vld [vmem:[%s11023_s25 + $0xed0] ss:$8 sps:$4 sm:$0xff]  }
 0x1d6   : > { %7474 = vmatprep.subr.bf16.mxu1 %v10079_v10  ;;  %v10137_v10 = vld [vmem:[%s11023_s25 + $0xfd0] ss:$8 sps:$4 sm:$0xff]  }
 0x1d7   : > { %v7139_v25 = vpop.f32.mrf.mxu0  ;;  %7384 = vmatmul.mubr.bf16.vlgmr.msra.gmra.mxu0 %v675_v17  ;;  %v10148_v17 = vld [vmem:[%s11023_s25 + $0xeb4] ss:$8 sps:$4 sm:$0xff]  }
 0x1d8   : > { %v7180_v26 = vpop.f32.mrf.mxu1  ;;  %7425 = vmatmul.mubr.bf16.vlgmr.msra.gmra.mxu1 %v677_v18  ;;  %v7140_v45 = vadd.f32 %v7139_v25, %v11525_v4  ;;  %7434 = vmatpush1.bf16.msra.mxu0 %v10074_v48  ;;  %v10142_v48 = vld [vmem:[%s11023_s25 + $0xec4] ss:$8 sps:$4 sm:$0xff]   ;;  %v10151_v18 = vld [vmem:[%s11023_s25 + $0xfb4] ss:$8 sps:$4 sm:$0xff]   ;;  %v10155_v25 = vld [vmem:[%s11023_s25 + $0xfa0] ss:$8 sps:$4 sm:$0xff]  }
 0x1d9   : > { %7475 = vmatpush1.bf16.msra.mxu1 %v10077_v11  ;;  %v7141_v46 = vpop.f32.mrf.mxu0  ;;  %7435 = vmatprep.subr.bf16.mxu0 %v10082_v19  ;;  %v10145_v11 = vld [vmem:[%s11023_s25 + $0xfc4] ss:$8 sps:$4 sm:$0xff]   ;;  %v10146_v19 = vld [vmem:[%s11023_s25 + $0xeb0] ss:$8 sps:$4 sm:$0xff]  }
 0x1da   : > { %v7182_v27 = vpop.f32.mrf.mxu1  ;;  %7476 = vmatprep.subr.bf16.mxu1 %v10085_v20  ;;  %v11610_v30 = vadd.f32 %v7180_v26, %v7140_v45  ;;  %v7142_v31 = vadd.f32 %v7141_v46, %v11530_v8  ;;  %7465 = vmatprep.mubr.bf16.mxu0 %v680_v23  ;;  %v10094_v8 = vld [vmem:[%s11023_s25 + $0xe44] ss:$8 sps:$4 sm:$0xff]   ;;  %v10149_v20 = vld [vmem:[%s11023_s25 + $0xfb0] ss:$8 sps:$4 sm:$0xff]   ;;  %v10160_v26 = vld [vmem:[%s11023_s25 + $0xe94] ss:$8 sps:$4 sm:$0xff]  }
 0x1db   : > { %7506 = vmatprep.mubr.bf16.mxu1 %v682_v24  ;;  %v7143_v4 = vpop.f32.mrf.mxu0  ;;  %v291_v23 = vld [vmem:[%s11018_s21 + $0x40] sm:$0xff]  ;;  %v10163_v45 = vld [vmem:[%s11023_s25 + $0xf94] ss:$8 sps:$4 sm:$0xff]  }
 0x1dc   : > { %v7184_v34 = vpop.f32.mrf.mxu1  ;;  %v11615_v57 = vadd.f32 %v7182_v27, %v7142_v31  ;;  %7436 = vmatpush1.bf16.msra.mxu0 %v10080_v21  ;;  %v10154_v21 = vld [vmem:[%s11023_s25 + $0xea4] ss:$8 sps:$4 sm:$0xff]   ;;  %v10152_v24 = vld [vmem:[%s11023_s25 + $0xea0] ss:$8 sps:$4 sm:$0xff]   ;;  %v451_v46 = vcombine.high %v291_v23, %v291_v23  ;;  %v10158_v27 = vld [vmem:[%s11023_s25 + $0xe90] ss:$8 sps:$4 sm:$0xff]  }
 0x1dd   : > { %7477 = vmatpush1.bf16.msra.mxu1 %v10083_v22  ;;  %v7144_v58 = vpop.f32.mrf.mxu0  ;;  %7437 = vmatprep.subr.bf16.mxu0 %v10088_v28  ;;  %v10157_v22 = vld [vmem:[%s11023_s25 + $0xfa4] ss:$8 sps:$4 sm:$0xff]   ;;  %v10161_v28 = vld [vmem:[%s11023_s25 + $0xf90] ss:$8 sps:$4 sm:$0xff]   ;;  %v10164_v4 = vld [vmem:[%s11023_s25 + $0xe80] ss:$8 sps:$4 sm:$0xff]  }
 0x1de   : > { %v7185_v35 = vpop.f32.mrf.mxu1  ;;  %7478 = vmatprep.subr.bf16.mxu1 %v10091_v29  ;;  %v10166_v29 = vld [vmem:[%s11023_s25 + $0xe84] ss:$8 sps:$4 sm:$0xff]   ;;  %v10167_v34 = vld [vmem:[%s11023_s25 + $0xf80] ss:$8 sps:$4 sm:$0xff]   ;;  %v10173_v58 = vld [vmem:[%s11023_s25 + $0x1074] ss:$8 sps:$4 sm:$0xff]  }
 0x1df   : > { %v10169_v31 = vld [vmem:[%s11023_s25 + $0xf84] ss:$8 sps:$4 sm:$0xff]   ;;  %v10176_v35 = vld [vmem:[%s11023_s25 + $0x1174] ss:$8 sps:$4 sm:$0xff]  }
 0x1e0   : > { %7438 = vmatpush1.bf16.msra.mxu0 %v10086_v32  ;;  %v11669_v32 = vrot.slane %v291_v23, %v11073_v50  ;;  %v10213_v23 = vld [vmem:[%s11023_s25 + $0x1000] ss:$8 sps:$4 sm:$0xff]  }
 0x1e1   : > { %7479 = vmatpush1.bf16.msra.mxu1 %v10089_v33  ;;  %7439 = vmatprep.subr.bf16.mxu0 %v10094_v8  ;;  %v11672_v33 = vrot.slane %v451_v46, %v11073_v50  ;;  %v10171_v8 = vld [vmem:[%s11023_s25 + $0x1070] ss:$8 sps:$4 sm:$0xff]  }
 0x1e2   : > { %7480 = vmatprep.subr.bf16.mxu1 %v10097_v37  ;;  %v10174_v37 = vld [vmem:[%s11023_s25 + $0x1170] ss:$8 sps:$4 sm:$0xff]  }
 0x1e3   : > { %v10222_v46 = vld [vmem:[%s11023_s25 + $0x11f0] ss:$8 sps:$4 sm:$0xff]  }
 0x1e4   : > { %7440 = vmatpush1.bf16.msra.mxu0 %v10092_v38  ;;  %v466_v38 = vcombine.high %v11669_v32, %v11669_v32 }
 0x1e5   : > { %7481 = vmatpush1.bf16.msra.mxu1 %v10095_v43  ;;  %7441 = vmatprep.subr.bf16.mxu0 %v10100_v42  ;;  %v467_v43 = vcombine.high %v11672_v33, %v11672_v33  ;;  %v679_v42 = vpack.c.bf16 %v11584_v6, %v11584_v6 }
 0x1e6   : > { %7482 = vmatprep.subr.bf16.mxu1 %v10103_v47  ;;  %v681_v47 = vpack.c.bf16 %v11587_v7, %v11587_v7 }
 0x1e8   : > { %7442 = vmatpush1.bf16.msra.mxu0 %v10098_v49  ;;  %v10179_v49 = vld [vmem:[%s11023_s25 + $0x1064] ss:$8 sps:$4 sm:$0xff]  }
 0x1e9   : > { %7483 = vmatpush1.bf16.msra.mxu1 %v10101_v51  ;;  %7443 = vmatprep.subr.bf16.mxu0 %v10106_v14  ;;  %v10182_v51 = vld [vmem:[%s11023_s25 + $0x1164] ss:$8 sps:$4 sm:$0xff]   ;;  %v10177_v14 = vld [vmem:[%s11023_s25 + $0x1060] ss:$8 sps:$4 sm:$0xff]  }
 0x1ea   : > { %7484 = vmatprep.subr.bf16.mxu1 %v10109_v52  ;;  %v10180_v52 = vld [vmem:[%s11023_s25 + $0x1160] ss:$8 sps:$4 sm:$0xff]  }
 0x1ec   : > { %7444 = vmatpush1.bf16.msra.mxu0 %v10104_v53  ;;  %v684_v53 = vpack.c.bf16 %v466_v38, %v466_v38  ;;  %v10237_v38 = vld [vmem:[%s11023_s25 + $0x10c0] ss:$8 sps:$4 sm:$0xff]  }
 0x1ed   : > { %7485 = vmatpush1.bf16.msra.mxu1 %v10107_v54  ;;  %7445 = vmatprep.subr.bf16.mxu0 %v10112_v55  ;;  %v686_v54 = vpack.c.bf16 %v467_v43, %v467_v43  ;;  %v10240_v43 = vld [vmem:[%s11023_s25 + $0x11c0] ss:$8 sps:$4 sm:$0xff]  }
 0x1ee   : > { %7486 = vmatprep.subr.bf16.mxu1 %v10115_v56 }
 0x1f0   : > { %7446 = vmatpush1.bf16.msra.mxu0 %v10110_v36 }
 0x1f1   : > { %7487 = vmatpush1.bf16.msra.mxu1 %v10113_v59  ;;  %7447 = vmatprep.subr.bf16.mxu0 %v10118_v40  ;;  %v10185_v59 = vld [vmem:[%s11023_s25 + $0x1054] ss:$8 sps:$4 sm:$0xff]  }
 0x1f2   : > { %7488 = vmatprep.subr.bf16.mxu1 %v10121_v60  ;;  %v10188_v40 = vld [vmem:[%s11023_s25 + $0x1154] ss:$8 sps:$4 sm:$0xff]  }
 0x1f4   : > { %7448 = vmatpush1.bf16.msra.mxu0 %v10116_v61 }
 0x1f5   : > { %7489 = vmatpush1.bf16.msra.mxu1 %v10119_v62  ;;  %7449 = vmatprep.subr.bf16.mxu0 %v10124_v63  ;;  %v10183_v62 = vld [vmem:[%s11023_s25 + $0x1050] ss:$8 sps:$4 sm:$0xff]  }
 0x1f6   : > { %7490 = vmatprep.subr.bf16.mxu1 %v10127_v0  ;;  %v10186_v63 = vld [vmem:[%s11023_s25 + $0x1150] ss:$8 sps:$4 sm:$0xff]  }
 0x1f8   : > { %7450 = vmatpush2.bf16.msra.mxu0 %v10122_v15 }
 0x1f9   : > { %7491 = vmatpush2.bf16.msra.mxu1 %v10125_v16  ;;  %7451 = vmatprep.subr.bf16.mxu0 %v10130_v1 }
 0x1fa   : > { %7492 = vmatprep.subr.bf16.mxu1 %v10133_v2  ;;  %v10194_v2 = vld [vmem:[%s11023_s25 + $0x1144] ss:$8 sps:$4 sm:$0xff]  }
 0x1fc   : > { %7452 = vmatpush2.bf16.msra.mxu0 %v10128_v3  ;;  %v10189_v3 = vld [vmem:[%s11023_s25 + $0x1040] ss:$8 sps:$4 sm:$0xff]  }
 0x1fd   : > { %7493 = vmatpush2.bf16.msra.mxu1 %v10131_v5  ;;  %7453 = vmatprep.subr.bf16.mxu0 %v10136_v39  ;;  %v10192_v5 = vld [vmem:[%s11023_s25 + $0x1140] ss:$8 sps:$4 sm:$0xff]   ;;  %v10197_v39 = vld [vmem:[%s11023_s25 + $0x1034] ss:$8 sps:$4 sm:$0xff]  }
 0x1fe   : > { %7494 = vmatprep.subr.bf16.mxu1 %v10139_v41  ;;  %v10200_v41 = vld [vmem:[%s11023_s25 + $0x1134] ss:$8 sps:$4 sm:$0xff]  }
 0x200   : > { %7454 = vmatpush2.bf16.msra.mxu0 %v10134_v9  ;;  %v10195_v9 = vld [vmem:[%s11023_s25 + $0x1030] ss:$8 sps:$4 sm:$0xff]  }
 0x201   : > { %7495 = vmatpush2.bf16.msra.mxu1 %v10137_v10  ;;  %7455 = vmatprep.subr.bf16.mxu0 %v10142_v48  ;;  %v10198_v10 = vld [vmem:[%s11023_s25 + $0x1130] ss:$8 sps:$4 sm:$0xff]   ;;  %v10203_v48 = vld [vmem:[%s11023_s25 + $0x1024] ss:$8 sps:$4 sm:$0xff]  }
 0x202   : > { %7496 = vmatprep.subr.bf16.mxu1 %v10145_v11  ;;  %v10206_v11 = vld [vmem:[%s11023_s25 + $0x1124] ss:$8 sps:$4 sm:$0xff]  }
 0x204   : > { %7456 = vmatpush2.bf16.msra.mxu0 %v10140_v12  ;;  %v10201_v12 = vld [vmem:[%s11023_s25 + $0x1020] ss:$8 sps:$4 sm:$0xff]  }
 0x205   : > { %7497 = vmatpush2.bf16.msra.mxu1 %v10143_v13  ;;  %7457 = vmatprep.subr.bf16.mxu0 %v10148_v17  ;;  %v10204_v13 = vld [vmem:[%s11023_s25 + $0x1120] ss:$8 sps:$4 sm:$0xff]   ;;  %v10209_v17 = vld [vmem:[%s11023_s25 + $0x1014] ss:$8 sps:$4 sm:$0xff]  }
 0x206   : > { %7498 = vmatprep.subr.bf16.mxu1 %v10151_v18  ;;  %v10212_v18 = vld [vmem:[%s11023_s25 + $0x1114] ss:$8 sps:$4 sm:$0xff]  }
 0x208   : > { %7458 = vmatpush2.bf16.msra.mxu0 %v10146_v19  ;;  %v10207_v19 = vld [vmem:[%s11023_s25 + $0x1010] ss:$8 sps:$4 sm:$0xff]  }
 0x209   : > { %7499 = vmatpush2.bf16.msra.mxu1 %v10149_v20  ;;  %7459 = vmatprep.subr.bf16.mxu0 %v10154_v21  ;;  %v10210_v20 = vld [vmem:[%s11023_s25 + $0x1110] ss:$8 sps:$4 sm:$0xff]   ;;  %v10215_v21 = vld [vmem:[%s11023_s25 + $0x1004] ss:$8 sps:$4 sm:$0xff]  }
 0x20a   : > { %7500 = vmatprep.subr.bf16.mxu1 %v10157_v22  ;;  %v10218_v22 = vld [vmem:[%s11023_s25 + $0x1104] ss:$8 sps:$4 sm:$0xff]  }
 0x20c   : > { %7460 = vmatpush2.bf16.msra.mxu0 %v10152_v24  ;;  %v10216_v24 = vld [vmem:[%s11023_s25 + $0x1100] ss:$8 sps:$4 sm:$0xff]  }
 0x20d   : > { %7501 = vmatpush2.bf16.msra.mxu1 %v10155_v25  ;;  %7461 = vmatprep.subr.bf16.mxu0 %v10160_v26  ;;  %v10221_v25 = vld [vmem:[%s11023_s25 + $0x10f4] ss:$8 sps:$4 sm:$0xff]  }
 0x20e   : > { %7502 = vmatprep.subr.bf16.mxu1 %v10163_v45  ;;  %v10224_v26 = vld [vmem:[%s11023_s25 + $0x11f4] ss:$8 sps:$4 sm:$0xff]   ;;  %v10219_v45 = vld [vmem:[%s11023_s25 + $0x10f0] ss:$8 sps:$4 sm:$0xff]  }
 0x210   : > { %7462 = vmatpush2.bf16.msra.mxu0 %v10158_v27  ;;  %v10227_v27 = vld [vmem:[%s11023_s25 + $0x10e4] ss:$8 sps:$4 sm:$0xff]  }
 0x211   : > { %7503 = vmatpush2.bf16.msra.mxu1 %v10161_v28  ;;  %7463 = vmatprep.subr.bf16.mxu0 %v10166_v29  ;;  %v10230_v28 = vld [vmem:[%s11023_s25 + $0x11e4] ss:$8 sps:$4 sm:$0xff]   ;;  %v10225_v29 = vld [vmem:[%s11023_s25 + $0x10e0] ss:$8 sps:$4 sm:$0xff]  }
 0x212   : > { %7504 = vmatprep.subr.bf16.mxu1 %v10169_v31  ;;  %v10228_v31 = vld [vmem:[%s11023_s25 + $0x11e0] ss:$8 sps:$4 sm:$0xff]  }
 0x214   : > { %7464 = vmatpush2.bf16.msra.mxu0 %v10164_v4  ;;  %v10233_v4 = vld [vmem:[%s11023_s25 + $0x10d4] ss:$8 sps:$4 sm:$0xff]  }
 0x215   : > { %7505 = vmatpush2.bf16.msra.mxu1 %v10167_v34  ;;  %7515 = vmatprep.subr.bf16.mxu0 %v10173_v58  ;;  %v10236_v34 = vld [vmem:[%s11023_s25 + $0x11d4] ss:$8 sps:$4 sm:$0xff]   ;;  %v10231_v58 = vld [vmem:[%s11023_s25 + $0x10d0] ss:$8 sps:$4 sm:$0xff]  }
 0x216   : > { %7556 = vmatprep.subr.bf16.mxu1 %v10176_v35  ;;  %v10234_v35 = vld [vmem:[%s11023_s25 + $0x11d0] ss:$8 sps:$4 sm:$0xff]  }
 0x217   : > { %v7221_v55 = vpop.f32.mrf.mxu0  ;;  %7466 = vmatmul.mubr.bf16.vlgmr.msra.gmra.mxu0 %v679_v42  ;;  %v10245_v42 = vld [vmem:[%s11023_s25 + $0x10b4] ss:$8 sps:$4 sm:$0xff]  }
 0x218   : > { %v7262_v56 = vpop.f32.mrf.mxu1  ;;  %7507 = vmatmul.mubr.bf16.vlgmr.msra.gmra.mxu1 %v681_v47  ;;  %v7222_v6 = vadd.f32 %v7221_v55, %v11610_v30  ;;  %7516 = vmatpush1.bf16.msra.mxu0 %v10171_v8  ;;  %v10239_v8 = vld [vmem:[%s11023_s25 + $0x10c4] ss:$8 sps:$4 sm:$0xff]   ;;  %v10248_v47 = vld [vmem:[%s11023_s25 + $0x11b4] ss:$8 sps:$4 sm:$0xff]   ;;  %v10252_v55 = vld [vmem:[%s11023_s25 + $0x11a0] ss:$8 sps:$4 sm:$0xff]  }
 0x219   : > { %7557 = vmatpush1.bf16.msra.mxu1 %v10174_v37  ;;  %v7223_v7 = vpop.f32.mrf.mxu0  ;;  %7517 = vmatprep.subr.bf16.mxu0 %v10179_v49  ;;  %v10242_v37 = vld [vmem:[%s11023_s25 + $0x11c4] ss:$8 sps:$4 sm:$0xff]   ;;  %v10243_v49 = vld [vmem:[%s11023_s25 + $0x10b0] ss:$8 sps:$4 sm:$0xff]  }
 0x21a   : > { %v7264_v36 = vpop.f32.mrf.mxu1  ;;  %7558 = vmatprep.subr.bf16.mxu1 %v10182_v51  ;;  %v11695_v60 = vadd.f32 %v7262_v56, %v7222_v6  ;;  %v7224_v61 = vadd.f32 %v7223_v7, %v11615_v57  ;;  %7547 = vmatprep.mubr.bf16.mxu0 %v684_v53  ;;  %v10191_v57 = vld [vmem:[%s11023_s25 + $0x1044] ss:$8 sps:$4 sm:$0xff]   ;;  %v10246_v51 = vld [vmem:[%s11023_s25 + $0x11b0] ss:$8 sps:$4 sm:$0xff]   ;;  %v10257_v56 = vld [vmem:[%s11023_s25 + $0x1094] ss:$8 sps:$4 sm:$0xff]  }
 0x21b   : > { %7588 = vmatprep.mubr.bf16.mxu1 %v686_v54  ;;  %v7225_v30 = vpop.f32.mrf.mxu0  ;;  %v292_v53 = vld [vmem:[%s11018_s21 + $0x48] sm:$0xff]  ;;  %v10260_v6 = vld [vmem:[%s11023_s25 + $0x1194] ss:$8 sps:$4 sm:$0xff]  }
 0x21c   : > { %v7266_v0 = vpop.f32.mrf.mxu1  ;;  %v11700_v15 = vadd.f32 %v7264_v36, %v7224_v61  ;;  %7518 = vmatpush1.bf16.msra.mxu0 %v10177_v14  ;;  %v10251_v14 = vld [vmem:[%s11023_s25 + $0x10a4] ss:$8 sps:$4 sm:$0xff]   ;;  %v10249_v54 = vld [vmem:[%s11023_s25 + $0x10a0] ss:$8 sps:$4 sm:$0xff]   ;;  %v468_v7 = vcombine.high %v292_v53, %v292_v53  ;;  %v10255_v36 = vld [vmem:[%s11023_s25 + $0x1090] ss:$8 sps:$4 sm:$0xff]  }
 0x21d   : > { %7559 = vmatpush1.bf16.msra.mxu1 %v10180_v52  ;;  %v7226_v16 = vpop.f32.mrf.mxu0  ;;  %7519 = vmatprep.subr.bf16.mxu0 %v10185_v59  ;;  %v10254_v52 = vld [vmem:[%s11023_s25 + $0x11a4] ss:$8 sps:$4 sm:$0xff]   ;;  %v10258_v59 = vld [vmem:[%s11023_s25 + $0x1190] ss:$8 sps:$4 sm:$0xff]   ;;  %v10261_v30 = vld [vmem:[%s11023_s25 + $0x1080] ss:$8 sps:$4 sm:$0xff]  }
 0x21e   : > { %v7267_v1 = vpop.f32.mrf.mxu1  ;;  %7560 = vmatprep.subr.bf16.mxu1 %v10188_v40  ;;  %v10263_v40 = vld [vmem:[%s11023_s25 + $0x1084] ss:$8 sps:$4 sm:$0xff]   ;;  %v10264_v0 = vld [vmem:[%s11023_s25 + $0x1180] ss:$8 sps:$4 sm:$0xff]   ;;  %v10270_v16 = vld [vmem:[%s11023_s25 + $0x1274] ss:$8 sps:$4 sm:$0xff]  }
 0x21f   : > { %v10266_v61 = vld [vmem:[%s11023_s25 + $0x1184] ss:$8 sps:$4 sm:$0xff]   ;;  %v10273_v1 = vld [vmem:[%s11023_s25 + $0x1374] ss:$8 sps:$4 sm:$0xff]  }
 0x220   : > { %7520 = vmatpush1.bf16.msra.mxu0 %v10183_v62  ;;  %v11754_v62 = vrot.slane %v292_v53, %v11073_v50  ;;  %v10310_v53 = vld [vmem:[%s11023_s25 + $0x1200] ss:$8 sps:$4 sm:$0xff]  }
 0x221   : > { %7561 = vmatpush1.bf16.msra.mxu1 %v10186_v63  ;;  %7521 = vmatprep.subr.bf16.mxu0 %v10191_v57  ;;  %v11757_v63 = vrot.slane %v468_v7, %v11073_v50  ;;  %v10268_v57 = vld [vmem:[%s11023_s25 + $0x1270] ss:$8 sps:$4 sm:$0xff]  }
 0x222   : > { %7562 = vmatprep.subr.bf16.mxu1 %v10194_v2  ;;  %v10271_v2 = vld [vmem:[%s11023_s25 + $0x1370] ss:$8 sps:$4 sm:$0xff]  }
 0x223   : > { %v10319_v7 = vld [vmem:[%s11023_s25 + $0x13f0] ss:$8 sps:$4 sm:$0xff]  }
 0x224   : > { %7522 = vmatpush1.bf16.msra.mxu0 %v10189_v3  ;;  %v483_v3 = vcombine.high %v11754_v62, %v11754_v62 }
 0x225   : > { %7563 = vmatpush1.bf16.msra.mxu1 %v10192_v5  ;;  %7523 = vmatprep.subr.bf16.mxu0 %v10197_v39  ;;  %v484_v5 = vcombine.high %v11757_v63, %v11757_v63  ;;  %v683_v39 = vpack.c.bf16 %v11669_v32, %v11669_v32 }
 0x226   : > { %7564 = vmatprep.subr.bf16.mxu1 %v10200_v41  ;;  %v685_v41 = vpack.c.bf16 %v11672_v33, %v11672_v33 }
 0x228   : > { %7524 = vmatpush1.bf16.msra.mxu0 %v10195_v9  ;;  %v10276_v9 = vld [vmem:[%s11023_s25 + $0x1264] ss:$8 sps:$4 sm:$0xff]  }
 0x229   : > { %7565 = vmatpush1.bf16.msra.mxu1 %v10198_v10  ;;  %7525 = vmatprep.subr.bf16.mxu0 %v10203_v48  ;;  %v10279_v10 = vld [vmem:[%s11023_s25 + $0x1364] ss:$8 sps:$4 sm:$0xff]   ;;  %v10274_v48 = vld [vmem:[%s11023_s25 + $0x1260] ss:$8 sps:$4 sm:$0xff]  }
 0x22a   : > { %7566 = vmatprep.subr.bf16.mxu1 %v10206_v11  ;;  %v10277_v11 = vld [vmem:[%s11023_s25 + $0x1360] ss:$8 sps:$4 sm:$0xff]  }
 0x22c   : > { %7526 = vmatpush1.bf16.msra.mxu0 %v10201_v12  ;;  %v688_v12 = vpack.c.bf16 %v483_v3, %v483_v3  ;;  %v10334_v3 = vld [vmem:[%s11023_s25 + $0x12c0] ss:$8 sps:$4 sm:$0xff]  }
 0x22d   : > { %7567 = vmatpush1.bf16.msra.mxu1 %v10204_v13  ;;  %7527 = vmatprep.subr.bf16.mxu0 %v10209_v17  ;;  %v690_v13 = vpack.c.bf16 %v484_v5, %v484_v5  ;;  %v10337_v5 = vld [vmem:[%s11023_s25 + $0x13c0] ss:$8 sps:$4 sm:$0xff]  }
 0x22e   : > { %7568 = vmatprep.subr.bf16.mxu1 %v10212_v18 }
 0x230   : > { %7528 = vmatpush1.bf16.msra.mxu0 %v10207_v19 }
 0x231   : > { %7569 = vmatpush1.bf16.msra.mxu1 %v10210_v20  ;;  %7529 = vmatprep.subr.bf16.mxu0 %v10215_v21  ;;  %v10282_v20 = vld [vmem:[%s11023_s25 + $0x1254] ss:$8 sps:$4 sm:$0xff]  }
 0x232   : > { %7570 = vmatprep.subr.bf16.mxu1 %v10218_v22  ;;  %v10285_v21 = vld [vmem:[%s11023_s25 + $0x1354] ss:$8 sps:$4 sm:$0xff]  }
 0x234   : > { %7530 = vmatpush1.bf16.msra.mxu0 %v10213_v23 }
 0x235   : > { %7571 = vmatpush1.bf16.msra.mxu1 %v10216_v24  ;;  %7531 = vmatprep.subr.bf16.mxu0 %v10221_v25 }
 0x236   : > { %7572 = vmatprep.subr.bf16.mxu1 %v10224_v26  ;;  %v10280_v26 = vld [vmem:[%s11023_s25 + $0x1250] ss:$8 sps:$4 sm:$0xff]  }
 0x238   : > { %7532 = vmatpush2.bf16.msra.mxu0 %v10219_v45  ;;  %v10283_v45 = vld [vmem:[%s11023_s25 + $0x1350] ss:$8 sps:$4 sm:$0xff]  }
 0x239   : > { %7573 = vmatpush2.bf16.msra.mxu1 %v10222_v46  ;;  %7533 = vmatprep.subr.bf16.mxu0 %v10227_v27 }
 0x23a   : > { %7574 = vmatprep.subr.bf16.mxu1 %v10230_v28  ;;  %v10291_v28 = vld [vmem:[%s11023_s25 + $0x1344] ss:$8 sps:$4 sm:$0xff]  }
 0x23c   : > { %7534 = vmatpush2.bf16.msra.mxu0 %v10225_v29  ;;  %v10286_v29 = vld [vmem:[%s11023_s25 + $0x1240] ss:$8 sps:$4 sm:$0xff]  }
 0x23d   : > { %7575 = vmatpush2.bf16.msra.mxu1 %v10228_v31  ;;  %7535 = vmatprep.subr.bf16.mxu0 %v10233_v4  ;;  %v10289_v31 = vld [vmem:[%s11023_s25 + $0x1340] ss:$8 sps:$4 sm:$0xff]   ;;  %v10294_v4 = vld [vmem:[%s11023_s25 + $0x1234] ss:$8 sps:$4 sm:$0xff]  }
 0x23e   : > { %7576 = vmatprep.subr.bf16.mxu1 %v10236_v34  ;;  %v10297_v34 = vld [vmem:[%s11023_s25 + $0x1334] ss:$8 sps:$4 sm:$0xff]  }
 0x240   : > { %7536 = vmatpush2.bf16.msra.mxu0 %v10231_v58  ;;  %v10292_v58 = vld [vmem:[%s11023_s25 + $0x1230] ss:$8 sps:$4 sm:$0xff]  }
 0x241   : > { %7577 = vmatpush2.bf16.msra.mxu1 %v10234_v35  ;;  %7537 = vmatprep.subr.bf16.mxu0 %v10239_v8  ;;  %v10295_v35 = vld [vmem:[%s11023_s25 + $0x1330] ss:$8 sps:$4 sm:$0xff]   ;;  %v10300_v8 = vld [vmem:[%s11023_s25 + $0x1224] ss:$8 sps:$4 sm:$0xff]  }
 0x242   : > { %7578 = vmatprep.subr.bf16.mxu1 %v10242_v37  ;;  %v10303_v37 = vld [vmem:[%s11023_s25 + $0x1324] ss:$8 sps:$4 sm:$0xff]  }
 0x244   : > { %7538 = vmatpush2.bf16.msra.mxu0 %v10237_v38  ;;  %v10298_v38 = vld [vmem:[%s11023_s25 + $0x1220] ss:$8 sps:$4 sm:$0xff]  }
 0x245   : > { %7579 = vmatpush2.bf16.msra.mxu1 %v10240_v43  ;;  %7539 = vmatprep.subr.bf16.mxu0 %v10245_v42  ;;  %v10301_v43 = vld [vmem:[%s11023_s25 + $0x1320] ss:$8 sps:$4 sm:$0xff]   ;;  %v10306_v42 = vld [vmem:[%s11023_s25 + $0x1214] ss:$8 sps:$4 sm:$0xff]  }
 0x246   : > { %7580 = vmatprep.subr.bf16.mxu1 %v10248_v47  ;;  %v10309_v47 = vld [vmem:[%s11023_s25 + $0x1314] ss:$8 sps:$4 sm:$0xff]  }
 0x248   : > { %7540 = vmatpush2.bf16.msra.mxu0 %v10243_v49  ;;  %v10304_v49 = vld [vmem:[%s11023_s25 + $0x1210] ss:$8 sps:$4 sm:$0xff]  }
 0x249   : > { %7581 = vmatpush2.bf16.msra.mxu1 %v10246_v51  ;;  %7541 = vmatprep.subr.bf16.mxu0 %v10251_v14  ;;  %v10307_v51 = vld [vmem:[%s11023_s25 + $0x1310] ss:$8 sps:$4 sm:$0xff]   ;;  %v10312_v14 = vld [vmem:[%s11023_s25 + $0x1204] ss:$8 sps:$4 sm:$0xff]  }
 0x24a   : > { %7582 = vmatprep.subr.bf16.mxu1 %v10254_v52  ;;  %v10315_v52 = vld [vmem:[%s11023_s25 + $0x1304] ss:$8 sps:$4 sm:$0xff]  }
 0x24c   : > { %7542 = vmatpush2.bf16.msra.mxu0 %v10249_v54  ;;  %v10313_v54 = vld [vmem:[%s11023_s25 + $0x1300] ss:$8 sps:$4 sm:$0xff]  }
 0x24d   : > { %7583 = vmatpush2.bf16.msra.mxu1 %v10252_v55  ;;  %7543 = vmatprep.subr.bf16.mxu0 %v10257_v56  ;;  %v10318_v55 = vld [vmem:[%s11023_s25 + $0x12f4] ss:$8 sps:$4 sm:$0xff]  }
 0x24e   : > { %7584 = vmatprep.subr.bf16.mxu1 %v10260_v6  ;;  %v10321_v56 = vld [vmem:[%s11023_s25 + $0x13f4] ss:$8 sps:$4 sm:$0xff]   ;;  %v10316_v6 = vld [vmem:[%s11023_s25 + $0x12f0] ss:$8 sps:$4 sm:$0xff]  }
 0x250   : > { %7544 = vmatpush2.bf16.msra.mxu0 %v10255_v36  ;;  %v10324_v36 = vld [vmem:[%s11023_s25 + $0x12e4] ss:$8 sps:$4 sm:$0xff]  }
 0x251   : > { %7585 = vmatpush2.bf16.msra.mxu1 %v10258_v59  ;;  %7545 = vmatprep.subr.bf16.mxu0 %v10263_v40  ;;  %v10327_v59 = vld [vmem:[%s11023_s25 + $0x13e4] ss:$8 sps:$4 sm:$0xff]   ;;  %v10322_v40 = vld [vmem:[%s11023_s25 + $0x12e0] ss:$8 sps:$4 sm:$0xff]  }
 0x252   : > { %7586 = vmatprep.subr.bf16.mxu1 %v10266_v61  ;;  %v10325_v61 = vld [vmem:[%s11023_s25 + $0x13e0] ss:$8 sps:$4 sm:$0xff]  }
 0x254   : > { %7546 = vmatpush2.bf16.msra.mxu0 %v10261_v30  ;;  %v10330_v30 = vld [vmem:[%s11023_s25 + $0x12d4] ss:$8 sps:$4 sm:$0xff]  }
 0x255   : > { %7587 = vmatpush2.bf16.msra.mxu1 %v10264_v0  ;;  %7597 = vmatprep.subr.bf16.mxu0 %v10270_v16  ;;  %v10333_v0 = vld [vmem:[%s11023_s25 + $0x13d4] ss:$8 sps:$4 sm:$0xff]   ;;  %v10328_v16 = vld [vmem:[%s11023_s25 + $0x12d0] ss:$8 sps:$4 sm:$0xff]  }
 0x256   : > { %7638 = vmatprep.subr.bf16.mxu1 %v10273_v1  ;;  %v10331_v1 = vld [vmem:[%s11023_s25 + $0x13d0] ss:$8 sps:$4 sm:$0xff]  }
 0x257   : > { %v7303_v17 = vpop.f32.mrf.mxu0  ;;  %7548 = vmatmul.mubr.bf16.vlgmr.msra.gmra.mxu0 %v683_v39  ;;  %v10342_v39 = vld [vmem:[%s11023_s25 + $0x12b4] ss:$8 sps:$4 sm:$0xff]  }
 0x258   : > { %v7344_v18 = vpop.f32.mrf.mxu1  ;;  %7589 = vmatmul.mubr.bf16.vlgmr.msra.gmra.mxu1 %v685_v41  ;;  %v7304_v32 = vadd.f32 %v7303_v17, %v11695_v60  ;;  %7598 = vmatpush1.bf16.msra.mxu0 %v10268_v57  ;;  %v10336_v57 = vld [vmem:[%s11023_s25 + $0x12c4] ss:$8 sps:$4 sm:$0xff]   ;;  %v10345_v41 = vld [vmem:[%s11023_s25 + $0x13b4] ss:$8 sps:$4 sm:$0xff]   ;;  %v10349_v17 = vld [vmem:[%s11023_s25 + $0x13a0] ss:$8 sps:$4 sm:$0xff]  }
 0x259   : > { %7639 = vmatpush1.bf16.msra.mxu1 %v10271_v2  ;;  %v7305_v33 = vpop.f32.mrf.mxu0  ;;  %7599 = vmatprep.subr.bf16.mxu0 %v10276_v9  ;;  %v10339_v2 = vld [vmem:[%s11023_s25 + $0x13c4] ss:$8 sps:$4 sm:$0xff]   ;;  %v10340_v9 = vld [vmem:[%s11023_s25 + $0x12b0] ss:$8 sps:$4 sm:$0xff]  }
 0x25a   : > { %v7346_v19 = vpop.f32.mrf.mxu1  ;;  %7640 = vmatprep.subr.bf16.mxu1 %v10279_v10  ;;  %v11780_v22 = vadd.f32 %v7344_v18, %v7304_v32  ;;  %v7306_v23 = vadd.f32 %v7305_v33, %v11700_v15  ;;  %7629 = vmatprep.mubr.bf16.mxu0 %v688_v12  ;;  %v10288_v15 = vld [vmem:[%s11023_s25 + $0x1244] ss:$8 sps:$4 sm:$0xff]   ;;  %v10343_v10 = vld [vmem:[%s11023_s25 + $0x13b0] ss:$8 sps:$4 sm:$0xff]   ;;  %v10354_v18 = vld [vmem:[%s11023_s25 + $0x1294] ss:$8 sps:$4 sm:$0xff]  }
 0x25b   : > { %7670 = vmatprep.mubr.bf16.mxu1 %v690_v13  ;;  %v7307_v60 = vpop.f32.mrf.mxu0  ;;  %v293_v12 = vld [vmem:[%s11018_s21 + $0x50] sm:$0xff]  ;;  %v10346_v13 = vld [vmem:[%s11023_s25 + $0x12a0] ss:$8 sps:$4 sm:$0xff]  }
 0x25c   : > { %v7348_v24 = vpop.f32.mrf.mxu1  ;;  %v11783_v25 = vadd.f32 %v7346_v19, %v7306_v23  ;;  %7600 = vmatpush1.bf16.msra.mxu0 %v10274_v48  ;;  %v10348_v48 = vld [vmem:[%s11023_s25 + $0x12a4] ss:$8 sps:$4 sm:$0xff]   ;;  %v10357_v32 = vld [vmem:[%s11023_s25 + $0x1394] ss:$8 sps:$4 sm:$0xff]   ;;  %v485_v33 = vcombine.high %v293_v12, %v293_v12  ;;  %v10352_v19 = vld [vmem:[%s11023_s25 + $0x1290] ss:$8 sps:$4 sm:$0xff]   ;;  %v11839_v60 = vrot.slane %v293_v12, %v11073_v50 }
 0x25d   : > { %7641 = vmatpush1.bf16.msra.mxu1 %v10277_v11  ;;  %v7308_v46 = vpop.f32.mrf.mxu0  ;;  %7601 = vmatprep.subr.bf16.mxu0 %v10282_v20  ;;  %v10351_v11 = vld [vmem:[%s11023_s25 + $0x13a4] ss:$8 sps:$4 sm:$0xff]   ;;  %v10355_v20 = vld [vmem:[%s11023_s25 + $0x1390] ss:$8 sps:$4 sm:$0xff]   ;;  %v10407_v12 = vld [vmem:[%s11023_s25 + $0x1400] ss:$8 sps:$4 sm:$0xff]  }
 0x25e   : > { %v7349_v27 = vpop.f32.mrf.mxu1  ;;  %7642 = vmatprep.subr.bf16.mxu1 %v10285_v21  ;;  %v10360_v21 = vld [vmem:[%s11023_s25 + $0x1284] ss:$8 sps:$4 sm:$0xff]   ;;  %v11842_v24 = vrot.slane %v485_v33, %v11073_v50  ;;  %v10367_v46 = vld [vmem:[%s11023_s25 + $0x1474] ss:$8 sps:$4 sm:$0xff]   ;;  %v10416_v33 = vld [vmem:[%s11023_s25 + $0x15f0] ss:$8 sps:$4 sm:$0xff]  }
 0x25f   : > { %v10363_v23 = vld [vmem:[%s11023_s25 + $0x1384] ss:$8 sps:$4 sm:$0xff]   ;;  %v10370_v27 = vld [vmem:[%s11023_s25 + $0x1574] ss:$8 sps:$4 sm:$0xff]  }
 0x260   : > { %7602 = vmatpush1.bf16.msra.mxu0 %v10280_v26  ;;  %v10358_v26 = vld [vmem:[%s11023_s25 + $0x1280] ss:$8 sps:$4 sm:$0xff]  }
 0x261   : > { %7643 = vmatpush1.bf16.msra.mxu1 %v10283_v45  ;;  %7603 = vmatprep.subr.bf16.mxu0 %v10288_v15  ;;  %v10361_v45 = vld [vmem:[%s11023_s25 + $0x1380] ss:$8 sps:$4 sm:$0xff]   ;;  %v500_v15 = vcombine.high %v11839_v60, %v11839_v60 }
 0x262   : > { %7644 = vmatprep.subr.bf16.mxu1 %v10291_v28  ;;  %v501_v28 = vcombine.high %v11842_v24, %v11842_v24 }
 0x264   : > { %7604 = vmatpush1.bf16.msra.mxu0 %v10286_v29  ;;  %v687_v29 = vpack.c.bf16 %v11754_v62, %v11754_v62 }
 0x265   : > { %7645 = vmatpush1.bf16.msra.mxu1 %v10289_v31  ;;  %7605 = vmatprep.subr.bf16.mxu0 %v10294_v4  ;;  %v689_v31 = vpack.c.bf16 %v11757_v63, %v11757_v63  ;;  %v10365_v4 = vld [vmem:[%s11023_s25 + $0x1470] ss:$8 sps:$4 sm:$0xff]   ;;  %v10371_v63 = vld [vmem:[%s11023_s25 + $0x1460] ss:$8 sps:$4 sm:$0xff]  }
 0x266   : > { %7646 = vmatprep.subr.bf16.mxu1 %v10297_v34  ;;  %v10368_v34 = vld [vmem:[%s11023_s25 + $0x1570] ss:$8 sps:$4 sm:$0xff]  }
 0x268   : > { %7606 = vmatpush1.bf16.msra.mxu0 %v10292_v58  ;;  %v10373_v58 = vld [vmem:[%s11023_s25 + $0x1464] ss:$8 sps:$4 sm:$0xff]  }
 0x269   : > { %7647 = vmatpush1.bf16.msra.mxu1 %v10295_v35  ;;  %7607 = vmatprep.subr.bf16.mxu0 %v10300_v8  ;;  %v10376_v35 = vld [vmem:[%s11023_s25 + $0x1564] ss:$8 sps:$4 sm:$0xff]   ;;  %v692_v8 = vpack.c.bf16 %v500_v15, %v500_v15 }
 0x26a   : > { %7648 = vmatprep.subr.bf16.mxu1 %v10303_v37  ;;  %v694_v37 = vpack.c.bf16 %v501_v28, %v501_v28  ;;  %v10433_v15 = vld [vmem:[%s11023_s25 + $0x14c4] ss:$8 sps:$4 sm:$0xff]  }
 0x26b   : > { %v10436_v28 = vld [vmem:[%s11023_s25 + $0x15c4] ss:$8 sps:$4 sm:$0xff]  }
 0x26c   : > { %7608 = vmatpush1.bf16.msra.mxu0 %v10298_v38 }
 0x26d   : > { %7649 = vmatpush1.bf16.msra.mxu1 %v10301_v43  ;;  %7609 = vmatprep.subr.bf16.mxu0 %v10306_v42  ;;  %v10374_v42 = vld [vmem:[%s11023_s25 + $0x1560] ss:$8 sps:$4 sm:$0xff]  }
 0x26e   : > { %7650 = vmatprep.subr.bf16.mxu1 %v10309_v47 }
 0x270   : > { %7610 = vmatpush1.bf16.msra.mxu0 %v10304_v49 }
 0x271   : > { %7651 = vmatpush1.bf16.msra.mxu1 %v10307_v51  ;;  %7611 = vmatprep.subr.bf16.mxu0 %v10312_v14  ;;  %v10379_v51 = vld [vmem:[%s11023_s25 + $0x1454] ss:$8 sps:$4 sm:$0xff]  }
 0x272   : > { %7652 = vmatprep.subr.bf16.mxu1 %v10315_v52  ;;  %v10382_v14 = vld [vmem:[%s11023_s25 + $0x1554] ss:$8 sps:$4 sm:$0xff]  }
 0x274   : > { %7612 = vmatpush1.bf16.msra.mxu0 %v10310_v53 }
 0x275   : > { %7653 = vmatpush1.bf16.msra.mxu1 %v10313_v54  ;;  %7613 = vmatprep.subr.bf16.mxu0 %v10318_v55 }
 0x276   : > { %7654 = vmatprep.subr.bf16.mxu1 %v10321_v56  ;;  %v10377_v56 = vld [vmem:[%s11023_s25 + $0x1450] ss:$8 sps:$4 sm:$0xff]  }
 0x278   : > { %7614 = vmatpush2.bf16.msra.mxu0 %v10316_v6  ;;  %v10380_v6 = vld [vmem:[%s11023_s25 + $0x1550] ss:$8 sps:$4 sm:$0xff]  }
 0x279   : > { %7655 = vmatpush2.bf16.msra.mxu1 %v10319_v7  ;;  %7615 = vmatprep.subr.bf16.mxu0 %v10324_v36 }
 0x27a   : > { %7656 = vmatprep.subr.bf16.mxu1 %v10327_v59  ;;  %v10388_v59 = vld [vmem:[%s11023_s25 + $0x1544] ss:$8 sps:$4 sm:$0xff]  }
 0x27c   : > { %7616 = vmatpush2.bf16.msra.mxu0 %v10322_v40  ;;  %v10383_v40 = vld [vmem:[%s11023_s25 + $0x1440] ss:$8 sps:$4 sm:$0xff]  }
 0x27d   : > { %7657 = vmatpush2.bf16.msra.mxu1 %v10325_v61  ;;  %7617 = vmatprep.subr.bf16.mxu0 %v10330_v30  ;;  %v10386_v61 = vld [vmem:[%s11023_s25 + $0x1540] ss:$8 sps:$4 sm:$0xff]   ;;  %v10391_v30 = vld [vmem:[%s11023_s25 + $0x1434] ss:$8 sps:$4 sm:$0xff]  }
 0x27e   : > { %7658 = vmatprep.subr.bf16.mxu1 %v10333_v0  ;;  %v10394_v0 = vld [vmem:[%s11023_s25 + $0x1534] ss:$8 sps:$4 sm:$0xff]  }
 0x280   : > { %7618 = vmatpush2.bf16.msra.mxu0 %v10328_v16  ;;  %v10389_v16 = vld [vmem:[%s11023_s25 + $0x1430] ss:$8 sps:$4 sm:$0xff]  }
 0x281   : > { %7659 = vmatpush2.bf16.msra.mxu1 %v10331_v1  ;;  %7619 = vmatprep.subr.bf16.mxu0 %v10336_v57  ;;  %v10392_v1 = vld [vmem:[%s11023_s25 + $0x1530] ss:$8 sps:$4 sm:$0xff]   ;;  %v10397_v57 = vld [vmem:[%s11023_s25 + $0x1424] ss:$8 sps:$4 sm:$0xff]  }
 0x282   : > { %7660 = vmatprep.subr.bf16.mxu1 %v10339_v2  ;;  %v10400_v2 = vld [vmem:[%s11023_s25 + $0x1524] ss:$8 sps:$4 sm:$0xff]  }
 0x284   : > { %7620 = vmatpush2.bf16.msra.mxu0 %v10334_v3  ;;  %v10395_v3 = vld [vmem:[%s11023_s25 + $0x1420] ss:$8 sps:$4 sm:$0xff]  }
 0x285   : > { %7661 = vmatpush2.bf16.msra.mxu1 %v10337_v5  ;;  %7621 = vmatprep.subr.bf16.mxu0 %v10342_v39  ;;  %v10398_v5 = vld [vmem:[%s11023_s25 + $0x1520] ss:$8 sps:$4 sm:$0xff]   ;;  %v10403_v39 = vld [vmem:[%s11023_s25 + $0x1414] ss:$8 sps:$4 sm:$0xff]  }
 0x286   : > { %7662 = vmatprep.subr.bf16.mxu1 %v10345_v41  ;;  %v10406_v41 = vld [vmem:[%s11023_s25 + $0x1514] ss:$8 sps:$4 sm:$0xff]  }
 0x288   : > { %7622 = vmatpush2.bf16.msra.mxu0 %v10340_v9  ;;  %v10401_v9 = vld [vmem:[%s11023_s25 + $0x1410] ss:$8 sps:$4 sm:$0xff]  }
 0x289   : > { %7663 = vmatpush2.bf16.msra.mxu1 %v10343_v10  ;;  %7623 = vmatprep.subr.bf16.mxu0 %v10348_v48  ;;  %v10404_v10 = vld [vmem:[%s11023_s25 + $0x1510] ss:$8 sps:$4 sm:$0xff]   ;;  %v10409_v48 = vld [vmem:[%s11023_s25 + $0x1404] ss:$8 sps:$4 sm:$0xff]  }
 0x28a   : > { %7664 = vmatprep.subr.bf16.mxu1 %v10351_v11  ;;  %v10412_v11 = vld [vmem:[%s11023_s25 + $0x1504] ss:$8 sps:$4 sm:$0xff]  }
 0x28c   : > { %7624 = vmatpush2.bf16.msra.mxu0 %v10346_v13  ;;  %v10410_v13 = vld [vmem:[%s11023_s25 + $0x1500] ss:$8 sps:$4 sm:$0xff]  }
 0x28d   : > { %7665 = vmatpush2.bf16.msra.mxu1 %v10349_v17  ;;  %7625 = vmatprep.subr.bf16.mxu0 %v10354_v18  ;;  %v10415_v17 = vld [vmem:[%s11023_s25 + $0x14f4] ss:$8 sps:$4 sm:$0xff]  }
 0x28e   : > { %7666 = vmatprep.subr.bf16.mxu1 %v10357_v32  ;;  %v10418_v18 = vld [vmem:[%s11023_s25 + $0x15f4] ss:$8 sps:$4 sm:$0xff]   ;;  %v10413_v32 = vld [vmem:[%s11023_s25 + $0x14f0] ss:$8 sps:$4 sm:$0xff]  }
 0x290   : > { %7626 = vmatpush2.bf16.msra.mxu0 %v10352_v19  ;;  %v10421_v19 = vld [vmem:[%s11023_s25 + $0x14e4] ss:$8 sps:$4 sm:$0xff]  }
 0x291   : > { %7667 = vmatpush2.bf16.msra.mxu1 %v10355_v20  ;;  %7627 = vmatprep.subr.bf16.mxu0 %v10360_v21  ;;  %v10424_v20 = vld [vmem:[%s11023_s25 + $0x15e4] ss:$8 sps:$4 sm:$0xff]   ;;  %v10419_v21 = vld [vmem:[%s11023_s25 + $0x14e0] ss:$8 sps:$4 sm:$0xff]  }
 0x292   : > { %7668 = vmatprep.subr.bf16.mxu1 %v10363_v23  ;;  %v10422_v23 = vld [vmem:[%s11023_s25 + $0x15e0] ss:$8 sps:$4 sm:$0xff]  }
 0x294   : > { %7628 = vmatpush2.bf16.msra.mxu0 %v10358_v26  ;;  %v10427_v26 = vld [vmem:[%s11023_s25 + $0x14d4] ss:$8 sps:$4 sm:$0xff]  }
 0x295   : > { %7669 = vmatpush2.bf16.msra.mxu1 %v10361_v45  ;;  %7679 = vmatprep.subr.bf16.mxu0 %v10367_v46  ;;  %v10430_v45 = vld [vmem:[%s11023_s25 + $0x15d4] ss:$8 sps:$4 sm:$0xff]   ;;  %v10425_v46 = vld [vmem:[%s11023_s25 + $0x14d0] ss:$8 sps:$4 sm:$0xff]  }
 0x296   : > { %7720 = vmatprep.subr.bf16.mxu1 %v10370_v27  ;;  %v10428_v27 = vld [vmem:[%s11023_s25 + $0x15d0] ss:$8 sps:$4 sm:$0xff]  }
 0x297   : > { %v7385_v38 = vpop.f32.mrf.mxu0  ;;  %7630 = vmatmul.mubr.bf16.vlgmr.msra.gmra.mxu0 %v687_v29  ;;  %v10431_v29 = vld [vmem:[%s11023_s25 + $0x14c0] ss:$8 sps:$4 sm:$0xff]  }
 0x298   : > { %v7426_v43 = vpop.f32.mrf.mxu1  ;;  %7671 = vmatmul.mubr.bf16.vlgmr.msra.gmra.mxu1 %v689_v31  ;;  %v7386_v62 = vadd.f32 %v7385_v38, %v11780_v22  ;;  %7680 = vmatpush1.bf16.msra.mxu0 %v10365_v4  ;;  %v10434_v31 = vld [vmem:[%s11023_s25 + $0x15c0] ss:$8 sps:$4 sm:$0xff]   ;;  %v10439_v4 = vld [vmem:[%s11023_s25 + $0x14b4] ss:$8 sps:$4 sm:$0xff]  }
 0x299   : > { %7721 = vmatpush1.bf16.msra.mxu1 %v10368_v34  ;;  %v7387_v47 = vpop.f32.mrf.mxu0  ;;  %7681 = vmatprep.subr.bf16.mxu0 %v10373_v58  ;;  %v10442_v34 = vld [vmem:[%s11023_s25 + $0x15b4] ss:$8 sps:$4 sm:$0xff]   ;;  %v10437_v58 = vld [vmem:[%s11023_s25 + $0x14b0] ss:$8 sps:$4 sm:$0xff]  }
 0x29a   : > { %v7428_v49 = vpop.f32.mrf.mxu1  ;;  %7722 = vmatprep.subr.bf16.mxu1 %v10376_v35  ;;  %v11865_v52 = vadd.f32 %v7426_v43, %v7386_v62  ;;  %v7388_v53 = vadd.f32 %v7387_v47, %v11783_v25  ;;  %7711 = vmatprep.mubr.bf16.mxu0 %v692_v8  ;;  %v10385_v25 = vld [vmem:[%s11023_s25 + $0x1444] ss:$8 sps:$4 sm:$0xff]   ;;  %v10440_v35 = vld [vmem:[%s11023_s25 + $0x15b0] ss:$8 sps:$4 sm:$0xff]   ;;  %v10443_v43 = vld [vmem:[%s11023_s25 + $0x14a0] ss:$8 sps:$4 sm:$0xff]  }
 0x29b   : > { %7752 = vmatprep.mubr.bf16.mxu1 %v694_v37  ;;  %v7389_v22 = vpop.f32.mrf.mxu0  ;;  %v10445_v8 = vld [vmem:[%s11023_s25 + $0x14a4] ss:$8 sps:$4 sm:$0xff]   ;;  %v294_v38 = vld [vmem:[%s11018_s21 + $0x58] sm:$0xff]  ;;  %v10446_v62 = vld [vmem:[%s11023_s25 + $0x15a0] ss:$8 sps:$4 sm:$0xff]  }
 0x29c   : > { %v7430_v54 = vpop.f32.mrf.mxu1  ;;  %v11868_v55 = vadd.f32 %v7428_v49, %v7388_v53  ;;  %7682 = vmatpush1.bf16.msra.mxu0 %v10371_v63  ;;  %v10448_v37 = vld [vmem:[%s11023_s25 + $0x15a4] ss:$8 sps:$4 sm:$0xff]   ;;  %v10451_v63 = vld [vmem:[%s11023_s25 + $0x1494] ss:$8 sps:$4 sm:$0xff]   ;;  %v502_v47 = vcombine.high %v294_v38, %v294_v38  ;;  %v10449_v49 = vld [vmem:[%s11023_s25 + $0x1490] ss:$8 sps:$4 sm:$0xff]   ;;  %v11924_v22 = vrot.slane %v294_v38, %v11073_v50 }
 0x29d   : > { %7723 = vmatpush1.bf16.msra.mxu1 %v10374_v42  ;;  %v7390_v7 = vpop.f32.mrf.mxu0  ;;  %7683 = vmatprep.subr.bf16.mxu0 %v10379_v51  ;;  %v10454_v42 = vld [vmem:[%s11023_s25 + $0x1594] ss:$8 sps:$4 sm:$0xff]   ;;  %v10452_v51 = vld [vmem:[%s11023_s25 + $0x1590] ss:$8 sps:$4 sm:$0xff]   ;;  %v10460_v53 = vld [vmem:[%s11023_s25 + $0x1584] ss:$8 sps:$4 sm:$0xff]  }
 0x29e   : > { %v7431_v36 = vpop.f32.mrf.mxu1  ;;  %7724 = vmatprep.subr.bf16.mxu1 %v10382_v14  ;;  %v10457_v14 = vld [vmem:[%s11023_s25 + $0x1484] ss:$8 sps:$4 sm:$0xff]   ;;  %v11927_v54 = vrot.slane %v502_v47, %v11073_v50  ;;  %v10464_v7 = vld [vmem:[%s11023_s25 + $0x1674] ss:$8 sps:$4 sm:$0xff]   ;;  %v10504_v38 = vld [vmem:[%s11023_s25 + $0x1600] ss:$8 sps:$4 sm:$0xff]  }
 0x29f   : > { %v10467_v36 = vld [vmem:[%s11023_s25 + $0x1774] ss:$8 sps:$4 sm:$0xff]   ;;  %v10513_v47 = vld [vmem:[%s11023_s25 + $0x17f0] ss:$8 sps:$4 sm:$0xff]  }
 0x2a0   : > { %7684 = vmatpush1.bf16.msra.mxu0 %v10377_v56  ;;  %v10455_v56 = vld [vmem:[%s11023_s25 + $0x1480] ss:$8 sps:$4 sm:$0xff]  }
 0x2a1   : > { %7725 = vmatpush1.bf16.msra.mxu1 %v10380_v6  ;;  %7685 = vmatprep.subr.bf16.mxu0 %v10385_v25  ;;  %v10458_v6 = vld [vmem:[%s11023_s25 + $0x1580] ss:$8 sps:$4 sm:$0xff]   ;;  %v517_v25 = vcombine.high %v11924_v22, %v11924_v22 }
 0x2a2   : > { %7726 = vmatprep.subr.bf16.mxu1 %v10388_v59  ;;  %v518_v59 = vcombine.high %v11927_v54, %v11927_v54 }
 0x2a4   : > { %7686 = vmatpush1.bf16.msra.mxu0 %v10383_v40  ;;  %v691_v40 = vpack.c.bf16 %v11839_v60, %v11839_v60 }
 0x2a5   : > { %7727 = vmatpush1.bf16.msra.mxu1 %v10386_v61  ;;  %7687 = vmatprep.subr.bf16.mxu0 %v10391_v30  ;;  %v693_v61 = vpack.c.bf16 %v11842_v24, %v11842_v24  ;;  %v10462_v30 = vld [vmem:[%s11023_s25 + $0x1670] ss:$8 sps:$4 sm:$0xff]   ;;  %v10468_v24 = vld [vmem:[%s11023_s25 + $0x1660] ss:$8 sps:$4 sm:$0xff]  }
 0x2a6   : > { %7728 = vmatprep.subr.bf16.mxu1 %v10394_v0  ;;  %v10465_v0 = vld [vmem:[%s11023_s25 + $0x1770] ss:$8 sps:$4 sm:$0xff]  }
 0x2a8   : > { %7688 = vmatpush1.bf16.msra.mxu0 %v10389_v16  ;;  %v10470_v16 = vld [vmem:[%s11023_s25 + $0x1664] ss:$8 sps:$4 sm:$0xff]  }
 0x2a9   : > { %7729 = vmatpush1.bf16.msra.mxu1 %v10392_v1  ;;  %7689 = vmatprep.subr.bf16.mxu0 %v10397_v57  ;;  %v10473_v1 = vld [vmem:[%s11023_s25 + $0x1764] ss:$8 sps:$4 sm:$0xff]   ;;  %v696_v57 = vpack.c.bf16 %v517_v25, %v517_v25 }
 0x2aa   : > { %7730 = vmatprep.subr.bf16.mxu1 %v10400_v2  ;;  %v698_v2 = vpack.c.bf16 %v518_v59, %v518_v59  ;;  %v10530_v25 = vld [vmem:[%s11023_s25 + $0x16c4] ss:$8 sps:$4 sm:$0xff]  }
 0x2ab   : > { %v10533_v59 = vld [vmem:[%s11023_s25 + $0x17c4] ss:$8 sps:$4 sm:$0xff]  }
 0x2ac   : > { %7690 = vmatpush1.bf16.msra.mxu0 %v10395_v3 }
 0x2ad   : > { %7731 = vmatpush1.bf16.msra.mxu1 %v10398_v5  ;;  %7691 = vmatprep.subr.bf16.mxu0 %v10403_v39  ;;  %v10471_v39 = vld [vmem:[%s11023_s25 + $0x1760] ss:$8 sps:$4 sm:$0xff]  }
 0x2ae   : > { %7732 = vmatprep.subr.bf16.mxu1 %v10406_v41 }
 0x2b0   : > { %7692 = vmatpush1.bf16.msra.mxu0 %v10401_v9 }
 0x2b1   : > { %7733 = vmatpush1.bf16.msra.mxu1 %v10404_v10  ;;  %7693 = vmatprep.subr.bf16.mxu0 %v10409_v48  ;;  %v10476_v10 = vld [vmem:[%s11023_s25 + $0x1654] ss:$8 sps:$4 sm:$0xff]  }
 0x2b2   : > { %7734 = vmatprep.subr.bf16.mxu1 %v10412_v11  ;;  %v10479_v48 = vld [vmem:[%s11023_s25 + $0x1754] ss:$8 sps:$4 sm:$0xff]  }
 0x2b4   : > { %7694 = vmatpush1.bf16.msra.mxu0 %v10407_v12 }
 0x2b5   : > { %7735 = vmatpush1.bf16.msra.mxu1 %v10410_v13  ;;  %7695 = vmatprep.subr.bf16.mxu0 %v10415_v17 }
 0x2b6   : > { %7736 = vmatprep.subr.bf16.mxu1 %v10418_v18  ;;  %v10474_v18 = vld [vmem:[%s11023_s25 + $0x1650] ss:$8 sps:$4 sm:$0xff]  }
 0x2b8   : > { %7696 = vmatpush2.bf16.msra.mxu0 %v10413_v32  ;;  %v10477_v32 = vld [vmem:[%s11023_s25 + $0x1750] ss:$8 sps:$4 sm:$0xff]  }
 0x2b9   : > { %7737 = vmatpush2.bf16.msra.mxu1 %v10416_v33  ;;  %7697 = vmatprep.subr.bf16.mxu0 %v10421_v19 }
 0x2ba   : > { %7738 = vmatprep.subr.bf16.mxu1 %v10424_v20  ;;  %v10485_v20 = vld [vmem:[%s11023_s25 + $0x1744] ss:$8 sps:$4 sm:$0xff]  }
 0x2bc   : > { %7698 = vmatpush2.bf16.msra.mxu0 %v10419_v21  ;;  %v10480_v21 = vld [vmem:[%s11023_s25 + $0x1640] ss:$8 sps:$4 sm:$0xff]  }
 0x2bd   : > { %7739 = vmatpush2.bf16.msra.mxu1 %v10422_v23  ;;  %7699 = vmatprep.subr.bf16.mxu0 %v10427_v26  ;;  %v10483_v23 = vld [vmem:[%s11023_s25 + $0x1740] ss:$8 sps:$4 sm:$0xff]   ;;  %v10488_v26 = vld [vmem:[%s11023_s25 + $0x1634] ss:$8 sps:$4 sm:$0xff]  }
 0x2be   : > { %7740 = vmatprep.subr.bf16.mxu1 %v10430_v45  ;;  %v10491_v45 = vld [vmem:[%s11023_s25 + $0x1734] ss:$8 sps:$4 sm:$0xff]  }
 0x2c0   : > { %7700 = vmatpush2.bf16.msra.mxu0 %v10425_v46  ;;  %v10486_v46 = vld [vmem:[%s11023_s25 + $0x1630] ss:$8 sps:$4 sm:$0xff]  }
 0x2c1   : > { %7741 = vmatpush2.bf16.msra.mxu1 %v10428_v27  ;;  %7701 = vmatprep.subr.bf16.mxu0 %v10433_v15  ;;  %v10489_v27 = vld [vmem:[%s11023_s25 + $0x1730] ss:$8 sps:$4 sm:$0xff]   ;;  %v10494_v15 = vld [vmem:[%s11023_s25 + $0x1624] ss:$8 sps:$4 sm:$0xff]  }
 0x2c2   : > { %7742 = vmatprep.subr.bf16.mxu1 %v10436_v28  ;;  %v10497_v28 = vld [vmem:[%s11023_s25 + $0x1724] ss:$8 sps:$4 sm:$0xff]  }
 0x2c4   : > { %7702 = vmatpush2.bf16.msra.mxu0 %v10431_v29  ;;  %v10492_v29 = vld [vmem:[%s11023_s25 + $0x1620] ss:$8 sps:$4 sm:$0xff]  }
 0x2c5   : > { %7743 = vmatpush2.bf16.msra.mxu1 %v10434_v31  ;;  %7703 = vmatprep.subr.bf16.mxu0 %v10439_v4  ;;  %v10495_v31 = vld [vmem:[%s11023_s25 + $0x1720] ss:$8 sps:$4 sm:$0xff]   ;;  %v10500_v4 = vld [vmem:[%s11023_s25 + $0x1614] ss:$8 sps:$4 sm:$0xff]  }
 0x2c6   : > { %7744 = vmatprep.subr.bf16.mxu1 %v10442_v34  ;;  %v10503_v34 = vld [vmem:[%s11023_s25 + $0x1714] ss:$8 sps:$4 sm:$0xff]  }
 0x2c8   : > { %7704 = vmatpush2.bf16.msra.mxu0 %v10437_v58  ;;  %v10498_v58 = vld [vmem:[%s11023_s25 + $0x1610] ss:$8 sps:$4 sm:$0xff]  }
 0x2c9   : > { %7745 = vmatpush2.bf16.msra.mxu1 %v10440_v35  ;;  %7705 = vmatprep.subr.bf16.mxu0 %v10445_v8  ;;  %v10501_v35 = vld [vmem:[%s11023_s25 + $0x1710] ss:$8 sps:$4 sm:$0xff]   ;;  %v10506_v8 = vld [vmem:[%s11023_s25 + $0x1604] ss:$8 sps:$4 sm:$0xff]  }
 0x2ca   : > { %7746 = vmatprep.subr.bf16.mxu1 %v10448_v37  ;;  %v10509_v37 = vld [vmem:[%s11023_s25 + $0x1704] ss:$8 sps:$4 sm:$0xff]  }
 0x2cc   : > { %7706 = vmatpush2.bf16.msra.mxu0 %v10443_v43  ;;  %v10507_v43 = vld [vmem:[%s11023_s25 + $0x1700] ss:$8 sps:$4 sm:$0xff]  }
 0x2cd   : > { %7747 = vmatpush2.bf16.msra.mxu1 %v10446_v62  ;;  %7707 = vmatprep.subr.bf16.mxu0 %v10451_v63  ;;  %v10512_v62 = vld [vmem:[%s11023_s25 + $0x16f4] ss:$8 sps:$4 sm:$0xff]  }
 0x2ce   : > { %7748 = vmatprep.subr.bf16.mxu1 %v10454_v42  ;;  %v10515_v63 = vld [vmem:[%s11023_s25 + $0x17f4] ss:$8 sps:$4 sm:$0xff]   ;;  %v10510_v42 = vld [vmem:[%s11023_s25 + $0x16f0] ss:$8 sps:$4 sm:$0xff]  }
 0x2d0   : > { %7708 = vmatpush2.bf16.msra.mxu0 %v10449_v49  ;;  %v10518_v49 = vld [vmem:[%s11023_s25 + $0x16e4] ss:$8 sps:$4 sm:$0xff]  }
 0x2d1   : > { %7749 = vmatpush2.bf16.msra.mxu1 %v10452_v51  ;;  %7709 = vmatprep.subr.bf16.mxu0 %v10457_v14  ;;  %v10521_v51 = vld [vmem:[%s11023_s25 + $0x17e4] ss:$8 sps:$4 sm:$0xff]   ;;  %v10516_v14 = vld [vmem:[%s11023_s25 + $0x16e0] ss:$8 sps:$4 sm:$0xff]  }
 0x2d2   : > { %7750 = vmatprep.subr.bf16.mxu1 %v10460_v53  ;;  %v10519_v53 = vld [vmem:[%s11023_s25 + $0x17e0] ss:$8 sps:$4 sm:$0xff]  }
 0x2d4   : > { %7710 = vmatpush2.bf16.msra.mxu0 %v10455_v56  ;;  %v10524_v56 = vld [vmem:[%s11023_s25 + $0x16d4] ss:$8 sps:$4 sm:$0xff]  }
 0x2d5   : > { %7751 = vmatpush2.bf16.msra.mxu1 %v10458_v6  ;;  %7761 = vmatprep.subr.bf16.mxu0 %v10464_v7  ;;  %v10527_v6 = vld [vmem:[%s11023_s25 + $0x17d4] ss:$8 sps:$4 sm:$0xff]   ;;  %v10522_v7 = vld [vmem:[%s11023_s25 + $0x16d0] ss:$8 sps:$4 sm:$0xff]  }
 0x2d6   : > { %7802 = vmatprep.subr.bf16.mxu1 %v10467_v36  ;;  %v10525_v36 = vld [vmem:[%s11023_s25 + $0x17d0] ss:$8 sps:$4 sm:$0xff]  }
 0x2d7   : > { %v7467_v3 = vpop.f32.mrf.mxu0  ;;  %7712 = vmatmul.mubr.bf16.vlgmr.msra.gmra.mxu0 %v691_v40  ;;  %v10528_v40 = vld [vmem:[%s11023_s25 + $0x16c0] ss:$8 sps:$4 sm:$0xff]  }
 0x2d8   : > { %v7508_v5 = vpop.f32.mrf.mxu1  ;;  %7753 = vmatmul.mubr.bf16.vlgmr.msra.gmra.mxu1 %v693_v61  ;;  %v7468_v60 = vadd.f32 %v7467_v3, %v11865_v52  ;;  %7762 = vmatpush1.bf16.msra.mxu0 %v10462_v30  ;;  %v10531_v61 = vld [vmem:[%s11023_s25 + $0x17c0] ss:$8 sps:$4 sm:$0xff]   ;;  %v10536_v30 = vld [vmem:[%s11023_s25 + $0x16b4] ss:$8 sps:$4 sm:$0xff]  }
 0x2d9   : > { %7803 = vmatpush1.bf16.msra.mxu1 %v10465_v0  ;;  %v7469_v41 = vpop.f32.mrf.mxu0  ;;  %7763 = vmatprep.subr.bf16.mxu0 %v10470_v16  ;;  %v10539_v0 = vld [vmem:[%s11023_s25 + $0x17b4] ss:$8 sps:$4 sm:$0xff]   ;;  %v10534_v16 = vld [vmem:[%s11023_s25 + $0x16b0] ss:$8 sps:$4 sm:$0xff]   ;;  %v295_v3 = vld [vmem:[%s11018_s21 + $0x60] sm:$0xff] }
 0x2da   : > { %v7510_v9 = vpop.f32.mrf.mxu1  ;;  %7804 = vmatprep.subr.bf16.mxu1 %v10473_v1  ;;  %v11950_v11 = vadd.f32 %v7508_v5, %v7468_v60  ;;  %v7470_v12 = vadd.f32 %v7469_v41, %v11868_v55  ;;  %7793 = vmatprep.mubr.bf16.mxu0 %v696_v57  ;;  %v10482_v55 = vld [vmem:[%s11023_s25 + $0x1644] ss:$8 sps:$4 sm:$0xff]   ;;  %v10537_v1 = vld [vmem:[%s11023_s25 + $0x17b0] ss:$8 sps:$4 sm:$0xff]   ;;  %v10540_v5 = vld [vmem:[%s11023_s25 + $0x16a0] ss:$8 sps:$4 sm:$0xff]   ;;  %v519_v41 = vcombine.high %v295_v3, %v295_v3 }
 0x2db   : > { %7834 = vmatprep.mubr.bf16.mxu1 %v698_v2  ;;  %v7471_v52 = vpop.f32.mrf.mxu0  ;;  %v10542_v57 = vld [vmem:[%s11023_s25 + $0x16a4] ss:$8 sps:$4 sm:$0xff]   ;;  %v10543_v60 = vld [vmem:[%s11023_s25 + $0x17a0] ss:$8 sps:$4 sm:$0xff]  }
 0x2dc   : > { %v7512_v13 = vpop.f32.mrf.mxu1  ;;  %v11953_v17 = vadd.f32 %v7510_v9, %v7470_v12  ;;  %7764 = vmatpush1.bf16.msra.mxu0 %v10468_v24  ;;  %v10545_v2 = vld [vmem:[%s11023_s25 + $0x17a4] ss:$8 sps:$4 sm:$0xff]   ;;  %v10548_v24 = vld [vmem:[%s11023_s25 + $0x1694] ss:$8 sps:$4 sm:$0xff]   ;;  %v10546_v9 = vld [vmem:[%s11023_s25 + $0x1690] ss:$8 sps:$4 sm:$0xff]   ;;  %v12009_v52 = vrot.slane %v295_v3, %v11073_v50 }
 0x2dd   : > { %7805 = vmatpush1.bf16.msra.mxu1 %v10471_v39  ;;  %v7472_v33 = vpop.f32.mrf.mxu0  ;;  %7765 = vmatprep.subr.bf16.mxu0 %v10476_v10  ;;  %v10551_v39 = vld [vmem:[%s11023_s25 + $0x1794] ss:$8 sps:$4 sm:$0xff]   ;;  %v10549_v10 = vld [vmem:[%s11023_s25 + $0x1790] ss:$8 sps:$4 sm:$0xff]   ;;  %v10557_v12 = vld [vmem:[%s11023_s25 + $0x1784] ss:$8 sps:$4 sm:$0xff]   ;;  %v12012_v13 = vrot.slane %v519_v41, %v11073_v50 }
 0x2de   : > { %v7513_v19 = vpop.f32.mrf.mxu1  ;;  %7806 = vmatprep.subr.bf16.mxu1 %v10479_v48  ;;  %v10554_v48 = vld [vmem:[%s11023_s25 + $0x1684] ss:$8 sps:$4 sm:$0xff]   ;;  %v10561_v33 = vld [vmem:[%s11023_s25 + $0x1874] ss:$8 sps:$4 sm:$0xff]   ;;  %v10601_v3 = vld [vmem:[%s11023_s25 + $0x1800] ss:$8 sps:$4 sm:$0xff]  }
 0x2df   : > { %v10564_v19 = vld [vmem:[%s11023_s25 + $0x1974] ss:$8 sps:$4 sm:$0xff]   ;;  %v10610_v41 = vld [vmem:[%s11023_s25 + $0x19f0] ss:$8 sps:$4 sm:$0xff]  }
 0x2e0   : > { %7766 = vmatpush1.bf16.msra.mxu0 %v10474_v18  ;;  %v10552_v18 = vld [vmem:[%s11023_s25 + $0x1680] ss:$8 sps:$4 sm:$0xff]  }
 0x2e1   : > { %7807 = vmatpush1.bf16.msra.mxu1 %v10477_v32  ;;  %7767 = vmatprep.subr.bf16.mxu0 %v10482_v55  ;;  %v10555_v32 = vld [vmem:[%s11023_s25 + $0x1780] ss:$8 sps:$4 sm:$0xff]   ;;  %v534_v55 = vcombine.high %v12009_v52, %v12009_v52 }
 0x2e2   : > { %7808 = vmatprep.subr.bf16.mxu1 %v10485_v20  ;;  %v535_v20 = vcombine.high %v12012_v13, %v12012_v13 }
 0x2e4   : > { %7768 = vmatpush1.bf16.msra.mxu0 %v10480_v21  ;;  %v695_v21 = vpack.c.bf16 %v11924_v22, %v11924_v22 }
 0x2e5   : > { %7809 = vmatpush1.bf16.msra.mxu1 %v10483_v23  ;;  %7769 = vmatprep.subr.bf16.mxu0 %v10488_v26  ;;  %v697_v23 = vpack.c.bf16 %v11927_v54, %v11927_v54  ;;  %v10559_v26 = vld [vmem:[%s11023_s25 + $0x1870] ss:$8 sps:$4 sm:$0xff]   ;;  %v10565_v54 = vld [vmem:[%s11023_s25 + $0x1860] ss:$8 sps:$4 sm:$0xff]  }
 0x2e6   : > { %7810 = vmatprep.subr.bf16.mxu1 %v10491_v45  ;;  %v10562_v45 = vld [vmem:[%s11023_s25 + $0x1970] ss:$8 sps:$4 sm:$0xff]  }
 0x2e8   : > { %7770 = vmatpush1.bf16.msra.mxu0 %v10486_v46  ;;  %v10567_v46 = vld [vmem:[%s11023_s25 + $0x1864] ss:$8 sps:$4 sm:$0xff]  }
 0x2e9   : > { %7811 = vmatpush1.bf16.msra.mxu1 %v10489_v27  ;;  %7771 = vmatprep.subr.bf16.mxu0 %v10494_v15  ;;  %v10570_v27 = vld [vmem:[%s11023_s25 + $0x1964] ss:$8 sps:$4 sm:$0xff]   ;;  %v700_v15 = vpack.c.bf16 %v534_v55, %v534_v55 }
 0x2ea   : > { %7812 = vmatprep.subr.bf16.mxu1 %v10497_v28  ;;  %v702_v28 = vpack.c.bf16 %v535_v20, %v535_v20  ;;  %v10627_v55 = vld [vmem:[%s11023_s25 + $0x18c4] ss:$8 sps:$4 sm:$0xff]  }
 0x2eb   : > { %v10630_v20 = vld [vmem:[%s11023_s25 + $0x19c4] ss:$8 sps:$4 sm:$0xff]  }
 0x2ec   : > { %7772 = vmatpush1.bf16.msra.mxu0 %v10492_v29 }
 0x2ed   : > { %7813 = vmatpush1.bf16.msra.mxu1 %v10495_v31  ;;  %7773 = vmatprep.subr.bf16.mxu0 %v10500_v4  ;;  %v10568_v4 = vld [vmem:[%s11023_s25 + $0x1960] ss:$8 sps:$4 sm:$0xff]  }
 0x2ee   : > { %7814 = vmatprep.subr.bf16.mxu1 %v10503_v34 }
 0x2f0   : > { %7774 = vmatpush1.bf16.msra.mxu0 %v10498_v58 }
 0x2f1   : > { %7815 = vmatpush1.bf16.msra.mxu1 %v10501_v35  ;;  %7775 = vmatprep.subr.bf16.mxu0 %v10506_v8  ;;  %v10573_v35 = vld [vmem:[%s11023_s25 + $0x1854] ss:$8 sps:$4 sm:$0xff]  }
 0x2f2   : > { %7816 = vmatprep.subr.bf16.mxu1 %v10509_v37  ;;  %v10576_v8 = vld [vmem:[%s11023_s25 + $0x1954] ss:$8 sps:$4 sm:$0xff]  }
 0x2f4   : > { %7776 = vmatpush1.bf16.msra.mxu0 %v10504_v38 }
 0x2f5   : > { %7817 = vmatpush1.bf16.msra.mxu1 %v10507_v43  ;;  %7777 = vmatprep.subr.bf16.mxu0 %v10512_v62 }
 0x2f6   : > { %7818 = vmatprep.subr.bf16.mxu1 %v10515_v63  ;;  %v10571_v63 = vld [vmem:[%s11023_s25 + $0x1850] ss:$8 sps:$4 sm:$0xff]  }
 0x2f8   : > { %7778 = vmatpush2.bf16.msra.mxu0 %v10510_v42  ;;  %v10574_v42 = vld [vmem:[%s11023_s25 + $0x1950] ss:$8 sps:$4 sm:$0xff]  }
 0x2f9   : > { %7819 = vmatpush2.bf16.msra.mxu1 %v10513_v47  ;;  %7779 = vmatprep.subr.bf16.mxu0 %v10518_v49 }
 0x2fa   : > { %7820 = vmatprep.subr.bf16.mxu1 %v10521_v51  ;;  %v10582_v51 = vld [vmem:[%s11023_s25 + $0x1944] ss:$8 sps:$4 sm:$0xff]  }
 0x2fc   : > { %7780 = vmatpush2.bf16.msra.mxu0 %v10516_v14  ;;  %v10577_v14 = vld [vmem:[%s11023_s25 + $0x1840] ss:$8 sps:$4 sm:$0xff]  }
 0x2fd   : > { %7821 = vmatpush2.bf16.msra.mxu1 %v10519_v53  ;;  %7781 = vmatprep.subr.bf16.mxu0 %v10524_v56  ;;  %v10580_v53 = vld [vmem:[%s11023_s25 + $0x1940] ss:$8 sps:$4 sm:$0xff]   ;;  %v10585_v56 = vld [vmem:[%s11023_s25 + $0x1834] ss:$8 sps:$4 sm:$0xff]  }
 0x2fe   : > { %7822 = vmatprep.subr.bf16.mxu1 %v10527_v6  ;;  %v10588_v6 = vld [vmem:[%s11023_s25 + $0x1934] ss:$8 sps:$4 sm:$0xff]  }
 0x300   : > { %7782 = vmatpush2.bf16.msra.mxu0 %v10522_v7  ;;  %v10583_v7 = vld [vmem:[%s11023_s25 + $0x1830] ss:$8 sps:$4 sm:$0xff]  }
 0x301   : > { %7823 = vmatpush2.bf16.msra.mxu1 %v10525_v36  ;;  %7783 = vmatprep.subr.bf16.mxu0 %v10530_v25  ;;  %v10586_v36 = vld [vmem:[%s11023_s25 + $0x1930] ss:$8 sps:$4 sm:$0xff]   ;;  %v10591_v25 = vld [vmem:[%s11023_s25 + $0x1824] ss:$8 sps:$4 sm:$0xff]  }
 0x302   : > { %7824 = vmatprep.subr.bf16.mxu1 %v10533_v59  ;;  %v10594_v59 = vld [vmem:[%s11023_s25 + $0x1924] ss:$8 sps:$4 sm:$0xff]  }
 0x304   : > { %7784 = vmatpush2.bf16.msra.mxu0 %v10528_v40  ;;  %v10589_v40 = vld [vmem:[%s11023_s25 + $0x1820] ss:$8 sps:$4 sm:$0xff]  }
 0x305   : > { %7825 = vmatpush2.bf16.msra.mxu1 %v10531_v61  ;;  %7785 = vmatprep.subr.bf16.mxu0 %v10536_v30  ;;  %v10592_v61 = vld [vmem:[%s11023_s25 + $0x1920] ss:$8 sps:$4 sm:$0xff]   ;;  %v10597_v30 = vld [vmem:[%s11023_s25 + $0x1814] ss:$8 sps:$4 sm:$0xff]  }
 0x306   : > { %7826 = vmatprep.subr.bf16.mxu1 %v10539_v0  ;;  %v10600_v0 = vld [vmem:[%s11023_s25 + $0x1914] ss:$8 sps:$4 sm:$0xff]  }
 0x308   : > { %7786 = vmatpush2.bf16.msra.mxu0 %v10534_v16  ;;  %v10595_v16 = vld [vmem:[%s11023_s25 + $0x1810] ss:$8 sps:$4 sm:$0xff]  }
 0x309   : > { %7827 = vmatpush2.bf16.msra.mxu1 %v10537_v1  ;;  %7787 = vmatprep.subr.bf16.mxu0 %v10542_v57  ;;  %v10598_v1 = vld [vmem:[%s11023_s25 + $0x1910] ss:$8 sps:$4 sm:$0xff]   ;;  %v10603_v57 = vld [vmem:[%s11023_s25 + $0x1804] ss:$8 sps:$4 sm:$0xff]  }
 0x30a   : > { %7828 = vmatprep.subr.bf16.mxu1 %v10545_v2  ;;  %v10606_v2 = vld [vmem:[%s11023_s25 + $0x1904] ss:$8 sps:$4 sm:$0xff]  }
 0x30c   : > { %7788 = vmatpush2.bf16.msra.mxu0 %v10540_v5  ;;  %v10604_v5 = vld [vmem:[%s11023_s25 + $0x1900] ss:$8 sps:$4 sm:$0xff]  }
 0x30d   : > { %7829 = vmatpush2.bf16.msra.mxu1 %v10543_v60  ;;  %7789 = vmatprep.subr.bf16.mxu0 %v10548_v24  ;;  %v10609_v60 = vld [vmem:[%s11023_s25 + $0x18f4] ss:$8 sps:$4 sm:$0xff]  }
 0x30e   : > { %7830 = vmatprep.subr.bf16.mxu1 %v10551_v39  ;;  %v10612_v24 = vld [vmem:[%s11023_s25 + $0x19f4] ss:$8 sps:$4 sm:$0xff]   ;;  %v10607_v39 = vld [vmem:[%s11023_s25 + $0x18f0] ss:$8 sps:$4 sm:$0xff]  }
 0x310   : > { %7790 = vmatpush2.bf16.msra.mxu0 %v10546_v9  ;;  %v10615_v9 = vld [vmem:[%s11023_s25 + $0x18e4] ss:$8 sps:$4 sm:$0xff]  }
 0x311   : > { %7831 = vmatpush2.bf16.msra.mxu1 %v10549_v10  ;;  %7791 = vmatprep.subr.bf16.mxu0 %v10554_v48  ;;  %v10618_v10 = vld [vmem:[%s11023_s25 + $0x19e4] ss:$8 sps:$4 sm:$0xff]   ;;  %v10613_v48 = vld [vmem:[%s11023_s25 + $0x18e0] ss:$8 sps:$4 sm:$0xff]  }
 0x312   : > { %7832 = vmatprep.subr.bf16.mxu1 %v10557_v12  ;;  %v10616_v12 = vld [vmem:[%s11023_s25 + $0x19e0] ss:$8 sps:$4 sm:$0xff]  }
 0x314   : > { %7792 = vmatpush2.bf16.msra.mxu0 %v10552_v18  ;;  %v10621_v18 = vld [vmem:[%s11023_s25 + $0x18d4] ss:$8 sps:$4 sm:$0xff]  }
 0x315   : > { %7833 = vmatpush2.bf16.msra.mxu1 %v10555_v32  ;;  %7843 = vmatprep.subr.bf16.mxu0 %v10561_v33  ;;  %v10624_v32 = vld [vmem:[%s11023_s25 + $0x19d4] ss:$8 sps:$4 sm:$0xff]   ;;  %v10619_v33 = vld [vmem:[%s11023_s25 + $0x18d0] ss:$8 sps:$4 sm:$0xff]  }
 0x316   : > { %7884 = vmatprep.subr.bf16.mxu1 %v10564_v19  ;;  %v10622_v19 = vld [vmem:[%s11023_s25 + $0x19d0] ss:$8 sps:$4 sm:$0xff]  }
 0x317   : > { %v7549_v29 = vpop.f32.mrf.mxu0  ;;  %7794 = vmatmul.mubr.bf16.vlgmr.msra.gmra.mxu0 %v695_v21  ;;  %v10625_v21 = vld [vmem:[%s11023_s25 + $0x18c0] ss:$8 sps:$4 sm:$0xff]  }
 0x318   : > { %v7590_v31 = vpop.f32.mrf.mxu1  ;;  %7835 = vmatmul.mubr.bf16.vlgmr.msra.gmra.mxu1 %v697_v23  ;;  %v7550_v22 = vadd.f32 %v7549_v29, %v11950_v11  ;;  %7844 = vmatpush1.bf16.msra.mxu0 %v10559_v26  ;;  %v10628_v23 = vld [vmem:[%s11023_s25 + $0x19c0] ss:$8 sps:$4 sm:$0xff]   ;;  %v10633_v26 = vld [vmem:[%s11023_s25 + $0x18b4] ss:$8 sps:$4 sm:$0xff]  }
 0x319   : > { %7885 = vmatpush1.bf16.msra.mxu1 %v10562_v45  ;;  %v7551_v34 = vpop.f32.mrf.mxu0  ;;  %7845 = vmatprep.subr.bf16.mxu0 %v10567_v46  ;;  %v10636_v45 = vld [vmem:[%s11023_s25 + $0x19b4] ss:$8 sps:$4 sm:$0xff]   ;;  %v10631_v46 = vld [vmem:[%s11023_s25 + $0x18b0] ss:$8 sps:$4 sm:$0xff]   ;;  %v296_v29 = vld [vmem:[%s11018_s21 + $0x68] sm:$0xff] }
 0x31a   : > { %v7592_v58 = vpop.f32.mrf.mxu1  ;;  %7886 = vmatprep.subr.bf16.mxu1 %v10570_v27  ;;  %v12035_v37 = vadd.f32 %v7590_v31, %v7550_v22  ;;  %v7552_v38 = vadd.f32 %v7551_v34, %v11953_v17  ;;  %7875 = vmatprep.mubr.bf16.mxu0 %v700_v15  ;;  %v10579_v17 = vld [vmem:[%s11023_s25 + $0x1844] ss:$8 sps:$4 sm:$0xff]   ;;  %v10634_v27 = vld [vmem:[%s11023_s25 + $0x19b0] ss:$8 sps:$4 sm:$0xff]   ;;  %v10637_v31 = vld [vmem:[%s11023_s25 + $0x18a0] ss:$8 sps:$4 sm:$0xff]   ;;  %v536_v34 = vcombine.high %v296_v29, %v296_v29 }
 0x31b   : > { %7916 = vmatprep.mubr.bf16.mxu1 %v702_v28  ;;  %v7553_v11 = vpop.f32.mrf.mxu0  ;;  %v10639_v15 = vld [vmem:[%s11023_s25 + $0x18a4] ss:$8 sps:$4 sm:$0xff]   ;;  %v10640_v22 = vld [vmem:[%s11023_s25 + $0x19a0] ss:$8 sps:$4 sm:$0xff]  }
 0x31c   : > { %v7594_v43 = vpop.f32.mrf.mxu1  ;;  %v12038_v62 = vadd.f32 %v7592_v58, %v7552_v38  ;;  %7846 = vmatpush1.bf16.msra.mxu0 %v10565_v54  ;;  %v10642_v28 = vld [vmem:[%s11023_s25 + $0x19a4] ss:$8 sps:$4 sm:$0xff]   ;;  %v10645_v54 = vld [vmem:[%s11023_s25 + $0x1894] ss:$8 sps:$4 sm:$0xff]   ;;  %v10643_v58 = vld [vmem:[%s11023_s25 + $0x1890] ss:$8 sps:$4 sm:$0xff]   ;;  %v12094_v11 = vrot.slane %v296_v29, %v11073_v50 }
 0x31d   : > { %7887 = vmatpush1.bf16.msra.mxu1 %v10568_v4  ;;  %v7554_v47 = vpop.f32.mrf.mxu0  ;;  %7847 = vmatprep.subr.bf16.mxu0 %v10573_v35  ;;  %v10648_v4 = vld [vmem:[%s11023_s25 + $0x1994] ss:$8 sps:$4 sm:$0xff]   ;;  %v10646_v35 = vld [vmem:[%s11023_s25 + $0x1990] ss:$8 sps:$4 sm:$0xff]   ;;  %v10654_v38 = vld [vmem:[%s11023_s25 + $0x1984] ss:$8 sps:$4 sm:$0xff]   ;;  %v12097_v43 = vrot.slane %v536_v34, %v11073_v50 }
 0x31e   : > { %v7595_v49 = vpop.f32.mrf.mxu1  ;;  %7888 = vmatprep.subr.bf16.mxu1 %v10576_v8  ;;  %v10651_v8 = vld [vmem:[%s11023_s25 + $0x1884] ss:$8 sps:$4 sm:$0xff]   ;;  %v10658_v47 = vld [vmem:[%s11023_s25 + $0x1a74] ss:$8 sps:$4 sm:$0xff]   ;;  %v10698_v29 = vld [vmem:[%s11023_s25 + $0x1a00] ss:$8 sps:$4 sm:$0xff]  }
 0x31f   : > { %v10661_v49 = vld [vmem:[%s11023_s25 + $0x1b74] ss:$8 sps:$4 sm:$0xff]   ;;  %v10707_v34 = vld [vmem:[%s11023_s25 + $0x1bf0] ss:$8 sps:$4 sm:$0xff]  }
 0x320   : > { %7848 = vmatpush1.bf16.msra.mxu0 %v10571_v63  ;;  %v10649_v63 = vld [vmem:[%s11023_s25 + $0x1880] ss:$8 sps:$4 sm:$0xff]  }
 0x321   : > { %7889 = vmatpush1.bf16.msra.mxu1 %v10574_v42  ;;  %7849 = vmatprep.subr.bf16.mxu0 %v10579_v17  ;;  %v10652_v42 = vld [vmem:[%s11023_s25 + $0x1980] ss:$8 sps:$4 sm:$0xff]   ;;  %v551_v17 = vcombine.high %v12094_v11, %v12094_v11 }
 0x322   : > { %7890 = vmatprep.subr.bf16.mxu1 %v10582_v51  ;;  %v552_v51 = vcombine.high %v12097_v43, %v12097_v43 }
 0x324   : > { %7850 = vmatpush1.bf16.msra.mxu0 %v10577_v14  ;;  %v699_v14 = vpack.c.bf16 %v12009_v52, %v12009_v52 }
 0x325   : > { %7891 = vmatpush1.bf16.msra.mxu1 %v10580_v53  ;;  %7851 = vmatprep.subr.bf16.mxu0 %v10585_v56  ;;  %v701_v53 = vpack.c.bf16 %v12012_v13, %v12012_v13  ;;  %v10656_v56 = vld [vmem:[%s11023_s25 + $0x1a70] ss:$8 sps:$4 sm:$0xff]   ;;  %v10662_v13 = vld [vmem:[%s11023_s25 + $0x1a60] ss:$8 sps:$4 sm:$0xff]  }
 0x326   : > { %7892 = vmatprep.subr.bf16.mxu1 %v10588_v6  ;;  %v10659_v6 = vld [vmem:[%s11023_s25 + $0x1b70] ss:$8 sps:$4 sm:$0xff]  }
 0x328   : > { %7852 = vmatpush1.bf16.msra.mxu0 %v10583_v7  ;;  %v10664_v7 = vld [vmem:[%s11023_s25 + $0x1a64] ss:$8 sps:$4 sm:$0xff]  }
 0x329   : > { %7893 = vmatpush1.bf16.msra.mxu1 %v10586_v36  ;;  %7853 = vmatprep.subr.bf16.mxu0 %v10591_v25  ;;  %v10667_v36 = vld [vmem:[%s11023_s25 + $0x1b64] ss:$8 sps:$4 sm:$0xff]   ;;  %v704_v25 = vpack.c.bf16 %v551_v17, %v551_v17 }
 0x32a   : > { %7894 = vmatprep.subr.bf16.mxu1 %v10594_v59  ;;  %v706_v59 = vpack.c.bf16 %v552_v51, %v552_v51  ;;  %v10724_v17 = vld [vmem:[%s11023_s25 + $0x1ac4] ss:$8 sps:$4 sm:$0xff]  }
 0x32b   : > { %v10727_v51 = vld [vmem:[%s11023_s25 + $0x1bc4] ss:$8 sps:$4 sm:$0xff]  }
 0x32c   : > { %7854 = vmatpush1.bf16.msra.mxu0 %v10589_v40 }
 0x32d   : > { %7895 = vmatpush1.bf16.msra.mxu1 %v10592_v61  ;;  %7855 = vmatprep.subr.bf16.mxu0 %v10597_v30  ;;  %v10665_v30 = vld [vmem:[%s11023_s25 + $0x1b60] ss:$8 sps:$4 sm:$0xff]  }
 0x32e   : > { %7896 = vmatprep.subr.bf16.mxu1 %v10600_v0 }
 0x330   : > { %7856 = vmatpush1.bf16.msra.mxu0 %v10595_v16 }
 0x331   : > { %7897 = vmatpush1.bf16.msra.mxu1 %v10598_v1  ;;  %7857 = vmatprep.subr.bf16.mxu0 %v10603_v57  ;;  %v10670_v1 = vld [vmem:[%s11023_s25 + $0x1a54] ss:$8 sps:$4 sm:$0xff]  }
 0x332   : > { %7898 = vmatprep.subr.bf16.mxu1 %v10606_v2  ;;  %v10673_v57 = vld [vmem:[%s11023_s25 + $0x1b54] ss:$8 sps:$4 sm:$0xff]  }
 0x334   : > { %7858 = vmatpush1.bf16.msra.mxu0 %v10601_v3 }
 0x335   : > { %7899 = vmatpush1.bf16.msra.mxu1 %v10604_v5  ;;  %7859 = vmatprep.subr.bf16.mxu0 %v10609_v60 }
 0x336   : > { %7900 = vmatprep.subr.bf16.mxu1 %v10612_v24  ;;  %v10668_v24 = vld [vmem:[%s11023_s25 + $0x1a50] ss:$8 sps:$4 sm:$0xff]  }
 0x338   : > { %7860 = vmatpush2.bf16.msra.mxu0 %v10607_v39  ;;  %v10671_v39 = vld [vmem:[%s11023_s25 + $0x1b50] ss:$8 sps:$4 sm:$0xff]  }
 0x339   : > { %7901 = vmatpush2.bf16.msra.mxu1 %v10610_v41  ;;  %7861 = vmatprep.subr.bf16.mxu0 %v10615_v9 }
 0x33a   : > { %7902 = vmatprep.subr.bf16.mxu1 %v10618_v10  ;;  %v10679_v10 = vld [vmem:[%s11023_s25 + $0x1b44] ss:$8 sps:$4 sm:$0xff]  }
 0x33c   : > { %7862 = vmatpush2.bf16.msra.mxu0 %v10613_v48  ;;  %v10674_v48 = vld [vmem:[%s11023_s25 + $0x1a40] ss:$8 sps:$4 sm:$0xff]  }
 0x33d   : > { %7903 = vmatpush2.bf16.msra.mxu1 %v10616_v12  ;;  %7863 = vmatprep.subr.bf16.mxu0 %v10621_v18  ;;  %v10677_v12 = vld [vmem:[%s11023_s25 + $0x1b40] ss:$8 sps:$4 sm:$0xff]   ;;  %v10682_v18 = vld [vmem:[%s11023_s25 + $0x1a34] ss:$8 sps:$4 sm:$0xff]  }
 0x33e   : > { %7904 = vmatprep.subr.bf16.mxu1 %v10624_v32  ;;  %v10685_v32 = vld [vmem:[%s11023_s25 + $0x1b34] ss:$8 sps:$4 sm:$0xff]  }
 0x340   : > { %7864 = vmatpush2.bf16.msra.mxu0 %v10619_v33  ;;  %v10680_v33 = vld [vmem:[%s11023_s25 + $0x1a30] ss:$8 sps:$4 sm:$0xff]  }
 0x341   : > { %7905 = vmatpush2.bf16.msra.mxu1 %v10622_v19  ;;  %7865 = vmatprep.subr.bf16.mxu0 %v10627_v55  ;;  %v10683_v19 = vld [vmem:[%s11023_s25 + $0x1b30] ss:$8 sps:$4 sm:$0xff]   ;;  %v10688_v55 = vld [vmem:[%s11023_s25 + $0x1a24] ss:$8 sps:$4 sm:$0xff]  }
 0x342   : > { %7906 = vmatprep.subr.bf16.mxu1 %v10630_v20  ;;  %v10691_v20 = vld [vmem:[%s11023_s25 + $0x1b24] ss:$8 sps:$4 sm:$0xff]  }
 0x344   : > { %7866 = vmatpush2.bf16.msra.mxu0 %v10625_v21  ;;  %v10686_v21 = vld [vmem:[%s11023_s25 + $0x1a20] ss:$8 sps:$4 sm:$0xff]  }
 0x345   : > { %7907 = vmatpush2.bf16.msra.mxu1 %v10628_v23  ;;  %7867 = vmatprep.subr.bf16.mxu0 %v10633_v26  ;;  %v10689_v23 = vld [vmem:[%s11023_s25 + $0x1b20] ss:$8 sps:$4 sm:$0xff]   ;;  %v10694_v26 = vld [vmem:[%s11023_s25 + $0x1a14] ss:$8 sps:$4 sm:$0xff]  }
 0x346   : > { %7908 = vmatprep.subr.bf16.mxu1 %v10636_v45  ;;  %v10697_v45 = vld [vmem:[%s11023_s25 + $0x1b14] ss:$8 sps:$4 sm:$0xff]  }
 0x348   : > { %7868 = vmatpush2.bf16.msra.mxu0 %v10631_v46  ;;  %v10692_v46 = vld [vmem:[%s11023_s25 + $0x1a10] ss:$8 sps:$4 sm:$0xff]  }
 0x349   : > { %7909 = vmatpush2.bf16.msra.mxu1 %v10634_v27  ;;  %7869 = vmatprep.subr.bf16.mxu0 %v10639_v15  ;;  %v10695_v27 = vld [vmem:[%s11023_s25 + $0x1b10] ss:$8 sps:$4 sm:$0xff]   ;;  %v10700_v15 = vld [vmem:[%s11023_s25 + $0x1a04] ss:$8 sps:$4 sm:$0xff]  }
 0x34a   : > { %7910 = vmatprep.subr.bf16.mxu1 %v10642_v28  ;;  %v10703_v28 = vld [vmem:[%s11023_s25 + $0x1b04] ss:$8 sps:$4 sm:$0xff]  }
 0x34c   : > { %7870 = vmatpush2.bf16.msra.mxu0 %v10637_v31  ;;  %v10701_v31 = vld [vmem:[%s11023_s25 + $0x1b00] ss:$8 sps:$4 sm:$0xff]  }
 0x34d   : > { %7911 = vmatpush2.bf16.msra.mxu1 %v10640_v22  ;;  %7871 = vmatprep.subr.bf16.mxu0 %v10645_v54  ;;  %v10706_v22 = vld [vmem:[%s11023_s25 + $0x1af4] ss:$8 sps:$4 sm:$0xff]  }
 0x34e   : > { %7912 = vmatprep.subr.bf16.mxu1 %v10648_v4  ;;  %v10709_v54 = vld [vmem:[%s11023_s25 + $0x1bf4] ss:$8 sps:$4 sm:$0xff]   ;;  %v10704_v4 = vld [vmem:[%s11023_s25 + $0x1af0] ss:$8 sps:$4 sm:$0xff]  }
 0x350   : > { %7872 = vmatpush2.bf16.msra.mxu0 %v10643_v58  ;;  %v10712_v58 = vld [vmem:[%s11023_s25 + $0x1ae4] ss:$8 sps:$4 sm:$0xff]  }
 0x351   : > { %7913 = vmatpush2.bf16.msra.mxu1 %v10646_v35  ;;  %7873 = vmatprep.subr.bf16.mxu0 %v10651_v8  ;;  %v10715_v35 = vld [vmem:[%s11023_s25 + $0x1be4] ss:$8 sps:$4 sm:$0xff]   ;;  %v10710_v8 = vld [vmem:[%s11023_s25 + $0x1ae0] ss:$8 sps:$4 sm:$0xff]  }
 0x352   : > { %7914 = vmatprep.subr.bf16.mxu1 %v10654_v38  ;;  %v10713_v38 = vld [vmem:[%s11023_s25 + $0x1be0] ss:$8 sps:$4 sm:$0xff]  }
 0x354   : > { %7874 = vmatpush2.bf16.msra.mxu0 %v10649_v63  ;;  %v10718_v63 = vld [vmem:[%s11023_s25 + $0x1ad4] ss:$8 sps:$4 sm:$0xff]  }
 0x355   : > { %7915 = vmatpush2.bf16.msra.mxu1 %v10652_v42  ;;  %7925 = vmatprep.subr.bf16.mxu0 %v10658_v47  ;;  %v10721_v42 = vld [vmem:[%s11023_s25 + $0x1bd4] ss:$8 sps:$4 sm:$0xff]   ;;  %v10716_v47 = vld [vmem:[%s11023_s25 + $0x1ad0] ss:$8 sps:$4 sm:$0xff]  }
 0x356   : > { %7966 = vmatprep.subr.bf16.mxu1 %v10661_v49  ;;  %v10719_v49 = vld [vmem:[%s11023_s25 + $0x1bd0] ss:$8 sps:$4 sm:$0xff]  }
 0x357   : > { %v7631_v40 = vpop.f32.mrf.mxu0  ;;  %7876 = vmatmul.mubr.bf16.vlgmr.msra.gmra.mxu0 %v699_v14  ;;  %v10722_v14 = vld [vmem:[%s11023_s25 + $0x1ac0] ss:$8 sps:$4 sm:$0xff]  }
 0x358   : > { %v7672_v61 = vpop.f32.mrf.mxu1  ;;  %7917 = vmatmul.mubr.bf16.vlgmr.msra.gmra.mxu1 %v701_v53  ;;  %v7632_v52 = vadd.f32 %v7631_v40, %v12035_v37  ;;  %7926 = vmatpush1.bf16.msra.mxu0 %v10656_v56  ;;  %v10725_v53 = vld [vmem:[%s11023_s25 + $0x1bc0] ss:$8 sps:$4 sm:$0xff]   ;;  %v10730_v56 = vld [vmem:[%s11023_s25 + $0x1ab4] ss:$8 sps:$4 sm:$0xff]  }
 0x359   : > { %7967 = vmatpush1.bf16.msra.mxu1 %v10659_v6  ;;  %v7633_v0 = vpop.f32.mrf.mxu0  ;;  %7927 = vmatprep.subr.bf16.mxu0 %v10664_v7  ;;  %v10733_v6 = vld [vmem:[%s11023_s25 + $0x1bb4] ss:$8 sps:$4 sm:$0xff]   ;;  %v10728_v7 = vld [vmem:[%s11023_s25 + $0x1ab0] ss:$8 sps:$4 sm:$0xff]  }
 0x35a   : > { %v7674_v16 = vpop.f32.mrf.mxu1  ;;  %7968 = vmatprep.subr.bf16.mxu1 %v10667_v36  ;;  %v12120_v2 = vadd.f32 %v7672_v61, %v7632_v52  ;;  %v7634_v3 = vadd.f32 %v7633_v0, %v12038_v62  ;;  %7957 = vmatprep.mubr.bf16.mxu0 %v704_v25  ;;  %v10676_v62 = vld [vmem:[%s11023_s25 + $0x1a44] ss:$8 sps:$4 sm:$0xff]   ;;  %v10731_v36 = vld [vmem:[%s11023_s25 + $0x1bb0] ss:$8 sps:$4 sm:$0xff]   ;;  %v10734_v61 = vld [vmem:[%s11023_s25 + $0x1aa0] ss:$8 sps:$4 sm:$0xff]  }
 0x35b   : > { %7998 = vmatprep.mubr.bf16.mxu1 %v706_v59  ;;  %v7635_v37 = vpop.f32.mrf.mxu0  ;;  %v10736_v25 = vld [vmem:[%s11023_s25 + $0x1aa4] ss:$8 sps:$4 sm:$0xff]   ;;  %v297_v40 = vld [vmem:[%s11018_s21 + $0x70] sm:$0xff]  ;;  %v10737_v52 = vld [vmem:[%s11023_s25 + $0x1ba0] ss:$8 sps:$4 sm:$0xff]  }
 0x35c   : > { %v7676_v5 = vpop.f32.mrf.mxu1  ;;  %v12123_v60 = vadd.f32 %v7674_v16, %v7634_v3  ;;  %7928 = vmatpush1.bf16.msra.mxu0 %v10662_v13  ;;  %v10739_v59 = vld [vmem:[%s11023_s25 + $0x1ba4] ss:$8 sps:$4 sm:$0xff]   ;;  %v10742_v13 = vld [vmem:[%s11023_s25 + $0x1a94] ss:$8 sps:$4 sm:$0xff]   ;;  %v553_v0 = vcombine.high %v297_v40, %v297_v40  ;;  %v10740_v16 = vld [vmem:[%s11023_s25 + $0x1a90] ss:$8 sps:$4 sm:$0xff]   ;;  %v12179_v37 = vrot.slane %v297_v40, %v11073_v50 }
 0x35d   : > { %7969 = vmatpush1.bf16.msra.mxu1 %v10665_v30  ;;  %v7636_v41 = vpop.f32.mrf.mxu0  ;;  %7929 = vmatprep.subr.bf16.mxu0 %v10670_v1  ;;  %v10745_v30 = vld [vmem:[%s11023_s25 + $0x1b94] ss:$8 sps:$4 sm:$0xff]   ;;  %v10743_v1 = vld [vmem:[%s11023_s25 + $0x1b90] ss:$8 sps:$4 sm:$0xff]   ;;  %v10751_v3 = vld [vmem:[%s11023_s25 + $0x1b84] ss:$8 sps:$4 sm:$0xff]  }
 0x35e   : > { %v7677_v9 = vpop.f32.mrf.mxu1  ;;  %7970 = vmatprep.subr.bf16.mxu1 %v10673_v57  ;;  %v10748_v57 = vld [vmem:[%s11023_s25 + $0x1a84] ss:$8 sps:$4 sm:$0xff]   ;;  %v12182_v5 = vrot.slane %v553_v0, %v11073_v50  ;;  %v10755_v41 = vld [vmem:[%s11023_s25 + $0x1c74] ss:$8 sps:$4 sm:$0xff]   ;;  %v10795_v40 = vld [vmem:[%s11023_s25 + $0x1c00] ss:$8 sps:$4 sm:$0xff]  }
 0x35f   : > { %v10758_v9 = vld [vmem:[%s11023_s25 + $0x1d74] ss:$8 sps:$4 sm:$0xff]   ;;  %v10804_v0 = vld [vmem:[%s11023_s25 + $0x1df0] ss:$8 sps:$4 sm:$0xff]  }
 0x360   : > { %7930 = vmatpush1.bf16.msra.mxu0 %v10668_v24  ;;  %v10746_v24 = vld [vmem:[%s11023_s25 + $0x1a80] ss:$8 sps:$4 sm:$0xff]  }
 0x361   : > { %7971 = vmatpush1.bf16.msra.mxu1 %v10671_v39  ;;  %7931 = vmatprep.subr.bf16.mxu0 %v10676_v62  ;;  %v10749_v39 = vld [vmem:[%s11023_s25 + $0x1b80] ss:$8 sps:$4 sm:$0xff]   ;;  %v568_v62 = vcombine.high %v12179_v37, %v12179_v37 }
 0x362   : > { %7972 = vmatprep.subr.bf16.mxu1 %v10679_v10  ;;  %v569_v10 = vcombine.high %v12182_v5, %v12182_v5 }
 0x364   : > { %7932 = vmatpush1.bf16.msra.mxu0 %v10674_v48  ;;  %v703_v48 = vpack.c.bf16 %v12094_v11, %v12094_v11 }
 0x365   : > { %7973 = vmatpush1.bf16.msra.mxu1 %v10677_v12  ;;  %7933 = vmatprep.subr.bf16.mxu0 %v10682_v18  ;;  %v705_v12 = vpack.c.bf16 %v12097_v43, %v12097_v43  ;;  %v10753_v18 = vld [vmem:[%s11023_s25 + $0x1c70] ss:$8 sps:$4 sm:$0xff]   ;;  %v10759_v43 = vld [vmem:[%s11023_s25 + $0x1c60] ss:$8 sps:$4 sm:$0xff]  }
 0x366   : > { %7974 = vmatprep.subr.bf16.mxu1 %v10685_v32  ;;  %v10756_v32 = vld [vmem:[%s11023_s25 + $0x1d70] ss:$8 sps:$4 sm:$0xff]  }
 0x368   : > { %7934 = vmatpush1.bf16.msra.mxu0 %v10680_v33  ;;  %v10761_v33 = vld [vmem:[%s11023_s25 + $0x1c64] ss:$8 sps:$4 sm:$0xff]  }
 0x369   : > { %7975 = vmatpush1.bf16.msra.mxu1 %v10683_v19  ;;  %7935 = vmatprep.subr.bf16.mxu0 %v10688_v55  ;;  %v10764_v19 = vld [vmem:[%s11023_s25 + $0x1d64] ss:$8 sps:$4 sm:$0xff]   ;;  %v708_v55 = vpack.c.bf16 %v568_v62, %v568_v62 }
 0x36a   : > { %7976 = vmatprep.subr.bf16.mxu1 %v10691_v20  ;;  %v710_v20 = vpack.c.bf16 %v569_v10, %v569_v10  ;;  %v10821_v62 = vld [vmem:[%s11023_s25 + $0x1cc4] ss:$8 sps:$4 sm:$0xff]  }
 0x36b   : > { %v10824_v10 = vld [vmem:[%s11023_s25 + $0x1dc4] ss:$8 sps:$4 sm:$0xff]  }
 0x36c   : > { %7936 = vmatpush1.bf16.msra.mxu0 %v10686_v21 }
 0x36d   : > { %7977 = vmatpush1.bf16.msra.mxu1 %v10689_v23  ;;  %7937 = vmatprep.subr.bf16.mxu0 %v10694_v26  ;;  %v10762_v26 = vld [vmem:[%s11023_s25 + $0x1d60] ss:$8 sps:$4 sm:$0xff]  }
 0x36e   : > { %7978 = vmatprep.subr.bf16.mxu1 %v10697_v45 }
 0x370   : > { %7938 = vmatpush1.bf16.msra.mxu0 %v10692_v46 }
 0x371   : > { %7979 = vmatpush1.bf16.msra.mxu1 %v10695_v27  ;;  %7939 = vmatprep.subr.bf16.mxu0 %v10700_v15  ;;  %v10767_v27 = vld [vmem:[%s11023_s25 + $0x1c54] ss:$8 sps:$4 sm:$0xff]  }
 0x372   : > { %7980 = vmatprep.subr.bf16.mxu1 %v10703_v28  ;;  %v10770_v15 = vld [vmem:[%s11023_s25 + $0x1d54] ss:$8 sps:$4 sm:$0xff]  }
 0x374   : > { %7940 = vmatpush1.bf16.msra.mxu0 %v10698_v29 }
 0x375   : > { %7981 = vmatpush1.bf16.msra.mxu1 %v10701_v31  ;;  %7941 = vmatprep.subr.bf16.mxu0 %v10706_v22 }
 0x376   : > { %7982 = vmatprep.subr.bf16.mxu1 %v10709_v54  ;;  %v10765_v54 = vld [vmem:[%s11023_s25 + $0x1c50] ss:$8 sps:$4 sm:$0xff]  }
 0x378   : > { %7942 = vmatpush2.bf16.msra.mxu0 %v10704_v4  ;;  %v10768_v4 = vld [vmem:[%s11023_s25 + $0x1d50] ss:$8 sps:$4 sm:$0xff]  }
 0x379   : > { %7983 = vmatpush2.bf16.msra.mxu1 %v10707_v34  ;;  %7943 = vmatprep.subr.bf16.mxu0 %v10712_v58 }
 0x37a   : > { %7984 = vmatprep.subr.bf16.mxu1 %v10715_v35  ;;  %v10776_v35 = vld [vmem:[%s11023_s25 + $0x1d44] ss:$8 sps:$4 sm:$0xff]  }
 0x37c   : > { %7944 = vmatpush2.bf16.msra.mxu0 %v10710_v8  ;;  %v10771_v8 = vld [vmem:[%s11023_s25 + $0x1c40] ss:$8 sps:$4 sm:$0xff]  }
 0x37d   : > { %7985 = vmatpush2.bf16.msra.mxu1 %v10713_v38  ;;  %7945 = vmatprep.subr.bf16.mxu0 %v10718_v63  ;;  %v10774_v38 = vld [vmem:[%s11023_s25 + $0x1d40] ss:$8 sps:$4 sm:$0xff]   ;;  %v10779_v63 = vld [vmem:[%s11023_s25 + $0x1c34] ss:$8 sps:$4 sm:$0xff]  }
 0x37e   : > { %7986 = vmatprep.subr.bf16.mxu1 %v10721_v42  ;;  %v10782_v42 = vld [vmem:[%s11023_s25 + $0x1d34] ss:$8 sps:$4 sm:$0xff]  }
 0x380   : > { %7946 = vmatpush2.bf16.msra.mxu0 %v10716_v47  ;;  %v10777_v47 = vld [vmem:[%s11023_s25 + $0x1c30] ss:$8 sps:$4 sm:$0xff]  }
 0x381   : > { %7987 = vmatpush2.bf16.msra.mxu1 %v10719_v49  ;;  %7947 = vmatprep.subr.bf16.mxu0 %v10724_v17  ;;  %v10780_v49 = vld [vmem:[%s11023_s25 + $0x1d30] ss:$8 sps:$4 sm:$0xff]   ;;  %v10785_v17 = vld [vmem:[%s11023_s25 + $0x1c24] ss:$8 sps:$4 sm:$0xff]  }
 0x382   : > { %7988 = vmatprep.subr.bf16.mxu1 %v10727_v51  ;;  %v10788_v51 = vld [vmem:[%s11023_s25 + $0x1d24] ss:$8 sps:$4 sm:$0xff]  }
 0x384   : > { %7948 = vmatpush2.bf16.msra.mxu0 %v10722_v14  ;;  %v10783_v14 = vld [vmem:[%s11023_s25 + $0x1c20] ss:$8 sps:$4 sm:$0xff]  }
 0x385   : > { %7989 = vmatpush2.bf16.msra.mxu1 %v10725_v53  ;;  %7949 = vmatprep.subr.bf16.mxu0 %v10730_v56  ;;  %v10786_v53 = vld [vmem:[%s11023_s25 + $0x1d20] ss:$8 sps:$4 sm:$0xff]   ;;  %v10791_v56 = vld [vmem:[%s11023_s25 + $0x1c14] ss:$8 sps:$4 sm:$0xff]  }
 0x386   : > { %7990 = vmatprep.subr.bf16.mxu1 %v10733_v6  ;;  %v10794_v6 = vld [vmem:[%s11023_s25 + $0x1d14] ss:$8 sps:$4 sm:$0xff]  }
 0x388   : > { %7950 = vmatpush2.bf16.msra.mxu0 %v10728_v7  ;;  %v10789_v7 = vld [vmem:[%s11023_s25 + $0x1c10] ss:$8 sps:$4 sm:$0xff]  }
 0x389   : > { %7991 = vmatpush2.bf16.msra.mxu1 %v10731_v36  ;;  %7951 = vmatprep.subr.bf16.mxu0 %v10736_v25  ;;  %v10792_v36 = vld [vmem:[%s11023_s25 + $0x1d10] ss:$8 sps:$4 sm:$0xff]   ;;  %v10797_v25 = vld [vmem:[%s11023_s25 + $0x1c04] ss:$8 sps:$4 sm:$0xff]  }
 0x38a   : > { %7992 = vmatprep.subr.bf16.mxu1 %v10739_v59  ;;  %v10800_v59 = vld [vmem:[%s11023_s25 + $0x1d04] ss:$8 sps:$4 sm:$0xff]  }
 0x38c   : > { %7952 = vmatpush2.bf16.msra.mxu0 %v10734_v61  ;;  %v10798_v61 = vld [vmem:[%s11023_s25 + $0x1d00] ss:$8 sps:$4 sm:$0xff]  }
 0x38d   : > { %7993 = vmatpush2.bf16.msra.mxu1 %v10737_v52  ;;  %7953 = vmatprep.subr.bf16.mxu0 %v10742_v13  ;;  %v10803_v52 = vld [vmem:[%s11023_s25 + $0x1cf4] ss:$8 sps:$4 sm:$0xff]  }
 0x38e   : > { %7994 = vmatprep.subr.bf16.mxu1 %v10745_v30  ;;  %v10806_v13 = vld [vmem:[%s11023_s25 + $0x1df4] ss:$8 sps:$4 sm:$0xff]   ;;  %v10801_v30 = vld [vmem:[%s11023_s25 + $0x1cf0] ss:$8 sps:$4 sm:$0xff]  }
 0x390   : > { %7954 = vmatpush2.bf16.msra.mxu0 %v10740_v16  ;;  %v10809_v16 = vld [vmem:[%s11023_s25 + $0x1ce4] ss:$8 sps:$4 sm:$0xff]  }
 0x391   : > { %7995 = vmatpush2.bf16.msra.mxu1 %v10743_v1  ;;  %7955 = vmatprep.subr.bf16.mxu0 %v10748_v57  ;;  %v10812_v1 = vld [vmem:[%s11023_s25 + $0x1de4] ss:$8 sps:$4 sm:$0xff]   ;;  %v10807_v57 = vld [vmem:[%s11023_s25 + $0x1ce0] ss:$8 sps:$4 sm:$0xff]  }
 0x392   : > { %7996 = vmatprep.subr.bf16.mxu1 %v10751_v3  ;;  %v10810_v3 = vld [vmem:[%s11023_s25 + $0x1de0] ss:$8 sps:$4 sm:$0xff]  }
 0x394   : > { %7956 = vmatpush2.bf16.msra.mxu0 %v10746_v24  ;;  %v10815_v24 = vld [vmem:[%s11023_s25 + $0x1cd4] ss:$8 sps:$4 sm:$0xff]  }
 0x395   : > { %7997 = vmatpush2.bf16.msra.mxu1 %v10749_v39  ;;  %8007 = vmatprep.subr.bf16.mxu0 %v10755_v41  ;;  %v10818_v39 = vld [vmem:[%s11023_s25 + $0x1dd4] ss:$8 sps:$4 sm:$0xff]   ;;  %v10813_v41 = vld [vmem:[%s11023_s25 + $0x1cd0] ss:$8 sps:$4 sm:$0xff]  }
 0x396   : > { %8048 = vmatprep.subr.bf16.mxu1 %v10758_v9  ;;  %v10816_v9 = vld [vmem:[%s11023_s25 + $0x1dd0] ss:$8 sps:$4 sm:$0xff]  }
 0x397   : > { %v7713_v21 = vpop.f32.mrf.mxu0  ;;  %7958 = vmatmul.mubr.bf16.vlgmr.msra.gmra.mxu0 %v703_v48  ;;  %v10819_v48 = vld [vmem:[%s11023_s25 + $0x1cc0] ss:$8 sps:$4 sm:$0xff]  }
 0x398   : > { %v7754_v23 = vpop.f32.mrf.mxu1  ;;  %7999 = vmatmul.mubr.bf16.vlgmr.msra.gmra.mxu1 %v705_v12  ;;  %v7714_v11 = vadd.f32 %v7713_v21, %v12120_v2  ;;  %8008 = vmatpush1.bf16.msra.mxu0 %v10753_v18  ;;  %v10822_v12 = vld [vmem:[%s11023_s25 + $0x1dc0] ss:$8 sps:$4 sm:$0xff]   ;;  %v10827_v18 = vld [vmem:[%s11023_s25 + $0x1cb4] ss:$8 sps:$4 sm:$0xff]  }
 0x399   : > { %8049 = vmatpush1.bf16.msra.mxu1 %v10756_v32  ;;  %v7715_v45 = vpop.f32.mrf.mxu0  ;;  %8009 = vmatprep.subr.bf16.mxu0 %v10761_v33  ;;  %v10830_v32 = vld [vmem:[%s11023_s25 + $0x1db4] ss:$8 sps:$4 sm:$0xff]   ;;  %v10825_v33 = vld [vmem:[%s11023_s25 + $0x1cb0] ss:$8 sps:$4 sm:$0xff]  }
 0x39a   : > { %v7756_v46 = vpop.f32.mrf.mxu1  ;;  %8050 = vmatprep.subr.bf16.mxu1 %v10764_v19  ;;  %v12205_v28 = vadd.f32 %v7754_v23, %v7714_v11  ;;  %v7716_v29 = vadd.f32 %v7715_v45, %v12123_v60  ;;  %8039 = vmatprep.mubr.bf16.mxu0 %v708_v55  ;;  %v10773_v60 = vld [vmem:[%s11023_s25 + $0x1c44] ss:$8 sps:$4 sm:$0xff]   ;;  %v10828_v19 = vld [vmem:[%s11023_s25 + $0x1db0] ss:$8 sps:$4 sm:$0xff]   ;;  %v10831_v23 = vld [vmem:[%s11023_s25 + $0x1ca0] ss:$8 sps:$4 sm:$0xff]  }
 0x39b   : > { %8080 = vmatprep.mubr.bf16.mxu1 %v710_v20  ;;  %v7717_v2 = vpop.f32.mrf.mxu0  ;;  %v10833_v55 = vld [vmem:[%s11023_s25 + $0x1ca4] ss:$8 sps:$4 sm:$0xff]   ;;  %v298_v21 = vld [vmem:[%s11018_s21 + $0x78] sm:$0xff]  ;;  %v10834_v11 = vld [vmem:[%s11023_s25 + $0x1da0] ss:$8 sps:$4 sm:$0xff]  }
 0x39c   : > { %v7758_v31 = vpop.f32.mrf.mxu1  ;;  %v12208_v22 = vadd.f32 %v7756_v46, %v7716_v29  ;;  %8010 = vmatpush1.bf16.msra.mxu0 %v10759_v43  ;;  %v10836_v20 = vld [vmem:[%s11023_s25 + $0x1da4] ss:$8 sps:$4 sm:$0xff]   ;;  %v10839_v43 = vld [vmem:[%s11023_s25 + $0x1c94] ss:$8 sps:$4 sm:$0xff]   ;;  %v570_v45 = vcombine.high %v298_v21, %v298_v21  ;;  %v10837_v46 = vld [vmem:[%s11023_s25 + $0x1c90] ss:$8 sps:$4 sm:$0xff]   ;;  %v12264_v2 = vrot.slane %v298_v21, %v11073_v50 }
 0x39d   : > { %8051 = vmatpush1.bf16.msra.mxu1 %v10762_v26  ;;  %v7718_v34 = vpop.f32.mrf.mxu0  ;;  %8011 = vmatprep.subr.bf16.mxu0 %v10767_v27  ;;  %v10842_v26 = vld [vmem:[%s11023_s25 + $0x1d94] ss:$8 sps:$4 sm:$0xff]   ;;  %v10840_v27 = vld [vmem:[%s11023_s25 + $0x1d90] ss:$8 sps:$4 sm:$0xff]   ;;  %v10848_v29 = vld [vmem:[%s11023_s25 + $0x1d84] ss:$8 sps:$4 sm:$0xff]  }
 0x39e   : > { %v7759_v58 = vpop.f32.mrf.mxu1  ;;  %8052 = vmatprep.subr.bf16.mxu1 %v10770_v15  ;;  %v10845_v15 = vld [vmem:[%s11023_s25 + $0x1c84] ss:$8 sps:$4 sm:$0xff]   ;;  %v12267_v31 = vrot.slane %v570_v45, %v11073_v50  ;;  %v10852_v34 = vld [vmem:[%s11023_s25 + $0x1e74] ss:$8 sps:$4 sm:$0xff]   ;;  %v10892_v21 = vld [vmem:[%s11023_s25 + $0x1e00] ss:$8 sps:$4 sm:$0xff]  }
 0x39f   : > { %v10855_v58 = vld [vmem:[%s11023_s25 + $0x1f74] ss:$8 sps:$4 sm:$0xff]   ;;  %v10901_v45 = vld [vmem:[%s11023_s25 + $0x1ff0] ss:$8 sps:$4 sm:$0xff]  }
 0x3a0   : > { %8012 = vmatpush1.bf16.msra.mxu0 %v10765_v54  ;;  %v10843_v54 = vld [vmem:[%s11023_s25 + $0x1c80] ss:$8 sps:$4 sm:$0xff]  }
 0x3a1   : > { %8053 = vmatpush1.bf16.msra.mxu1 %v10768_v4  ;;  %8013 = vmatprep.subr.bf16.mxu0 %v10773_v60  ;;  %v10846_v4 = vld [vmem:[%s11023_s25 + $0x1d80] ss:$8 sps:$4 sm:$0xff]   ;;  %v585_v60 = vcombine.high %v12264_v2, %v12264_v2 }
 0x3a2   : > { %8054 = vmatprep.subr.bf16.mxu1 %v10776_v35  ;;  %v586_v35 = vcombine.high %v12267_v31, %v12267_v31 }
 0x3a4   : > { %8014 = vmatpush1.bf16.msra.mxu0 %v10771_v8  ;;  %v707_v8 = vpack.c.bf16 %v12179_v37, %v12179_v37 }
 0x3a5   : > { %8055 = vmatpush1.bf16.msra.mxu1 %v10774_v38  ;;  %8015 = vmatprep.subr.bf16.mxu0 %v10779_v63  ;;  %v709_v38 = vpack.c.bf16 %v12182_v5, %v12182_v5  ;;  %v10850_v63 = vld [vmem:[%s11023_s25 + $0x1e70] ss:$8 sps:$4 sm:$0xff]   ;;  %v10856_v5 = vld [vmem:[%s11023_s25 + $0x1e60] ss:$8 sps:$4 sm:$0xff]  }
 0x3a6   : > { %8056 = vmatprep.subr.bf16.mxu1 %v10782_v42  ;;  %v10853_v42 = vld [vmem:[%s11023_s25 + $0x1f70] ss:$8 sps:$4 sm:$0xff]  }
 0x3a8   : > { %8016 = vmatpush1.bf16.msra.mxu0 %v10777_v47  ;;  %v10858_v47 = vld [vmem:[%s11023_s25 + $0x1e64] ss:$8 sps:$4 sm:$0xff]  }
 0x3a9   : > { %8057 = vmatpush1.bf16.msra.mxu1 %v10780_v49  ;;  %8017 = vmatprep.subr.bf16.mxu0 %v10785_v17  ;;  %v10861_v49 = vld [vmem:[%s11023_s25 + $0x1f64] ss:$8 sps:$4 sm:$0xff]   ;;  %v712_v17 = vpack.c.bf16 %v585_v60, %v585_v60 }
 0x3aa   : > { %8058 = vmatprep.subr.bf16.mxu1 %v10788_v51  ;;  %v714_v51 = vpack.c.bf16 %v586_v35, %v586_v35  ;;  %v10918_v60 = vld [vmem:[%s11023_s25 + $0x1ec4] ss:$8 sps:$4 sm:$0xff]  }
 0x3ab   : > { %v10921_v35 = vld [vmem:[%s11023_s25 + $0x1fc4] ss:$8 sps:$4 sm:$0xff]  }
 0x3ac   : > { %8018 = vmatpush1.bf16.msra.mxu0 %v10783_v14 }
 0x3ad   : > { %8059 = vmatpush1.bf16.msra.mxu1 %v10786_v53  ;;  %8019 = vmatprep.subr.bf16.mxu0 %v10791_v56  ;;  %v10859_v56 = vld [vmem:[%s11023_s25 + $0x1f60] ss:$8 sps:$4 sm:$0xff]  }
 0x3ae   : > { %8060 = vmatprep.subr.bf16.mxu1 %v10794_v6 }
 0x3b0   : > { %8020 = vmatpush1.bf16.msra.mxu0 %v10789_v7 }
 0x3b1   : > { %8061 = vmatpush1.bf16.msra.mxu1 %v10792_v36  ;;  %8021 = vmatprep.subr.bf16.mxu0 %v10797_v25  ;;  %v10864_v36 = vld [vmem:[%s11023_s25 + $0x1e54] ss:$8 sps:$4 sm:$0xff]  }
 0x3b2   : > { %8062 = vmatprep.subr.bf16.mxu1 %v10800_v59  ;;  %v10867_v25 = vld [vmem:[%s11023_s25 + $0x1f54] ss:$8 sps:$4 sm:$0xff]  }
 0x3b4   : > { %8022 = vmatpush1.bf16.msra.mxu0 %v10795_v40 }
 0x3b5   : > { %8063 = vmatpush1.bf16.msra.mxu1 %v10798_v61  ;;  %8023 = vmatprep.subr.bf16.mxu0 %v10803_v52 }
 0x3b6   : > { %8064 = vmatprep.subr.bf16.mxu1 %v10806_v13  ;;  %v10862_v13 = vld [vmem:[%s11023_s25 + $0x1e50] ss:$8 sps:$4 sm:$0xff]  }
 0x3b8   : > { %8024 = vmatpush2.bf16.msra.mxu0 %v10801_v30  ;;  %v10865_v30 = vld [vmem:[%s11023_s25 + $0x1f50] ss:$8 sps:$4 sm:$0xff]  }
 0x3b9   : > { %8065 = vmatpush2.bf16.msra.mxu1 %v10804_v0  ;;  %8025 = vmatprep.subr.bf16.mxu0 %v10809_v16 }
 0x3ba   : > { %8066 = vmatprep.subr.bf16.mxu1 %v10812_v1  ;;  %v10873_v1 = vld [vmem:[%s11023_s25 + $0x1f44] ss:$8 sps:$4 sm:$0xff]  }
 0x3bc   : > { %8026 = vmatpush2.bf16.msra.mxu0 %v10807_v57  ;;  %v10868_v57 = vld [vmem:[%s11023_s25 + $0x1e40] ss:$8 sps:$4 sm:$0xff]  }
 0x3bd   : > { %8067 = vmatpush2.bf16.msra.mxu1 %v10810_v3  ;;  %8027 = vmatprep.subr.bf16.mxu0 %v10815_v24  ;;  %v10871_v3 = vld [vmem:[%s11023_s25 + $0x1f40] ss:$8 sps:$4 sm:$0xff]   ;;  %v10876_v24 = vld [vmem:[%s11023_s25 + $0x1e34] ss:$8 sps:$4 sm:$0xff]  }
 0x3be   : > { %8068 = vmatprep.subr.bf16.mxu1 %v10818_v39  ;;  %v10879_v39 = vld [vmem:[%s11023_s25 + $0x1f34] ss:$8 sps:$4 sm:$0xff]  }
 0x3c0   : > { %8028 = vmatpush2.bf16.msra.mxu0 %v10813_v41  ;;  %v10874_v41 = vld [vmem:[%s11023_s25 + $0x1e30] ss:$8 sps:$4 sm:$0xff]  }
 0x3c1   : > { %8069 = vmatpush2.bf16.msra.mxu1 %v10816_v9  ;;  %8029 = vmatprep.subr.bf16.mxu0 %v10821_v62  ;;  %v10877_v9 = vld [vmem:[%s11023_s25 + $0x1f30] ss:$8 sps:$4 sm:$0xff]   ;;  %v10882_v62 = vld [vmem:[%s11023_s25 + $0x1e24] ss:$8 sps:$4 sm:$0xff]  }
 0x3c2   : > { %8070 = vmatprep.subr.bf16.mxu1 %v10824_v10  ;;  %v10885_v10 = vld [vmem:[%s11023_s25 + $0x1f24] ss:$8 sps:$4 sm:$0xff]  }
 0x3c4   : > { %8030 = vmatpush2.bf16.msra.mxu0 %v10819_v48  ;;  %v10880_v48 = vld [vmem:[%s11023_s25 + $0x1e20] ss:$8 sps:$4 sm:$0xff]  }
 0x3c5   : > { %8071 = vmatpush2.bf16.msra.mxu1 %v10822_v12  ;;  %8031 = vmatprep.subr.bf16.mxu0 %v10827_v18  ;;  %v10883_v12 = vld [vmem:[%s11023_s25 + $0x1f20] ss:$8 sps:$4 sm:$0xff]   ;;  %v10888_v18 = vld [vmem:[%s11023_s25 + $0x1e14] ss:$8 sps:$4 sm:$0xff]  }
 0x3c6   : > { %8072 = vmatprep.subr.bf16.mxu1 %v10830_v32  ;;  %v10891_v32 = vld [vmem:[%s11023_s25 + $0x1f14] ss:$8 sps:$4 sm:$0xff]  }
 0x3c8   : > { %8032 = vmatpush2.bf16.msra.mxu0 %v10825_v33  ;;  %v10886_v33 = vld [vmem:[%s11023_s25 + $0x1e10] ss:$8 sps:$4 sm:$0xff]  }
 0x3c9   : > { %8073 = vmatpush2.bf16.msra.mxu1 %v10828_v19  ;;  %8033 = vmatprep.subr.bf16.mxu0 %v10833_v55  ;;  %v10889_v19 = vld [vmem:[%s11023_s25 + $0x1f10] ss:$8 sps:$4 sm:$0xff]   ;;  %v10894_v55 = vld [vmem:[%s11023_s25 + $0x1e04] ss:$8 sps:$4 sm:$0xff]  }
 0x3ca   : > { %8074 = vmatprep.subr.bf16.mxu1 %v10836_v20  ;;  %v10897_v20 = vld [vmem:[%s11023_s25 + $0x1f04] ss:$8 sps:$4 sm:$0xff]  }
 0x3cc   : > { %8034 = vmatpush2.bf16.msra.mxu0 %v10831_v23  ;;  %v10895_v23 = vld [vmem:[%s11023_s25 + $0x1f00] ss:$8 sps:$4 sm:$0xff]  }
 0x3cd   : > { %8075 = vmatpush2.bf16.msra.mxu1 %v10834_v11  ;;  %8035 = vmatprep.subr.bf16.mxu0 %v10839_v43  ;;  %v10900_v11 = vld [vmem:[%s11023_s25 + $0x1ef4] ss:$8 sps:$4 sm:$0xff]  }
 0x3ce   : > { %8076 = vmatprep.subr.bf16.mxu1 %v10842_v26  ;;  %v10903_v43 = vld [vmem:[%s11023_s25 + $0x1ff4] ss:$8 sps:$4 sm:$0xff]   ;;  %v10898_v26 = vld [vmem:[%s11023_s25 + $0x1ef0] ss:$8 sps:$4 sm:$0xff]  }
 0x3d0   : > { %8036 = vmatpush2.bf16.msra.mxu0 %v10837_v46  ;;  %v10906_v46 = vld [vmem:[%s11023_s25 + $0x1ee4] ss:$8 sps:$4 sm:$0xff]  }
 0x3d1   : > { %8077 = vmatpush2.bf16.msra.mxu1 %v10840_v27  ;;  %8037 = vmatprep.subr.bf16.mxu0 %v10845_v15  ;;  %v10909_v27 = vld [vmem:[%s11023_s25 + $0x1fe4] ss:$8 sps:$4 sm:$0xff]   ;;  %v10904_v15 = vld [vmem:[%s11023_s25 + $0x1ee0] ss:$8 sps:$4 sm:$0xff]  }
 0x3d2   : > { %8078 = vmatprep.subr.bf16.mxu1 %v10848_v29  ;;  %v10907_v29 = vld [vmem:[%s11023_s25 + $0x1fe0] ss:$8 sps:$4 sm:$0xff]  }
 0x3d4   : > { %8038 = vmatpush2.bf16.msra.mxu0 %v10843_v54  ;;  %v10912_v54 = vld [vmem:[%s11023_s25 + $0x1ed4] ss:$8 sps:$4 sm:$0xff]  }
 0x3d5   : > { %8079 = vmatpush2.bf16.msra.mxu1 %v10846_v4  ;;  %8089 = vmatprep.subr.bf16.mxu0 %v10852_v34  ;;  %v10915_v4 = vld [vmem:[%s11023_s25 + $0x1fd4] ss:$8 sps:$4 sm:$0xff]   ;;  %v10910_v34 = vld [vmem:[%s11023_s25 + $0x1ed0] ss:$8 sps:$4 sm:$0xff]  }
 0x3d6   : > { %8130 = vmatprep.subr.bf16.mxu1 %v10855_v58  ;;  %v10913_v58 = vld [vmem:[%s11023_s25 + $0x1fd0] ss:$8 sps:$4 sm:$0xff]  }
 0x3d7   : > { %v7795_v14 = vpop.f32.mrf.mxu0  ;;  %8040 = vmatmul.mubr.bf16.vlgmr.msra.gmra.mxu0 %v707_v8  ;;  %v10916_v8 = vld [vmem:[%s11023_s25 + $0x1ec0] ss:$8 sps:$4 sm:$0xff]  }
 0x3d8   : > { %v7836_v53 = vpop.f32.mrf.mxu1  ;;  %8081 = vmatmul.mubr.bf16.vlgmr.msra.gmra.mxu1 %v709_v38  ;;  %v7796_v37 = vadd.f32 %v7795_v14, %v12205_v28  ;;  %8090 = vmatpush1.bf16.msra.mxu0 %v10850_v63  ;;  %v10919_v38 = vld [vmem:[%s11023_s25 + $0x1fc0] ss:$8 sps:$4 sm:$0xff]   ;;  %v10924_v63 = vld [vmem:[%s11023_s25 + $0x1eb4] ss:$8 sps:$4 sm:$0xff]  }
 0x3d9   : > { %8131 = vmatpush1.bf16.msra.mxu1 %v10853_v42  ;;  %v7797_v6 = vpop.f32.mrf.mxu0  ;;  %8091 = vmatprep.subr.bf16.mxu0 %v10858_v47  ;;  %v10927_v42 = vld [vmem:[%s11023_s25 + $0x1fb4] ss:$8 sps:$4 sm:$0xff]   ;;  %v10922_v47 = vld [vmem:[%s11023_s25 + $0x1eb0] ss:$8 sps:$4 sm:$0xff]   ;;  %v10928_v14 = vld [vmem:[%s11023_s25 + $0x1ea0] ss:$8 sps:$4 sm:$0xff]  }
 0x3da   : > { %v7838_v7 = vpop.f32.mrf.mxu1  ;;  %8132 = vmatprep.subr.bf16.mxu1 %v10861_v49  ;;  %v12290_v59 = vadd.f32 %v7836_v53, %v7796_v37  ;;  %v7798_v40 = vadd.f32 %v7797_v6, %v12208_v22  ;;  %8121 = vmatprep.mubr.bf16.mxu0 %v712_v17  ;;  %v10870_v22 = vld [vmem:[%s11023_s25 + $0x1e44] ss:$8 sps:$4 sm:$0xff]   ;;  %v10925_v49 = vld [vmem:[%s11023_s25 + $0x1fb0] ss:$8 sps:$4 sm:$0xff]   ;;  %v10931_v53 = vld [vmem:[%s11023_s25 + $0x1fa0] ss:$8 sps:$4 sm:$0xff]  }
 0x3db   : > { %8162 = vmatprep.mubr.bf16.mxu1 %v714_v51  ;;  %v7799_v28 = vpop.f32.mrf.mxu0  ;;  %v10930_v17 = vld [vmem:[%s11023_s25 + $0x1ea4] ss:$8 sps:$4 sm:$0xff]   ;;  %v10936_v37 = vld [vmem:[%s11023_s25 + $0x1e94] ss:$8 sps:$4 sm:$0xff]   ;;  %v10937_v6 = vld [vmem:[%s11023_s25 + $0x1f90] ss:$8 sps:$4 sm:$0xff]  }
 0x3dc   : > { %v7840_v61 = vpop.f32.mrf.mxu1  ;;  %v12293_v52 = vadd.f32 %v7838_v7, %v7798_v40  ;;  %8092 = vmatpush1.bf16.msra.mxu0 %v10856_v5  ;;  %v10933_v51 = vld [vmem:[%s11023_s25 + $0x1fa4] ss:$8 sps:$4 sm:$0xff]   ;;  %v10939_v5 = vld [vmem:[%s11023_s25 + $0x1f94] ss:$8 sps:$4 sm:$0xff]   ;;  %v10943_v40 = vld [vmem:[%s11023_s25 + $0x1f80] ss:$8 sps:$4 sm:$0xff]   ;;  %v711_v28 = vpack.c.bf16 %v12264_v2, %v12264_v2 }
 0x3dd   : > { %8133 = vmatpush1.bf16.msra.mxu1 %v10859_v56  ;;  %v7800_v0 = vpop.f32.mrf.mxu0  ;;  %8093 = vmatprep.subr.bf16.mxu0 %v10864_v36  ;;  %v10934_v56 = vld [vmem:[%s11023_s25 + $0x1e90] ss:$8 sps:$4 sm:$0xff]   ;;  %v10942_v7 = vld [vmem:[%s11023_s25 + $0x1e84] ss:$8 sps:$4 sm:$0xff]   ;;  %v713_v61 = vpack.c.bf16 %v12267_v31, %v12267_v31 }
 0x3de   : > { %v7841_v16 = vpop.f32.mrf.mxu1  ;;  %8134 = vmatprep.subr.bf16.mxu1 %v10867_v25  ;;  %v10945_v36 = vld [vmem:[%s11023_s25 + $0x1f84] ss:$8 sps:$4 sm:$0xff]   ;;  %v10940_v25 = vld [vmem:[%s11023_s25 + $0x1e80] ss:$8 sps:$4 sm:$0xff]  }
 0x3e0   : > { %8094 = vmatpush1.bf16.msra.mxu0 %v10862_v13 }
 0x3e1   : > { %8135 = vmatpush1.bf16.msra.mxu1 %v10865_v30  ;;  %8095 = vmatprep.subr.bf16.mxu0 %v10870_v22 }
 0x3e2   : > { %8136 = vmatprep.subr.bf16.mxu1 %v10873_v1 }
 0x3e4   : > { %8096 = vmatpush1.bf16.msra.mxu0 %v10868_v57 }
 0x3e5   : > { %8137 = vmatpush1.bf16.msra.mxu1 %v10871_v3  ;;  %8097 = vmatprep.subr.bf16.mxu0 %v10876_v24 }
 0x3e6   : > { %8138 = vmatprep.subr.bf16.mxu1 %v10879_v39 }
 0x3e8   : > { %8098 = vmatpush1.bf16.msra.mxu0 %v10874_v41 }
 0x3e9   : > { %8139 = vmatpush1.bf16.msra.mxu1 %v10877_v9  ;;  %8099 = vmatprep.subr.bf16.mxu0 %v10882_v62 }
 0x3ea   : > { %8140 = vmatprep.subr.bf16.mxu1 %v10885_v10 }
 0x3ec   : > { %8100 = vmatpush1.bf16.msra.mxu0 %v10880_v48 }
 0x3ed   : > { %8141 = vmatpush1.bf16.msra.mxu1 %v10883_v12  ;;  %8101 = vmatprep.subr.bf16.mxu0 %v10888_v18 }
 0x3ee   : > { %8142 = vmatprep.subr.bf16.mxu1 %v10891_v32 }
 0x3f0   : > { %8102 = vmatpush1.bf16.msra.mxu0 %v10886_v33 }
 0x3f1   : > { %8143 = vmatpush1.bf16.msra.mxu1 %v10889_v19  ;;  %8103 = vmatprep.subr.bf16.mxu0 %v10894_v55 }
 0x3f2   : > { %8144 = vmatprep.subr.bf16.mxu1 %v10897_v20 }
 0x3f4   : > { %8104 = vmatpush1.bf16.msra.mxu0 %v10892_v21 }
 0x3f5   : > { %8145 = vmatpush1.bf16.msra.mxu1 %v10895_v23  ;;  %8105 = vmatprep.subr.bf16.mxu0 %v10900_v11 }
 0x3f6   : > { %8146 = vmatprep.subr.bf16.mxu1 %v10903_v43 }
 0x3f8   : > { %8106 = vmatpush2.bf16.msra.mxu0 %v10898_v26 }
 0x3f9   : > { %8147 = vmatpush2.bf16.msra.mxu1 %v10901_v45  ;;  %8107 = vmatprep.subr.bf16.mxu0 %v10906_v46 }
 0x3fa   : > { %8148 = vmatprep.subr.bf16.mxu1 %v10909_v27 }
 0x3fc   : > { %8108 = vmatpush2.bf16.msra.mxu0 %v10904_v15 }
 0x3fd   : > { %8149 = vmatpush2.bf16.msra.mxu1 %v10907_v29  ;;  %8109 = vmatprep.subr.bf16.mxu0 %v10912_v54 }
 0x3fe   : > { %8150 = vmatprep.subr.bf16.mxu1 %v10915_v4 }
 0x400   : > { %8110 = vmatpush2.bf16.msra.mxu0 %v10910_v34 }
 0x401   : > { %8151 = vmatpush2.bf16.msra.mxu1 %v10913_v58  ;;  %8111 = vmatprep.subr.bf16.mxu0 %v10918_v60 }
 0x402   : > { %8152 = vmatprep.subr.bf16.mxu1 %v10921_v35 }
 0x404   : > { %8112 = vmatpush2.bf16.msra.mxu0 %v10916_v8 }
 0x405   : > { %8153 = vmatpush2.bf16.msra.mxu1 %v10919_v38  ;;  %8113 = vmatprep.subr.bf16.mxu0 %v10924_v63 }
 0x406   : > { %8154 = vmatprep.subr.bf16.mxu1 %v10927_v42 }
 0x408   : > { %8114 = vmatpush2.bf16.msra.mxu0 %v10922_v47 }
 0x409   : > { %8155 = vmatpush2.bf16.msra.mxu1 %v10925_v49  ;;  %8115 = vmatprep.subr.bf16.mxu0 %v10930_v17 }
 0x40a   : > { %8156 = vmatprep.subr.bf16.mxu1 %v10933_v51  ;;  %v282_v51 = vld [vmem:[#allocation2] sm:$0xf] }
 0x40c   : > { %8116 = vmatpush2.bf16.msra.mxu0 %v10928_v14 }
 0x40d   : > { %8157 = vmatpush2.bf16.msra.mxu1 %v10931_v53  ;;  %8117 = vmatprep.subr.bf16.mxu0 %v10936_v37 }
 0x40e   : > { %8158 = vmatprep.subr.bf16.mxu1 %v10939_v5 }
 0x410   : > { %8118 = vmatpush2.bf16.msra.mxu0 %v10934_v56 }
 0x411   : > { %8159 = vmatpush2.bf16.msra.mxu1 %v10937_v6  ;;  %8119 = vmatprep.subr.bf16.mxu0 %v10942_v7 }
 0x412   : > { %8160 = vmatprep.subr.bf16.mxu1 %v10945_v36 }
 0x414   : > { %8120 = vmatpush2.bf16.msra.mxu0 %v10940_v25 }
 0x415   : > { %8161 = vmatpush2.bf16.msra.mxu1 %v10943_v40 }
 0x417   : > { %v7877_v13 = vpop.f32.mrf.mxu0  ;;  %8122 = vmatmul.mubr.bf16.vlgmr.msra.gmra.mxu0 %v711_v28 }
 0x418   : > { %v7918_v30 = vpop.f32.mrf.mxu1  ;;  %8163 = vmatmul.mubr.bf16.vlgmr.msra.gmra.mxu1 %v713_v61  ;;  %v7878_v0 = vadd.f32 %v7877_v13, %v12290_v59 }
 0x419   : > { %v7879_v16 = vpop.f32.mrf.mxu0 }
 0x41a   : > { %v7920_v22 = vpop.f32.mrf.mxu1  ;;  %v7919_v1 = vadd.f32 %v7918_v30, %v7878_v0  ;;  %v7880_v57 = vadd.f32 %v7879_v16, %v12293_v52 }
 0x41b   : > { %v7881_v3 = vpop.f32.mrf.mxu0 }
 0x41c   : > { %v7922_v24 = vpop.f32.mrf.mxu1  ;;  %v7921_v39 = vadd.f32 %v7920_v22, %v7880_v57 }
 0x41d   : > { %v7882_v2 = vpop.f32.mrf.mxu0 }
 0x41e   : > { %v7923_v41 = vpop.f32.mrf.mxu1 }
 0x457   : > { %v7959_v9 = vpop.f32.mrf.mxu0 }
 0x458   : > { %v8000_v31 = vpop.f32.mrf.mxu1  ;;  %v7960_v62 = vadd.f32 %v7959_v9, %v7919_v1 }
 0x459   : > { %v7961_v10 = vpop.f32.mrf.mxu0 }
 0x45a   : > { %v8002_v48 = vpop.f32.mrf.mxu1  ;;  %v8001_v12 = vadd.f32 %v8000_v31, %v7960_v62  ;;  %v7962_v18 = vadd.f32 %v7961_v10, %v7921_v39 }
 0x45b   : > { %v7963_v32 = vpop.f32.mrf.mxu0 }
 0x45c   : > { %v8004_v33 = vpop.f32.mrf.mxu1  ;;  %v8003_v59 = vadd.f32 %v8002_v48, %v7962_v18 }
 0x45d   : > { %v7964_v19 = vpop.f32.mrf.mxu0 }
 0x45e   : > { %v8005_v55 = vpop.f32.mrf.mxu1 }
 0x497   : > { %v8041_v20 = vpop.f32.mrf.mxu0 }
 0x498   : > { %v8082_v21 = vpop.f32.mrf.mxu1  ;;  %v8042_v52 = vadd.f32 %v8041_v20, %v8001_v12 }
 0x499   : > { %v8043_v23 = vpop.f32.mrf.mxu0 }
 0x49a   : > { %v8084_v11 = vpop.f32.mrf.mxu1  ;;  %v8083_v43 = vadd.f32 %v8082_v21, %v8042_v52  ;;  %v8044_v15 = vadd.f32 %v8043_v23, %v8003_v59 }
 0x49b   : > { %v8045_v26 = vpop.f32.mrf.mxu0 }
 0x49c   : > { %v8086_v45 = vpop.f32.mrf.mxu1  ;;  %v8085_v4 = vadd.f32 %v8084_v11, %v8044_v15 }
 0x49d   : > { %v8046_v46 = vpop.f32.mrf.mxu0 }
 0x49e   : > { %v8087_v27 = vpop.f32.mrf.mxu1 }
 0x4d7   : > { %v8123_v29 = vpop.f32.mrf.mxu0 }
 0x4d8   : > { %v8164_v54 = vpop.f32.mrf.mxu1  ;;  %v8124_v34 = vadd.f32 %v8123_v29, %v8083_v43 }
 0x4d9   : > { %v8125_v58 = vpop.f32.mrf.mxu0 }
 0x4da   : > { %v8166_v60 = vpop.f32.mrf.mxu1  ;;  %v8126_v35 = vadd.f32 %v8125_v58, %v8085_v4  ;;  %v8165_v63 = vadd.f32 %v8164_v54, %v8124_v34 }
 0x4db   : > { %v8127_v8 = vpop.f32.mrf.mxu0 }
 0x4dc   : > { %v8168_v38 = vpop.f32.mrf.mxu1  ;;  %v8167_v42 = vadd.f32 %v8166_v60, %v8126_v35 }
 0x4dd   : > { %v8128_v47 = vpop.f32.mrf.mxu0 }
 0x4de   : > { %v8169_v49 = vpop.f32.mrf.mxu1  ;;  %v8173_v17 = vcombine.low %v8165_v63, %v8167_v42 }
 0x4e0   : > { %v8180_v14 = vrot.slane %v8173_v17, %v11073_v50  ;;  %8187 = sbr.rel (%p9363_p7) target bundleno = 1266 (0x4f2), region = 40 }
 0x4e2   : > { %v8182_v53 = vadd.f32 %v8180_v14, %v282_v51 }
 0x4e4   : > { %8183 = vst [vmem:[#allocation2] sm:$0xf] %v8182_v53 }
 0x4e5   : > { %v8189_v37 = vld [vmem:[%s12377_s2] sm:$0x3]  ;;  %v8193_v5 = vsub.s32 0, %v11065_v44  ;;  %v8197_v56 = vsub.s32 1, %v11065_v44 }
 0x4e7   : > { %v8194_v6 = vrot.slane %v8189_v37, %v8193_v5  ;;  %v8198_v7 = vrot.slane %v8189_v37, %v8197_v56 }
 0x4e9   : > { %v8199_v36 = vcombine.low %v8194_v6, %v8198_v7 }
 0x4eb   : > { %v8188_v25 = vld [vmem:[#allocation2] sm:$0xf]  ;;  %v8206_v40 = vrot.slane %v8199_v36, %v11073_v50 }
 0x4ed   : > { %v8208_v28 = vadd.f32 %v8206_v40, %v8188_v25 }
 0x4ef   : > { %v8209_v61 = vmax.f32 %v8208_v28, 0.0 }
 0x4f1   : > { %8210 = vst [vmem:[%s12378_s3] sm:$0xf] %v8209_v61 }
 0x4f2 PF: > { %s13_s14 = sadd.s32 1, %s10969_s14   ;;  %s12379_s12 = smov %s10965_s13 }
 0x4f3   : > { %p10_p8 = scmp.ge.s32.totalorder %s13_s14, 4   ;;  %s12380_s13 = smov %s12382_s15 }
 0x4f5   :  { %12 = sbr.rel (!%p10_p8) target bundleno = 2 (0x2), region = 76 }

</bundles_post_ra>
